<compile_context>
chip_gen: v5e
topology: v5e:2x2
jax: 0.10.0
libtpu: 0.0.40
codegen_flags: <defaults>
</compile_context>

<pallas_src>
import functools

import jax
import jax.numpy as jnp
from jax.experimental import pallas as pl
from jax.experimental.pallas import tpu as pltpu

EPS = 1e-5                      # PyTorch BatchNorm default eps
VMEM_LIMIT = 48 * 1024 * 1024   # explicit scoped-VMEM limit (< v7x 64 MiB physical)
MXU_ROW_TILE = 256              # feed full 256-wide MXU on v6e/v7x
ELT_ROW_TILE = 512              # memory-bound elementwise kernels: big row tiles


def _round_up(x, m):
    return ((x + m - 1) // m) * m


def _row_tile(M, target):
    tm = target if M >= target else _round_up(max(M, 1), 8)
    Mp = _round_up(M, tm)
    return tm, Mp


def _pad_rows(x, Mp):
    M = x.shape[0]
    if Mp == M:
        return x
    return jnp.pad(x, ((0, Mp - M), (0, 0)))


# ----------------------------------------------------------------------------
# Pallas kernels
# ----------------------------------------------------------------------------

def _matmul_bias_stats_kernel(a_ref, b_ref, bias_ref, o_ref, st_ref):
    """(tm,K)bf16 @ (K,N)bf16 + bias, plus fused per-tile column sum / sumsq."""
    y = (jnp.dot(a_ref[...], b_ref[...], preferred_element_type=jnp.float32)
         + bias_ref[...])
    o_ref[...] = y
    s = jnp.sum(y, axis=0, keepdims=True)          # (1, N)
    ss = jnp.sum(y * y, axis=0, keepdims=True)     # (1, N)
    rid = jax.lax.broadcasted_iota(jnp.int32, (8, 1), 0)
    st_ref[...] = jnp.where(rid == 0, s, 0.0) + jnp.where(rid == 1, ss, 0.0)


def matmul_bias_stats(a, b, bias):
    """A(M,K)bf16 @ B(K,N)bf16 + bias[N]; returns (y_f32[M,N], colsum, colsumsq).

    BatchNorm statistics are computed in the matmul epilogue so the activation
    is not re-read from HBM.  Row padding is corrected exactly in glue (padded
    zero rows produce exactly `bias` as output).
    """
    M, K = a.shape
    K2, N = b.shape
    assert K == K2
    tm, Mp = _row_tile(M, MXU_ROW_TILE)
    gm = Mp // tm
    a_p = _pad_rows(a, Mp)
    bias_f = bias.astype(jnp.float32)

    o, st = pl.pallas_call(
        _matmul_bias_stats_kernel,
        out_shape=(jax.ShapeDtypeStruct((Mp, N), jnp.float32),
                   jax.ShapeDtypeStruct((8 * gm, N), jnp.float32)),
        grid=(gm,),
        in_specs=[
            pl.BlockSpec((tm, K), lambda i: (i, 0)),
            pl.BlockSpec((K, N), lambda i: (0, 0)),
            pl.BlockSpec((1, N), lambda i: (0, 0)),
        ],
        out_specs=(
            pl.BlockSpec((tm, N), lambda i: (i, 0)),
            pl.BlockSpec((8, N), lambda i: (i, 0)),
        ),
        compiler_params=pltpu.CompilerParams(
            dimension_semantics=("parallel",),
            vmem_limit_bytes=VMEM_LIMIT),
    )(a_p, b, bias_f.reshape(1, N))

    st = st.reshape(gm, 8, N).sum(axis=0)
    n_pad = Mp - M
    sums = st[0] - n_pad * bias_f
    sumsq = st[1] - n_pad * bias_f * bias_f
    return o[:M], sums, sumsq


def _scale_shift_kernel(x_ref, s_ref, t_ref, o_ref, *, relu):
    y = x_ref[...] * s_ref[...] + t_ref[...]
    if relu:
        y = jnp.maximum(y, 0.0)
    o_ref[...] = y


def _scale_shift_res_kernel(x_ref, s_ref, t_ref, r_ref, o_ref, *, relu):
    y = x_ref[...] * s_ref[...] + t_ref[...] + r_ref[...]
    if relu:
        y = jnp.maximum(y, 0.0)
    o_ref[...] = y


def scale_shift_act(y, scale, shift, relu=True, residual=None):
    """Per-channel scale/shift (+residual)(+ReLU).  Lane-folds narrow C to 128."""
    M, C = y.shape
    g = 1
    if C < 128 and (128 % C == 0) and (M % (128 // C) == 0):
        g = 128 // C                                   # lane-dense fold
    Mf, Cf = M // g, C * g
    yf = y.reshape(Mf, Cf)
    sc = jnp.tile(scale.astype(jnp.float32), g).reshape(1, Cf)
    sh = jnp.tile(shift.astype(jnp.float32), g).reshape(1, Cf)
    rf = residual.reshape(Mf, Cf) if residual is not None else None

    tm, Mp = _row_tile(Mf, ELT_ROW_TILE)
    gm = Mp // tm
    yp = _pad_rows(yf, Mp)
    cp = pltpu.CompilerParams(dimension_semantics=("parallel",),
                              vmem_limit_bytes=VMEM_LIMIT)
    if rf is None:
        out = pl.pallas_call(
            functools.partial(_scale_shift_kernel, relu=relu),
            out_shape=jax.ShapeDtypeStruct((Mp, Cf), jnp.float32),
            grid=(gm,),
            in_specs=[
                pl.BlockSpec((tm, Cf), lambda i: (i, 0)),
                pl.BlockSpec((1, Cf), lambda i: (0, 0)),
                pl.BlockSpec((1, Cf), lambda i: (0, 0)),
            ],
            out_specs=pl.BlockSpec((tm, Cf), lambda i: (i, 0)),
            compiler_params=cp,
        )(yp, sc, sh)
    else:
        rp = _pad_rows(rf, Mp)
        out = pl.pallas_call(
            functools.partial(_scale_shift_res_kernel, relu=relu),
            out_shape=jax.ShapeDtypeStruct((Mp, Cf), jnp.float32),
            grid=(gm,),
            in_specs=[
                pl.BlockSpec((tm, Cf), lambda i: (i, 0)),
                pl.BlockSpec((1, Cf), lambda i: (0, 0)),
                pl.BlockSpec((1, Cf), lambda i: (0, 0)),
                pl.BlockSpec((tm, Cf), lambda i: (i, 0)),
            ],
            out_specs=pl.BlockSpec((tm, Cf), lambda i: (i, 0)),
            compiler_params=cp,
        )(yp, sc, sh, rp)
    return out[:Mf].reshape(M, C)


def bn_scale_shift(sums, sumsq, count, gamma, beta):
    """Training-mode BatchNorm finalization (tiny per-channel glue)."""
    # NOTE: E[x^2]-E[x]^2 in f32; fine for these activation magnitudes (fwd only).
    mean = sums / count
    var = sumsq / count - mean * mean
    scale = gamma * jax.lax.rsqrt(var + EPS)
    shift = beta - mean * scale
    return scale, shift


def _vq_kernel(x_ref, e_ref, e2_ref, q_ref, loss_ref, *, m_total):
    """Per-M-tile VQ: distances -> argmin -> one-hot codebook matmul -> SSE part."""
    tm, D = x_ref.shape
    Kc = e_ref.shape[0]
    x = x_ref[...]                                    # (tm, D) f32
    e = e_ref[...]                                    # (Kc, D) f32

    # distance term that affects argmin: ||e||^2 - 2 x.e   (||x||^2 is row-const)
    xe = jax.lax.dot_general(
        x.astype(jnp.bfloat16), e.astype(jnp.bfloat16),
        dimension_numbers=(((1,), (1,)), ((), ())),
        preferred_element_type=jnp.float32)           # (tm, Kc)
    d = e2_ref[...] - 2.0 * xe

    ids = jax.lax.broadcasted_iota(jnp.int32, (tm, Kc), 1)
    dmin = jnp.min(d, axis=1, keepdims=True)
    # first index achieving the minimum (matches torch.argmin tie-breaking)
    idx = jnp.min(jnp.where(d == dmin, ids, Kc), axis=1, keepdims=True)
    onehot = (ids == idx).astype(jnp.float32)
    q = jnp.dot(onehot, e, preferred_element_type=jnp.float32)   # (tm, D)
    q_ref[...] = q   # straight-through fwd value == quantized value

    row = jax.lax.broadcasted_iota(jnp.int32, (tm, 1), 0) + pl.program_id(0) * tm
    diff = (q - x) * (row < m_total).astype(jnp.float32)          # mask pad rows
    sse = jnp.sum(jnp.sum(diff * diff, axis=1, keepdims=True), axis=0,
                  keepdims=True)                                  # (1, 1)
    rid = jax.lax.broadcasted_iota(jnp.int32, (8, 128), 0)
    cid = jax.lax.broadcasted_iota(jnp.int32, (8, 128), 1)
    loss_ref[...] = jnp.where((rid == 0) & (cid == 0), sse, 0.0)


def vector_quantize(flat, emb, commitment_cost=0.25):
    M, D = flat.shape
    Kc = emb.shape[0]
    emb_f = emb.astype(jnp.float32)
    e2 = jnp.sum(emb_f * emb_f, axis=1, keepdims=True).T          # (1, Kc) glue

    tm, Mp = _row_tile(M, MXU_ROW_TILE)
    gm = Mp // tm
    fp = _pad_rows(flat, Mp)

    q, losspart = pl.pallas_call(
        functools.partial(_vq_kernel, m_total=M),
        out_shape=(jax.ShapeDtypeStruct((Mp, D), jnp.float32),
                   jax.ShapeDtypeStruct((8 * gm, 128), jnp.float32)),
        grid=(gm,),
        in_specs=[
            pl.BlockSpec((tm, D), lambda i: (i, 0)),
            pl.BlockSpec((Kc, D), lambda i: (0, 0)),
            pl.BlockSpec((1, Kc), lambda i: (0, 0)),
        ],
        out_specs=(
            pl.BlockSpec((tm, D), lambda i: (i, 0)),
            pl.BlockSpec((8, 128), lambda i: (i, 0)),
        ),
        compiler_params=pltpu.CompilerParams(
            dimension_semantics=("parallel",),
            vmem_limit_bytes=VMEM_LIMIT),
    )(fp, emb_f, e2)

    sse = jnp.sum(losspart)
    # q_latent_loss + commitment_cost * e_latent_loss == (1+cc) * mse (fwd value)
    loss = sse * ((1.0 + commitment_cost) / (M * D))
    return q[:M], loss


def _sse_partial_kernel(a_ref, b_ref, o_ref):
    d = a_ref[...] - b_ref[...]
    sse = jnp.sum(jnp.sum(d * d, axis=1, keepdims=True), axis=0, keepdims=True)
    rid = jax.lax.broadcasted_iota(jnp.int32, (8, 128), 0)
    cid = jax.lax.broadcasted_iota(jnp.int32, (8, 128), 1)
    o_ref[...] = jnp.where((rid == 0) & (cid == 0), sse, 0.0)


def mse_loss(a, b):
    total = a.size
    cols = 128 if total % 128 == 0 else a.shape[-1]   # lane-dense when possible
    a2 = a.reshape(-1, cols).astype(jnp.float32)
    b2 = b.reshape(-1, cols).astype(jnp.float32)
    M, C = a2.shape
    tm, Mp = _row_tile(M, ELT_ROW_TILE)
    gm = Mp // tm
    ap = _pad_rows(a2, Mp)      # both padded with zeros -> diff of pad rows == 0
    bp = _pad_rows(b2, Mp)
    part = pl.pallas_call(
        _sse_partial_kernel,
        out_shape=jax.ShapeDtypeStruct((8 * gm, 128), jnp.float32),
        grid=(gm,),
        in_specs=[
            pl.BlockSpec((tm, C), lambda i: (i, 0)),
            pl.BlockSpec((tm, C), lambda i: (i, 0)),
        ],
        out_specs=pl.BlockSpec((8, 128), lambda i: (i, 0)),
        compiler_params=pltpu.CompilerParams(
            dimension_semantics=("parallel",),
            vmem_limit_bytes=VMEM_LIMIT),
    )(ap, bp)
    return jnp.sum(part) / total


# ----------------------------------------------------------------------------
# Convolution glue (im2col in JAX, matmul + fused BN stats in Pallas)
# ----------------------------------------------------------------------------

def extract_patches(x, kh, kw, stride, pad):
    N, H, W, C = x.shape
    Ho = (H + 2 * pad - kh) // stride + 1
    Wo = (W + 2 * pad - kw) // stride + 1
    if kh == 1 and kw == 1 and stride == 1 and pad == 0:
        return x.reshape(N * H * W, C), (N, H, W)
    xp = jnp.pad(x, ((0, 0), (pad, pad), (pad, pad), (0, 0)))
    cols = []
    for i in range(kh):
        for j in range(kw):
            cols.append(
                xp[:, i:i + stride * Ho:stride, j:j + stride * Wo:stride, :])
    patches = jnp.stack(cols, axis=3).reshape(N * Ho * Wo, kh * kw * C)
    return patches, (N, Ho, Wo)


def conv_bn_act(x, p, kh, kw, stride, pad, relu=True, residual2d=None):
    """Conv2d + training-mode BatchNorm (+residual) (+ReLU) on NHWC input."""
    Cout = p["w"].shape[0]
    patches, (N, Ho, Wo) = extract_patches(x.astype(jnp.bfloat16),
                                           kh, kw, stride, pad)
    wm = jnp.transpose(p["w"], (2, 3, 1, 0)).reshape(-1, Cout).astype(jnp.bfloat16)
    y, sums, sumsq = matmul_bias_stats(patches, wm, p["b"])
    M = N * Ho * Wo
    scale, shift = bn_scale_shift(sums, sumsq, M, p["gamma"], p["beta"])
    out = scale_shift_act(y, scale, shift, relu=relu, residual=residual2d)
    return out.reshape(N, Ho, Wo, Cout)


def build_tconv_matrix(w_t):
    """ConvTranspose2d(k=4, s=2, p=1) as a single (9*Cin, 2*2*Cout) matrix.

    Output pixel (2m+a, 2n+b) depends only on a 3x3 input window centered at
    (m, n); each (a, b) parity selects a 2x2 subset of the 4x4 kernel taps.
    """
    Cin, Cout = w_t.shape[0], w_t.shape[1]
    kmap = {(0, 0): 3, (0, 1): 1, (1, 1): 2, (1, 2): 0}   # (parity, d) -> kernel tap
    Wb = jnp.zeros((3, 3, Cin, 2, 2, Cout), jnp.float32)
    for a in (0, 1):
        for dy in (0, 1, 2):
            ky = kmap.get((a, dy))
            if ky is None:
                continue
            for b in (0, 1):
                for dx in (0, 1, 2):
                    kx = kmap.get((b, dx))
                    if kx is None:
                        continue
                    Wb = Wb.at[dy, dx, :, a, b, :].set(w_t[:, :, ky, kx])
    return Wb.reshape(9 * Cin, 4 * Cout)


def tconv_bn(x, p):
    """ConvTranspose2d(128->Cout, k=4, s=2, p=1) + BatchNorm (no ReLU)."""
    N, H, W, Cin = x.shape
    Cout = p["w"].shape[1]
    patches, _ = extract_patches(x.astype(jnp.bfloat16), 3, 3, 1, 1)  # (M, 9*Cin)
    wm = build_tconv_matrix(p["w"]).astype(jnp.bfloat16)              # (9*Cin, 4*Cout)
    bias16 = jnp.tile(p["b"], 4)                                      # col%Cout = co
    y16, sums16, sumsq16 = matmul_bias_stats(patches, wm, bias16)     # (M, 4*Cout)
    M = N * H * W
    sums = sums16.reshape(4, Cout).sum(axis=0)
    sumsq = sumsq16.reshape(4, Cout).sum(axis=0)
    scale, shift = bn_scale_shift(sums, sumsq, 4 * M, p["gamma"], p["beta"])
    # apply BN pre-interleave on the (M, 16) layout (lane-folded inside)
    y16 = scale_shift_act(y16, jnp.tile(scale, 4), jnp.tile(shift, 4), relu=False)
    out = y16.reshape(N, H, W, 2, 2, Cout).transpose(0, 1, 3, 2, 4, 5)
    return out.reshape(N, 2 * H, 2 * W, Cout)


def res_block(x, p):
    N, H, W, C = x.shape
    x2d = x.reshape(-1, C)
    out = conv_bn_act(x, p["c1"], 1, 1, 1, 0, relu=True)
    out = conv_bn_act(out, p["c2"], 3, 3, 1, 1, relu=True)
    out = conv_bn_act(out, p["c3"], 1, 1, 1, 0, relu=True, residual2d=x2d)
    return out


# ----------------------------------------------------------------------------
# Parameters (deterministic, synthetic)
# ----------------------------------------------------------------------------

def init_conv(key, cout, cin, kh, kw):
    kw_, kb, kg, kbe = jax.random.split(key, 4)
    return {
        "w": 0.05 * jax.random.normal(kw_, (cout, cin, kh, kw), jnp.float32),
        "b": 0.05 * jax.random.normal(kb, (cout,), jnp.float32),
        "gamma": 1.0 + 0.1 * jax.random.normal(kg, (cout,), jnp.float32),
        "beta": 0.1 * jax.random.normal(kbe, (cout,), jnp.float32),
    }


def init_resblock(key, C, ratio=4):
    k1, k2, k3 = jax.random.split(key, 3)
    Cb = C // ratio
    return {
        "c1": init_conv(k1, Cb, C, 1, 1),
        "c2": init_conv(k2, Cb, Cb, 3, 3),
        "c3": init_conv(k3, C, Cb, 1, 1),
    }


def init_params(key, in_channels, embedding_dim, num_embeddings, num_res_blocks):
    ks = iter(jax.random.split(key, 64))
    params = {}
    params["enc_conv1"] = init_conv(next(ks), 128, in_channels, 4, 4)
    params["enc_conv2"] = init_conv(next(ks), embedding_dim, 128, 3, 3)
    params["enc_res"] = [init_resblock(next(ks), embedding_dim)
                         for _ in range(num_res_blocks)]
    params["embedding"] = jax.random.uniform(
        next(ks), (num_embeddings, embedding_dim), jnp.float32,
        minval=-1.0 / num_embeddings, maxval=1.0 / num_embeddings)
    params["dec_conv1"] = init_conv(next(ks), embedding_dim, embedding_dim, 3, 3)
    params["dec_res"] = [init_resblock(next(ks), embedding_dim)
                         for _ in range(num_res_blocks)]
    params["dec_conv2"] = init_conv(next(ks), 128, embedding_dim, 3, 3)
    kt = next(ks)
    k1, k2, k3, k4 = jax.random.split(kt, 4)
    params["dec_tconv"] = {
        "w": 0.05 * jax.random.normal(k1, (128, in_channels, 4, 4), jnp.float32),
        "b": 0.05 * jax.random.normal(k2, (in_channels,), jnp.float32),
        "gamma": 1.0 + 0.1 * jax.random.normal(k3, (in_channels,), jnp.float32),
        "beta": 0.1 * jax.random.normal(k4, (in_channels,), jnp.float32),
    }
    return params


# ----------------------------------------------------------------------------
# Full VQVAE forward
# ----------------------------------------------------------------------------

def vqvae_forward(params, x_nchw, commitment_cost=0.25):
    # boundary: NCHW (PyTorch) -> NHWC (kernel layout)
    x = jnp.transpose(x_nchw, (0, 2, 3, 1)).astype(jnp.float32)

    # ---- encoder ----
    h = conv_bn_act(x, params["enc_conv1"], 4, 4, 2, 1, relu=True)
    h = conv_bn_act(h, params["enc_conv2"], 3, 3, 1, 1, relu=True)
    for p in params["enc_res"]:
        h = res_block(h, p)

    # ---- vector quantizer ----
    N, Hq, Wq, D = h.shape
    flat = h.reshape(-1, D)
    q_flat, vq_loss = vector_quantize(flat, params["embedding"], commitment_cost)
    z_q = q_flat.reshape(N, Hq, Wq, D)

    # ---- decoder ----
    d = conv_bn_act(z_q, params["dec_conv1"], 3, 3, 1, 1, relu=True)
    for p in params["dec_res"]:
        d = res_block(d, p)
    d = conv_bn_act(d, params["dec_conv2"], 3, 3, 1, 1, relu=True)
    x_recon = tconv_bn(d, params["dec_tconv"])

    # ---- losses ----
    recon_loss = mse_loss(x_recon, x)
    total_loss = recon_loss + vq_loss

    return jnp.transpose(x_recon, (0, 3, 1, 2)), total_loss, recon_loss


if __name__ == "__main__":
    key = jax.random.PRNGKey(0)
    kp, kx = jax.random.split(key)

    # small but tile-friendly configuration
    B, in_channels, H, W = 2, 4, 16, 16
    embedding_dim, num_embeddings, num_res_blocks = 128, 256, 2

    params = init_params(kp, in_channels, embedding_dim,
                         num_embeddings, num_res_blocks)
    x = jax.random.normal(kx, (B, in_channels, H, W), jnp.float32)

    fwd = jax.jit(vqvae_forward)
    x_recon, total_loss, recon_loss = fwd(params, x)
    jax.block_until_ready((x_recon, total_loss, recon_loss))

    assert x_recon.shape == (B, in_channels, H, W)
    assert total_loss.shape == () and recon_loss.shape == ()
    print("KERNEL_OK")
</pallas_src>

<mosaic_0001>
module attributes {stable_mosaic.version = 11 : i64} {
  func.func @_scale_shift_kernel(%arg0: i32, %arg1: memref<128x128xf32, #tpu.memory_space<vmem>>, %arg2: memref<1x128xf32, #tpu.memory_space<vmem>>, %arg3: memref<1x128xf32, #tpu.memory_space<vmem>>, %arg4: memref<128x128xf32, #tpu.memory_space<vmem>>) attributes {dimension_semantics = [#tpu.dimension_semantics<parallel>], iteration_bounds = array<i64: 1>, scalar_prefetch = 0 : i64, scratch_operands = 0 : i64, tpu.core_type = #tpu.core_type<tc>, window_params = [{transform_indices = @transform_0, window_bounds = array<i64: 128, 128>}, {pipeline_mode = #tpu.pipeline_mode<synchronous>, transform_indices = @transform_1, window_bounds = array<i64: 1, 128>}, {pipeline_mode = #tpu.pipeline_mode<synchronous>, transform_indices = @transform_2, window_bounds = array<i64: 1, 128>}, {transform_indices = @transform_3, window_bounds = array<i64: 128, 128>}]} {
    %c0 = arith.constant 0 : index
    %c0_0 = arith.constant 0 : index
    %0 = vector.load %arg1[%c0, %c0_0] : memref<128x128xf32, #tpu.memory_space<vmem>>, vector<128x128xf32>
    %c0_1 = arith.constant 0 : index
    %c0_2 = arith.constant 0 : index
    %1 = vector.load %arg2[%c0_1, %c0_2] : memref<1x128xf32, #tpu.memory_space<vmem>>, vector<1x128xf32>
    %2 = vector.broadcast %1 : vector<1x128xf32> to vector<128x128xf32>
    %3 = arith.mulf %0, %2 : vector<128x128xf32>
    %c0_3 = arith.constant 0 : index
    %c0_4 = arith.constant 0 : index
    %4 = vector.load %arg3[%c0_3, %c0_4] : memref<1x128xf32, #tpu.memory_space<vmem>>, vector<1x128xf32>
    %5 = vector.broadcast %4 : vector<1x128xf32> to vector<128x128xf32>
    %6 = arith.addf %3, %5 : vector<128x128xf32>
    %cst = arith.constant 0.000000e+00 : f32
    %7 = vector.broadcast %cst : f32 to vector<128x128xf32>
    %8 = arith.maximumf %6, %7 : vector<128x128xf32>
    %c0_5 = arith.constant 0 : index
    %c0_6 = arith.constant 0 : index
    %9 = vector.load %arg4[%c0_5, %c0_6] : memref<128x128xf32, #tpu.memory_space<vmem>>, vector<128x128xf32>
    tpu.vector_store %arg4[%c0_5, %c0_6], %8 {strides = array<i32>} : memref<128x128xf32, #tpu.memory_space<vmem>>, vector<128x128xf32>,
    return
  }
  func.func @transform_0(%arg0: i32) -> (i32, i32) {
    %c0_i32 = arith.constant 0 : i32
    %c0_i32_0 = arith.constant 0 : i32
    return %arg0, %c0_i32 : i32, i32
  }
  func.func @transform_1(%arg0: i32) -> (i32, i32) {
    %c0_i32 = arith.constant 0 : i32
    %c0_i32_0 = arith.constant 0 : i32
    %c0_i32_1 = arith.constant 0 : i32
    return %c0_i32, %c0_i32_0 : i32, i32
  }
  func.func @transform_2(%arg0: i32) -> (i32, i32) {
    %c0_i32 = arith.constant 0 : i32
    %c0_i32_0 = arith.constant 0 : i32
    %c0_i32_1 = arith.constant 0 : i32
    return %c0_i32, %c0_i32_0 : i32, i32
  }
  func.func @transform_3(%arg0: i32) -> (i32, i32) {
    %c0_i32 = arith.constant 0 : i32
    %c0_i32_0 = arith.constant 0 : i32
    return %arg0, %c0_i32 : i32, i32
  }
}

module attributes {stable_mosaic.version = 11 : i64} {
  func.func @_matmul_bias_stats_kernel(%arg0: i32, %arg1: memref<128x64xbf16, #tpu.memory_space<vmem>>, %arg2: memref<64x128xbf16, #tpu.memory_space<vmem>>, %arg3: memref<1x128xf32, #tpu.memory_space<vmem>>, %arg4: memref<128x128xf32, #tpu.memory_space<vmem>>, %arg5: memref<8x128xf32, #tpu.memory_space<vmem>>) attributes {dimension_semantics = [#tpu.dimension_semantics<parallel>], iteration_bounds = array<i64: 1>, scalar_prefetch = 0 : i64, scratch_operands = 0 : i64, tpu.core_type = #tpu.core_type<tc>, window_params = [{transform_indices = @transform_0, window_bounds = array<i64: 128, 64>}, {pipeline_mode = #tpu.pipeline_mode<synchronous>, transform_indices = @transform_1, window_bounds = array<i64: 64, 128>}, {pipeline_mode = #tpu.pipeline_mode<synchronous>, transform_indices = @transform_2, window_bounds = array<i64: 1, 128>}, {transform_indices = @transform_3, window_bounds = array<i64: 128, 128>}, {transform_indices = @transform_4, window_bounds = array<i64: 8, 128>}]} {
    %c0 = arith.constant 0 : index
    %c0_0 = arith.constant 0 : index
    %0 = vector.load %arg1[%c0, %c0_0] : memref<128x64xbf16, #tpu.memory_space<vmem>>, vector<128x64xbf16>
    %c0_1 = arith.constant 0 : index
    %c0_2 = arith.constant 0 : index
    %1 = vector.load %arg2[%c0_1, %c0_2] : memref<64x128xbf16, #tpu.memory_space<vmem>>, vector<64x128xbf16>
    %cst = arith.constant dense<0.000000e+00> : vector<128x128xf32>
    %2 = tpu.matmul %0, %1, %cst {dimension_numbers = #tpu.dot_dimension_numbers<[1], [0], [0], [1], [0, 0, 1, 1], [], []>} : vector<128x64xbf16>, vector<64x128xbf16>, vector<128x128xf32> -> vector<128x128xf32>
    %c0_3 = arith.constant 0 : index
    %c0_4 = arith.constant 0 : index
    %3 = vector.load %arg3[%c0_3, %c0_4] : memref<1x128xf32, #tpu.memory_space<vmem>>, vector<1x128xf32>
    %4 = vector.broadcast %3 : vector<1x128xf32> to vector<128x128xf32>
    %5 = arith.addf %2, %4 : vector<128x128xf32>
    %c0_5 = arith.constant 0 : index
    %c0_6 = arith.constant 0 : index
    %6 = vector.load %arg4[%c0_5, %c0_6] : memref<128x128xf32, #tpu.memory_space<vmem>>, vector<128x128xf32>
    tpu.vector_store %arg4[%c0_5, %c0_6], %5 {strides = array<i32>} : memref<128x128xf32, #tpu.memory_space<vmem>>, vector<128x128xf32>,
    %cst_7 = arith.constant dense<0.000000e+00> : vector<128xf32>
    %7 = vector.multi_reduction <add>, %5, %cst_7 [0] : vector<128x128xf32> to vector<128xf32>
    %8 = vector.shape_cast %7 : vector<128xf32> to vector<1x128xf32>
    %9 = arith.mulf %5, %5 : vector<128x128xf32>
    %cst_8 = arith.constant dense<0.000000e+00> : vector<128xf32>
    %10 = vector.multi_reduction <add>, %9, %cst_8 [0] : vector<128x128xf32> to vector<128xf32>
    %11 = vector.shape_cast %10 : vector<128xf32> to vector<1x128xf32>
    %12 = tpu.iota {dimensions = array<i32: 0>} : vector<8x1xi32>
    %c0_i32 = arith.constant 0 : i32
    %13 = vector.broadcast %c0_i32 : i32 to vector<8x1xi32>
    %14 = arith.cmpi eq, %12, %13 : vector<8x1xi32>
    %cst_9 = arith.constant 0.000000e+00 : f32
    %15 = vector.shape_cast %14 : vector<8x1xi1> to vector<8x1xi1>
    %16 = vector.broadcast %15 : vector<8x1xi1> to vector<8x128xi1>
    %17 = vector.shape_cast %8 : vector<1x128xf32> to vector<1x128xf32>
    %18 = vector.broadcast %17 : vector<1x128xf32> to vector<8x128xf32>
    %19 = vector.broadcast %cst_9 : f32 to vector<8x128xf32>
    %20 = arith.select %16, %18, %19 : vector<8x128xi1>, vector<8x128xf32>
    %c1_i32 = arith.constant 1 : i32
    %21 = vector.broadcast %c1_i32 : i32 to vector<8x1xi32>
    %22 = arith.cmpi eq, %12, %21 : vector<8x1xi32>
    %cst_10 = arith.constant 0.000000e+00 : f32
    %23 = vector.shape_cast %22 : vector<8x1xi1> to vector<8x1xi1>
    %24 = vector.broadcast %23 : vector<8x1xi1> to vector<8x128xi1>
    %25 = vector.shape_cast %11 : vector<1x128xf32> to vector<1x128xf32>
    %26 = vector.broadcast %25 : vector<1x128xf32> to vector<8x128xf32>
    %27 = vector.broadcast %cst_10 : f32 to vector<8x128xf32>
    %28 = arith.select %24, %26, %27 : vector<8x128xi1>, vector<8x128xf32>
    %29 = arith.addf %20, %28 : vector<8x128xf32>
    %c0_11 = arith.constant 0 : index
    %c0_12 = arith.constant 0 : index
    %30 = vector.load %arg5[%c0_11, %c0_12] : memref<8x128xf32, #tpu.memory_space<vmem>>, vector<8x128xf32>
    tpu.vector_store %arg5[%c0_11, %c0_12], %29 {strides = array<i32>} : memref<8x128xf32, #tpu.memory_space<vmem>>, vector<8x128xf32>,
    return
  }
  func.func @transform_0(%arg0: i32) -> (i32, i32) {
    %c0_i32 = arith.constant 0 : i32
    %c0_i32_0 = arith.constant 0 : i32
    return %arg0, %c0_i32 : i32, i32
  }
  func.func @transform_1(%arg0: i32) -> (i32, i32) {
    %c0_i32 = arith.constant 0 : i32
    %c0_i32_0 = arith.constant 0 : i32
    %c0_i32_1 = arith.constant 0 : i32
    return %c0_i32, %c0_i32_0 : i32, i32
  }
  func.func @transform_2(%arg0: i32) -> (i32, i32) {
    %c0_i32 = arith.constant 0 : i32
    %c0_i32_0 = arith.constant 0 : i32
    %c0_i32_1 = arith.constant 0 : i32
    return %c0_i32, %c0_i32_0 : i32, i32
  }
  func.func @transform_3(%arg0: i32) -> (i32, i32) {
    %c0_i32 = arith.constant 0 : i32
    %c0_i32_0 = arith.constant 0 : i32
    return %arg0, %c0_i32 : i32, i32
  }
  func.func @transform_4(%arg0: i32) -> (i32, i32) {
    %c0_i32 = arith.constant 0 : i32
    %c0_i32_0 = arith.constant 0 : i32
    return %arg0, %c0_i32 : i32, i32
  }
}

module attributes {stable_mosaic.version = 11 : i64} {
  func.func @_matmul_bias_stats_kernel(%arg0: i32, %arg1: memref<128x1152xbf16, #tpu.memory_space<vmem>>, %arg2: memref<1152x128xbf16, #tpu.memory_space<vmem>>, %arg3: memref<1x128xf32, #tpu.memory_space<vmem>>, %arg4: memref<128x128xf32, #tpu.memory_space<vmem>>, %arg5: memref<8x128xf32, #tpu.memory_space<vmem>>) attributes {dimension_semantics = [#tpu.dimension_semantics<parallel>], iteration_bounds = array<i64: 1>, scalar_prefetch = 0 : i64, scratch_operands = 0 : i64, tpu.core_type = #tpu.core_type<tc>, window_params = [{transform_indices = @transform_0, window_bounds = array<i64: 128, 1152>}, {pipeline_mode = #tpu.pipeline_mode<synchronous>, transform_indices = @transform_1, window_bounds = array<i64: 1152, 128>}, {pipeline_mode = #tpu.pipeline_mode<synchronous>, transform_indices = @transform_2, window_bounds = array<i64: 1, 128>}, {transform_indices = @transform_3, window_bounds = array<i64: 128, 128>}, {transform_indices = @transform_4, window_bounds = array<i64: 8, 128>}]} {
    %c0 = arith.constant 0 : index
    %c0_0 = arith.constant 0 : index
    %0 = vector.load %arg1[%c0, %c0_0] : memref<128x1152xbf16, #tpu.memory_space<vmem>>, vector<128x1152xbf16>
    %c0_1 = arith.constant 0 : index
    %c0_2 = arith.constant 0 : index
    %1 = vector.load %arg2[%c0_1, %c0_2] : memref<1152x128xbf16, #tpu.memory_space<vmem>>, vector<1152x128xbf16>
    %cst = arith.constant dense<0.000000e+00> : vector<128x128xf32>
    %2 = tpu.matmul %0, %1, %cst {dimension_numbers = #tpu.dot_dimension_numbers<[1], [0], [0], [1], [0, 0, 1, 1], [], []>} : vector<128x1152xbf16>, vector<1152x128xbf16>, vector<128x128xf32> -> vector<128x128xf32>
    %c0_3 = arith.constant 0 : index
    %c0_4 = arith.constant 0 : index
    %3 = vector.load %arg3[%c0_3, %c0_4] : memref<1x128xf32, #tpu.memory_space<vmem>>, vector<1x128xf32>
    %4 = vector.broadcast %3 : vector<1x128xf32> to vector<128x128xf32>
    %5 = arith.addf %2, %4 : vector<128x128xf32>
    %c0_5 = arith.constant 0 : index
    %c0_6 = arith.constant 0 : index
    %6 = vector.load %arg4[%c0_5, %c0_6] : memref<128x128xf32, #tpu.memory_space<vmem>>, vector<128x128xf32>
    tpu.vector_store %arg4[%c0_5, %c0_6], %5 {strides = array<i32>} : memref<128x128xf32, #tpu.memory_space<vmem>>, vector<128x128xf32>,
    %cst_7 = arith.constant dense<0.000000e+00> : vector<128xf32>
    %7 = vector.multi_reduction <add>, %5, %cst_7 [0] : vector<128x128xf32> to vector<128xf32>
    %8 = vector.shape_cast %7 : vector<128xf32> to vector<1x128xf32>
    %9 = arith.mulf %5, %5 : vector<128x128xf32>
    %cst_8 = arith.constant dense<0.000000e+00> : vector<128xf32>
    %10 = vector.multi_reduction <add>, %9, %cst_8 [0] : vector<128x128xf32> to vector<128xf32>
    %11 = vector.shape_cast %10 : vector<128xf32> to vector<1x128xf32>
    %12 = tpu.iota {dimensions = array<i32: 0>} : vector<8x1xi32>
    %c0_i32 = arith.constant 0 : i32
    %13 = vector.broadcast %c0_i32 : i32 to vector<8x1xi32>
    %14 = arith.cmpi eq, %12, %13 : vector<8x1xi32>
    %cst_9 = arith.constant 0.000000e+00 : f32
    %15 = vector.shape_cast %14 : vector<8x1xi1> to vector<8x1xi1>
    %16 = vector.broadcast %15 : vector<8x1xi1> to vector<8x128xi1>
    %17 = vector.shape_cast %8 : vector<1x128xf32> to vector<1x128xf32>
    %18 = vector.broadcast %17 : vector<1x128xf32> to vector<8x128xf32>
    %19 = vector.broadcast %cst_9 : f32 to vector<8x128xf32>
    %20 = arith.select %16, %18, %19 : vector<8x128xi1>, vector<8x128xf32>
    %c1_i32 = arith.constant 1 : i32
    %21 = vector.broadcast %c1_i32 : i32 to vector<8x1xi32>
    %22 = arith.cmpi eq, %12, %21 : vector<8x1xi32>
    %cst_10 = arith.constant 0.000000e+00 : f32
    %23 = vector.shape_cast %22 : vector<8x1xi1> to vector<8x1xi1>
    %24 = vector.broadcast %23 : vector<8x1xi1> to vector<8x128xi1>
    %25 = vector.shape_cast %11 : vector<1x128xf32> to vector<1x128xf32>
    %26 = vector.broadcast %25 : vector<1x128xf32> to vector<8x128xf32>
    %27 = vector.broadcast %cst_10 : f32 to vector<8x128xf32>
    %28 = arith.select %24, %26, %27 : vector<8x128xi1>, vector<8x128xf32>
    %29 = arith.addf %20, %28 : vector<8x128xf32>
    %c0_11 = arith.constant 0 : index
    %c0_12 = arith.constant 0 : index
    %30 = vector.load %arg5[%c0_11, %c0_12] : memref<8x128xf32, #tpu.memory_space<vmem>>, vector<8x128xf32>
    tpu.vector_store %arg5[%c0_11, %c0_12], %29 {strides = array<i32>} : memref<8x128xf32, #tpu.memory_space<vmem>>, vector<8x128xf32>,
    return
  }
  func.func @transform_0(%arg0: i32) -> (i32, i32) {
    %c0_i32 = arith.constant 0 : i32
    %c0_i32_0 = arith.constant 0 : i32
    return %arg0, %c0_i32 : i32, i32
  }
  func.func @transform_1(%arg0: i32) -> (i32, i32) {
    %c0_i32 = arith.constant 0 : i32
    %c0_i32_0 = arith.constant 0 : i32
    %c0_i32_1 = arith.constant 0 : i32
    return %c0_i32, %c0_i32_0 : i32, i32
  }
  func.func @transform_2(%arg0: i32) -> (i32, i32) {
    %c0_i32 = arith.constant 0 : i32
    %c0_i32_0 = arith.constant 0 : i32
    %c0_i32_1 = arith.constant 0 : i32
    return %c0_i32, %c0_i32_0 : i32, i32
  }
  func.func @transform_3(%arg0: i32) -> (i32, i32) {
    %c0_i32 = arith.constant 0 : i32
    %c0_i32_0 = arith.constant 0 : i32
    return %arg0, %c0_i32 : i32, i32
  }
  func.func @transform_4(%arg0: i32) -> (i32, i32) {
    %c0_i32 = arith.constant 0 : i32
    %c0_i32_0 = arith.constant 0 : i32
    return %arg0, %c0_i32 : i32, i32
  }
}

module attributes {stable_mosaic.version = 11 : i64} {
  func.func @_matmul_bias_stats_kernel(%arg0: i32, %arg1: memref<128x128xbf16, #tpu.memory_space<vmem>>, %arg2: memref<128x32xbf16, #tpu.memory_space<vmem>>, %arg3: memref<1x32xf32, #tpu.memory_space<vmem>>, %arg4: memref<128x32xf32, #tpu.memory_space<vmem>>, %arg5: memref<8x32xf32, #tpu.memory_space<vmem>>) attributes {dimension_semantics = [#tpu.dimension_semantics<parallel>], iteration_bounds = array<i64: 1>, scalar_prefetch = 0 : i64, scratch_operands = 0 : i64, tpu.core_type = #tpu.core_type<tc>, window_params = [{transform_indices = @transform_0, window_bounds = array<i64: 128, 128>}, {pipeline_mode = #tpu.pipeline_mode<synchronous>, transform_indices = @transform_1, window_bounds = array<i64: 128, 32>}, {pipeline_mode = #tpu.pipeline_mode<synchronous>, transform_indices = @transform_2, window_bounds = array<i64: 1, 32>}, {transform_indices = @transform_3, window_bounds = array<i64: 128, 32>}, {transform_indices = @transform_4, window_bounds = array<i64: 8, 32>}]} {
    %c0 = arith.constant 0 : index
    %c0_0 = arith.constant 0 : index
    %0 = vector.load %arg1[%c0, %c0_0] : memref<128x128xbf16, #tpu.memory_space<vmem>>, vector<128x128xbf16>
    %c0_1 = arith.constant 0 : index
    %c0_2 = arith.constant 0 : index
    %1 = vector.load %arg2[%c0_1, %c0_2] : memref<128x32xbf16, #tpu.memory_space<vmem>>, vector<128x32xbf16>
    %cst = arith.constant dense<0.000000e+00> : vector<128x32xf32>
    %2 = tpu.matmul %0, %1, %cst {dimension_numbers = #tpu.dot_dimension_numbers<[1], [0], [0], [1], [0, 0, 1, 1], [], []>} : vector<128x128xbf16>, vector<128x32xbf16>, vector<128x32xf32> -> vector<128x32xf32>
    %c0_3 = arith.constant 0 : index
    %c0_4 = arith.constant 0 : index
    %3 = vector.load %arg3[%c0_3, %c0_4] : memref<1x32xf32, #tpu.memory_space<vmem>>, vector<1x32xf32>
    %4 = vector.broadcast %3 : vector<1x32xf32> to vector<128x32xf32>
    %5 = arith.addf %2, %4 : vector<128x32xf32>
    %c0_5 = arith.constant 0 : index
    %c0_6 = arith.constant 0 : index
    %6 = vector.load %arg4[%c0_5, %c0_6] : memref<128x32xf32, #tpu.memory_space<vmem>>, vector<128x32xf32>
    tpu.vector_store %arg4[%c0_5, %c0_6], %5 {strides = array<i32>} : memref<128x32xf32, #tpu.memory_space<vmem>>, vector<128x32xf32>,
    %cst_7 = arith.constant dense<0.000000e+00> : vector<32xf32>
    %7 = vector.multi_reduction <add>, %5, %cst_7 [0] : vector<128x32xf32> to vector<32xf32>
    %8 = vector.shape_cast %7 : vector<32xf32> to vector<1x32xf32>
    %9 = arith.mulf %5, %5 : vector<128x32xf32>
    %cst_8 = arith.constant dense<0.000000e+00> : vector<32xf32>
    %10 = vector.multi_reduction <add>, %9, %cst_8 [0] : vector<128x32xf32> to vector<32xf32>
    %11 = vector.shape_cast %10 : vector<32xf32> to vector<1x32xf32>
    %12 = tpu.iota {dimensions = array<i32: 0>} : vector<8x1xi32>
    %c0_i32 = arith.constant 0 : i32
    %13 = vector.broadcast %c0_i32 : i32 to vector<8x1xi32>
    %14 = arith.cmpi eq, %12, %13 : vector<8x1xi32>
    %cst_9 = arith.constant 0.000000e+00 : f32
    %15 = vector.shape_cast %14 : vector<8x1xi1> to vector<8x1xi1>
    %16 = vector.broadcast %15 : vector<8x1xi1> to vector<8x32xi1>
    %17 = vector.shape_cast %8 : vector<1x32xf32> to vector<1x32xf32>
    %18 = vector.broadcast %17 : vector<1x32xf32> to vector<8x32xf32>
    %19 = vector.broadcast %cst_9 : f32 to vector<8x32xf32>
    %20 = arith.select %16, %18, %19 : vector<8x32xi1>, vector<8x32xf32>
    %c1_i32 = arith.constant 1 : i32
    %21 = vector.broadcast %c1_i32 : i32 to vector<8x1xi32>
    %22 = arith.cmpi eq, %12, %21 : vector<8x1xi32>
    %cst_10 = arith.constant 0.000000e+00 : f32
    %23 = vector.shape_cast %22 : vector<8x1xi1> to vector<8x1xi1>
    %24 = vector.broadcast %23 : vector<8x1xi1> to vector<8x32xi1>
    %25 = vector.shape_cast %11 : vector<1x32xf32> to vector<1x32xf32>
    %26 = vector.broadcast %25 : vector<1x32xf32> to vector<8x32xf32>
    %27 = vector.broadcast %cst_10 : f32 to vector<8x32xf32>
    %28 = arith.select %24, %26, %27 : vector<8x32xi1>, vector<8x32xf32>
    %29 = arith.addf %20, %28 : vector<8x32xf32>
    %c0_11 = arith.constant 0 : index
    %c0_12 = arith.constant 0 : index
    %30 = vector.load %arg5[%c0_11, %c0_12] : memref<8x32xf32, #tpu.memory_space<vmem>>, vector<8x32xf32>
    tpu.vector_store %arg5[%c0_11, %c0_12], %29 {strides = array<i32>} : memref<8x32xf32, #tpu.memory_space<vmem>>, vector<8x32xf32>,
    return
  }
  func.func @transform_0(%arg0: i32) -> (i32, i32) {
    %c0_i32 = arith.constant 0 : i32
    %c0_i32_0 = arith.constant 0 : i32
    return %arg0, %c0_i32 : i32, i32
  }
  func.func @transform_1(%arg0: i32) -> (i32, i32) {
    %c0_i32 = arith.constant 0 : i32
    %c0_i32_0 = arith.constant 0 : i32
    %c0_i32_1 = arith.constant 0 : i32
    return %c0_i32, %c0_i32_0 : i32, i32
  }
  func.func @transform_2(%arg0: i32) -> (i32, i32) {
    %c0_i32 = arith.constant 0 : i32
    %c0_i32_0 = arith.constant 0 : i32
    %c0_i32_1 = arith.constant 0 : i32
    return %c0_i32, %c0_i32_0 : i32, i32
  }
  func.func @transform_3(%arg0: i32) -> (i32, i32) {
    %c0_i32 = arith.constant 0 : i32
    %c0_i32_0 = arith.constant 0 : i32
    return %arg0, %c0_i32 : i32, i32
  }
  func.func @transform_4(%arg0: i32) -> (i32, i32) {
    %c0_i32 = arith.constant 0 : i32
    %c0_i32_0 = arith.constant 0 : i32
    return %arg0, %c0_i32 : i32, i32
  }
}

module attributes {stable_mosaic.version = 11 : i64} {
  func.func @_scale_shift_kernel(%arg0: i32, %arg1: memref<32x128xf32, #tpu.memory_space<vmem>>, %arg2: memref<1x128xf32, #tpu.memory_space<vmem>>, %arg3: memref<1x128xf32, #tpu.memory_space<vmem>>, %arg4: memref<32x128xf32, #tpu.memory_space<vmem>>) attributes {dimension_semantics = [#tpu.dimension_semantics<parallel>], iteration_bounds = array<i64: 1>, scalar_prefetch = 0 : i64, scratch_operands = 0 : i64, tpu.core_type = #tpu.core_type<tc>, window_params = [{transform_indices = @transform_0, window_bounds = array<i64: 32, 128>}, {pipeline_mode = #tpu.pipeline_mode<synchronous>, transform_indices = @transform_1, window_bounds = array<i64: 1, 128>}, {pipeline_mode = #tpu.pipeline_mode<synchronous>, transform_indices = @transform_2, window_bounds = array<i64: 1, 128>}, {transform_indices = @transform_3, window_bounds = array<i64: 32, 128>}]} {
    %c0 = arith.constant 0 : index
    %c0_0 = arith.constant 0 : index
    %0 = vector.load %arg1[%c0, %c0_0] : memref<32x128xf32, #tpu.memory_space<vmem>>, vector<32x128xf32>
    %c0_1 = arith.constant 0 : index
    %c0_2 = arith.constant 0 : index
    %1 = vector.load %arg2[%c0_1, %c0_2] : memref<1x128xf32, #tpu.memory_space<vmem>>, vector<1x128xf32>
    %2 = vector.broadcast %1 : vector<1x128xf32> to vector<32x128xf32>
    %3 = arith.mulf %0, %2 : vector<32x128xf32>
    %c0_3 = arith.constant 0 : index
    %c0_4 = arith.constant 0 : index
    %4 = vector.load %arg3[%c0_3, %c0_4] : memref<1x128xf32, #tpu.memory_space<vmem>>, vector<1x128xf32>
    %5 = vector.broadcast %4 : vector<1x128xf32> to vector<32x128xf32>
    %6 = arith.addf %3, %5 : vector<32x128xf32>
    %cst = arith.constant 0.000000e+00 : f32
    %7 = vector.broadcast %cst : f32 to vector<32x128xf32>
    %8 = arith.maximumf %6, %7 : vector<32x128xf32>
    %c0_5 = arith.constant 0 : index
    %c0_6 = arith.constant 0 : index
    %9 = vector.load %arg4[%c0_5, %c0_6] : memref<32x128xf32, #tpu.memory_space<vmem>>, vector<32x128xf32>
    tpu.vector_store %arg4[%c0_5, %c0_6], %8 {strides = array<i32>} : memref<32x128xf32, #tpu.memory_space<vmem>>, vector<32x128xf32>,
    return
  }
  func.func @transform_0(%arg0: i32) -> (i32, i32) {
    %c0_i32 = arith.constant 0 : i32
    %c0_i32_0 = arith.constant 0 : i32
    return %arg0, %c0_i32 : i32, i32
  }
  func.func @transform_1(%arg0: i32) -> (i32, i32) {
    %c0_i32 = arith.constant 0 : i32
    %c0_i32_0 = arith.constant 0 : i32
    %c0_i32_1 = arith.constant 0 : i32
    return %c0_i32, %c0_i32_0 : i32, i32
  }
  func.func @transform_2(%arg0: i32) -> (i32, i32) {
    %c0_i32 = arith.constant 0 : i32
    %c0_i32_0 = arith.constant 0 : i32
    %c0_i32_1 = arith.constant 0 : i32
    return %c0_i32, %c0_i32_0 : i32, i32
  }
  func.func @transform_3(%arg0: i32) -> (i32, i32) {
    %c0_i32 = arith.constant 0 : i32
    %c0_i32_0 = arith.constant 0 : i32
    return %arg0, %c0_i32 : i32, i32
  }
}

module attributes {stable_mosaic.version = 11 : i64} {
  func.func @_matmul_bias_stats_kernel(%arg0: i32, %arg1: memref<128x288xbf16, #tpu.memory_space<vmem>>, %arg2: memref<288x32xbf16, #tpu.memory_space<vmem>>, %arg3: memref<1x32xf32, #tpu.memory_space<vmem>>, %arg4: memref<128x32xf32, #tpu.memory_space<vmem>>, %arg5: memref<8x32xf32, #tpu.memory_space<vmem>>) attributes {dimension_semantics = [#tpu.dimension_semantics<parallel>], iteration_bounds = array<i64: 1>, scalar_prefetch = 0 : i64, scratch_operands = 0 : i64, tpu.core_type = #tpu.core_type<tc>, window_params = [{transform_indices = @transform_0, window_bounds = array<i64: 128, 288>}, {pipeline_mode = #tpu.pipeline_mode<synchronous>, transform_indices = @transform_1, window_bounds = array<i64: 288, 32>}, {pipeline_mode = #tpu.pipeline_mode<synchronous>, transform_indices = @transform_2, window_bounds = array<i64: 1, 32>}, {transform_indices = @transform_3, window_bounds = array<i64: 128, 32>}, {transform_indices = @transform_4, window_bounds = array<i64: 8, 32>}]} {
    %c0 = arith.constant 0 : index
    %c0_0 = arith.constant 0 : index
    %0 = vector.load %arg1[%c0, %c0_0] : memref<128x288xbf16, #tpu.memory_space<vmem>>, vector<128x288xbf16>
    %c0_1 = arith.constant 0 : index
    %c0_2 = arith.constant 0 : index
    %1 = vector.load %arg2[%c0_1, %c0_2] : memref<288x32xbf16, #tpu.memory_space<vmem>>, vector<288x32xbf16>
    %cst = arith.constant dense<0.000000e+00> : vector<128x32xf32>
    %2 = tpu.matmul %0, %1, %cst {dimension_numbers = #tpu.dot_dimension_numbers<[1], [0], [0], [1], [0, 0, 1, 1], [], []>} : vector<128x288xbf16>, vector<288x32xbf16>, vector<128x32xf32> -> vector<128x32xf32>
    %c0_3 = arith.constant 0 : index
    %c0_4 = arith.constant 0 : index
    %3 = vector.load %arg3[%c0_3, %c0_4] : memref<1x32xf32, #tpu.memory_space<vmem>>, vector<1x32xf32>
    %4 = vector.broadcast %3 : vector<1x32xf32> to vector<128x32xf32>
    %5 = arith.addf %2, %4 : vector<128x32xf32>
    %c0_5 = arith.constant 0 : index
    %c0_6 = arith.constant 0 : index
    %6 = vector.load %arg4[%c0_5, %c0_6] : memref<128x32xf32, #tpu.memory_space<vmem>>, vector<128x32xf32>
    tpu.vector_store %arg4[%c0_5, %c0_6], %5 {strides = array<i32>} : memref<128x32xf32, #tpu.memory_space<vmem>>, vector<128x32xf32>,
    %cst_7 = arith.constant dense<0.000000e+00> : vector<32xf32>
    %7 = vector.multi_reduction <add>, %5, %cst_7 [0] : vector<128x32xf32> to vector<32xf32>
    %8 = vector.shape_cast %7 : vector<32xf32> to vector<1x32xf32>
    %9 = arith.mulf %5, %5 : vector<128x32xf32>
    %cst_8 = arith.constant dense<0.000000e+00> : vector<32xf32>
    %10 = vector.multi_reduction <add>, %9, %cst_8 [0] : vector<128x32xf32> to vector<32xf32>
    %11 = vector.shape_cast %10 : vector<32xf32> to vector<1x32xf32>
    %12 = tpu.iota {dimensions = array<i32: 0>} : vector<8x1xi32>
    %c0_i32 = arith.constant 0 : i32
    %13 = vector.broadcast %c0_i32 : i32 to vector<8x1xi32>
    %14 = arith.cmpi eq, %12, %13 : vector<8x1xi32>
    %cst_9 = arith.constant 0.000000e+00 : f32
    %15 = vector.shape_cast %14 : vector<8x1xi1> to vector<8x1xi1>
    %16 = vector.broadcast %15 : vector<8x1xi1> to vector<8x32xi1>
    %17 = vector.shape_cast %8 : vector<1x32xf32> to vector<1x32xf32>
    %18 = vector.broadcast %17 : vector<1x32xf32> to vector<8x32xf32>
    %19 = vector.broadcast %cst_9 : f32 to vector<8x32xf32>
    %20 = arith.select %16, %18, %19 : vector<8x32xi1>, vector<8x32xf32>
    %c1_i32 = arith.constant 1 : i32
    %21 = vector.broadcast %c1_i32 : i32 to vector<8x1xi32>
    %22 = arith.cmpi eq, %12, %21 : vector<8x1xi32>
    %cst_10 = arith.constant 0.000000e+00 : f32
    %23 = vector.shape_cast %22 : vector<8x1xi1> to vector<8x1xi1>
    %24 = vector.broadcast %23 : vector<8x1xi1> to vector<8x32xi1>
    %25 = vector.shape_cast %11 : vector<1x32xf32> to vector<1x32xf32>
    %26 = vector.broadcast %25 : vector<1x32xf32> to vector<8x32xf32>
    %27 = vector.broadcast %cst_10 : f32 to vector<8x32xf32>
    %28 = arith.select %24, %26, %27 : vector<8x32xi1>, vector<8x32xf32>
    %29 = arith.addf %20, %28 : vector<8x32xf32>
    %c0_11 = arith.constant 0 : index
    %c0_12 = arith.constant 0 : index
    %30 = vector.load %arg5[%c0_11, %c0_12] : memref<8x32xf32, #tpu.memory_space<vmem>>, vector<8x32xf32>
    tpu.vector_store %arg5[%c0_11, %c0_12], %29 {strides = array<i32>} : memref<8x32xf32, #tpu.memory_space<vmem>>, vector<8x32xf32>,
    return
  }
  func.func @transform_0(%arg0: i32) -> (i32, i32) {
    %c0_i32 = arith.constant 0 : i32
    %c0_i32_0 = arith.constant 0 : i32
    return %arg0, %c0_i32 : i32, i32
  }
  func.func @transform_1(%arg0: i32) -> (i32, i32) {
    %c0_i32 = arith.constant 0 : i32
    %c0_i32_0 = arith.constant 0 : i32
    %c0_i32_1 = arith.constant 0 : i32
    return %c0_i32, %c0_i32_0 : i32, i32
  }
  func.func @transform_2(%arg0: i32) -> (i32, i32) {
    %c0_i32 = arith.constant 0 : i32
    %c0_i32_0 = arith.constant 0 : i32
    %c0_i32_1 = arith.constant 0 : i32
    return %c0_i32, %c0_i32_0 : i32, i32
  }
  func.func @transform_3(%arg0: i32) -> (i32, i32) {
    %c0_i32 = arith.constant 0 : i32
    %c0_i32_0 = arith.constant 0 : i32
    return %arg0, %c0_i32 : i32, i32
  }
  func.func @transform_4(%arg0: i32) -> (i32, i32) {
    %c0_i32 = arith.constant 0 : i32
    %c0_i32_0 = arith.constant 0 : i32
    return %arg0, %c0_i32 : i32, i32
  }
}

module attributes {stable_mosaic.version = 11 : i64} {
  func.func @_matmul_bias_stats_kernel(%arg0: i32, %arg1: memref<128x32xbf16, #tpu.memory_space<vmem>>, %arg2: memref<32x128xbf16, #tpu.memory_space<vmem>>, %arg3: memref<1x128xf32, #tpu.memory_space<vmem>>, %arg4: memref<128x128xf32, #tpu.memory_space<vmem>>, %arg5: memref<8x128xf32, #tpu.memory_space<vmem>>) attributes {dimension_semantics = [#tpu.dimension_semantics<parallel>], iteration_bounds = array<i64: 1>, scalar_prefetch = 0 : i64, scratch_operands = 0 : i64, tpu.core_type = #tpu.core_type<tc>, window_params = [{transform_indices = @transform_0, window_bounds = array<i64: 128, 32>}, {pipeline_mode = #tpu.pipeline_mode<synchronous>, transform_indices = @transform_1, window_bounds = array<i64: 32, 128>}, {pipeline_mode = #tpu.pipeline_mode<synchronous>, transform_indices = @transform_2, window_bounds = array<i64: 1, 128>}, {transform_indices = @transform_3, window_bounds = array<i64: 128, 128>}, {transform_indices = @transform_4, window_bounds = array<i64: 8, 128>}]} {
    %c0 = arith.constant 0 : index
    %c0_0 = arith.constant 0 : index
    %0 = vector.load %arg1[%c0, %c0_0] : memref<128x32xbf16, #tpu.memory_space<vmem>>, vector<128x32xbf16>
    %c0_1 = arith.constant 0 : index
    %c0_2 = arith.constant 0 : index
    %1 = vector.load %arg2[%c0_1, %c0_2] : memref<32x128xbf16, #tpu.memory_space<vmem>>, vector<32x128xbf16>
    %cst = arith.constant dense<0.000000e+00> : vector<128x128xf32>
    %2 = tpu.matmul %0, %1, %cst {dimension_numbers = #tpu.dot_dimension_numbers<[1], [0], [0], [1], [0, 0, 1, 1], [], []>} : vector<128x32xbf16>, vector<32x128xbf16>, vector<128x128xf32> -> vector<128x128xf32>
    %c0_3 = arith.constant 0 : index
    %c0_4 = arith.constant 0 : index
    %3 = vector.load %arg3[%c0_3, %c0_4] : memref<1x128xf32, #tpu.memory_space<vmem>>, vector<1x128xf32>
    %4 = vector.broadcast %3 : vector<1x128xf32> to vector<128x128xf32>
    %5 = arith.addf %2, %4 : vector<128x128xf32>
    %c0_5 = arith.constant 0 : index
    %c0_6 = arith.constant 0 : index
    %6 = vector.load %arg4[%c0_5, %c0_6] : memref<128x128xf32, #tpu.memory_space<vmem>>, vector<128x128xf32>
    tpu.vector_store %arg4[%c0_5, %c0_6], %5 {strides = array<i32>} : memref<128x128xf32, #tpu.memory_space<vmem>>, vector<128x128xf32>,
    %cst_7 = arith.constant dense<0.000000e+00> : vector<128xf32>
    %7 = vector.multi_reduction <add>, %5, %cst_7 [0] : vector<128x128xf32> to vector<128xf32>
    %8 = vector.shape_cast %7 : vector<128xf32> to vector<1x128xf32>
    %9 = arith.mulf %5, %5 : vector<128x128xf32>
    %cst_8 = arith.constant dense<0.000000e+00> : vector<128xf32>
    %10 = vector.multi_reduction <add>, %9, %cst_8 [0] : vector<128x128xf32> to vector<128xf32>
    %11 = vector.shape_cast %10 : vector<128xf32> to vector<1x128xf32>
    %12 = tpu.iota {dimensions = array<i32: 0>} : vector<8x1xi32>
    %c0_i32 = arith.constant 0 : i32
    %13 = vector.broadcast %c0_i32 : i32 to vector<8x1xi32>
    %14 = arith.cmpi eq, %12, %13 : vector<8x1xi32>
    %cst_9 = arith.constant 0.000000e+00 : f32
    %15 = vector.shape_cast %14 : vector<8x1xi1> to vector<8x1xi1>
    %16 = vector.broadcast %15 : vector<8x1xi1> to vector<8x128xi1>
    %17 = vector.shape_cast %8 : vector<1x128xf32> to vector<1x128xf32>
    %18 = vector.broadcast %17 : vector<1x128xf32> to vector<8x128xf32>
    %19 = vector.broadcast %cst_9 : f32 to vector<8x128xf32>
    %20 = arith.select %16, %18, %19 : vector<8x128xi1>, vector<8x128xf32>
    %c1_i32 = arith.constant 1 : i32
    %21 = vector.broadcast %c1_i32 : i32 to vector<8x1xi32>
    %22 = arith.cmpi eq, %12, %21 : vector<8x1xi32>
    %cst_10 = arith.constant 0.000000e+00 : f32
    %23 = vector.shape_cast %22 : vector<8x1xi1> to vector<8x1xi1>
    %24 = vector.broadcast %23 : vector<8x1xi1> to vector<8x128xi1>
    %25 = vector.shape_cast %11 : vector<1x128xf32> to vector<1x128xf32>
    %26 = vector.broadcast %25 : vector<1x128xf32> to vector<8x128xf32>
    %27 = vector.broadcast %cst_10 : f32 to vector<8x128xf32>
    %28 = arith.select %24, %26, %27 : vector<8x128xi1>, vector<8x128xf32>
    %29 = arith.addf %20, %28 : vector<8x128xf32>
    %c0_11 = arith.constant 0 : index
    %c0_12 = arith.constant 0 : index
    %30 = vector.load %arg5[%c0_11, %c0_12] : memref<8x128xf32, #tpu.memory_space<vmem>>, vector<8x128xf32>
    tpu.vector_store %arg5[%c0_11, %c0_12], %29 {strides = array<i32>} : memref<8x128xf32, #tpu.memory_space<vmem>>, vector<8x128xf32>,
    return
  }
  func.func @transform_0(%arg0: i32) -> (i32, i32) {
    %c0_i32 = arith.constant 0 : i32
    %c0_i32_0 = arith.constant 0 : i32
    return %arg0, %c0_i32 : i32, i32
  }
  func.func @transform_1(%arg0: i32) -> (i32, i32) {
    %c0_i32 = arith.constant 0 : i32
    %c0_i32_0 = arith.constant 0 : i32
    %c0_i32_1 = arith.constant 0 : i32
    return %c0_i32, %c0_i32_0 : i32, i32
  }
  func.func @transform_2(%arg0: i32) -> (i32, i32) {
    %c0_i32 = arith.constant 0 : i32
    %c0_i32_0 = arith.constant 0 : i32
    %c0_i32_1 = arith.constant 0 : i32
    return %c0_i32, %c0_i32_0 : i32, i32
  }
  func.func @transform_3(%arg0: i32) -> (i32, i32) {
    %c0_i32 = arith.constant 0 : i32
    %c0_i32_0 = arith.constant 0 : i32
    return %arg0, %c0_i32 : i32, i32
  }
  func.func @transform_4(%arg0: i32) -> (i32, i32) {
    %c0_i32 = arith.constant 0 : i32
    %c0_i32_0 = arith.constant 0 : i32
    return %arg0, %c0_i32 : i32, i32
  }
}

module attributes {stable_mosaic.version = 11 : i64} {
  func.func @_scale_shift_res_kernel(%arg0: i32, %arg1: memref<128x128xf32, #tpu.memory_space<vmem>>, %arg2: memref<1x128xf32, #tpu.memory_space<vmem>>, %arg3: memref<1x128xf32, #tpu.memory_space<vmem>>, %arg4: memref<128x128xf32, #tpu.memory_space<vmem>>, %arg5: memref<128x128xf32, #tpu.memory_space<vmem>>) attributes {dimension_semantics = [#tpu.dimension_semantics<parallel>], iteration_bounds = array<i64: 1>, scalar_prefetch = 0 : i64, scratch_operands = 0 : i64, tpu.core_type = #tpu.core_type<tc>, window_params = [{transform_indices = @transform_0, window_bounds = array<i64: 128, 128>}, {pipeline_mode = #tpu.pipeline_mode<synchronous>, transform_indices = @transform_1, window_bounds = array<i64: 1, 128>}, {pipeline_mode = #tpu.pipeline_mode<synchronous>, transform_indices = @transform_2, window_bounds = array<i64: 1, 128>}, {transform_indices = @transform_3, window_bounds = array<i64: 128, 128>}, {transform_indices = @transform_4, window_bounds = array<i64: 128, 128>}]} {
    %c0 = arith.constant 0 : index
    %c0_0 = arith.constant 0 : index
    %0 = vector.load %arg1[%c0, %c0_0] : memref<128x128xf32, #tpu.memory_space<vmem>>, vector<128x128xf32>
    %c0_1 = arith.constant 0 : index
    %c0_2 = arith.constant 0 : index
    %1 = vector.load %arg2[%c0_1, %c0_2] : memref<1x128xf32, #tpu.memory_space<vmem>>, vector<1x128xf32>
    %2 = vector.broadcast %1 : vector<1x128xf32> to vector<128x128xf32>
    %3 = arith.mulf %0, %2 : vector<128x128xf32>
    %c0_3 = arith.constant 0 : index
    %c0_4 = arith.constant 0 : index
    %4 = vector.load %arg3[%c0_3, %c0_4] : memref<1x128xf32, #tpu.memory_space<vmem>>, vector<1x128xf32>
    %5 = vector.broadcast %4 : vector<1x128xf32> to vector<128x128xf32>
    %6 = arith.addf %3, %5 : vector<128x128xf32>
    %c0_5 = arith.constant 0 : index
    %c0_6 = arith.constant 0 : index
    %7 = vector.load %arg4[%c0_5, %c0_6] : memref<128x128xf32, #tpu.memory_space<vmem>>, vector<128x128xf32>
    %8 = arith.addf %6, %7 : vector<128x128xf32>
    %cst = arith.constant 0.000000e+00 : f32
    %9 = vector.broadcast %cst : f32 to vector<128x128xf32>
    %10 = arith.maximumf %8, %9 : vector<128x128xf32>
    %c0_7 = arith.constant 0 : index
    %c0_8 = arith.constant 0 : index
    %11 = vector.load %arg5[%c0_7, %c0_8] : memref<128x128xf32, #tpu.memory_space<vmem>>, vector<128x128xf32>
    tpu.vector_store %arg5[%c0_7, %c0_8], %10 {strides = array<i32>} : memref<128x128xf32, #tpu.memory_space<vmem>>, vector<128x128xf32>,
    return
  }
  func.func @transform_0(%arg0: i32) -> (i32, i32) {
    %c0_i32 = arith.constant 0 : i32
    %c0_i32_0 = arith.constant 0 : i32
    return %arg0, %c0_i32 : i32, i32
  }
  func.func @transform_1(%arg0: i32) -> (i32, i32) {
    %c0_i32 = arith.constant 0 : i32
    %c0_i32_0 = arith.constant 0 : i32
    %c0_i32_1 = arith.constant 0 : i32
    return %c0_i32, %c0_i32_0 : i32, i32
  }
  func.func @transform_2(%arg0: i32) -> (i32, i32) {
    %c0_i32 = arith.constant 0 : i32
    %c0_i32_0 = arith.constant 0 : i32
    %c0_i32_1 = arith.constant 0 : i32
    return %c0_i32, %c0_i32_0 : i32, i32
  }
  func.func @transform_3(%arg0: i32) -> (i32, i32) {
    %c0_i32 = arith.constant 0 : i32
    %c0_i32_0 = arith.constant 0 : i32
    return %arg0, %c0_i32 : i32, i32
  }
  func.func @transform_4(%arg0: i32) -> (i32, i32) {
    %c0_i32 = arith.constant 0 : i32
    %c0_i32_0 = arith.constant 0 : i32
    return %arg0, %c0_i32 : i32, i32
  }
}

module attributes {stable_mosaic.version = 11 : i64} {
  func.func @_vq_kernel(%arg0: i32, %arg1: memref<128x128xf32, #tpu.memory_space<vmem>>, %arg2: memref<256x128xf32, #tpu.memory_space<vmem>>, %arg3: memref<1x256xf32, #tpu.memory_space<vmem>>, %arg4: memref<128x128xf32, #tpu.memory_space<vmem>>, %arg5: memref<8x128xf32, #tpu.memory_space<vmem>>) attributes {dimension_semantics = [#tpu.dimension_semantics<parallel>], iteration_bounds = array<i64: 1>, scalar_prefetch = 0 : i64, scratch_operands = 0 : i64, tpu.core_type = #tpu.core_type<tc>, window_params = [{transform_indices = @transform_0, window_bounds = array<i64: 128, 128>}, {pipeline_mode = #tpu.pipeline_mode<synchronous>, transform_indices = @transform_1, window_bounds = array<i64: 256, 128>}, {pipeline_mode = #tpu.pipeline_mode<synchronous>, transform_indices = @transform_2, window_bounds = array<i64: 1, 256>}, {transform_indices = @transform_3, window_bounds = array<i64: 128, 128>}, {transform_indices = @transform_4, window_bounds = array<i64: 8, 128>}]} {
    %c0 = arith.constant 0 : index
    %c0_0 = arith.constant 0 : index
    %0 = vector.load %arg1[%c0, %c0_0] : memref<128x128xf32, #tpu.memory_space<vmem>>, vector<128x128xf32>
    %c0_1 = arith.constant 0 : index
    %c0_2 = arith.constant 0 : index
    %1 = vector.load %arg2[%c0_1, %c0_2] : memref<256x128xf32, #tpu.memory_space<vmem>>, vector<256x128xf32>
    %2 = arith.truncf %0 : vector<128x128xf32> to vector<128x128xbf16>
    %3 = arith.truncf %1 : vector<256x128xf32> to vector<256x128xbf16>
    %cst = arith.constant dense<0.000000e+00> : vector<128x256xf32>
    %4 = tpu.matmul %2, %3, %cst {dimension_numbers = #tpu.dot_dimension_numbers<[1], [1], [0], [0], [0, 0, 1, 0], [], []>} : vector<128x128xbf16>, vector<256x128xbf16>, vector<128x256xf32> -> vector<128x256xf32>
    %c0_3 = arith.constant 0 : index
    %c0_4 = arith.constant 0 : index
    %5 = vector.load %arg3[%c0_3, %c0_4] : memref<1x256xf32, #tpu.memory_space<vmem>>, vector<1x256xf32>
    %cst_5 = arith.constant 2.000000e+00 : f32
    %6 = vector.broadcast %cst_5 : f32 to vector<128x256xf32>
    %7 = arith.mulf %6, %4 : vector<128x256xf32>
    %8 = vector.broadcast %5 : vector<1x256xf32> to vector<128x256xf32>
    %9 = arith.subf %8, %7 : vector<128x256xf32>
    %10 = tpu.iota {dimensions = array<i32: 1>} : vector<128x256xi32>
    %cst_6 = arith.constant dense<0x7F800000> : vector<128xf32>
    %11 = vector.multi_reduction <minimumf>, %9, %cst_6 [1] : vector<128x256xf32> to vector<128xf32>
    %12 = vector.shape_cast %11 : vector<128xf32> to vector<128x1xf32>
    %13 = vector.broadcast %12 : vector<128x1xf32> to vector<128x256xf32>
    %14 = arith.cmpf oeq, %9, %13 : vector<128x256xf32>
    %c256_i32 = arith.constant 256 : i32
    %15 = vector.broadcast %c256_i32 : i32 to vector<128x256xi32>
    %16 = arith.select %14, %10, %15 : vector<128x256xi1>, vector<128x256xi32>
    %cst_7 = arith.constant dense<2147483647> : vector<128xi32>
    %17 = vector.multi_reduction <minsi>, %16, %cst_7 [1] : vector<128x256xi32> to vector<128xi32>
    %18 = vector.shape_cast %17 : vector<128xi32> to vector<128x1xi32>
    %19 = vector.broadcast %18 : vector<128x1xi32> to vector<128x256xi32>
    %20 = arith.cmpi eq, %10, %19 : vector<128x256xi32>
    %21 = arith.extui %20 : vector<128x256xi1> to vector<128x256xi32>
    %22 = arith.sitofp %21 : vector<128x256xi32> to vector<128x256xf32>
    %cst_8 = arith.constant dense<0.000000e+00> : vector<128x128xf32>
    %23 = tpu.matmul %22, %1, %cst_8 {dimension_numbers = #tpu.dot_dimension_numbers<[1], [0], [0], [1], [0, 0, 1, 1], [], []>} : vector<128x256xf32>, vector<256x128xf32>, vector<128x128xf32> -> vector<128x128xf32>
    %c0_9 = arith.constant 0 : index
    %c0_10 = arith.constant 0 : index
    %24 = vector.load %arg4[%c0_9, %c0_10] : memref<128x128xf32, #tpu.memory_space<vmem>>, vector<128x128xf32>
    tpu.vector_store %arg4[%c0_9, %c0_10], %23 {strides = array<i32>} : memref<128x128xf32, #tpu.memory_space<vmem>>, vector<128x128xf32>,
    %25 = tpu.iota {dimensions = array<i32: 0>} : vector<128x1xi32>
    %c128_i32 = arith.constant 128 : i32
    %26 = arith.muli %arg0, %c128_i32 : i32
    %27 = vector.broadcast %26 : i32 to vector<128x1xi32>
    %28 = arith.addi %25, %27 : vector<128x1xi32>
    %29 = arith.subf %23, %0 : vector<128x128xf32>
    %c128_i32_11 = arith.constant 128 : i32
    %30 = vector.broadcast %c128_i32_11 : i32 to vector<128x1xi32>
    %31 = arith.cmpi slt, %28, %30 : vector<128x1xi32>
    %32 = arith.extui %31 : vector<128x1xi1> to vector<128x1xi32>
    %33 = arith.sitofp %32 : vector<128x1xi32> to vector<128x1xf32>
    %34 = vector.broadcast %33 : vector<128x1xf32> to vector<128x128xf32>
    %35 = arith.mulf %29, %34 : vector<128x128xf32>
    %36 = arith.mulf %35, %35 : vector<128x128xf32>
    %cst_12 = arith.constant dense<0.000000e+00> : vector<128xf32>
    %37 = vector.multi_reduction <add>, %36, %cst_12 [1] : vector<128x128xf32> to vector<128xf32>
    %38 = vector.shape_cast %37 : vector<128xf32> to vector<128x1xf32>
    %cst_13 = arith.constant dense<0.000000e+00> : vector<1xf32>
    %39 = vector.multi_reduction <add>, %38, %cst_13 [0] : vector<128x1xf32> to vector<1xf32>
    %40 = vector.shape_cast %39 : vector<1xf32> to vector<1x1xf32>
    %41 = tpu.iota {dimensions = array<i32: 0>} : vector<8x128xi32>
    %42 = tpu.iota {dimensions = array<i32: 1>} : vector<8x128xi32>
    %c0_i32 = arith.constant 0 : i32
    %43 = vector.broadcast %c0_i32 : i32 to vector<8x128xi32>
    %44 = arith.cmpi eq, %41, %43 : vector<8x128xi32>
    %c0_i32_14 = arith.constant 0 : i32
    %45 = vector.broadcast %c0_i32_14 : i32 to vector<8x128xi32>
    %46 = arith.cmpi eq, %42, %45 : vector<8x128xi32>
    %47 = arith.andi %44, %46 : vector<8x128xi1>
    %cst_15 = arith.constant 0.000000e+00 : f32
    %48 = vector.shape_cast %40 : vector<1x1xf32> to vector<1x1xf32>
    %49 = vector.broadcast %48 : vector<1x1xf32> to vector<8x128xf32>
    %50 = vector.broadcast %cst_15 : f32 to vector<8x128xf32>
    %51 = arith.select %47, %49, %50 : vector<8x128xi1>, vector<8x128xf32>
    %c0_16 = arith.constant 0 : index
    %c0_17 = arith.constant 0 : index
    %52 = vector.load %arg5[%c0_16, %c0_17] : memref<8x128xf32, #tpu.memory_space<vmem>>, vector<8x128xf32>
    tpu.vector_store %arg5[%c0_16, %c0_17], %51 {strides = array<i32>} : memref<8x128xf32, #tpu.memory_space<vmem>>, vector<8x128xf32>,
    return
  }
  func.func @transform_0(%arg0: i32) -> (i32, i32) {
    %c0_i32 = arith.constant 0 : i32
    %c0_i32_0 = arith.constant 0 : i32
    return %arg0, %c0_i32 : i32, i32
  }
  func.func @transform_1(%arg0: i32) -> (i32, i32) {
    %c0_i32 = arith.constant 0 : i32
    %c0_i32_0 = arith.constant 0 : i32
    %c0_i32_1 = arith.constant 0 : i32
    return %c0_i32, %c0_i32_0 : i32, i32
  }
  func.func @transform_2(%arg0: i32) -> (i32, i32) {
    %c0_i32 = arith.constant 0 : i32
    %c0_i32_0 = arith.constant 0 : i32
    %c0_i32_1 = arith.constant 0 : i32
    return %c0_i32, %c0_i32_0 : i32, i32
  }
  func.func @transform_3(%arg0: i32) -> (i32, i32) {
    %c0_i32 = arith.constant 0 : i32
    %c0_i32_0 = arith.constant 0 : i32
    return %arg0, %c0_i32 : i32, i32
  }
  func.func @transform_4(%arg0: i32) -> (i32, i32) {
    %c0_i32 = arith.constant 0 : i32
    %c0_i32_0 = arith.constant 0 : i32
    return %arg0, %c0_i32 : i32, i32
  }
}

module attributes {stable_mosaic.version = 11 : i64} {
  func.func @_matmul_bias_stats_kernel(%arg0: i32, %arg1: memref<128x1152xbf16, #tpu.memory_space<vmem>>, %arg2: memref<1152x16xbf16, #tpu.memory_space<vmem>>, %arg3: memref<1x16xf32, #tpu.memory_space<vmem>>, %arg4: memref<128x16xf32, #tpu.memory_space<vmem>>, %arg5: memref<8x16xf32, #tpu.memory_space<vmem>>) attributes {dimension_semantics = [#tpu.dimension_semantics<parallel>], iteration_bounds = array<i64: 1>, scalar_prefetch = 0 : i64, scratch_operands = 0 : i64, tpu.core_type = #tpu.core_type<tc>, window_params = [{transform_indices = @transform_0, window_bounds = array<i64: 128, 1152>}, {pipeline_mode = #tpu.pipeline_mode<synchronous>, transform_indices = @transform_1, window_bounds = array<i64: 1152, 16>}, {pipeline_mode = #tpu.pipeline_mode<synchronous>, transform_indices = @transform_2, window_bounds = array<i64: 1, 16>}, {transform_indices = @transform_3, window_bounds = array<i64: 128, 16>}, {transform_indices = @transform_4, window_bounds = array<i64: 8, 16>}]} {
    %c0 = arith.constant 0 : index
    %c0_0 = arith.constant 0 : index
    %0 = vector.load %arg1[%c0, %c0_0] : memref<128x1152xbf16, #tpu.memory_space<vmem>>, vector<128x1152xbf16>
    %c0_1 = arith.constant 0 : index
    %c0_2 = arith.constant 0 : index
    %1 = vector.load %arg2[%c0_1, %c0_2] : memref<1152x16xbf16, #tpu.memory_space<vmem>>, vector<1152x16xbf16>
    %cst = arith.constant dense<0.000000e+00> : vector<128x16xf32>
    %2 = tpu.matmul %0, %1, %cst {dimension_numbers = #tpu.dot_dimension_numbers<[1], [0], [0], [1], [0, 0, 1, 1], [], []>} : vector<128x1152xbf16>, vector<1152x16xbf16>, vector<128x16xf32> -> vector<128x16xf32>
    %c0_3 = arith.constant 0 : index
    %c0_4 = arith.constant 0 : index
    %3 = vector.load %arg3[%c0_3, %c0_4] : memref<1x16xf32, #tpu.memory_space<vmem>>, vector<1x16xf32>
    %4 = vector.broadcast %3 : vector<1x16xf32> to vector<128x16xf32>
    %5 = arith.addf %2, %4 : vector<128x16xf32>
    %c0_5 = arith.constant 0 : index
    %c0_6 = arith.constant 0 : index
    %6 = vector.load %arg4[%c0_5, %c0_6] : memref<128x16xf32, #tpu.memory_space<vmem>>, vector<128x16xf32>
    tpu.vector_store %arg4[%c0_5, %c0_6], %5 {strides = array<i32>} : memref<128x16xf32, #tpu.memory_space<vmem>>, vector<128x16xf32>,
    %cst_7 = arith.constant dense<0.000000e+00> : vector<16xf32>
    %7 = vector.multi_reduction <add>, %5, %cst_7 [0] : vector<128x16xf32> to vector<16xf32>
    %8 = vector.shape_cast %7 : vector<16xf32> to vector<1x16xf32>
    %9 = arith.mulf %5, %5 : vector<128x16xf32>
    %cst_8 = arith.constant dense<0.000000e+00> : vector<16xf32>
    %10 = vector.multi_reduction <add>, %9, %cst_8 [0] : vector<128x16xf32> to vector<16xf32>
    %11 = vector.shape_cast %10 : vector<16xf32> to vector<1x16xf32>
    %12 = tpu.iota {dimensions = array<i32: 0>} : vector<8x1xi32>
    %c0_i32 = arith.constant 0 : i32
    %13 = vector.broadcast %c0_i32 : i32 to vector<8x1xi32>
    %14 = arith.cmpi eq, %12, %13 : vector<8x1xi32>
    %cst_9 = arith.constant 0.000000e+00 : f32
    %15 = vector.shape_cast %14 : vector<8x1xi1> to vector<8x1xi1>
    %16 = vector.broadcast %15 : vector<8x1xi1> to vector<8x16xi1>
    %17 = vector.shape_cast %8 : vector<1x16xf32> to vector<1x16xf32>
    %18 = vector.broadcast %17 : vector<1x16xf32> to vector<8x16xf32>
    %19 = vector.broadcast %cst_9 : f32 to vector<8x16xf32>
    %20 = arith.select %16, %18, %19 : vector<8x16xi1>, vector<8x16xf32>
    %c1_i32 = arith.constant 1 : i32
    %21 = vector.broadcast %c1_i32 : i32 to vector<8x1xi32>
    %22 = arith.cmpi eq, %12, %21 : vector<8x1xi32>
    %cst_10 = arith.constant 0.000000e+00 : f32
    %23 = vector.shape_cast %22 : vector<8x1xi1> to vector<8x1xi1>
    %24 = vector.broadcast %23 : vector<8x1xi1> to vector<8x16xi1>
    %25 = vector.shape_cast %11 : vector<1x16xf32> to vector<1x16xf32>
    %26 = vector.broadcast %25 : vector<1x16xf32> to vector<8x16xf32>
    %27 = vector.broadcast %cst_10 : f32 to vector<8x16xf32>
    %28 = arith.select %24, %26, %27 : vector<8x16xi1>, vector<8x16xf32>
    %29 = arith.addf %20, %28 : vector<8x16xf32>
    %c0_11 = arith.constant 0 : index
    %c0_12 = arith.constant 0 : index
    %30 = vector.load %arg5[%c0_11, %c0_12] : memref<8x16xf32, #tpu.memory_space<vmem>>, vector<8x16xf32>
    tpu.vector_store %arg5[%c0_11, %c0_12], %29 {strides = array<i32>} : memref<8x16xf32, #tpu.memory_space<vmem>>, vector<8x16xf32>,
    return
  }
  func.func @transform_0(%arg0: i32) -> (i32, i32) {
    %c0_i32 = arith.constant 0 : i32
    %c0_i32_0 = arith.constant 0 : i32
    return %arg0, %c0_i32 : i32, i32
  }
  func.func @transform_1(%arg0: i32) -> (i32, i32) {
    %c0_i32 = arith.constant 0 : i32
    %c0_i32_0 = arith.constant 0 : i32
    %c0_i32_1 = arith.constant 0 : i32
    return %c0_i32, %c0_i32_0 : i32, i32
  }
  func.func @transform_2(%arg0: i32) -> (i32, i32) {
    %c0_i32 = arith.constant 0 : i32
    %c0_i32_0 = arith.constant 0 : i32
    %c0_i32_1 = arith.constant 0 : i32
    return %c0_i32, %c0_i32_0 : i32, i32
  }
  func.func @transform_3(%arg0: i32) -> (i32, i32) {
    %c0_i32 = arith.constant 0 : i32
    %c0_i32_0 = arith.constant 0 : i32
    return %arg0, %c0_i32 : i32, i32
  }
  func.func @transform_4(%arg0: i32) -> (i32, i32) {
    %c0_i32 = arith.constant 0 : i32
    %c0_i32_0 = arith.constant 0 : i32
    return %arg0, %c0_i32 : i32, i32
  }
}

module attributes {stable_mosaic.version = 11 : i64} {
  func.func @_scale_shift_kernel(%arg0: i32, %arg1: memref<16x128xf32, #tpu.memory_space<vmem>>, %arg2: memref<1x128xf32, #tpu.memory_space<vmem>>, %arg3: memref<1x128xf32, #tpu.memory_space<vmem>>, %arg4: memref<16x128xf32, #tpu.memory_space<vmem>>) attributes {dimension_semantics = [#tpu.dimension_semantics<parallel>], iteration_bounds = array<i64: 1>, scalar_prefetch = 0 : i64, scratch_operands = 0 : i64, tpu.core_type = #tpu.core_type<tc>, window_params = [{transform_indices = @transform_0, window_bounds = array<i64: 16, 128>}, {pipeline_mode = #tpu.pipeline_mode<synchronous>, transform_indices = @transform_1, window_bounds = array<i64: 1, 128>}, {pipeline_mode = #tpu.pipeline_mode<synchronous>, transform_indices = @transform_2, window_bounds = array<i64: 1, 128>}, {transform_indices = @transform_3, window_bounds = array<i64: 16, 128>}]} {
    %c0 = arith.constant 0 : index
    %c0_0 = arith.constant 0 : index
    %0 = vector.load %arg1[%c0, %c0_0] : memref<16x128xf32, #tpu.memory_space<vmem>>, vector<16x128xf32>
    %c0_1 = arith.constant 0 : index
    %c0_2 = arith.constant 0 : index
    %1 = vector.load %arg2[%c0_1, %c0_2] : memref<1x128xf32, #tpu.memory_space<vmem>>, vector<1x128xf32>
    %2 = vector.broadcast %1 : vector<1x128xf32> to vector<16x128xf32>
    %3 = arith.mulf %0, %2 : vector<16x128xf32>
    %c0_3 = arith.constant 0 : index
    %c0_4 = arith.constant 0 : index
    %4 = vector.load %arg3[%c0_3, %c0_4] : memref<1x128xf32, #tpu.memory_space<vmem>>, vector<1x128xf32>
    %5 = vector.broadcast %4 : vector<1x128xf32> to vector<16x128xf32>
    %6 = arith.addf %3, %5 : vector<16x128xf32>
    %c0_5 = arith.constant 0 : index
    %c0_6 = arith.constant 0 : index
    %7 = vector.load %arg4[%c0_5, %c0_6] : memref<16x128xf32, #tpu.memory_space<vmem>>, vector<16x128xf32>
    tpu.vector_store %arg4[%c0_5, %c0_6], %6 {strides = array<i32>} : memref<16x128xf32, #tpu.memory_space<vmem>>, vector<16x128xf32>,
    return
  }
  func.func @transform_0(%arg0: i32) -> (i32, i32) {
    %c0_i32 = arith.constant 0 : i32
    %c0_i32_0 = arith.constant 0 : i32
    return %arg0, %c0_i32 : i32, i32
  }
  func.func @transform_1(%arg0: i32) -> (i32, i32) {
    %c0_i32 = arith.constant 0 : i32
    %c0_i32_0 = arith.constant 0 : i32
    %c0_i32_1 = arith.constant 0 : i32
    return %c0_i32, %c0_i32_0 : i32, i32
  }
  func.func @transform_2(%arg0: i32) -> (i32, i32) {
    %c0_i32 = arith.constant 0 : i32
    %c0_i32_0 = arith.constant 0 : i32
    %c0_i32_1 = arith.constant 0 : i32
    return %c0_i32, %c0_i32_0 : i32, i32
  }
  func.func @transform_3(%arg0: i32) -> (i32, i32) {
    %c0_i32 = arith.constant 0 : i32
    %c0_i32_0 = arith.constant 0 : i32
    return %arg0, %c0_i32 : i32, i32
  }
}

module attributes {stable_mosaic.version = 11 : i64} {
  func.func @_sse_partial_kernel(%arg0: i32, %arg1: memref<16x128xf32, #tpu.memory_space<vmem>>, %arg2: memref<16x128xf32, #tpu.memory_space<vmem>>, %arg3: memref<8x128xf32, #tpu.memory_space<vmem>>) attributes {dimension_semantics = [#tpu.dimension_semantics<parallel>], iteration_bounds = array<i64: 1>, scalar_prefetch = 0 : i64, scratch_operands = 0 : i64, tpu.core_type = #tpu.core_type<tc>, window_params = [{transform_indices = @transform_0, window_bounds = array<i64: 16, 128>}, {transform_indices = @transform_1, window_bounds = array<i64: 16, 128>}, {transform_indices = @transform_2, window_bounds = array<i64: 8, 128>}]} {
    %c0 = arith.constant 0 : index
    %c0_0 = arith.constant 0 : index
    %0 = vector.load %arg1[%c0, %c0_0] : memref<16x128xf32, #tpu.memory_space<vmem>>, vector<16x128xf32>
    %c0_1 = arith.constant 0 : index
    %c0_2 = arith.constant 0 : index
    %1 = vector.load %arg2[%c0_1, %c0_2] : memref<16x128xf32, #tpu.memory_space<vmem>>, vector<16x128xf32>
    %2 = arith.subf %0, %1 : vector<16x128xf32>
    %3 = arith.mulf %2, %2 : vector<16x128xf32>
    %cst = arith.constant dense<0.000000e+00> : vector<16xf32>
    %4 = vector.multi_reduction <add>, %3, %cst [1] : vector<16x128xf32> to vector<16xf32>
    %5 = vector.shape_cast %4 : vector<16xf32> to vector<16x1xf32>
    %cst_3 = arith.constant dense<0.000000e+00> : vector<1xf32>
    %6 = vector.multi_reduction <add>, %5, %cst_3 [0] : vector<16x1xf32> to vector<1xf32>
    %7 = vector.shape_cast %6 : vector<1xf32> to vector<1x1xf32>
    %8 = tpu.iota {dimensions = array<i32: 0>} : vector<8x128xi32>
    %9 = tpu.iota {dimensions = array<i32: 1>} : vector<8x128xi32>
    %c0_i32 = arith.constant 0 : i32
    %10 = vector.broadcast %c0_i32 : i32 to vector<8x128xi32>
    %11 = arith.cmpi eq, %8, %10 : vector<8x128xi32>
    %c0_i32_4 = arith.constant 0 : i32
    %12 = vector.broadcast %c0_i32_4 : i32 to vector<8x128xi32>
    %13 = arith.cmpi eq, %9, %12 : vector<8x128xi32>
    %14 = arith.andi %11, %13 : vector<8x128xi1>
    %cst_5 = arith.constant 0.000000e+00 : f32
    %15 = vector.shape_cast %7 : vector<1x1xf32> to vector<1x1xf32>
    %16 = vector.broadcast %15 : vector<1x1xf32> to vector<8x128xf32>
    %17 = vector.broadcast %cst_5 : f32 to vector<8x128xf32>
    %18 = arith.select %14, %16, %17 : vector<8x128xi1>, vector<8x128xf32>
    %c0_6 = arith.constant 0 : index
    %c0_7 = arith.constant 0 : index
    %19 = vector.load %arg3[%c0_6, %c0_7] : memref<8x128xf32, #tpu.memory_space<vmem>>, vector<8x128xf32>
    tpu.vector_store %arg3[%c0_6, %c0_7], %18 {strides = array<i32>} : memref<8x128xf32, #tpu.memory_space<vmem>>, vector<8x128xf32>,
    return
  }
  func.func @transform_0(%arg0: i32) -> (i32, i32) {
    %c0_i32 = arith.constant 0 : i32
    %c0_i32_0 = arith.constant 0 : i32
    return %arg0, %c0_i32 : i32, i32
  }
  func.func @transform_1(%arg0: i32) -> (i32, i32) {
    %c0_i32 = arith.constant 0 : i32
    %c0_i32_0 = arith.constant 0 : i32
    return %arg0, %c0_i32 : i32, i32
  }
  func.func @transform_2(%arg0: i32) -> (i32, i32) {
    %c0_i32 = arith.constant 0 : i32
    %c0_i32_0 = arith.constant 0 : i32
    return %arg0, %c0_i32 : i32, i32
  }
}

</mosaic_0001>

<bundles_post_ra>
// kernel: vqvae_forward.37
= control target key start
LH: loop header
LB: loop body
LE: loop exit
PB: predicated region body
PF: predicated region fallthrough
CT: control target
= control target key end

     0   :  { %s248_s0 = inlined_call_operand.vmem [shape: f32[128,128], index: 0, kind: input, shape index: {}]   ;;  %s249_s1 = inlined_call_operand.vmem [shape: f32[1,128], index: 1, kind: input, shape index: {}]   ;;  %s250_s2 = inlined_call_operand.vmem [shape: f32[1,128], index: 2, kind: input, shape index: {}]   ;;  %s251_s3 = inlined_call_operand.vmem [shape: f32[128,128], index: 3, kind: output, shape index: {}]  }
   0x1   :  { %v14_v0 = vld [vmem:[%s248_s0] sm:$0xff]  ;;  %v15_v3 = vld [vmem:[%s248_s0 + $0x8] sm:$0xff]  ;;  %v16_v6 = vld [vmem:[%s248_s0 + $0x10] sm:$0xff] }
   0x2   :  { %v106_v1 = vld [vmem:[%s249_s1] ss:$0 sm:$0xff]  ;;  %v17_v7 = vld [vmem:[%s248_s0 + $0x18] sm:$0xff]  ;;  %v19_v12 = vld [vmem:[%s248_s0 + $0x28] sm:$0xff] }
   0x3   :  { %v137_v2 = vld [vmem:[%s250_s2] ss:$0 sm:$0xff]  ;;  %v34_v4 = vmul.f32 %v106_v1, %v14_v0  ;;  %v35_v5 = vmul.f32 %v106_v1, %v15_v3  ;;  %v36_v9 = vmul.f32 %v106_v1, %v16_v6  ;;  %v37_v10 = vmul.f32 %v106_v1, %v17_v7  ;;  %v20_v13 = vld [vmem:[%s248_s0 + $0x30] sm:$0xff]  ;;  %v21_v14 = vld [vmem:[%s248_s0 + $0x38] sm:$0xff] }
   0x4   :  { %v18_v8 = vld [vmem:[%s248_s0 + $0x20] sm:$0xff]  ;;  %v39_v17 = vmul.f32 %v106_v1, %v19_v12  ;;  %v40_v18 = vmul.f32 %v106_v1, %v20_v13  ;;  %v41_v22 = vmul.f32 %v106_v1, %v21_v14  ;;  %v23_v24 = vld [vmem:[%s248_s0 + $0x48] sm:$0xff]  ;;  %v24_v29 = vld [vmem:[%s248_s0 + $0x50] sm:$0xff] }
   0x5   :  { %v38_v11 = vmul.f32 %v106_v1, %v18_v8  ;;  %v54_v15 = vadd.f32 %v137_v2, %v34_v4  ;;  %v55_v16 = vadd.f32 %v137_v2, %v35_v5  ;;  %v56_v19 = vadd.f32 %v137_v2, %v36_v9  ;;  %v22_v23 = vld [vmem:[%s248_s0 + $0x40] sm:$0xff]  ;;  %v25_v30 = vld [vmem:[%s248_s0 + $0x58] sm:$0xff]  ;;  %v27_v35 = vld [vmem:[%s248_s0 + $0x68] sm:$0xff] }
   0x6   :  { %v57_v20 = vadd.f32 %v137_v2, %v37_v10  ;;  %v59_v27 = vadd.f32 %v137_v2, %v39_v17  ;;  %v60_v28 = vadd.f32 %v137_v2, %v40_v18  ;;  %v26_v31 = vld [vmem:[%s248_s0 + $0x60] sm:$0xff]  ;;  %v61_v34 = vadd.f32 %v137_v2, %v41_v22  ;;  %v28_v36 = vld [vmem:[%s248_s0 + $0x70] sm:$0xff]  ;;  %v29_v41 = vld [vmem:[%s248_s0 + $0x78] sm:$0xff] }
   0x7   :  { %v58_v21 = vadd.f32 %v137_v2, %v38_v11  ;;  %v70_v25 = vmax.f32 %v54_v15, 0.0  ;;  %v71_v26 = vmax.f32 %v55_v16, 0.0  ;;  %v72_v32 = vmax.f32 %v56_v19, 0.0 }
   0x8   :  { %v73_v33 = vmax.f32 %v57_v20, 0.0  ;;  %v75_v38 = vmax.f32 %v59_v27, 0.0  ;;  %v42_v39 = vmul.f32 %v106_v1, %v22_v23  ;;  %v43_v40 = vmul.f32 %v106_v1, %v23_v24 }
   0x9   :  { %86 = vst [vmem:[%s251_s3] sm:$0xff] %v70_v25  ;;  %v74_v37 = vmax.f32 %v58_v21, 0.0  ;;  %v76_v42 = vmax.f32 %v60_v28, 0.0  ;;  %v44_v43 = vmul.f32 %v106_v1, %v24_v29  ;;  %v45_v44 = vmul.f32 %v106_v1, %v25_v30 }
   0xa   :  { %87 = vst [vmem:[%s251_s3 + $0x8] sm:$0xff] %v71_v26  ;;  %v46_v45 = vmul.f32 %v106_v1, %v26_v31  ;;  %v62_v46 = vadd.f32 %v137_v2, %v42_v39  ;;  %v63_v47 = vadd.f32 %v137_v2, %v43_v40  ;;  %v47_v48 = vmul.f32 %v106_v1, %v27_v35 }
   0xb   :  { %88 = vst [vmem:[%s251_s3 + $0x10] sm:$0xff] %v72_v32  ;;  %v48_v49 = vmul.f32 %v106_v1, %v28_v36  ;;  %v77_v50 = vmax.f32 %v61_v34, 0.0  ;;  %v64_v51 = vadd.f32 %v137_v2, %v44_v43  ;;  %v65_v52 = vadd.f32 %v137_v2, %v45_v44 }
   0xc   :  { %89 = vst [vmem:[%s251_s3 + $0x18] sm:$0xff] %v73_v33  ;;  %v49_v53 = vmul.f32 %v106_v1, %v29_v41  ;;  %v78_v54 = vmax.f32 %v62_v46, 0.0  ;;  %v66_v55 = vadd.f32 %v137_v2, %v46_v45  ;;  %v79_v56 = vmax.f32 %v63_v47, 0.0 }
   0xd   :  { %90 = vst [vmem:[%s251_s3 + $0x20] sm:$0xff] %v74_v37  ;;  %v67_v57 = vadd.f32 %v137_v2, %v47_v48  ;;  %v80_v58 = vmax.f32 %v64_v51, 0.0  ;;  %v68_v59 = vadd.f32 %v137_v2, %v48_v49  ;;  %v81_v60 = vmax.f32 %v65_v52, 0.0 }
   0xe   :  { %91 = vst [vmem:[%s251_s3 + $0x28] sm:$0xff] %v75_v38  ;;  %v69_v61 = vadd.f32 %v137_v2, %v49_v53  ;;  %v82_v62 = vmax.f32 %v66_v55, 0.0 }
   0xf   :  { %92 = vst [vmem:[%s251_s3 + $0x30] sm:$0xff] %v76_v42  ;;  %v83_v63 = vmax.f32 %v67_v57, 0.0  ;;  %v84_v0 = vmax.f32 %v68_v59, 0.0 }
  0x10   :  { %93 = vst [vmem:[%s251_s3 + $0x38] sm:$0xff] %v77_v50  ;;  %v85_v1 = vmax.f32 %v69_v61, 0.0 }
  0x11   :  { %94 = vst [vmem:[%s251_s3 + $0x40] sm:$0xff] %v78_v54 }
  0x12   :  { %95 = vst [vmem:[%s251_s3 + $0x48] sm:$0xff] %v79_v56 }
  0x13   :  { %96 = vst [vmem:[%s251_s3 + $0x50] sm:$0xff] %v80_v58 }
  0x14   :  { %97 = vst [vmem:[%s251_s3 + $0x58] sm:$0xff] %v81_v60 }
  0x15   :  { %98 = vst [vmem:[%s251_s3 + $0x60] sm:$0xff] %v82_v62 }
  0x16   :  { %99 = vst [vmem:[%s251_s3 + $0x68] sm:$0xff] %v83_v63 }
  0x17   :  { %100 = vst [vmem:[%s251_s3 + $0x70] sm:$0xff] %v84_v0 }
  0x18   :  { %101 = vst [vmem:[%s251_s3 + $0x78] sm:$0xff] %v85_v1 }

// kernel: vqvae_forward.36
= control target key start
LH: loop header
LB: loop body
LE: loop exit
PB: predicated region body
PF: predicated region fallthrough
CT: control target
= control target key end

     0   :  { %vm109_vm0 = vcmask 523264   ;;  %s487_s1 = inlined_call_operand.vmem [shape: bf16[64,128], index: 1, kind: input, shape index: {}]   ;;  %s488_s2 = inlined_call_operand.vmem [shape: f32[1,128], index: 2, kind: input, shape index: {}]   ;;  %s489_s0 = inlined_call_operand.vmem [shape: bf16[128,64], index: 0, kind: input, shape index: {}]   ;;  %s490_s3 = inlined_call_operand.vmem [shape: f32[128,128], index: 3, kind: output, shape index: {0}]   ;;  %s491_s4 = inlined_call_operand.vmem [shape: f32[8,128], index: 4, kind: output, shape index: {1}]  }
   0x1   :  { %v344_v0 = vld [vmem:[%s487_s1 + $0x18] sm:$0xff]  ;;  %v343_v1 = vld [vmem:[%s487_s1 + $0x10] sm:$0xff]  ;;  %v342_v2 = vld [vmem:[%s487_s1 + $0x8] sm:$0xff] }
   0x2   :  { %138 = vmatpush.bf16.msra.mxu0 %v344_v0  ;;  %345 = vmatpush.bf16.msra.mxu1 %v344_v0  ;;  %v341_v3 = vld [vmem:[%s487_s1] sm:$0xff]  ;;  %v335_v5 = vld [vmem:[%s489_s0 + $0x10] sm:$0xff]  ;;  %v334_v8 = vld [vmem:[%s489_s0 + $0x8] sm:$0xff] }
   0x3   :  { %346 = vmatpush.bf16.msra.mxu2 %v344_v0  ;;  %347 = vmatpush.bf16.msra.mxu3 %v344_v0  ;;  %v333_v4 = vld [vmem:[%s489_s0] sm:$0xff]  ;;  %v339_v7 = vld [vmem:[%s489_s0 + $0x30] sm:$0xff]  ;;  %v336_v9 = vld [vmem:[%s489_s0 + $0x18] sm:$0xff] }
   0x4   :  { %v337_v6 = vld [vmem:[%s489_s0 + $0x20] sm:$0xff]  ;;  %v338_v10 = vld [vmem:[%s489_s0 + $0x28] sm:$0xff]  ;;  %v340_v11 = vld [vmem:[%s489_s0 + $0x38] sm:$0xff] }
   0x5   :  { %v357_v12 = vld [vmem:[%s488_s2] ss:$0 sm:$0xff] }
   0x6   :  { %139 = vmatpush.bf16.msra.mxu0 %v343_v1  ;;  %348 = vmatpush.bf16.msra.mxu1 %v343_v1 }
   0x7   :  { %349 = vmatpush.bf16.msra.mxu2 %v343_v1  ;;  %350 = vmatpush.bf16.msra.mxu3 %v343_v1 }
   0xa   :  { %140 = vmatpush.bf16.msra.mxu0 %v342_v2  ;;  %351 = vmatpush.bf16.msra.mxu1 %v342_v2 }
   0xb   :  { %352 = vmatpush.bf16.msra.mxu2 %v342_v2  ;;  %353 = vmatpush.bf16.msra.mxu3 %v342_v2 }
   0xe   :  { %141 = vmatpush.bf16.msra.mxu0 %v341_v3  ;;  %354 = vmatpush.bf16.msra.mxu1 %v341_v3 }
   0xf   :  { %355 = vmatpush.bf16.msra.mxu2 %v341_v3  ;;  %356 = vmatpush.bf16.msra.mxu3 %v341_v3 }
  0x11   :  { %325 = vmatmul.msk.bf16.vlgmr.msra.gmra.mxu0 %vm109_vm0, %v333_v4  ;;  %327 = vmatmul.msk.bf16.vlgmr.msra.gmra.mxu1 %vm109_vm0, %v335_v5 }
  0x12   :  { %329 = vmatmul.msk.bf16.vlgmr.msra.gmra.mxu2 %vm109_vm0, %v337_v6  ;;  %331 = vmatmul.msk.bf16.vlgmr.msra.gmra.mxu3 %vm109_vm0, %v339_v7 }
  0x21   :  { %326 = vmatmul.msk.bf16.gmra.mxu0 %vm109_vm0, %v334_v8  ;;  %328 = vmatmul.msk.bf16.gmra.mxu1 %vm109_vm0, %v336_v9 }
  0x22   :  { %330 = vmatmul.msk.bf16.gmra.mxu2 %vm109_vm0, %v338_v10  ;;  %332 = vmatmul.msk.bf16.gmra.mxu3 %vm109_vm0, %v340_v11 }
  0x8e   :  { %v143_v13 = vpop.f32.mrf.mxu0  ;;  %v153_v14 = vpop.f32.mrf.mxu1 }
  0x8f   :  { %v144_v15 = vadd.f32 %v357_v12, %v143_v13  ;;  %v154_v16 = vadd.f32 %v357_v12, %v153_v14 }
  0x91   :  { %183 = vst [vmem:[%s490_s3] sm:$0xff] %v144_v15  ;;  %v220_v34 = vmul.f32 %v144_v15, %v144_v15  ;;  %v224_v50 = vmul.f32 %v154_v16, %v154_v16 }
  0x92   :  { %187 = vst [vmem:[%s490_s3 + $0x20] sm:$0xff] %v154_v16 }
  0x95   :  { %v163_v17 = vpop.f32.mrf.mxu2  ;;  %v173_v18 = vpop.f32.mrf.mxu3 }
  0x96   :  { %v145_v19 = vpop.f32.mrf.mxu0  ;;  %v155_v20 = vpop.f32.mrf.mxu1  ;;  %v164_v21 = vadd.f32 %v357_v12, %v163_v17  ;;  %v436_v24 = vadd.f32 %v357_v12, %v173_v18 }
  0x97   :  { %v146_v22 = vadd.f32 %v357_v12, %v145_v19  ;;  %v156_v23 = vadd.f32 %v357_v12, %v155_v20 }
  0x98   :  { %191 = vst [vmem:[%s490_s3 + $0x40] sm:$0xff] %v164_v21  ;;  %v228_v2 = vmul.f32 %v164_v21, %v164_v21  ;;  %v232_v14 = vmul.f32 %v436_v24, %v436_v24 }
  0x99   :  { %184 = vst [vmem:[%s490_s3 + $0x8] sm:$0xff] %v146_v22  ;;  %v221_v33 = vmul.f32 %v146_v22, %v146_v22  ;;  %v199_v35 = vadd.f32 %v146_v22, %v144_v15  ;;  %v225_v53 = vmul.f32 %v156_v23, %v156_v23 }
  0x9a   :  { %188 = vst [vmem:[%s490_s3 + $0x28] sm:$0xff] %v156_v23 }
  0x9b   :  { %195 = vst [vmem:[%s490_s3 + $0x60] sm:$0xff] %v436_v24  ;;  %v236_v39 = vadd.f32 %v221_v33, %v220_v34 }
  0x9d   :  { %v165_v25 = vpop.f32.mrf.mxu2  ;;  %v175_v26 = vpop.f32.mrf.mxu3 }
  0x9e   :  { %v148_v27 = vpop.f32.mrf.mxu0  ;;  %v158_v28 = vpop.f32.mrf.mxu1  ;;  %v166_v29 = vadd.f32 %v357_v12, %v165_v25  ;;  %v176_v32 = vadd.f32 %v357_v12, %v175_v26 }
  0x9f   :  { %v149_v30 = vadd.f32 %v357_v12, %v148_v27  ;;  %v159_v31 = vadd.f32 %v357_v12, %v158_v28 }
  0xa0   :  { %192 = vst [vmem:[%s490_s3 + $0x48] sm:$0xff] %v166_v29  ;;  %v229_v5 = vmul.f32 %v166_v29, %v166_v29  ;;  %v233_v17 = vmul.f32 %v176_v32, %v176_v32 }
  0xa1   :  { %185 = vst [vmem:[%s490_s3 + $0x10] sm:$0xff] %v149_v30  ;;  %v222_v36 = vmul.f32 %v149_v30, %v149_v30  ;;  %v200_v43 = vadd.f32 %v199_v35, %v149_v30  ;;  %v226_v60 = vmul.f32 %v159_v31, %v159_v31 }
  0xa2   :  { %189 = vst [vmem:[%s490_s3 + $0x30] sm:$0xff] %v159_v31 }
  0xa3   :  { %196 = vst [vmem:[%s490_s3 + $0x68] sm:$0xff] %v176_v32  ;;  %v237_v47 = vadd.f32 %v236_v39, %v222_v36 }
  0xa5   :  { %v168_v37 = vpop.f32.mrf.mxu2  ;;  %v178_v38 = vpop.f32.mrf.mxu3 }
  0xa6   :  { %v150_v40 = vpop.f32.mrf.mxu0  ;;  %v160_v41 = vpop.f32.mrf.mxu1  ;;  %v169_v42 = vadd.f32 %v357_v12, %v168_v37  ;;  %v179_v46 = vadd.f32 %v357_v12, %v178_v38 }
  0xa7   :  { %v151_v44 = vadd.f32 %v357_v12, %v150_v40  ;;  %v161_v45 = vadd.f32 %v357_v12, %v160_v41 }
  0xa8   :  { %193 = vst [vmem:[%s490_s3 + $0x50] sm:$0xff] %v169_v42  ;;  %v230_v9 = vmul.f32 %v169_v42, %v169_v42 }
  0xa9   :  { %186 = vst [vmem:[%s490_s3 + $0x18] sm:$0xff] %v151_v44  ;;  %v201_v48 = vadd.f32 %v200_v43, %v151_v44  ;;  %v223_v49 = vmul.f32 %v151_v44, %v151_v44  ;;  %v227_v0 = vmul.f32 %v161_v45, %v161_v45 }
  0xaa   :  { %190 = vst [vmem:[%s490_s3 + $0x38] sm:$0xff] %v161_v45 }
  0xab   :  { %v202_v51 = vadd.f32 %v201_v48, %v154_v16  ;;  %v238_v52 = vadd.f32 %v237_v47, %v223_v49  ;;  %197 = vst [vmem:[%s490_s3 + $0x70] sm:$0xff] %v179_v46 }
  0xad   :  { %v239_v54 = vadd.f32 %v238_v52, %v224_v50  ;;  %v203_v55 = vadd.f32 %v202_v51, %v156_v23  ;;  %v170_v56 = vpop.f32.mrf.mxu2  ;;  %v180_v57 = vpop.f32.mrf.mxu3 }
  0xae   :  { %v171_v58 = vadd.f32 %v357_v12, %v170_v56  ;;  %v181_v59 = vadd.f32 %v357_v12, %v180_v57 }
  0xaf   :  { %v204_v61 = vadd.f32 %v203_v55, %v159_v31  ;;  %v240_v62 = vadd.f32 %v239_v54, %v225_v53  ;;  %v257_v31 = vlaneseq }
  0xb0   :  { %194 = vst [vmem:[%s490_s3 + $0x58] sm:$0xff] %v171_v58  ;;  %v231_v13 = vmul.f32 %v171_v58, %v171_v58  ;;  %v235_v26 = vmul.f32 %v181_v59, %v181_v59 }
  0xb1   :  { %v205_v63 = vadd.f32 %v204_v61, %v161_v45  ;;  %v241_v1 = vadd.f32 %v240_v62, %v226_v60  ;;  %198 = vst [vmem:[%s490_s3 + $0x78] sm:$0xff] %v181_v59 }
  0xb3   :  { %v206_v3 = vadd.f32 %v205_v63, %v164_v21  ;;  %v242_v4 = vadd.f32 %v241_v1, %v227_v0  ;;  %v234_v21 = vmul.f32 %v179_v46, %v179_v46 }
  0xb5   :  { %v243_v6 = vadd.f32 %v242_v4, %v228_v2  ;;  %v207_v7 = vadd.f32 %v206_v3, %v166_v29 }
  0xb7   :  { %v208_v8 = vadd.f32 %v207_v7, %v169_v42  ;;  %v244_v10 = vadd.f32 %v243_v6, %v229_v5 }
  0xb9   :  { %v245_v11 = vadd.f32 %v244_v10, %v230_v9  ;;  %v209_v12 = vadd.f32 %v208_v8, %v171_v58 }
  0xbb   :  { %v210_v15 = vadd.f32 %v209_v12, %v436_v24  ;;  %v246_v16 = vadd.f32 %v245_v11, %v231_v13  ;;  %v258_v24 = vshrl.u32 %v257_v31, 7 }
  0xbd   :  { %v247_v18 = vadd.f32 %v246_v16, %v232_v14  ;;  %v211_v19 = vadd.f32 %v210_v15, %v176_v32  ;;  %vm259_vm1 = vcmp.eq.s32.totalorder %v258_v24, 0  ;;  %vm263_vm2 = vcmp.eq.s32.totalorder %v258_v24, 1 }
  0xbf   :  { %v212_v20 = vadd.f32 %v211_v19, %v179_v46  ;;  %v248_v22 = vadd.f32 %v247_v18, %v233_v17 }
  0xc1   :  { %v249_v23 = vadd.f32 %v248_v22, %v234_v21  ;;  %v213_v25 = vadd.f32 %v212_v20, %v181_v59 }
  0xc3   :  { %v214_v27 = vrot.slane %v213_v25, 4  ;;  %v250_v28 = vadd.f32 %v249_v23, %v235_v26 }
  0xc5   :  { %v215_v29 = vadd.f32 %v214_v27, %v213_v25  ;;  %v251_v30 = vrot.slane %v250_v28, 4 }
  0xc7   :  { %v216_v33 = vrot.slane %v215_v29, 2  ;;  %v252_v34 = vadd.f32 %v251_v30, %v250_v28 }
  0xc9   :  { %v217_v35 = vadd.f32 %v216_v33, %v215_v29  ;;  %v253_v36 = vrot.slane %v252_v34, 2 }
  0xcb   :  { %v218_v37 = vrot.slane %v217_v35, 1  ;;  %v254_v38 = vadd.f32 %v253_v36, %v252_v34 }
  0xcd   :  { %v219_v39 = vadd.f32 %v218_v37, %v217_v35  ;;  %v255_v32 = vrot.slane %v254_v38, 1 }
  0xcf   :  { %v256_v40 = vadd.f32 %v255_v32, %v254_v38  ;;  %v262_v41 = vsel %vm259_vm1, %v219_v39, 0.0 }
  0xd1   :  { %v266_v42 = vsel %vm263_vm2, %v256_v40, 0.0 }
  0xd2   :  { %v267_v43 = vadd.f32 %v266_v42, %v262_v41 }
  0xd4   :  { %268 = vst [vmem:[%s491_s4] sm:$0xff] %v267_v43 }

// kernel: tile.127
= control target key start
LH: loop header
LB: loop body
LE: loop exit
PB: predicated region body
PF: predicated region fallthrough
CT: control target
= control target key end

     0   :  { %s22_s0 = inlined_call_operand.vmem [shape: f32[32], index: 0, kind: input, shape index: {}]   ;;  %s23_s1 = inlined_call_operand.vmem [shape: f32[4,32], index: 1, kind: output, shape index: {}]  }
   0x1   :  { %v4_v0 = vld [vmem:[%s22_s0] ss:$0 sm:$0xff] }
   0x2   :  { %5 = vst [vmem:[%s23_s1] sm:$0xf] %v4_v0 }

// kernel: tile.128
= control target key start
LH: loop header
LB: loop body
LE: loop exit
PB: predicated region body
PF: predicated region fallthrough
CT: control target
= control target key end

     0   :  { %s37_s8 = smov 32   ;;  %s38_s9 = smov 64   ;;  %vm7_vm0 = vcmask 261120   ;;  %vm13_vm1 = vcmask 1048320   ;;  %vm19_vm2 = vcmask 785920   ;;  %vm25_vm3 = vcmask 523520   ;;  %s55_s0 = inlined_call_operand.vmem [shape: f32[4,32], index: 0, kind: input, shape index: {}]   ;;  %s56_s1 = inlined_call_operand.vmem [shape: f32[1,128], index: 1, kind: output, shape index: {}]  }
   0x1   :  { %v4_v0 = vld [vmem:[%s55_s0] sm:$0xf]  ;;  %s36_s0 = smov 96  }
   0x2   :  { %5 = vst [vmem:[#allocation1] sm:$0xf] %v4_v0 }
   0x9   :  { %v10_v1 = vld [vmem:[#allocation1 + $0x3] sm:$0x1]   ;;  %v22_v2 = vld [vmem:[#allocation1 + $0x1] sm:$0x1]   ;;  %v16_v3 = vld [vmem:[#allocation1 + $0x2] sm:$0x1]  }
   0xa   :  { %11 = vrot.lane.b32.xlu0 %v10_v1, %s36_s0  ;;  %23 = vrot.lane.b32.xlu1 %v22_v2, %s37_s8  ;;  %v6_v4 = vld [vmem:[#allocation1] sm:$0x1]  }
   0xb   :  { %8 = vst.msk [vmem:[#allocation0] sm:$0x1] %vm7_vm0, %v6_v4  }
  0x12   :  { %17 = vrot.lane.b32.xlu0 %v16_v3, %s38_s9 }
  0x7c   :  { %v12_v5 = vpop.permute.xlu0 %11   ;;  %v24_v6 = vpop.permute.xlu1 %23  }
  0x7d   :  { %14 = vst.msk [vmem:[#allocation0] sm:$0x1] %vm13_vm1, %v12_v5  }
  0x84   :  { %v18_v7 = vpop.permute.xlu0 %17  }
  0x85   :  { %20 = vst.msk [vmem:[#allocation0] sm:$0x1] %vm19_vm2, %v18_v7  }
  0x86   :  { %26 = vst.msk [vmem:[#allocation0] sm:$0x1] %vm25_vm3, %v24_v6  }
  0x8d   :  { %v29_v8 = vld [vmem:[#allocation0] sm:$0x1] }
  0x8e   :  { %32 = vst [vmem:[%s56_s1] sm:$0x1] %v29_v8 }

// kernel: vqvae_forward.41
= control target key start
LH: loop header
LB: loop body
LE: loop exit
PB: predicated region body
PF: predicated region fallthrough
CT: control target
= control target key end

     0   :  { %s98_s0 = inlined_call_operand.vmem [shape: f32[32,128], index: 0, kind: input, shape index: {}]   ;;  %s99_s1 = inlined_call_operand.vmem [shape: f32[1,128], index: 1, kind: input, shape index: {}]   ;;  %s100_s2 = inlined_call_operand.vmem [shape: f32[1,128], index: 2, kind: input, shape index: {}]   ;;  %s101_s3 = inlined_call_operand.vmem [shape: f32[32,128], index: 3, kind: output, shape index: {}]  }
   0x1   :  { %v14_v0 = vld [vmem:[%s98_s0] sm:$0xff]  ;;  %v15_v3 = vld [vmem:[%s98_s0 + $0x8] sm:$0xff]  ;;  %v16_v6 = vld [vmem:[%s98_s0 + $0x10] sm:$0xff] }
   0x2   :  { %v46_v1 = vld [vmem:[%s99_s1] ss:$0 sm:$0xff]  ;;  %v17_v7 = vld [vmem:[%s98_s0 + $0x18] sm:$0xff] }
   0x3   :  { %v47_v2 = vld [vmem:[%s100_s2] ss:$0 sm:$0xff]  ;;  %v22_v4 = vmul.f32 %v46_v1, %v14_v0  ;;  %v23_v5 = vmul.f32 %v46_v1, %v15_v3  ;;  %v24_v8 = vmul.f32 %v46_v1, %v16_v6  ;;  %v25_v9 = vmul.f32 %v46_v1, %v17_v7 }
   0x5   :  { %v30_v10 = vadd.f32 %v47_v2, %v22_v4  ;;  %v31_v11 = vadd.f32 %v47_v2, %v23_v5  ;;  %v32_v12 = vadd.f32 %v47_v2, %v24_v8  ;;  %v33_v13 = vadd.f32 %v47_v2, %v25_v9 }
   0x7   :  { %v34_v14 = vmax.f32 %v30_v10, 0.0  ;;  %v35_v15 = vmax.f32 %v31_v11, 0.0  ;;  %v36_v16 = vmax.f32 %v32_v12, 0.0  ;;  %v37_v17 = vmax.f32 %v33_v13, 0.0 }
   0x9   :  { %38 = vst [vmem:[%s101_s3] sm:$0xff] %v34_v14 }
   0xa   :  { %39 = vst [vmem:[%s101_s3 + $0x8] sm:$0xff] %v35_v15 }
   0xb   :  { %40 = vst [vmem:[%s101_s3 + $0x10] sm:$0xff] %v36_v16 }
   0xc   :  { %41 = vst [vmem:[%s101_s3 + $0x18] sm:$0xff] %v37_v17 }

// kernel: vqvae_forward.40
= control target key start
LH: loop header
LB: loop body
LE: loop exit
PB: predicated region body
PF: predicated region fallthrough
CT: control target
= control target key end

     0   :  { %vm197_vm0 = vcmask 261120   ;;  %s653_s1 = inlined_call_operand.vmem [shape: bf16[128,32], index: 1, kind: input, shape index: {}]   ;;  %s654_s2 = inlined_call_operand.vmem [shape: f32[1,32], index: 2, kind: input, shape index: {}]   ;;  %s655_s0 = inlined_call_operand.vmem [shape: bf16[128,128], index: 0, kind: input, shape index: {}]   ;;  %s656_s3 = inlined_call_operand.vmem [shape: f32[128,32], index: 3, kind: output, shape index: {0}]   ;;  %s657_s4 = inlined_call_operand.vmem [shape: f32[8,32], index: 4, kind: output, shape index: {1}]  }
   0x1   :  { %v403_v0 = vld [vmem:[%s653_s1 + $0x38] sm:$0xff]  ;;  %v402_v1 = vld [vmem:[%s653_s1 + $0x30] sm:$0xff]  ;;  %v401_v2 = vld [vmem:[%s653_s1 + $0x28] sm:$0xff] }
   0x2   :  { %148 = vmatpush.bf16.msra.mxu0 %v403_v0  ;;  %404 = vmatpush.bf16.msra.mxu1 %v403_v0  ;;  %v400_v3 = vld [vmem:[%s653_s1 + $0x20] sm:$0xff]  ;;  %v399_v4 = vld [vmem:[%s653_s1 + $0x18] sm:$0xff]  ;;  %v398_v5 = vld [vmem:[%s653_s1 + $0x10] sm:$0xff] }
   0x3   :  { %405 = vmatpush.bf16.msra.mxu2 %v403_v0  ;;  %406 = vmatpush.bf16.msra.mxu3 %v403_v0  ;;  %v397_v6 = vld [vmem:[%s653_s1 + $0x8] sm:$0xff]  ;;  %v396_v7 = vld [vmem:[%s653_s1] sm:$0xff]  ;;  %v390_v9 = vld [vmem:[%s655_s0 + $0x10] sm:$0xff] }
   0x4   :  { %v388_v8 = vld [vmem:[%s655_s0] sm:$0xff]  ;;  %v394_v11 = vld [vmem:[%s655_s0 + $0x30] sm:$0xff]  ;;  %v389_v12 = vld [vmem:[%s655_s0 + $0x8] sm:$0xff] }
   0x5   :  { %v392_v10 = vld [vmem:[%s655_s0 + $0x20] sm:$0xff]  ;;  %v391_v13 = vld [vmem:[%s655_s0 + $0x18] sm:$0xff]  ;;  %v393_v14 = vld [vmem:[%s655_s0 + $0x28] sm:$0xff] }
   0x6   :  { %149 = vmatpush.bf16.msra.mxu0 %v402_v1  ;;  %407 = vmatpush.bf16.msra.mxu1 %v402_v1  ;;  %v395_v15 = vld [vmem:[%s655_s0 + $0x38] sm:$0xff]  ;;  %v505_v16 = vld [vmem:[%s654_s2] ss:$0 sm:$0xff] }
   0x7   :  { %408 = vmatpush.bf16.msra.mxu2 %v402_v1  ;;  %409 = vmatpush.bf16.msra.mxu3 %v402_v1 }
   0xa   :  { %150 = vmatpush.bf16.msra.mxu0 %v401_v2  ;;  %410 = vmatpush.bf16.msra.mxu1 %v401_v2 }
   0xb   :  { %411 = vmatpush.bf16.msra.mxu2 %v401_v2  ;;  %412 = vmatpush.bf16.msra.mxu3 %v401_v2 }
   0xe   :  { %151 = vmatpush.bf16.msra.mxu0 %v400_v3  ;;  %413 = vmatpush.bf16.msra.mxu1 %v400_v3 }
   0xf   :  { %414 = vmatpush.bf16.msra.mxu2 %v400_v3  ;;  %415 = vmatpush.bf16.msra.mxu3 %v400_v3 }
  0x12   :  { %152 = vmatpush.bf16.msra.mxu0 %v399_v4  ;;  %416 = vmatpush.bf16.msra.mxu1 %v399_v4 }
  0x13   :  { %417 = vmatpush.bf16.msra.mxu2 %v399_v4  ;;  %418 = vmatpush.bf16.msra.mxu3 %v399_v4 }
  0x16   :  { %153 = vmatpush.bf16.msra.mxu0 %v398_v5  ;;  %419 = vmatpush.bf16.msra.mxu1 %v398_v5 }
  0x17   :  { %420 = vmatpush.bf16.msra.mxu2 %v398_v5  ;;  %421 = vmatpush.bf16.msra.mxu3 %v398_v5 }
  0x1a   :  { %154 = vmatpush.bf16.msra.mxu0 %v397_v6  ;;  %422 = vmatpush.bf16.msra.mxu1 %v397_v6 }
  0x1b   :  { %423 = vmatpush.bf16.msra.mxu2 %v397_v6  ;;  %424 = vmatpush.bf16.msra.mxu3 %v397_v6 }
  0x1e   :  { %155 = vmatpush.bf16.msra.mxu0 %v396_v7  ;;  %425 = vmatpush.bf16.msra.mxu1 %v396_v7 }
  0x1f   :  { %426 = vmatpush.bf16.msra.mxu2 %v396_v7  ;;  %427 = vmatpush.bf16.msra.mxu3 %v396_v7 }
  0x21   :  { %156 = vmatmul.bf16.vlgmr.msra.gmra.mxu0 %v388_v8  ;;  %166 = vmatmul.bf16.vlgmr.msra.gmra.mxu1 %v390_v9 }
  0x22   :  { %176 = vmatmul.bf16.vlgmr.msra.gmra.mxu2 %v392_v10  ;;  %186 = vmatmul.bf16.vlgmr.msra.gmra.mxu3 %v394_v11 }
  0x31   :  { %161 = vmatmul.bf16.gmra.mxu0 %v389_v12  ;;  %171 = vmatmul.bf16.gmra.mxu1 %v391_v13 }
  0x32   :  { %181 = vmatmul.bf16.gmra.mxu2 %v393_v14  ;;  %191 = vmatmul.bf16.gmra.mxu3 %v395_v15 }
  0x9e   :  { %v157_v17 = vpop.f32.mrf.mxu0  ;;  %v167_v18 = vpop.f32.mrf.mxu1 }
  0x9f   :  { %v158_v19 = vadd.f32 %v505_v16, %v157_v17  ;;  %v168_v20 = vadd.f32 %v505_v16, %v167_v18 }
  0xa1   :  { %198 = vst.msk [vmem:[%s656_s3] sm:$0xff] %vm197_vm0, %v158_v19  ;;  %v251_v38 = vmul.f32 %v158_v19, %v158_v19  ;;  %v214_v41 = vsel %vm197_vm0, %v158_v19, 0.0  ;;  %v255_v57 = vmul.f32 %v168_v20, %v168_v20  ;;  %v221_v62 = vsel %vm197_vm0, %v168_v20, 0.0 }
  0xa2   :  { %202 = vst.msk [vmem:[%s656_s3 + $0x20] sm:$0xff] %vm197_vm0, %v168_v20 }
  0xa3   :  { %v267_v46 = vsel %vm197_vm0, %v251_v38, 0.0  ;;  %v274_v3 = vsel %vm197_vm0, %v255_v57, 0.0 }
  0xa5   :  { %v177_v21 = vpop.f32.mrf.mxu2  ;;  %v187_v22 = vpop.f32.mrf.mxu3 }
  0xa6   :  { %v159_v23 = vpop.f32.mrf.mxu0  ;;  %v169_v24 = vpop.f32.mrf.mxu1  ;;  %v518_v25 = vadd.f32 %v505_v16, %v177_v21  ;;  %v523_v28 = vadd.f32 %v505_v16, %v187_v22 }
  0xa7   :  { %v160_v26 = vadd.f32 %v505_v16, %v159_v23  ;;  %v170_v27 = vadd.f32 %v505_v16, %v169_v24 }
  0xa8   :  { %206 = vst.msk [vmem:[%s656_s3 + $0x40] sm:$0xff] %vm197_vm0, %v518_v25  ;;  %v259_v18 = vmul.f32 %v518_v25, %v518_v25  ;;  %v229_v22 = vsel %vm197_vm0, %v518_v25, 0.0 }
  0xa9   :  { %199 = vst.msk [vmem:[%s656_s3 + $0x8] sm:$0xff] %vm197_vm0, %v160_v26  ;;  %v252_v37 = vmul.f32 %v160_v26, %v160_v26  ;;  %v215_v39 = vsel %vm197_vm0, %v160_v26, 0.0  ;;  %v256_v63 = vmul.f32 %v170_v27, %v170_v27  ;;  %v223_v4 = vsel %vm197_vm0, %v170_v27, 0.0 }
  0xaa   :  { %203 = vst.msk [vmem:[%s656_s3 + $0x28] sm:$0xff] %vm197_vm0, %v170_v27  ;;  %v216_v47 = vadd.f32 %v215_v39, %v214_v41 }
  0xab   :  { %210 = vst.msk [vmem:[%s656_s3 + $0x60] sm:$0xff] %vm197_vm0, %v523_v28  ;;  %v268_v42 = vsel %vm197_vm0, %v252_v37, 0.0  ;;  %v276_v12 = vsel %vm197_vm0, %v256_v63, 0.0 }
  0xac   :  { %v269_v55 = vadd.f32 %v268_v42, %v267_v46 }
  0xad   :  { %v179_v29 = vpop.f32.mrf.mxu2  ;;  %v189_v30 = vpop.f32.mrf.mxu3 }
  0xae   :  { %v162_v31 = vpop.f32.mrf.mxu0  ;;  %v172_v32 = vpop.f32.mrf.mxu1  ;;  %v544_v33 = vadd.f32 %v505_v16, %v179_v29  ;;  %v549_v36 = vadd.f32 %v505_v16, %v189_v30  ;;  %v282_v29 = vsel %vm197_vm0, %v259_v18, 0.0 }
  0xaf   :  { %v163_v34 = vadd.f32 %v505_v16, %v162_v31  ;;  %v173_v35 = vadd.f32 %v505_v16, %v172_v32 }
  0xb0   :  { %207 = vst.msk [vmem:[%s656_s3 + $0x48] sm:$0xff] %vm197_vm0, %v544_v33  ;;  %v260_v23 = vmul.f32 %v544_v33, %v544_v33  ;;  %v231_v30 = vsel %vm197_vm0, %v544_v33, 0.0  ;;  %v237_v33 = vsel %vm197_vm0, %v523_v28, 0.0 }
  0xb1   :  { %200 = vst.msk [vmem:[%s656_s3 + $0x10] sm:$0xff] %vm197_vm0, %v163_v34  ;;  %v253_v40 = vmul.f32 %v163_v34, %v163_v34  ;;  %v217_v43 = vsel %vm197_vm0, %v163_v34, 0.0  ;;  %v257_v5 = vmul.f32 %v173_v35, %v173_v35  ;;  %v225_v13 = vsel %vm197_vm0, %v173_v35, 0.0 }
  0xb2   :  { %204 = vst.msk [vmem:[%s656_s3 + $0x30] sm:$0xff] %vm197_vm0, %v173_v35  ;;  %v218_v56 = vadd.f32 %v217_v43, %v216_v47  ;;  %v284_v35 = vsel %vm197_vm0, %v260_v23, 0.0 }
  0xb3   :  { %211 = vst.msk [vmem:[%s656_s3 + $0x68] sm:$0xff] %vm197_vm0, %v549_v36  ;;  %v270_v51 = vsel %vm197_vm0, %v253_v40, 0.0  ;;  %v278_v19 = vsel %vm197_vm0, %v257_v5, 0.0  ;;  %v263_v40 = vmul.f32 %v523_v28, %v523_v28 }
  0xb4   :  { %v271_v60 = vadd.f32 %v270_v51, %v269_v55 }
  0xb5   :  { %v182_v44 = vpop.f32.mrf.mxu2  ;;  %v192_v45 = vpop.f32.mrf.mxu3 }
  0xb6   :  { %v164_v48 = vpop.f32.mrf.mxu0  ;;  %v174_v49 = vpop.f32.mrf.mxu1  ;;  %v183_v50 = vadd.f32 %v505_v16, %v182_v44  ;;  %v579_v54 = vadd.f32 %v505_v16, %v192_v45  ;;  %v264_v45 = vmul.f32 %v549_v36, %v549_v36 }
  0xb7   :  { %v165_v52 = vadd.f32 %v505_v16, %v164_v48  ;;  %v175_v53 = vadd.f32 %v505_v16, %v174_v49  ;;  %v290_v49 = vsel %vm197_vm0, %v263_v40, 0.0 }
  0xb8   :  { %208 = vst.msk [vmem:[%s656_s3 + $0x50] sm:$0xff] %vm197_vm0, %v183_v50  ;;  %v261_v31 = vmul.f32 %v183_v50, %v183_v50  ;;  %v233_v37 = vsel %vm197_vm0, %v183_v50, 0.0  ;;  %v239_v50 = vsel %vm197_vm0, %v549_v36, 0.0  ;;  %v265_v51 = vmul.f32 %v579_v54, %v579_v54 }
  0xb9   :  { %201 = vst.msk [vmem:[%s656_s3 + $0x18] sm:$0xff] %vm197_vm0, %v165_v52  ;;  %v219_v58 = vsel %vm197_vm0, %v165_v52, 0.0  ;;  %v254_v59 = vmul.f32 %v165_v52, %v165_v52  ;;  %v258_v14 = vmul.f32 %v175_v53, %v175_v53  ;;  %v227_v20 = vsel %vm197_vm0, %v175_v53, 0.0 }
  0xba   :  { %v220_v61 = vadd.f32 %v219_v58, %v218_v56  ;;  %205 = vst.msk [vmem:[%s656_s3 + $0x38] sm:$0xff] %vm197_vm0, %v175_v53  ;;  %v286_v41 = vsel %vm197_vm0, %v261_v31, 0.0  ;;  %v292_v55 = vsel %vm197_vm0, %v264_v45, 0.0  ;;  %v241_v28 = vsel %vm197_vm0, %v579_v54, 0.0 }
  0xbb   :  { %v272_v0 = vsel %vm197_vm0, %v254_v59, 0.0  ;;  %212 = vst.msk [vmem:[%s656_s3 + $0x70] sm:$0xff] %vm197_vm0, %v579_v54  ;;  %v280_v24 = vsel %vm197_vm0, %v258_v14, 0.0  ;;  %v294_v59 = vsel %vm197_vm0, %v265_v51, 0.0 }
  0xbc   :  { %v222_v1 = vadd.f32 %v221_v62, %v220_v61  ;;  %v273_v2 = vadd.f32 %v272_v0, %v271_v60 }
  0xbd   :  { %v184_v6 = vpop.f32.mrf.mxu2  ;;  %v194_v7 = vpop.f32.mrf.mxu3 }
  0xbe   :  { %v275_v8 = vadd.f32 %v274_v3, %v273_v2  ;;  %v224_v9 = vadd.f32 %v223_v4, %v222_v1  ;;  %v185_v10 = vadd.f32 %v505_v16, %v184_v6  ;;  %v195_v11 = vadd.f32 %v505_v16, %v194_v7 }
  0xbf   :  { %v304_v3 = vlaneseq }
  0xc0   :  { %v226_v15 = vadd.f32 %v225_v13, %v224_v9  ;;  %v277_v17 = vadd.f32 %v276_v12, %v275_v8  ;;  %209 = vst.msk [vmem:[%s656_s3 + $0x58] sm:$0xff] %vm197_vm0, %v185_v10  ;;  %v262_v25 = vmul.f32 %v185_v10, %v185_v10  ;;  %v235_v42 = vsel %vm197_vm0, %v185_v10, 0.0 }
  0xc1   :  { %213 = vst.msk [vmem:[%s656_s3 + $0x78] sm:$0xff] %vm197_vm0, %v195_v11  ;;  %v266_v56 = vmul.f32 %v195_v11, %v195_v11  ;;  %v243_v60 = vsel %vm197_vm0, %v195_v11, 0.0  ;;  %v305_v7 = vshrl.u32 %v304_v3, 7 }
  0xc2   :  { %v228_v16 = vadd.f32 %v227_v20, %v226_v15  ;;  %v279_v21 = vadd.f32 %v278_v19, %v277_v17  ;;  %v288_v46 = vsel %vm197_vm0, %v262_v25, 0.0 }
  0xc3   :  { %v296_v36 = vsel %vm197_vm0, %v266_v56, 0.0  ;;  %vm306_vm1 = vcmp.eq.s32.totalorder %v305_v7, 0  ;;  %vm310_vm2 = vcmp.eq.s32.totalorder %v305_v7, 1 }
  0xc4   :  { %v230_v26 = vadd.f32 %v229_v22, %v228_v16  ;;  %v281_v27 = vadd.f32 %v280_v24, %v279_v21 }
  0xc6   :  { %v283_v32 = vadd.f32 %v282_v29, %v281_v27  ;;  %v232_v34 = vadd.f32 %v231_v30, %v230_v26 }
  0xc8   :  { %v234_v38 = vadd.f32 %v233_v37, %v232_v34  ;;  %v285_v39 = vadd.f32 %v284_v35, %v283_v32 }
  0xca   :  { %v287_v43 = vadd.f32 %v286_v41, %v285_v39  ;;  %v236_v44 = vadd.f32 %v235_v42, %v234_v38 }
  0xcc   :  { %v238_v47 = vadd.f32 %v237_v33, %v236_v44  ;;  %v289_v48 = vadd.f32 %v288_v46, %v287_v43 }
  0xce   :  { %v291_v52 = vadd.f32 %v290_v49, %v289_v48  ;;  %v240_v53 = vadd.f32 %v239_v50, %v238_v47 }
  0xd0   :  { %v242_v57 = vadd.f32 %v241_v28, %v240_v53  ;;  %v293_v58 = vadd.f32 %v292_v55, %v291_v52 }
  0xd2   :  { %v295_v61 = vadd.f32 %v294_v59, %v293_v58  ;;  %v244_v62 = vadd.f32 %v243_v60, %v242_v57 }
  0xd4   :  { %v245_v63 = vrot.slane %v244_v62, 4  ;;  %v297_v0 = vadd.f32 %v296_v36, %v295_v61 }
  0xd6   :  { %v246_v1 = vadd.f32 %v245_v63, %v244_v62  ;;  %v298_v2 = vrot.slane %v297_v0, 4 }
  0xd8   :  { %v247_v4 = vrot.slane %v246_v1, 2  ;;  %v299_v5 = vadd.f32 %v298_v2, %v297_v0 }
  0xda   :  { %v248_v6 = vadd.f32 %v247_v4, %v246_v1  ;;  %v300_v54 = vrot.slane %v299_v5, 2 }
  0xdc   :  { %v249_v8 = vrot.slane %v248_v6, 1  ;;  %v301_v9 = vadd.f32 %v300_v54, %v299_v5 }
  0xde   :  { %v250_v10 = vadd.f32 %v249_v8, %v248_v6  ;;  %v302_v12 = vrot.slane %v301_v9, 1 }
  0xe0   :  { %v303_v11 = vadd.f32 %v302_v12, %v301_v9  ;;  %v309_v13 = vsel %vm306_vm1, %v250_v10, 0.0 }
  0xe2   :  { %v313_v14 = vsel %vm310_vm2, %v303_v11, 0.0 }
  0xe3   :  { %v314_v15 = vadd.f32 %v313_v14, %v309_v13 }
  0xe5   :  { %315 = vst.msk [vmem:[%s657_s4] sm:$0xff] %vm197_vm0, %v314_v15 }

// kernel: vqvae_forward.38
= control target key start
LH: loop header
LB: loop body
LE: loop exit
PB: predicated region body
PF: predicated region fallthrough
CT: control target
= control target key end

     0   :  { %s3153_s1 = inlined_call_operand.vmem [shape: bf16[1152,128], index: 1, kind: input, shape index: {}]   ;;  %s3154_s2 = inlined_call_operand.vmem [shape: f32[1,128], index: 2, kind: input, shape index: {}]   ;;  %s3155_s0 = inlined_call_operand.vmem [shape: bf16[128,1152], index: 0, kind: input, shape index: {}]   ;;  %s3156_s3 = inlined_call_operand.vmem [shape: f32[128,128], index: 3, kind: output, shape index: {0}]   ;;  %s3157_s4 = inlined_call_operand.vmem [shape: f32[8,128], index: 4, kind: output, shape index: {1}]  }
   0x1   :  { %v2234_v0 = vld [vmem:[%s3153_s1 + $0x38] sm:$0xff]  ;;  %v2233_v1 = vld [vmem:[%s3153_s1 + $0x30] sm:$0xff]  ;;  %v2232_v2 = vld [vmem:[%s3153_s1 + $0x28] sm:$0xff] }
   0x2   :  { %2299 = vmatpush.bf16.msra.mxu1 %v2234_v0  ;;  %2300 = vmatpush.bf16.msra.mxu2 %v2234_v0  ;;  %v2231_v3 = vld [vmem:[%s3153_s1 + $0x20] sm:$0xff]  ;;  %v2230_v4 = vld [vmem:[%s3153_s1 + $0x18] sm:$0xff]  ;;  %v2229_v5 = vld [vmem:[%s3153_s1 + $0x10] sm:$0xff] }
   0x3   :  { %2301 = vmatpush.bf16.msra.mxu3 %v2234_v0  ;;  %1044 = vmatpush.bf16.msra.mxu0 %v2234_v0  ;;  %v2228_v6 = vld [vmem:[%s3153_s1 + $0x8] sm:$0xff]  ;;  %v2227_v7 = vld [vmem:[%s3153_s1] sm:$0xff]  ;;  %v1653_v8 = vld [vmem:[%s3155_s0 + $0x90] sm:$0xf] }
   0x4   :  { %v2177_v9 = vld [vmem:[%s3155_s0 + $0xb0] sm:$0xf0]  ;;  %v1725_v10 = vld [vmem:[%s3155_s0 + $0x120] sm:$0xf]  ;;  %v2195_v11 = vld [vmem:[%s3155_s0 + $0x140] sm:$0xf0] }
   0x5   :  { %v1797_v12 = vld [vmem:[%s3155_s0 + $0x1b0] sm:$0xf]  ;;  %v2213_v13 = vld [vmem:[%s3155_s0 + $0x1d0] sm:$0xf0]  ;;  %v1581_v14 = vld [vmem:[%s3155_s0] sm:$0xf]  ;;  %v1654_v18 = vor.u32 %v2177_v9, %v1653_v8  ;;  %v1726_v19 = vor.u32 %v2195_v11, %v1725_v10 }
   0x6   :  { %2302 = vmatpush.bf16.msra.mxu1 %v2233_v1  ;;  %2303 = vmatpush.bf16.msra.mxu2 %v2233_v1  ;;  %v2159_v15 = vld [vmem:[%s3155_s0 + $0x20] sm:$0xf0]  ;;  %v2250_v16 = vld [vmem:[%s3153_s1 + $0xb8] sm:$0xff]  ;;  %v1798_v20 = vor.u32 %v2213_v13, %v1797_v12  ;;  %v2249_v24 = vld [vmem:[%s3153_s1 + $0xb0] sm:$0xff] }
   0x7   :  { %2304 = vmatpush.bf16.msra.mxu3 %v2233_v1  ;;  %1045 = vmatpush.bf16.msra.mxu0 %v2233_v1  ;;  %v2242_v17 = vld [vmem:[%s3153_s1 + $0x78] sm:$0xff]  ;;  %v1582_v21 = vor.u32 %v2159_v15, %v1581_v14  ;;  %v2241_v25 = vld [vmem:[%s3153_s1 + $0x70] sm:$0xff]  ;;  %v2248_v28 = vld [vmem:[%s3153_s1 + $0xa8] sm:$0xff] }
   0x8   :  { %v2258_v22 = vld [vmem:[%s3153_s1 + $0xf8] sm:$0xff]  ;;  %v2257_v26 = vld [vmem:[%s3153_s1 + $0xf0] sm:$0xff]  ;;  %v2240_v29 = vld [vmem:[%s3153_s1 + $0x68] sm:$0xff] }
   0x9   :  { %v2266_v23 = vld [vmem:[%s3153_s1 + $0x138] sm:$0xff]  ;;  %v2265_v27 = vld [vmem:[%s3153_s1 + $0x130] sm:$0xff]  ;;  %v2256_v30 = vld [vmem:[%s3153_s1 + $0xe8] sm:$0xff] }
   0xa   :  { %2305 = vmatpush.bf16.msra.mxu1 %v2232_v2  ;;  %2306 = vmatpush.bf16.msra.mxu2 %v2232_v2  ;;  %v2264_v31 = vld [vmem:[%s3153_s1 + $0x128] sm:$0xff]  ;;  %v2247_v32 = vld [vmem:[%s3153_s1 + $0xa0] sm:$0xff]  ;;  %v1689_v36 = vld [vmem:[%s3155_s0 + $0xd8] sm:$0xf] }
   0xb   :  { %2307 = vmatpush.bf16.msra.mxu3 %v2232_v2  ;;  %1046 = vmatpush.bf16.msra.mxu0 %v2232_v2  ;;  %v2239_v33 = vld [vmem:[%s3153_s1 + $0x60] sm:$0xff]  ;;  %v2186_v37 = vld [vmem:[%s3155_s0 + $0xf8] sm:$0xf0]  ;;  %v1761_v38 = vld [vmem:[%s3155_s0 + $0x168] sm:$0xf] }
   0xc   :  { %v2255_v34 = vld [vmem:[%s3153_s1 + $0xe0] sm:$0xff]  ;;  %v2204_v39 = vld [vmem:[%s3155_s0 + $0x188] sm:$0xf0]  ;;  %v1833_v40 = vld [vmem:[%s3155_s0 + $0x1f8] sm:$0xf]  ;;  %v1690_v46 = vor.u32 %v2186_v37, %v1689_v36 }
   0xd   :  { %v2263_v35 = vld [vmem:[%s3153_s1 + $0x120] sm:$0xff]  ;;  %v2222_v41 = vld [vmem:[%s3155_s0 + $0x218] sm:$0xf0]  ;;  %v1617_v42 = vld [vmem:[%s3155_s0 + $0x48] sm:$0xf]  ;;  %v1762_v47 = vor.u32 %v2204_v39, %v1761_v38 }
   0xe   :  { %2308 = vmatpush.bf16.msra.mxu1 %v2231_v3  ;;  %2309 = vmatpush.bf16.msra.mxu2 %v2231_v3  ;;  %v2168_v43 = vld [vmem:[%s3155_s0 + $0x68] sm:$0xf0]  ;;  %v2246_v44 = vld [vmem:[%s3153_s1 + $0x98] sm:$0xff]  ;;  %v1834_v48 = vor.u32 %v2222_v41, %v1833_v40  ;;  %v2245_v52 = vld [vmem:[%s3153_s1 + $0x90] sm:$0xff] }
   0xf   :  { %2310 = vmatpush.bf16.msra.mxu3 %v2231_v3  ;;  %1047 = vmatpush.bf16.msra.mxu0 %v2231_v3  ;;  %v2238_v45 = vld [vmem:[%s3153_s1 + $0x58] sm:$0xff]  ;;  %v1618_v49 = vor.u32 %v2168_v43, %v1617_v42  ;;  %v2237_v53 = vld [vmem:[%s3153_s1 + $0x50] sm:$0xff]  ;;  %v2244_v56 = vld [vmem:[%s3153_s1 + $0x88] sm:$0xff] }
  0x10   :  { %v2254_v50 = vld [vmem:[%s3153_s1 + $0xd8] sm:$0xff]  ;;  %v2253_v54 = vld [vmem:[%s3153_s1 + $0xd0] sm:$0xff]  ;;  %v2236_v57 = vld [vmem:[%s3153_s1 + $0x48] sm:$0xff] }
  0x11   :  { %v2262_v51 = vld [vmem:[%s3153_s1 + $0x118] sm:$0xff]  ;;  %v2261_v55 = vld [vmem:[%s3153_s1 + $0x110] sm:$0xff]  ;;  %v2252_v58 = vld [vmem:[%s3153_s1 + $0xc8] sm:$0xff] }
  0x12   :  { %2311 = vmatpush.bf16.msra.mxu1 %v2230_v4  ;;  %2312 = vmatpush.bf16.msra.mxu2 %v2230_v4  ;;  %v2260_v59 = vld [vmem:[%s3153_s1 + $0x108] sm:$0xff]  ;;  %v2243_v60 = vld [vmem:[%s3153_s1 + $0x80] sm:$0xff]  ;;  %v2282_v2 = vld [vmem:[%s3153_s1 + $0x1b8] sm:$0xff] }
  0x13   :  { %2313 = vmatpush.bf16.msra.mxu3 %v2230_v4  ;;  %1048 = vmatpush.bf16.msra.mxu0 %v2230_v4  ;;  %v2235_v61 = vld [vmem:[%s3153_s1 + $0x40] sm:$0xff]  ;;  %v1583_v1 = vld [vmem:[%s3155_s0 + $0x24] sm:$0xf0]  ;;  %v2274_v3 = vld [vmem:[%s3153_s1 + $0x178] sm:$0xff] }
  0x14   :  { %v2155_v62 = vld [vmem:[%s3155_s0 + $0x4] sm:$0xf]  ;;  %v1589_v4 = vld [vmem:[%s3155_s0 + $0x8] sm:$0xf]  ;;  %v1597_v8 = vld [vmem:[%s3155_s0 + $0x10] sm:$0xf] }
  0x15   :  { %v2251_v63 = vld [vmem:[%s3153_s1 + $0xc0] sm:$0xff]  ;;  %v2161_v9 = vld [vmem:[%s3155_s0 + $0x30] sm:$0xf0]  ;;  %v2290_v10 = vld [vmem:[%s3153_s1 + $0x1f8] sm:$0xff]  ;;  %v1586_v12 = vor.u32 %v2155_v62, %v1583_v1 }
  0x16   :  { %2314 = vmatpush.bf16.msra.mxu1 %v2229_v5  ;;  %2315 = vmatpush.bf16.msra.mxu2 %v2229_v5  ;;  %v2259_v0 = vld [vmem:[%s3153_s1 + $0x100] sm:$0xff]  ;;  %v2298_v11 = vld [vmem:[%s3153_s1 + $0x238] sm:$0xff]  ;;  %v1598_v15 = vor.u32 %v2161_v9, %v1597_v8  ;;  %v2173_v40 = vld [vmem:[%s3155_s0 + $0x94] sm:$0xf] }
  0x17   :  { %2316 = vmatpush.bf16.msra.mxu3 %v2229_v5  ;;  %1049 = vmatpush.bf16.msra.mxu0 %v2229_v5  ;;  %v2160_v5 = vld [vmem:[%s3155_s0 + $0x28] sm:$0xf0]  ;;  %v2279_v36 = vld [vmem:[%s3153_s1 + $0x1a0] sm:$0xff]  ;;  %v1655_v41 = vld [vmem:[%s3155_s0 + $0xb4] sm:$0xf0] }
  0x18   :  { %v1590_v13 = vor.u32 %v2160_v5, %v1589_v4  ;;  %v2287_v37 = vld [vmem:[%s3153_s1 + $0x1e0] sm:$0xff]  ;;  %v1661_v42 = vld [vmem:[%s3155_s0 + $0x98] sm:$0xf]  ;;  %v2178_v43 = vld [vmem:[%s3155_s0 + $0xb8] sm:$0xf0] }
  0x19   :  { %v2271_v38 = vld [vmem:[%s3153_s1 + $0x160] sm:$0xff]  ;;  %v1705_v62 = vld [vmem:[%s3155_s0 + $0xe8] sm:$0xf]  ;;  %v2277_v4 = vld [vmem:[%s3153_s1 + $0x190] sm:$0xff] }
  0x1a   :  { %2317 = vmatpush.bf16.msra.mxu1 %v2228_v6  ;;  %2318 = vmatpush.bf16.msra.mxu2 %v2228_v6  ;;  %v2295_v39 = vld [vmem:[%s3153_s1 + $0x220] sm:$0xff]  ;;  %v2285_v5 = vld [vmem:[%s3153_s1 + $0x1d0] sm:$0xff]  ;;  %v1727_v9 = vld [vmem:[%s3155_s0 + $0x144] sm:$0xf0] }
  0x1b   :  { %2319 = vmatpush.bf16.msra.mxu3 %v2228_v6  ;;  %1050 = vmatpush.bf16.msra.mxu0 %v2228_v6  ;;  %v2156_v6 = vld [vmem:[%s3155_s0 + $0xc] sm:$0xf]  ;;  %v2191_v8 = vld [vmem:[%s3155_s0 + $0x124] sm:$0xf] }
  0x1e   :  { %2320 = vmatpush.bf16.msra.mxu1 %v2227_v7  ;;  %2321 = vmatpush.bf16.msra.mxu2 %v2227_v7 }
  0x1f   :  { %2322 = vmatpush.bf16.msra.mxu3 %v2227_v7  ;;  %1051 = vmatpush.bf16.msra.mxu0 %v2227_v7  ;;  %v1591_v7 = vld [vmem:[%s3155_s0 + $0x2c] sm:$0xf0] }
  0x20   :  { %v1594_v14 = vor.u32 %v2156_v6, %v1591_v7  ;;  %v2269_v6 = vld [vmem:[%s3153_s1 + $0x150] sm:$0xff] }
  0x21   :  { %1062 = vmatmul.bf16.vlgmr.msra.gmra.mxu1 %v1654_v18  ;;  %1072 = vmatmul.bf16.vlgmr.msra.gmra.mxu2 %v1726_v19  ;;  %v2289_v18 = vld [vmem:[%s3153_s1 + $0x1f0] sm:$0xff] }
  0x22   :  { %1142 = vmatpush.bf16.msrb.mxu2 %v2250_v16  ;;  %1093 = vmatpush.bf16.msrb.mxu1 %v2242_v17  ;;  %v2281_v16 = vld [vmem:[%s3153_s1 + $0x1b0] sm:$0xff] }
  0x23   :  { %1082 = vmatmul.bf16.vlgmr.msra.gmra.mxu3 %v1798_v20  ;;  %1052 = vmatmul.bf16.vlgmr.msra.gmra.mxu0 %v1582_v21  ;;  %v2273_v17 = vld [vmem:[%s3153_s1 + $0x170] sm:$0xff]  ;;  %v2280_v20 = vld [vmem:[%s3153_s1 + $0x1a8] sm:$0xff] }
  0x24   :  { %1191 = vmatpush.bf16.msrb.mxu3 %v2258_v22  ;;  %1240 = vmatpush.bf16.msrb.mxu0 %v2266_v23  ;;  %v2297_v19 = vld [vmem:[%s3153_s1 + $0x230] sm:$0xff]  ;;  %v2272_v21 = vld [vmem:[%s3153_s1 + $0x168] sm:$0xff] }
  0x25   :  { %v2288_v22 = vld [vmem:[%s3153_s1 + $0x1e8] sm:$0xff]  ;;  %v2293_v7 = vld [vmem:[%s3153_s1 + $0x210] sm:$0xff] }
  0x26   :  { %1143 = vmatpush.bf16.msrb.mxu2 %v2249_v24  ;;  %1094 = vmatpush.bf16.msrb.mxu1 %v2241_v25  ;;  %v2296_v23 = vld [vmem:[%s3153_s1 + $0x228] sm:$0xff]  ;;  %v1619_v25 = vld [vmem:[%s3155_s0 + $0x6c] sm:$0xf0] }
  0x27   :  { %v2164_v24 = vld [vmem:[%s3155_s0 + $0x4c] sm:$0xf] }
  0x28   :  { %1192 = vmatpush.bf16.msrb.mxu3 %v2257_v26  ;;  %1241 = vmatpush.bf16.msrb.mxu0 %v2265_v27  ;;  %v1625_v26 = vld [vmem:[%s3155_s0 + $0x50] sm:$0xf]  ;;  %v2169_v27 = vld [vmem:[%s3155_s0 + $0x70] sm:$0xf0] }
  0x2a   :  { %1144 = vmatpush.bf16.msrb.mxu2 %v2248_v28  ;;  %1095 = vmatpush.bf16.msrb.mxu1 %v2240_v29  ;;  %v2165_v28 = vld [vmem:[%s3155_s0 + $0x54] sm:$0xf]  ;;  %v1627_v29 = vld [vmem:[%s3155_s0 + $0x74] sm:$0xf0] }
  0x2c   :  { %1193 = vmatpush.bf16.msrb.mxu3 %v2256_v30  ;;  %1242 = vmatpush.bf16.msrb.mxu0 %v2264_v31  ;;  %v1633_v30 = vld [vmem:[%s3155_s0 + $0x58] sm:$0xf]  ;;  %v2170_v31 = vld [vmem:[%s3155_s0 + $0x78] sm:$0xf0] }
  0x2e   :  { %1145 = vmatpush.bf16.msrb.mxu2 %v2247_v32  ;;  %1096 = vmatpush.bf16.msrb.mxu1 %v2239_v33  ;;  %v1622_v32 = vor.u32 %v2164_v24, %v1619_v25  ;;  %v1626_v33 = vor.u32 %v2169_v27, %v1625_v26  ;;  %v2200_v24 = vld [vmem:[%s3155_s0 + $0x16c] sm:$0xf]  ;;  %v1763_v25 = vld [vmem:[%s3155_s0 + $0x18c] sm:$0xf0]  ;;  %v2205_v27 = vld [vmem:[%s3155_s0 + $0x190] sm:$0xf0] }
  0x2f   :  { %v1769_v26 = vld [vmem:[%s3155_s0 + $0x170] sm:$0xf] }
  0x30   :  { %1194 = vmatpush.bf16.msrb.mxu3 %v2255_v34  ;;  %1243 = vmatpush.bf16.msrb.mxu0 %v2263_v35  ;;  %v1630_v34 = vor.u32 %v2165_v28, %v1627_v29  ;;  %v1634_v35 = vor.u32 %v2170_v31, %v1633_v30  ;;  %v2201_v28 = vld [vmem:[%s3155_s0 + $0x174] sm:$0xf]  ;;  %v1771_v29 = vld [vmem:[%s3155_s0 + $0x194] sm:$0xf0]  ;;  %v2206_v31 = vld [vmem:[%s3155_s0 + $0x198] sm:$0xf0] }
  0x31   :  { %1067 = vmatmul.bf16.gmra.mxu1 %v1690_v46  ;;  %1077 = vmatmul.bf16.gmra.mxu2 %v1762_v47  ;;  %v1669_v46 = vld [vmem:[%s3155_s0 + $0xa0] sm:$0xf]  ;;  %v2179_v47 = vld [vmem:[%s3155_s0 + $0xc0] sm:$0xf0]  ;;  %v1777_v30 = vld [vmem:[%s3155_s0 + $0x178] sm:$0xf] }
  0x32   :  { %1146 = vmatpush.bf16.msrb.mxu2 %v2246_v44  ;;  %1097 = vmatpush.bf16.msrb.mxu1 %v2238_v45  ;;  %v2174_v44 = vld [vmem:[%s3155_s0 + $0x9c] sm:$0xf]  ;;  %v1663_v45 = vld [vmem:[%s3155_s0 + $0xbc] sm:$0xf0] }
  0x33   :  { %1087 = vmatmul.bf16.gmra.mxu3 %v1834_v48  ;;  %1057 = vmatmul.bf16.gmra.mxu0 %v1618_v49  ;;  %v1658_v48 = vor.u32 %v2173_v40, %v1655_v41  ;;  %v1662_v49 = vor.u32 %v2178_v43, %v1661_v42  ;;  %v2209_v40 = vld [vmem:[%s3155_s0 + $0x1b4] sm:$0xf]  ;;  %v1799_v41 = vld [vmem:[%s3155_s0 + $0x1d4] sm:$0xf0]  ;;  %v2214_v43 = vld [vmem:[%s3155_s0 + $0x1d8] sm:$0xf0] }
  0x34   :  { %1195 = vmatpush.bf16.msrb.mxu3 %v2254_v50  ;;  %1244 = vmatpush.bf16.msrb.mxu0 %v2262_v51  ;;  %v1666_v50 = vor.u32 %v2174_v44, %v1663_v45  ;;  %v1670_v51 = vor.u32 %v2179_v47, %v1669_v46  ;;  %v1805_v42 = vld [vmem:[%s3155_s0 + $0x1b8] sm:$0xf]  ;;  %v2210_v44 = vld [vmem:[%s3155_s0 + $0x1bc] sm:$0xf]  ;;  %v1807_v45 = vld [vmem:[%s3155_s0 + $0x1dc] sm:$0xf0] }
  0x35   :  { %v1813_v46 = vld [vmem:[%s3155_s0 + $0x1c0] sm:$0xf]  ;;  %v2215_v47 = vld [vmem:[%s3155_s0 + $0x1e0] sm:$0xf0] }
  0x36   :  { %1147 = vmatpush.bf16.msrb.mxu2 %v2245_v52  ;;  %1098 = vmatpush.bf16.msrb.mxu1 %v2237_v53  ;;  %v2278_v52 = vld [vmem:[%s3153_s1 + $0x198] sm:$0xff] }
  0x37   :  { %v2286_v53 = vld [vmem:[%s3153_s1 + $0x1d8] sm:$0xff] }
  0x38   :  { %1196 = vmatpush.bf16.msrb.mxu3 %v2253_v54  ;;  %1245 = vmatpush.bf16.msrb.mxu0 %v2261_v55  ;;  %v2270_v54 = vld [vmem:[%s3153_s1 + $0x158] sm:$0xff] }
  0x39   :  { %v2294_v55 = vld [vmem:[%s3153_s1 + $0x218] sm:$0xff] }
  0x3a   :  { %1148 = vmatpush.bf16.msrb.mxu2 %v2244_v56  ;;  %1099 = vmatpush.bf16.msrb.mxu1 %v2236_v57  ;;  %v2182_v56 = vld [vmem:[%s3155_s0 + $0xdc] sm:$0xf]  ;;  %v1691_v57 = vld [vmem:[%s3155_s0 + $0xfc] sm:$0xf0] }
  0x3c   :  { %1197 = vmatpush.bf16.msrb.mxu3 %v2252_v58  ;;  %1246 = vmatpush.bf16.msrb.mxu0 %v2260_v59  ;;  %v1697_v58 = vld [vmem:[%s3155_s0 + $0xe0] sm:$0xf]  ;;  %v2187_v59 = vld [vmem:[%s3155_s0 + $0x100] sm:$0xf0] }
  0x3d   :  { %v1698_v1 = vor.u32 %v2187_v59, %v1697_v58 }
  0x3e   :  { %1149 = vmatpush.bf16.msrb.mxu2 %v2243_v60  ;;  %1100 = vmatpush.bf16.msrb.mxu1 %v2235_v61  ;;  %v2183_v60 = vld [vmem:[%s3155_s0 + $0xe4] sm:$0xf]  ;;  %v1699_v61 = vld [vmem:[%s3155_s0 + $0x104] sm:$0xf0] }
  0x40   :  { %1198 = vmatpush.bf16.msrb.mxu3 %v2251_v63  ;;  %1247 = vmatpush.bf16.msrb.mxu0 %v2259_v0  ;;  %v2188_v63 = vld [vmem:[%s3155_s0 + $0x108] sm:$0xf0]  ;;  %v1694_v0 = vor.u32 %v2182_v56, %v1691_v57 }
  0x41   :  { %1101 = vmatmul.bf16.vlgmr.msrb.gmra.mxu1 %v1586_v12  ;;  %1150 = vmatmul.bf16.vlgmr.msrb.gmra.mxu2 %v1590_v13  ;;  %v2192_v12 = vld [vmem:[%s3155_s0 + $0x12c] sm:$0xf]  ;;  %v1735_v13 = vld [vmem:[%s3155_s0 + $0x14c] sm:$0xf0] }
  0x42   :  { %1338 = vmatpush.bf16.msra.mxu2 %v2282_v2  ;;  %1289 = vmatpush.bf16.msra.mxu1 %v2274_v3  ;;  %v1702_v2 = vor.u32 %v2183_v60, %v1699_v61  ;;  %v1706_v3 = vor.u32 %v2188_v63, %v1705_v62  ;;  %v2218_v61 = vld [vmem:[%s3155_s0 + $0x1fc] sm:$0xf]  ;;  %v1835_v62 = vld [vmem:[%s3155_s0 + $0x21c] sm:$0xf0] }
  0x43   :  { %1199 = vmatmul.bf16.vlgmr.msrb.gmra.mxu3 %v1594_v14  ;;  %1248 = vmatmul.bf16.vlgmr.msrb.gmra.mxu0 %v1598_v15  ;;  %v1741_v14 = vld [vmem:[%s3155_s0 + $0x130] sm:$0xf]  ;;  %v2197_v15 = vld [vmem:[%s3155_s0 + $0x150] sm:$0xf0]  ;;  %v1841_v63 = vld [vmem:[%s3155_s0 + $0x200] sm:$0xf] }
  0x44   :  { %1387 = vmatpush.bf16.msra.mxu3 %v2290_v10  ;;  %1436 = vmatpush.bf16.msra.mxu0 %v2298_v11  ;;  %v1733_v10 = vld [vmem:[%s3155_s0 + $0x128] sm:$0xf]  ;;  %v2196_v11 = vld [vmem:[%s3155_s0 + $0x148] sm:$0xf0] }
  0x46   :  { %1339 = vmatpush.bf16.msra.mxu2 %v2281_v16  ;;  %1290 = vmatpush.bf16.msra.mxu1 %v2273_v17  ;;  %v1730_v16 = vor.u32 %v2191_v8, %v1727_v9  ;;  %v1734_v17 = vor.u32 %v2196_v11, %v1733_v10  ;;  %v1838_v8 = vor.u32 %v2218_v61, %v1835_v62  ;;  %v1649_v61 = vld [vmem:[%s3155_s0 + $0x68] sm:$0xf]  ;;  %v2172_v62 = vld [vmem:[%s3155_s0 + $0x88] sm:$0xf0] }
  0x48   :  { %1388 = vmatpush.bf16.msra.mxu3 %v2289_v18  ;;  %1437 = vmatpush.bf16.msra.mxu0 %v2297_v19  ;;  %v1738_v18 = vor.u32 %v2192_v12, %v1735_v13  ;;  %v1742_v19 = vor.u32 %v2197_v15, %v1741_v14 }
  0x4a   :  { %1340 = vmatpush.bf16.msra.mxu2 %v2280_v20  ;;  %1291 = vmatpush.bf16.msra.mxu1 %v2272_v21  ;;  %v2276_v20 = vld [vmem:[%s3153_s1 + $0x188] sm:$0xff] }
  0x4b   :  { %v2284_v21 = vld [vmem:[%s3153_s1 + $0x1c8] sm:$0xff] }
  0x4c   :  { %1389 = vmatpush.bf16.msra.mxu3 %v2288_v22  ;;  %1438 = vmatpush.bf16.msra.mxu0 %v2296_v23  ;;  %v2268_v22 = vld [vmem:[%s3153_s1 + $0x148] sm:$0xff] }
  0x4d   :  { %v2292_v23 = vld [vmem:[%s3153_s1 + $0x208] sm:$0xff] }
  0x4e   :  { %1341 = vmatpush.bf16.msra.mxu2 %v2279_v36  ;;  %1292 = vmatpush.bf16.msra.mxu1 %v2271_v38  ;;  %v2275_v36 = vld [vmem:[%s3153_s1 + $0x180] sm:$0xff] }
  0x4f   :  { %v2267_v38 = vld [vmem:[%s3153_s1 + $0x140] sm:$0xff] }
  0x50   :  { %1390 = vmatpush.bf16.msra.mxu3 %v2287_v37  ;;  %1439 = vmatpush.bf16.msra.mxu0 %v2295_v39  ;;  %v2283_v37 = vld [vmem:[%s3153_s1 + $0x1c0] sm:$0xff] }
  0x51   :  { %1106 = vmatmul.bf16.gmra.mxu1 %v1622_v32  ;;  %1155 = vmatmul.bf16.gmra.mxu2 %v1626_v33  ;;  %v1766_v32 = vor.u32 %v2200_v24, %v1763_v25  ;;  %v1770_v33 = vor.u32 %v2205_v27, %v1769_v26  ;;  %v2291_v39 = vld [vmem:[%s3153_s1 + $0x200] sm:$0xff]  ;;  %v2162_v24 = vld [vmem:[%s3155_s0 + $0x38] sm:$0xf0] }
  0x52   :  { %1342 = vmatpush.bf16.msra.mxu2 %v2278_v52  ;;  %1293 = vmatpush.bf16.msra.mxu1 %v2270_v54  ;;  %v1814_v52 = vor.u32 %v2215_v47, %v1813_v46  ;;  %v2786_v54 = vld [vmem:[%s3154_s2] ss:$0 sm:$0xff]  ;;  %v2158_v25 = vld [vmem:[%s3155_s0 + $0x1c] sm:$0xf] }
  0x53   :  { %1204 = vmatmul.bf16.gmra.mxu3 %v1630_v34  ;;  %1253 = vmatmul.bf16.gmra.mxu0 %v1634_v35  ;;  %v1774_v34 = vor.u32 %v2201_v28, %v1771_v29  ;;  %v1778_v35 = vor.u32 %v2206_v31, %v1777_v30  ;;  %v1607_v26 = vld [vmem:[%s3155_s0 + $0x3c] sm:$0xf0]  ;;  %v2163_v28 = vld [vmem:[%s3155_s0 + $0x40] sm:$0xf0] }
  0x54   :  { %1391 = vmatpush.bf16.msra.mxu3 %v2286_v53  ;;  %1440 = vmatpush.bf16.msra.mxu0 %v2294_v55  ;;  %v1613_v27 = vld [vmem:[%s3155_s0 + $0x20] sm:$0xf] }
  0x56   :  { %1343 = vmatpush.bf16.msra.mxu2 %v2277_v4  ;;  %1294 = vmatpush.bf16.msra.mxu1 %v2269_v6  ;;  %v2224_v4 = vld [vmem:[%s3155_s0 + $0x228] sm:$0xf0] }
  0x58   :  { %1392 = vmatpush.bf16.msra.mxu3 %v2285_v5  ;;  %1441 = vmatpush.bf16.msra.mxu0 %v2293_v7 }
  0x5a   :  { %1344 = vmatpush.bf16.msra.mxu2 %v2276_v20  ;;  %1295 = vmatpush.bf16.msra.mxu1 %v2268_v22  ;;  %v1599_v22 = vld [vmem:[%s3155_s0 + $0x34] sm:$0xf0] }
  0x5c   :  { %1393 = vmatpush.bf16.msra.mxu3 %v2284_v21  ;;  %1442 = vmatpush.bf16.msra.mxu0 %v2292_v23  ;;  %v2157_v21 = vld [vmem:[%s3155_s0 + $0x14] sm:$0xf]  ;;  %v1605_v23 = vld [vmem:[%s3155_s0 + $0x18] sm:$0xf] }
  0x5e   :  { %1345 = vmatpush.bf16.msra.mxu2 %v2275_v36  ;;  %1296 = vmatpush.bf16.msra.mxu1 %v2267_v38  ;;  %v1614_v38 = vor.u32 %v2163_v28, %v1613_v27  ;;  %v2175_v27 = vld [vmem:[%s3155_s0 + $0xa4] sm:$0xf]  ;;  %v1671_v28 = vld [vmem:[%s3155_s0 + $0xc4] sm:$0xf0] }
  0x60   :  { %1394 = vmatpush.bf16.msra.mxu3 %v2283_v37  ;;  %1443 = vmatpush.bf16.msra.mxu0 %v2291_v39  ;;  %v1610_v37 = vor.u32 %v2158_v25, %v1607_v26 }
  0x61   :  { %1111 = vmatmul.bf16.gmra.mxu1 %v1658_v48  ;;  %1160 = vmatmul.bf16.gmra.mxu2 %v1662_v49  ;;  %v1802_v48 = vor.u32 %v2209_v40, %v1799_v41  ;;  %v1806_v49 = vor.u32 %v2214_v43, %v1805_v42 }
  0x63   :  { %1209 = vmatmul.bf16.gmra.mxu3 %v1666_v50  ;;  %1258 = vmatmul.bf16.gmra.mxu0 %v1670_v51  ;;  %v1810_v51 = vor.u32 %v2210_v44, %v1807_v45 }
  0x71   :  { %1116 = vmatmul.bf16.gmra.mxu1 %v1694_v0  ;;  %1165 = vmatmul.bf16.gmra.mxu2 %v1698_v1  ;;  %v2223_v0 = vld [vmem:[%s3155_s0 + $0x220] sm:$0xf0] }
  0x72   :  { %v2219_v1 = vld [vmem:[%s3155_s0 + $0x204] sm:$0xf]  ;;  %v1842_v9 = vor.u32 %v2223_v0, %v1841_v63 }
  0x73   :  { %1214 = vmatmul.bf16.gmra.mxu3 %v1702_v2  ;;  %1263 = vmatmul.bf16.gmra.mxu0 %v1706_v3  ;;  %v1843_v2 = vld [vmem:[%s3155_s0 + $0x224] sm:$0xf0] }
  0x74   :  { %v1849_v3 = vld [vmem:[%s3155_s0 + $0x208] sm:$0xf]  ;;  %v1846_v12 = vor.u32 %v2219_v1, %v1843_v2 }
  0x75   :  { %v1850_v13 = vor.u32 %v2224_v4, %v1849_v3 }
  0x81   :  { %1121 = vmatmul.bf16.gmra.mxu1 %v1730_v16  ;;  %1170 = vmatmul.bf16.gmra.mxu2 %v1734_v17 }
  0x83   :  { %1219 = vmatmul.bf16.gmra.mxu3 %v1738_v18  ;;  %1268 = vmatmul.bf16.gmra.mxu0 %v1742_v19 }
  0x91   :  { %1126 = vmatmul.bf16.gmra.mxu1 %v1766_v32  ;;  %1175 = vmatmul.bf16.gmra.mxu2 %v1770_v33  ;;  %v1602_v33 = vor.u32 %v2157_v21, %v1599_v22 }
  0x93   :  { %1224 = vmatmul.bf16.gmra.mxu3 %v1774_v34  ;;  %1273 = vmatmul.bf16.gmra.mxu0 %v1778_v35  ;;  %v1606_v34 = vor.u32 %v2162_v24, %v1605_v23 }
  0x9e   :  { %v2781_v50 = vpop.f32.mrf.mxu1 }
  0xa0   :  { %v1053_v53 = vpop.f32.mrf.mxu0 }
  0xa1   :  { %1131 = vmatmul.bf16.gmra.mxu1 %v1802_v48  ;;  %1180 = vmatmul.bf16.gmra.mxu2 %v1806_v49  ;;  %v1054_v30 = vadd.f32 %v2786_v54, %v1053_v53  ;;  %v2166_v49 = vld [vmem:[%s3155_s0 + $0x5c] sm:$0xf]  ;;  %v1641_v53 = vld [vmem:[%s3155_s0 + $0x60] sm:$0xf] }
  0xa3   :  { %1229 = vmatmul.bf16.gmra.mxu3 %v1810_v51  ;;  %1278 = vmatmul.bf16.gmra.mxu0 %v1814_v52  ;;  %v1635_v51 = vld [vmem:[%s3155_s0 + $0x7c] sm:$0xf0] }
  0xa4   :  { %v1073_v55 = vpop.f32.mrf.mxu2  ;;  %v1638_v3 = vor.u32 %v2166_v49, %v1635_v51 }
  0xa5   :  { %v2789_v56 = vadd.f32 %v2786_v54, %v1073_v55  ;;  %v2171_v55 = vld [vmem:[%s3155_s0 + $0x80] sm:$0xf0] }
  0xa6   :  { %v1083_v57 = vpop.f32.mrf.mxu3  ;;  %v2794_v59 = vpop.f32.mrf.mxu1  ;;  %v1642_v4 = vor.u32 %v2171_v55, %v1641_v53 }
  0xa7   :  { %v2792_v58 = vadd.f32 %v2786_v54, %v1083_v57  ;;  %v2167_v57 = vld [vmem:[%s3155_s0 + $0x64] sm:$0xf] }
  0xa8   :  { %v1055_v60 = vpop.f32.mrf.mxu0 }
  0xa9   :  { %v1056_v42 = vadd.f32 %v2786_v54, %v1055_v60  ;;  %v1643_v60 = vld [vmem:[%s3155_s0 + $0x84] sm:$0xf0] }
  0xac   :  { %v1075_v5 = vpop.f32.mrf.mxu2 }
  0xad   :  { %v2821_v6 = vadd.f32 %v2786_v54, %v1075_v5 }
  0xae   :  { %v1085_v7 = vpop.f32.mrf.mxu3  ;;  %v2826_v11 = vpop.f32.mrf.mxu1 }
  0xaf   :  { %v2824_v10 = vadd.f32 %v2786_v54, %v1085_v7  ;;  %v1646_v7 = vor.u32 %v2167_v57, %v1643_v60 }
  0xb0   :  { %v1058_v14 = vpop.f32.mrf.mxu0 }
  0xb1   :  { %1136 = vmatmul.bf16.gmra.mxu1 %v1838_v8  ;;  %1185 = vmatmul.bf16.gmra.mxu2 %v1842_v9  ;;  %v1059_v0 = vadd.f32 %v2786_v54, %v1058_v14  ;;  %v1650_v8 = vor.u32 %v2172_v62, %v1649_v61 }
  0xb3   :  { %1234 = vmatmul.bf16.gmra.mxu3 %v1846_v12  ;;  %1283 = vmatmul.bf16.gmra.mxu0 %v1850_v13 }
  0xb4   :  { %v1078_v15 = vpop.f32.mrf.mxu2 }
  0xb5   :  { %v2829_v16 = vadd.f32 %v2786_v54, %v1078_v15 }
  0xb6   :  { %v1088_v17 = vpop.f32.mrf.mxu3  ;;  %v2834_v19 = vpop.f32.mrf.mxu1 }
  0xb7   :  { %v2832_v18 = vadd.f32 %v2786_v54, %v1088_v17 }
  0xb8   :  { %v1060_v20 = vpop.f32.mrf.mxu0 }
  0xb9   :  { %v1061_v21 = vadd.f32 %v2786_v54, %v1060_v20  ;;  %v1677_v20 = vld [vmem:[%s3155_s0 + $0xa8] sm:$0xf] }
  0xbc   :  { %v1080_v29 = vpop.f32.mrf.mxu2 }
  0xbd   :  { %v2862_v31 = vadd.f32 %v2786_v54, %v1080_v29 }
  0xbe   :  { %v1090_v32 = vpop.f32.mrf.mxu3  ;;  %v1102_v36 = vpop.f32.mrf.mxu1 }
  0xbf   :  { %v2865_v35 = vadd.f32 %v2786_v54, %v1090_v32  ;;  %v1103_v39 = vadd.f32 %v1102_v36, %v1054_v30  ;;  %v2180_v30 = vld [vmem:[%s3155_s0 + $0xc8] sm:$0xf0]  ;;  %v2181_v36 = vld [vmem:[%s3155_s0 + $0xd0] sm:$0xf0] }
  0xc0   :  { %v1249_v40 = vpop.f32.mrf.mxu0  ;;  %v2176_v32 = vld [vmem:[%s3155_s0 + $0xac] sm:$0xf] }
  0xc1   :  { %1297 = vmatmul.bf16.vlgmr.msra.gmra.mxu1 %v1602_v33  ;;  %1346 = vmatmul.bf16.vlgmr.msra.gmra.mxu2 %v1606_v34  ;;  %v1679_v33 = vld [vmem:[%s3155_s0 + $0xcc] sm:$0xf0] }
  0xc2   :  { %v1685_v34 = vld [vmem:[%s3155_s0 + $0xb0] sm:$0xf] }
  0xc3   :  { %1395 = vmatmul.bf16.vlgmr.msra.gmra.mxu3 %v1610_v37  ;;  %1444 = vmatmul.bf16.vlgmr.msra.gmra.mxu0 %v1614_v38  ;;  %v1064_v38 = vadd.f32 %v2786_v54, %v2781_v50  ;;  %v1066_v50 = vadd.f32 %v2786_v54, %v2794_v59  ;;  %v1713_v59 = vld [vmem:[%s3155_s0 + $0xf0] sm:$0xf] }
  0xc4   :  { %v1151_v41 = vpop.f32.mrf.mxu2 }
  0xc5   :  { %v1152_v43 = vadd.f32 %v1151_v41, %v1103_v39  ;;  %v1674_v41 = vor.u32 %v2175_v27, %v1671_v28 }
  0xc6   :  { %v1200_v44 = vpop.f32.mrf.mxu3  ;;  %v1104_v45 = vpop.f32.mrf.mxu1 }
  0xc7   :  { %v1201_v46 = vadd.f32 %v1200_v44, %v1152_v43  ;;  %v1105_v47 = vadd.f32 %v1104_v45, %v1056_v42  ;;  %v1678_v42 = vor.u32 %v2180_v30, %v1677_v20  ;;  %v1682_v44 = vor.u32 %v2176_v32, %v1679_v33 }
  0xc8   :  { %v1251_v48 = vpop.f32.mrf.mxu0  ;;  %v1686_v45 = vor.u32 %v2181_v36, %v1685_v34 }
  0xc9   :  { %v2874_v52 = vadd.f32 %v1249_v40, %v1201_v46 }
  0xcc   :  { %v1153_v63 = vpop.f32.mrf.mxu2 }
  0xcd   :  { %v1154_v1 = vadd.f32 %v1153_v63, %v1105_v47  ;;  %v2184_v63 = vld [vmem:[%s3155_s0 + $0xec] sm:$0xf] }
  0xce   :  { %v1202_v2 = vpop.f32.mrf.mxu3  ;;  %v1107_v5 = vpop.f32.mrf.mxu1 }
  0xcf   :  { %v1203_v9 = vadd.f32 %v1202_v2, %v1154_v1  ;;  %v1108_v12 = vadd.f32 %v1107_v5, %v1059_v0  ;;  %v1707_v0 = vld [vmem:[%s3155_s0 + $0x10c] sm:$0xf0]  ;;  %v2189_v2 = vld [vmem:[%s3155_s0 + $0x110] sm:$0xf0]  ;;  %v1721_v5 = vld [vmem:[%s3155_s0 + $0xf8] sm:$0xf] }
  0xd0   :  { %v1254_v13 = vpop.f32.mrf.mxu0 }
  0xd1   :  { %1302 = vmatmul.bf16.gmra.mxu1 %v1638_v3  ;;  %1351 = vmatmul.bf16.gmra.mxu2 %v1642_v4  ;;  %v2895_v15 = vadd.f32 %v1251_v48, %v1203_v9  ;;  %v2185_v3 = vld [vmem:[%s3155_s0 + $0xf4] sm:$0xf]  ;;  %v1715_v4 = vld [vmem:[%s3155_s0 + $0x114] sm:$0xf0]  ;;  %v1069_v9 = vadd.f32 %v2786_v54, %v2826_v11  ;;  %v1071_v11 = vadd.f32 %v2786_v54, %v2834_v19  ;;  %v2198_v19 = vld [vmem:[%s3155_s0 + $0x158] sm:$0xf0] }
  0xd2   :  { %v1749_v54 = vld [vmem:[%s3155_s0 + $0x138] sm:$0xf] }
  0xd3   :  { %1400 = vmatmul.bf16.gmra.mxu3 %v1646_v7  ;;  %1449 = vmatmul.bf16.gmra.mxu0 %v1650_v8  ;;  %v2190_v7 = vld [vmem:[%s3155_s0 + $0x118] sm:$0xf0] }
  0xd4   :  { %v1156_v17 = vpop.f32.mrf.mxu2 }
  0xd5   :  { %v1157_v14 = vadd.f32 %v1156_v17, %v1108_v12  ;;  %v1710_v17 = vor.u32 %v2184_v63, %v1707_v0 }
  0xd6   :  { %v1205_v22 = vpop.f32.mrf.mxu3  ;;  %v1109_v23 = vpop.f32.mrf.mxu1 }
  0xd7   :  { %v1206_v24 = vadd.f32 %v1205_v22, %v1157_v14  ;;  %v1110_v25 = vadd.f32 %v1109_v23, %v1061_v21  ;;  %v1714_v21 = vor.u32 %v2189_v2, %v1713_v59  ;;  %v1718_v22 = vor.u32 %v2185_v3, %v1715_v4 }
  0xd8   :  { %v1256_v26 = vpop.f32.mrf.mxu0  ;;  %v1722_v23 = vor.u32 %v2190_v7, %v1721_v5  ;;  %v2202_v5 = vld [vmem:[%s3155_s0 + $0x17c] sm:$0xf] }
  0xd9   :  { %v2904_v29 = vadd.f32 %v1254_v13, %v1206_v24 }
  0xdc   :  { %v1158_v37 = vpop.f32.mrf.mxu2 }
  0xdd   :  { %v1159_v39 = vadd.f32 %v1158_v37, %v1110_v25  ;;  %v2193_v37 = vld [vmem:[%s3155_s0 + $0x134] sm:$0xf] }
  0xde   :  { %v1207_v40 = vpop.f32.mrf.mxu3  ;;  %v1112_v43 = vpop.f32.mrf.mxu1 }
  0xdf   :  { %v1208_v46 = vadd.f32 %v1207_v40, %v1159_v39  ;;  %v1113_v47 = vadd.f32 %v1112_v43, %v1064_v38  ;;  %v1743_v38 = vld [vmem:[%s3155_s0 + $0x154] sm:$0xf0]  ;;  %v2194_v40 = vld [vmem:[%s3155_s0 + $0x13c] sm:$0xf]  ;;  %v2199_v43 = vld [vmem:[%s3155_s0 + $0x160] sm:$0xf0] }
  0xe0   :  { %v1259_v48 = vpop.f32.mrf.mxu0 }
  0xe1   :  { %1307 = vmatmul.bf16.gmra.mxu1 %v1674_v41  ;;  %1356 = vmatmul.bf16.gmra.mxu2 %v1678_v42  ;;  %v2926_v49 = vadd.f32 %v1256_v26, %v1208_v46  ;;  %v1751_v41 = vld [vmem:[%s3155_s0 + $0x15c] sm:$0xf0] }
  0xe2   :  { %v1757_v42 = vld [vmem:[%s3155_s0 + $0x140] sm:$0xf] }
  0xe3   :  { %1405 = vmatmul.bf16.gmra.mxu3 %v1682_v44  ;;  %1454 = vmatmul.bf16.gmra.mxu0 %v1686_v45 }
  0xe4   :  { %v1161_v51 = vpop.f32.mrf.mxu2 }
  0xe5   :  { %v1162_v53 = vadd.f32 %v1161_v51, %v1113_v47  ;;  %v1746_v47 = vor.u32 %v2193_v37, %v1743_v38 }
  0xe6   :  { %v1210_v55 = vpop.f32.mrf.mxu3  ;;  %v1114_v57 = vpop.f32.mrf.mxu1 }
  0xe7   :  { %v1211_v60 = vadd.f32 %v1210_v55, %v1162_v53  ;;  %v1115_v61 = vadd.f32 %v1114_v57, %v1066_v50  ;;  %v1754_v50 = vor.u32 %v2194_v40, %v1751_v41  ;;  %v1758_v53 = vor.u32 %v2199_v43, %v1757_v42  ;;  %v2211_v40 = vld [vmem:[%s3155_s0 + $0x1c4] sm:$0xf]  ;;  %v1821_v42 = vld [vmem:[%s3155_s0 + $0x1c8] sm:$0xf]  ;;  %v2216_v43 = vld [vmem:[%s3155_s0 + $0x1e8] sm:$0xf0] }
  0xe8   :  { %v1261_v62 = vpop.f32.mrf.mxu0 }
  0xe9   :  { %v2936_v1 = vadd.f32 %v1259_v48, %v1211_v60  ;;  %v1750_v48 = vor.u32 %v2198_v19, %v1749_v54 }
  0xec   :  { %v1163_v8 = vpop.f32.mrf.mxu2 }
  0xed   :  { %v1164_v12 = vadd.f32 %v1163_v8, %v1115_v61  ;;  %v1785_v8 = vld [vmem:[%s3155_s0 + $0x180] sm:$0xf] }
  0xee   :  { %v1212_v13 = vpop.f32.mrf.mxu3  ;;  %v1117_v14 = vpop.f32.mrf.mxu1 }
  0xef   :  { %v1213_v24 = vadd.f32 %v1212_v13, %v1164_v12  ;;  %v1118_v25 = vadd.f32 %v1117_v14, %v1069_v9  ;;  %v2207_v9 = vld [vmem:[%s3155_s0 + $0x1a0] sm:$0xf0]  ;;  %v1787_v12 = vld [vmem:[%s3155_s0 + $0x1a4] sm:$0xf0] }
  0xf0   :  { %v1264_v26 = vpop.f32.mrf.mxu0  ;;  %v1793_v13 = vld [vmem:[%s3155_s0 + $0x188] sm:$0xf] }
  0xf1   :  { %1312 = vmatmul.bf16.gmra.mxu1 %v1710_v17  ;;  %1361 = vmatmul.bf16.gmra.mxu2 %v1714_v21  ;;  %v2958_v27 = vadd.f32 %v1261_v62, %v1213_v24  ;;  %v2208_v17 = vld [vmem:[%s3155_s0 + $0x1a8] sm:$0xf0]  ;;  %v1786_v24 = vor.u32 %v2207_v9, %v1785_v8 }
  0xf3   :  { %1410 = vmatmul.bf16.gmra.mxu3 %v1718_v22  ;;  %1459 = vmatmul.bf16.gmra.mxu0 %v1722_v23 }
  0xf4   :  { %v1166_v28 = vpop.f32.mrf.mxu2 }
  0xf5   :  { %v1167_v20 = vadd.f32 %v1166_v28, %v1118_v25  ;;  %v1794_v28 = vor.u32 %v2208_v17, %v1793_v13  ;;  %v1857_v13 = vld [vmem:[%s3155_s0 + $0x210] sm:$0xf]  ;;  %v2225_v17 = vld [vmem:[%s3155_s0 + $0x230] sm:$0xf0] }
  0xf6   :  { %v1215_v30 = vpop.f32.mrf.mxu3  ;;  %v1119_v32 = vpop.f32.mrf.mxu1 }
  0xf7   :  { %v1216_v33 = vadd.f32 %v1215_v30, %v1167_v20  ;;  %v1120_v34 = vadd.f32 %v1119_v32, %v1071_v11 }
  0xf8   :  { %v1266_v36 = vpop.f32.mrf.mxu0 }
  0xf9   :  { %v2968_v39 = vadd.f32 %v1264_v26, %v1216_v33 }
  0xfc   :  { %v1168_v44 = vpop.f32.mrf.mxu2 }
  0xfd   :  { %v1169_v45 = vadd.f32 %v1168_v44, %v1120_v34  ;;  %v1823_v44 = vld [vmem:[%s3155_s0 + $0x1ec] sm:$0xf0] }
  0xfe   :  { %v1217_v46 = vpop.f32.mrf.mxu3  ;;  %v1122_v51 = vpop.f32.mrf.mxu1 }
  0xff   :  { %v1218_v55 = vadd.f32 %v1217_v46, %v1169_v45  ;;  %v1123_v57 = vadd.f32 %v1122_v51, %v2789_v56  ;;  %v1779_v56 = vld [vmem:[%s3155_s0 + $0x19c] sm:$0xf0]  ;;  %v1829_v45 = vld [vmem:[%s3155_s0 + $0x1d0] sm:$0xf]  ;;  %v2217_v46 = vld [vmem:[%s3155_s0 + $0x1f0] sm:$0xf0] }
 0x100   :  { %v1269_v60 = vpop.f32.mrf.mxu0  ;;  %v1782_v23 = vor.u32 %v2202_v5, %v1779_v56 }
 0x101   :  { %1317 = vmatmul.bf16.gmra.mxu1 %v1746_v47  ;;  %1366 = vmatmul.bf16.gmra.mxu2 %v1750_v48  ;;  %v2989_v61 = vadd.f32 %v1266_v36, %v1218_v55 }
 0x103   :  { %1415 = vmatmul.bf16.gmra.mxu3 %v1754_v50  ;;  %1464 = vmatmul.bf16.gmra.mxu0 %v1758_v53  ;;  %v1822_v53 = vor.u32 %v2216_v43, %v1821_v42 }
 0x104   :  { %v1171_v62 = vpop.f32.mrf.mxu2 }
 0x105   :  { %v1172_v63 = vadd.f32 %v1171_v62, %v1123_v57 }
 0x106   :  { %v1220_v0 = vpop.f32.mrf.mxu3  ;;  %v1124_v59 = vpop.f32.mrf.mxu1 }
 0x107   :  { %v1221_v2 = vadd.f32 %v1220_v0, %v1172_v63  ;;  %v1125_v3 = vadd.f32 %v1124_v59, %v2821_v6  ;;  %v2203_v6 = vld [vmem:[%s3155_s0 + $0x184] sm:$0xf] }
 0x108   :  { %v1271_v4 = vpop.f32.mrf.mxu0  ;;  %v1790_v26 = vor.u32 %v2203_v6, %v1787_v12  ;;  %v2220_v6 = vld [vmem:[%s3155_s0 + $0x20c] sm:$0xf] }
 0x109   :  { %v2998_v7 = vadd.f32 %v1269_v60, %v1221_v2  ;;  %v1830_v60 = vor.u32 %v2217_v46, %v1829_v45 }
 0x10c   :  { %v1173_v21 = vpop.f32.mrf.mxu2 }
 0x10d   :  { %v1174_v14 = vadd.f32 %v1173_v21, %v1125_v3  ;;  %v1859_v21 = vld [vmem:[%s3155_s0 + $0x234] sm:$0xf0] }
 0x10e   :  { %v1222_v22 = vpop.f32.mrf.mxu3  ;;  %v1127_v25 = vpop.f32.mrf.mxu1 }
 0x10f   :  { %v1223_v11 = vadd.f32 %v1222_v22, %v1174_v14  ;;  %v1128_v20 = vadd.f32 %v1127_v25, %v2829_v16  ;;  %v1815_v16 = vld [vmem:[%s3155_s0 + $0x1e4] sm:$0xf0]  ;;  %v1865_v14 = vld [vmem:[%s3155_s0 + $0x218] sm:$0xf]  ;;  %v2226_v22 = vld [vmem:[%s3155_s0 + $0x238] sm:$0xf0] }
 0x110   :  { %v1274_v30 = vpop.f32.mrf.mxu0  ;;  %v1818_v50 = vor.u32 %v2211_v40, %v1815_v16 }
 0x111   :  { %1322 = vmatmul.bf16.gmra.mxu1 %v1782_v23  ;;  %1371 = vmatmul.bf16.gmra.mxu2 %v1786_v24  ;;  %v3019_v32 = vadd.f32 %v1271_v4, %v1223_v11 }
 0x113   :  { %1420 = vmatmul.bf16.gmra.mxu3 %v1790_v26  ;;  %1469 = vmatmul.bf16.gmra.mxu0 %v1794_v28  ;;  %v1858_v28 = vor.u32 %v2225_v17, %v1857_v13 }
 0x114   :  { %v1176_v33 = vpop.f32.mrf.mxu2 }
 0x115   :  { %v1177_v34 = vadd.f32 %v1176_v33, %v1128_v20 }
 0x116   :  { %v1225_v36 = vpop.f32.mrf.mxu3  ;;  %v1129_v37 = vpop.f32.mrf.mxu1 }
 0x117   :  { %v1226_v38 = vadd.f32 %v1225_v36, %v1177_v34  ;;  %v1130_v54 = vadd.f32 %v1129_v37, %v2862_v31  ;;  %v2212_v31 = vld [vmem:[%s3155_s0 + $0x1cc] sm:$0xf] }
 0x118   :  { %v1276_v19 = vpop.f32.mrf.mxu0  ;;  %v1826_v57 = vor.u32 %v2212_v31, %v1823_v44 }
 0x119   :  { %v3028_v41 = vadd.f32 %v1274_v30, %v1226_v38  ;;  %v1866_v30 = vor.u32 %v2226_v22, %v1865_v14 }
 0x11c   :  { %v1178_v47 = vpop.f32.mrf.mxu2 }
 0x11d   :  { %v1179_v48 = vadd.f32 %v1178_v47, %v1130_v54 }
 0x11e   :  { %v1227_v51 = vpop.f32.mrf.mxu3  ;;  %v1132_v55 = vpop.f32.mrf.mxu1 }
 0x11f   :  { %v1228_v62 = vadd.f32 %v1227_v51, %v1179_v48  ;;  %v1133_v63 = vadd.f32 %v1132_v55, %v2792_v58  ;;  %v1851_v58 = vld [vmem:[%s3155_s0 + $0x22c] sm:$0xf0] }
 0x120   :  { %v1279_v0 = vpop.f32.mrf.mxu0  ;;  %v1854_v26 = vor.u32 %v2220_v6, %v1851_v58 }
 0x121   :  { %1327 = vmatmul.bf16.gmra.mxu1 %v1818_v50  ;;  %1376 = vmatmul.bf16.gmra.mxu2 %v1822_v53  ;;  %v3049_v59 = vadd.f32 %v1276_v19, %v1228_v62 }
 0x123   :  { %1425 = vmatmul.bf16.gmra.mxu3 %v1826_v57  ;;  %1474 = vmatmul.bf16.gmra.mxu0 %v1830_v60 }
 0x124   :  { %v1181_v2 = vpop.f32.mrf.mxu2 }
 0x125   :  { %v1182_v3 = vadd.f32 %v1181_v2, %v1133_v63 }
 0x126   :  { %v1230_v4 = vpop.f32.mrf.mxu3  ;;  %v1134_v5 = vpop.f32.mrf.mxu1 }
 0x127   :  { %v1231_v56 = vadd.f32 %v1230_v4, %v1182_v3  ;;  %v1135_v8 = vadd.f32 %v1134_v5, %v2824_v10  ;;  %v2221_v10 = vld [vmem:[%s3155_s0 + $0x214] sm:$0xf] }
 0x128   :  { %v1281_v9 = vpop.f32.mrf.mxu0  ;;  %v1862_v20 = vor.u32 %v2221_v10, %v1859_v21 }
 0x129   :  { %v3058_v12 = vadd.f32 %v1279_v0, %v1231_v56 }
 0x12c   :  { %v1183_v23 = vpop.f32.mrf.mxu2 }
 0x12d   :  { %v1184_v24 = vadd.f32 %v1183_v23, %v1135_v8 }
 0x12e   :  { %v1232_v25 = vpop.f32.mrf.mxu3  ;;  %v1137_v11 = vpop.f32.mrf.mxu1 }
 0x12f   :  { %v1233_v33 = vadd.f32 %v1232_v25, %v1184_v24  ;;  %v1138_v34 = vadd.f32 %v1137_v11, %v2832_v18 }
 0x130   :  { %v1284_v36 = vpop.f32.mrf.mxu0 }
 0x131   :  { %1332 = vmatmul.bf16.gmra.mxu1 %v1854_v26  ;;  %1381 = vmatmul.bf16.gmra.mxu2 %v1858_v28  ;;  %v3079_v37 = vadd.f32 %v1281_v9, %v1233_v33 }
 0x133   :  { %1430 = vmatmul.bf16.gmra.mxu3 %v1862_v20  ;;  %1479 = vmatmul.bf16.gmra.mxu0 %v1866_v30 }
 0x134   :  { %v1186_v38 = vpop.f32.mrf.mxu2 }
 0x135   :  { %v1187_v54 = vadd.f32 %v1186_v38, %v1138_v34 }
 0x136   :  { %v1235_v19 = vpop.f32.mrf.mxu3  ;;  %v1139_v40 = vpop.f32.mrf.mxu1 }
 0x137   :  { %v1236_v16 = vadd.f32 %v1235_v19, %v1187_v54  ;;  %v1140_v42 = vadd.f32 %v1139_v40, %v2865_v35 }
 0x138   :  { %v1286_v43 = vpop.f32.mrf.mxu0 }
 0x139   :  { %v3082_v31 = vadd.f32 %v1284_v36, %v1236_v16 }
 0x13c   :  { %v1188_v44 = vpop.f32.mrf.mxu2 }
 0x13d   :  { %v1189_v45 = vadd.f32 %v1188_v44, %v1140_v42 }
 0x13e   :  { %v1237_v18 = vpop.f32.mrf.mxu3  ;;  %v1298_v46 = vpop.f32.mrf.mxu1 }
 0x13f   :  { %v1238_v47 = vadd.f32 %v1237_v18, %v1189_v45  ;;  %v1299_v50 = vadd.f32 %v1298_v46, %v2874_v52 }
 0x140   :  { %v1445_v48 = vpop.f32.mrf.mxu0 }
 0x141   :  { %v3084_v51 = vadd.f32 %v1286_v43, %v1238_v47 }
 0x144   :  { %v1347_v53 = vpop.f32.mrf.mxu2 }
 0x145   :  { %v1348_v55 = vadd.f32 %v1347_v53, %v1299_v50 }
 0x146   :  { %v1396_v57 = vpop.f32.mrf.mxu3  ;;  %v1300_v60 = vpop.f32.mrf.mxu1 }
 0x147   :  { %v1397_v62 = vadd.f32 %v1396_v57, %v1348_v55  ;;  %v1301_v0 = vadd.f32 %v1300_v60, %v2895_v15 }
 0x148   :  { %v1447_v63 = vpop.f32.mrf.mxu0 }
 0x149   :  { %v1446_v35 = vadd.f32 %v1445_v48, %v1397_v62 }
 0x14b   :  { %1485 = vst [vmem:[%s3156_s3] sm:$0xff] %v1446_v35  ;;  %v1522_v9 = vmul.f32 %v1446_v35, %v1446_v35 }
 0x14c   :  { %v1349_v2 = vpop.f32.mrf.mxu2 }
 0x14d   :  { %v1350_v3 = vadd.f32 %v1349_v2, %v1301_v0 }
 0x14e   :  { %v1398_v4 = vpop.f32.mrf.mxu3  ;;  %v1303_v5 = vpop.f32.mrf.mxu1 }
 0x14f   :  { %v1399_v56 = vadd.f32 %v1398_v4, %v1350_v3  ;;  %v1304_v13 = vadd.f32 %v1303_v5, %v2904_v29 }
 0x150   :  { %v1450_v8 = vpop.f32.mrf.mxu0 }
 0x151   :  { %v1448_v52 = vadd.f32 %v1447_v63, %v1399_v56 }
 0x153   :  { %1486 = vst [vmem:[%s3156_s3 + $0x8] sm:$0xff] %v1448_v52  ;;  %v1501_v6 = vadd.f32 %v1448_v52, %v1446_v35  ;;  %v1523_v58 = vmul.f32 %v1448_v52, %v1448_v52 }
 0x154   :  { %v1352_v17 = vpop.f32.mrf.mxu2 }
 0x155   :  { %v1538_v10 = vadd.f32 %v1523_v58, %v1522_v9  ;;  %v1353_v21 = vadd.f32 %v1352_v17, %v1304_v13 }
 0x156   :  { %v1401_v15 = vpop.f32.mrf.mxu3  ;;  %v1305_v14 = vpop.f32.mrf.mxu1 }
 0x157   :  { %v1402_v22 = vadd.f32 %v1401_v15, %v1353_v21  ;;  %v1306_v28 = vadd.f32 %v1305_v14, %v2926_v49 }
 0x158   :  { %v1452_v23 = vpop.f32.mrf.mxu0 }
 0x159   :  { %v1451_v24 = vadd.f32 %v1450_v8, %v1402_v22 }
 0x15b   :  { %1487 = vst [vmem:[%s3156_s3 + $0x10] sm:$0xff] %v1451_v24  ;;  %v1502_v25 = vadd.f32 %v1501_v6, %v1451_v24  ;;  %v1524_v26 = vmul.f32 %v1451_v24, %v1451_v24 }
 0x15c   :  { %v1354_v11 = vpop.f32.mrf.mxu2 }
 0x15d   :  { %v1539_v20 = vadd.f32 %v1538_v10, %v1524_v26  ;;  %v1355_v30 = vadd.f32 %v1354_v11, %v1306_v28 }
 0x15e   :  { %v1403_v29 = vpop.f32.mrf.mxu3  ;;  %v1308_v33 = vpop.f32.mrf.mxu1 }
 0x15f   :  { %v1404_v34 = vadd.f32 %v1403_v29, %v1355_v30  ;;  %v1309_v40 = vadd.f32 %v1308_v33, %v2936_v1 }
 0x160   :  { %v1455_v36 = vpop.f32.mrf.mxu0 }
 0x161   :  { %v1453_v38 = vadd.f32 %v1452_v23, %v1404_v34 }
 0x163   :  { %1488 = vst [vmem:[%s3156_s3 + $0x18] sm:$0xff] %v1453_v38  ;;  %v1503_v54 = vadd.f32 %v1502_v25, %v1453_v38  ;;  %v1525_v19 = vmul.f32 %v1453_v38, %v1453_v38 }
 0x164   :  { %v1357_v16 = vpop.f32.mrf.mxu2 }
 0x165   :  { %v1540_v42 = vadd.f32 %v1539_v20, %v1525_v19  ;;  %v1358_v43 = vadd.f32 %v1357_v16, %v1309_v40 }
 0x166   :  { %v1406_v49 = vpop.f32.mrf.mxu3  ;;  %v1310_v44 = vpop.f32.mrf.mxu1 }
 0x167   :  { %v1407_v45 = vadd.f32 %v1406_v49, %v1358_v43  ;;  %v1311_v50 = vadd.f32 %v1310_v44, %v2958_v27 }
 0x168   :  { %v1457_v18 = vpop.f32.mrf.mxu0 }
 0x169   :  { %v1456_v46 = vadd.f32 %v1455_v36, %v1407_v45 }
 0x16b   :  { %1489 = vst [vmem:[%s3156_s3 + $0x20] sm:$0xff] %v1456_v46  ;;  %v1504_v47 = vadd.f32 %v1503_v54, %v1456_v46  ;;  %v1526_v48 = vmul.f32 %v1456_v46, %v1456_v46 }
 0x16c   :  { %v1359_v53 = vpop.f32.mrf.mxu2 }
 0x16d   :  { %v1541_v55 = vadd.f32 %v1540_v42, %v1526_v48  ;;  %v1360_v57 = vadd.f32 %v1359_v53, %v1311_v50 }
 0x16e   :  { %v1408_v1 = vpop.f32.mrf.mxu3  ;;  %v1313_v60 = vpop.f32.mrf.mxu1 }
 0x16f   :  { %v1409_v62 = vadd.f32 %v1408_v1, %v1360_v57  ;;  %v1314_v3 = vadd.f32 %v1313_v60, %v2968_v39 }
 0x170   :  { %v1460_v63 = vpop.f32.mrf.mxu0 }
 0x171   :  { %v1458_v35 = vadd.f32 %v1457_v18, %v1409_v62 }
 0x173   :  { %1490 = vst [vmem:[%s3156_s3 + $0x28] sm:$0xff] %v1458_v35  ;;  %v1505_v0 = vadd.f32 %v1504_v47, %v1458_v35  ;;  %v1527_v2 = vmul.f32 %v1458_v35, %v1458_v35 }
 0x174   :  { %v1362_v4 = vpop.f32.mrf.mxu2 }
 0x175   :  { %v1542_v5 = vadd.f32 %v1541_v55, %v1527_v2  ;;  %v1363_v56 = vadd.f32 %v1362_v4, %v1314_v3 }
 0x176   :  { %v1411_v27 = vpop.f32.mrf.mxu3  ;;  %v1315_v8 = vpop.f32.mrf.mxu1 }
 0x177   :  { %v1412_v52 = vadd.f32 %v1411_v27, %v1363_v56  ;;  %v1316_v17 = vadd.f32 %v1315_v8, %v2989_v61 }
 0x178   :  { %v1462_v9 = vpop.f32.mrf.mxu0 }
 0x179   :  { %v1461_v6 = vadd.f32 %v1460_v63, %v1412_v52 }
 0x17b   :  { %1491 = vst [vmem:[%s3156_s3 + $0x30] sm:$0xff] %v1461_v6  ;;  %v1506_v58 = vadd.f32 %v1505_v0, %v1461_v6  ;;  %v1528_v13 = vmul.f32 %v1461_v6, %v1461_v6 }
 0x17c   :  { %v1364_v10 = vpop.f32.mrf.mxu2 }
 0x17d   :  { %v1543_v21 = vadd.f32 %v1542_v5, %v1528_v13  ;;  %v1365_v15 = vadd.f32 %v1364_v10, %v1316_v17 }
 0x17e   :  { %v1413_v39 = vpop.f32.mrf.mxu3  ;;  %v1318_v14 = vpop.f32.mrf.mxu1 }
 0x17f   :  { %v1414_v22 = vadd.f32 %v1413_v39, %v1365_v15  ;;  %v1319_v28 = vadd.f32 %v1318_v14, %v2998_v7 }
 0x180   :  { %v1465_v23 = vpop.f32.mrf.mxu0 }
 0x181   :  { %v1463_v24 = vadd.f32 %v1462_v9, %v1414_v22 }
 0x183   :  { %1492 = vst [vmem:[%s3156_s3 + $0x38] sm:$0xff] %v1463_v24  ;;  %v1507_v25 = vadd.f32 %v1506_v58, %v1463_v24  ;;  %v1529_v26 = vmul.f32 %v1463_v24, %v1463_v24 }
 0x184   :  { %v1367_v11 = vpop.f32.mrf.mxu2 }
 0x185   :  { %v1544_v20 = vadd.f32 %v1543_v21, %v1529_v26  ;;  %v1368_v30 = vadd.f32 %v1367_v11, %v1319_v28 }
 0x186   :  { %v1416_v61 = vpop.f32.mrf.mxu3  ;;  %v1320_v29 = vpop.f32.mrf.mxu1 }
 0x187   :  { %v1417_v33 = vadd.f32 %v1416_v61, %v1368_v30  ;;  %v1321_v19 = vadd.f32 %v1320_v29, %v3019_v32 }
 0x188   :  { %v1467_v34 = vpop.f32.mrf.mxu0 }
 0x189   :  { %v1466_v36 = vadd.f32 %v1465_v23, %v1417_v33 }
 0x18b   :  { %1493 = vst [vmem:[%s3156_s3 + $0x40] sm:$0xff] %v1466_v36  ;;  %v1508_v38 = vadd.f32 %v1507_v25, %v1466_v36  ;;  %v1530_v54 = vmul.f32 %v1466_v36, %v1466_v36 }
 0x18c   :  { %v1369_v40 = vpop.f32.mrf.mxu2 }
 0x18d   :  { %v1545_v16 = vadd.f32 %v1544_v20, %v1530_v54  ;;  %v1370_v42 = vadd.f32 %v1369_v40, %v1321_v19 }
 0x18e   :  { %v1418_v7 = vpop.f32.mrf.mxu3  ;;  %v1323_v43 = vpop.f32.mrf.mxu1 }
 0x18f   :  { %v1419_v49 = vadd.f32 %v1418_v7, %v1370_v42  ;;  %v1324_v47 = vadd.f32 %v1323_v43, %v3028_v41 }
 0x190   :  { %v1470_v44 = vpop.f32.mrf.mxu0 }
 0x191   :  { %v1468_v45 = vadd.f32 %v1467_v34, %v1419_v49 }
 0x193   :  { %1494 = vst [vmem:[%s3156_s3 + $0x48] sm:$0xff] %v1468_v45  ;;  %v1509_v18 = vadd.f32 %v1508_v38, %v1468_v45  ;;  %v1531_v46 = vmul.f32 %v1468_v45, %v1468_v45 }
 0x194   :  { %v1372_v48 = vpop.f32.mrf.mxu2 }
 0x195   :  { %v1546_v50 = vadd.f32 %v1545_v16, %v1531_v46  ;;  %v1373_v53 = vadd.f32 %v1372_v48, %v1324_v47 }
 0x196   :  { %v1421_v32 = vpop.f32.mrf.mxu3  ;;  %v1325_v55 = vpop.f32.mrf.mxu1 }
 0x197   :  { %v1422_v57 = vadd.f32 %v1421_v32, %v1373_v53  ;;  %v1326_v35 = vadd.f32 %v1325_v55, %v3049_v59  ;;  %v1559_v55 = vlaneseq }
 0x198   :  { %v1472_v1 = vpop.f32.mrf.mxu0 }
 0x199   :  { %v1471_v60 = vadd.f32 %v1470_v44, %v1422_v57 }
 0x19b   :  { %1495 = vst [vmem:[%s3156_s3 + $0x50] sm:$0xff] %v1471_v60  ;;  %v1510_v62 = vadd.f32 %v1509_v18, %v1471_v60  ;;  %v1532_v63 = vmul.f32 %v1471_v60, %v1471_v60 }
 0x19c   :  { %v1374_v0 = vpop.f32.mrf.mxu2 }
 0x19d   :  { %v1547_v2 = vadd.f32 %v1546_v50, %v1532_v63  ;;  %v1375_v3 = vadd.f32 %v1374_v0, %v1326_v35 }
 0x19e   :  { %v1423_v41 = vpop.f32.mrf.mxu3  ;;  %v1328_v4 = vpop.f32.mrf.mxu1 }
 0x19f   :  { %v1424_v5 = vadd.f32 %v1423_v41, %v1375_v3  ;;  %v1329_v9 = vadd.f32 %v1328_v4, %v3058_v12 }
 0x1a0   :  { %v1475_v27 = vpop.f32.mrf.mxu0 }
 0x1a1   :  { %v1473_v56 = vadd.f32 %v1472_v1, %v1424_v5 }
 0x1a3   :  { %1496 = vst [vmem:[%s3156_s3 + $0x58] sm:$0xff] %v1473_v56  ;;  %v1511_v8 = vadd.f32 %v1510_v62, %v1473_v56  ;;  %v1533_v52 = vmul.f32 %v1473_v56, %v1473_v56  ;;  %v1560_v62 = vshrl.u32 %v1559_v55, 7 }
 0x1a4   :  { %v1377_v6 = vpop.f32.mrf.mxu2 }
 0x1a5   :  { %v1548_v58 = vadd.f32 %v1547_v2, %v1533_v52  ;;  %v1378_v13 = vadd.f32 %v1377_v6, %v1329_v9  ;;  %vm1561_vm0 = vcmp.eq.s32.totalorder %v1560_v62, 0  ;;  %vm1565_vm1 = vcmp.eq.s32.totalorder %v1560_v62, 1 }
 0x1a6   :  { %v1426_v59 = vpop.f32.mrf.mxu3  ;;  %v1330_v17 = vpop.f32.mrf.mxu1 }
 0x1a7   :  { %v1427_v10 = vadd.f32 %v1426_v59, %v1378_v13  ;;  %v1331_v14 = vadd.f32 %v1330_v17, %v3079_v37 }
 0x1a8   :  { %v1477_v22 = vpop.f32.mrf.mxu0 }
 0x1a9   :  { %v1476_v21 = vadd.f32 %v1475_v27, %v1427_v10 }
 0x1ab   :  { %1497 = vst [vmem:[%s3156_s3 + $0x60] sm:$0xff] %v1476_v21  ;;  %v1512_v15 = vadd.f32 %v1511_v8, %v1476_v21  ;;  %v1534_v39 = vmul.f32 %v1476_v21, %v1476_v21 }
 0x1ac   :  { %v1379_v23 = vpop.f32.mrf.mxu2 }
 0x1ad   :  { %v1549_v24 = vadd.f32 %v1548_v58, %v1534_v39  ;;  %v1380_v25 = vadd.f32 %v1379_v23, %v1331_v14 }
 0x1ae   :  { %v1428_v12 = vpop.f32.mrf.mxu3  ;;  %v1333_v26 = vpop.f32.mrf.mxu1 }
 0x1af   :  { %v1429_v28 = vadd.f32 %v1428_v12, %v1380_v25  ;;  %v1334_v61 = vadd.f32 %v1333_v26, %v3082_v31 }
 0x1b0   :  { %v1480_v36 = vpop.f32.mrf.mxu0 }
 0x1b1   :  { %v1478_v11 = vadd.f32 %v1477_v22, %v1429_v28 }
 0x1b3   :  { %1498 = vst [vmem:[%s3156_s3 + $0x68] sm:$0xff] %v1478_v11  ;;  %v1513_v20 = vadd.f32 %v1512_v15, %v1478_v11  ;;  %v1535_v30 = vmul.f32 %v1478_v11, %v1478_v11 }
 0x1b4   :  { %v1382_v29 = vpop.f32.mrf.mxu2 }
 0x1b5   :  { %v1550_v33 = vadd.f32 %v1549_v24, %v1535_v30  ;;  %v1383_v34 = vadd.f32 %v1382_v29, %v1334_v61 }
 0x1b6   :  { %v1431_v37 = vpop.f32.mrf.mxu3  ;;  %v1335_v54 = vpop.f32.mrf.mxu1 }
 0x1b7   :  { %v1432_v38 = vadd.f32 %v1431_v37, %v1383_v34  ;;  %v1336_v42 = vadd.f32 %v1335_v54, %v3084_v51 }
 0x1b8   :  { %v1482_v45 = vpop.f32.mrf.mxu0 }
 0x1b9   :  { %v1481_v19 = vadd.f32 %v1480_v36, %v1432_v38 }
 0x1bb   :  { %1499 = vst [vmem:[%s3156_s3 + $0x70] sm:$0xff] %v1481_v19  ;;  %v1514_v40 = vadd.f32 %v1513_v20, %v1481_v19  ;;  %v1536_v16 = vmul.f32 %v1481_v19, %v1481_v19 }
 0x1bc   :  { %v1384_v7 = vpop.f32.mrf.mxu2 }
 0x1bd   :  { %v1551_v43 = vadd.f32 %v1550_v33, %v1536_v16  ;;  %v1385_v49 = vadd.f32 %v1384_v7, %v1336_v42 }
 0x1be   :  { %v1433_v31 = vpop.f32.mrf.mxu3 }
 0x1bf   :  { %v1434_v44 = vadd.f32 %v1433_v31, %v1385_v49 }
 0x1c1   :  { %v1483_v18 = vadd.f32 %v1482_v45, %v1434_v44 }
 0x1c3   :  { %1500 = vst [vmem:[%s3156_s3 + $0x78] sm:$0xff] %v1483_v18  ;;  %v1515_v46 = vadd.f32 %v1514_v40, %v1483_v18  ;;  %v1537_v47 = vmul.f32 %v1483_v18, %v1483_v18 }
 0x1c5   :  { %v1516_v48 = vrot.slane %v1515_v46, 4  ;;  %v1552_v50 = vadd.f32 %v1551_v43, %v1537_v47 }
 0x1c7   :  { %v1517_v53 = vadd.f32 %v1516_v48, %v1515_v46  ;;  %v1553_v32 = vrot.slane %v1552_v50, 4 }
 0x1c9   :  { %v1518_v57 = vrot.slane %v1517_v53, 2  ;;  %v1554_v51 = vadd.f32 %v1553_v32, %v1552_v50 }
 0x1cb   :  { %v1519_v1 = vadd.f32 %v1518_v57, %v1517_v53  ;;  %v1555_v60 = vrot.slane %v1554_v51, 2 }
 0x1cd   :  { %v1520_v63 = vrot.slane %v1519_v1, 1  ;;  %v1556_v35 = vadd.f32 %v1555_v60, %v1554_v51 }
 0x1cf   :  { %v1521_v0 = vadd.f32 %v1520_v63, %v1519_v1  ;;  %v1557_v2 = vrot.slane %v1556_v35, 1 }
 0x1d1   :  { %v1558_v3 = vadd.f32 %v1557_v2, %v1556_v35  ;;  %v1564_v41 = vsel %vm1561_vm0, %v1521_v0, 0.0 }
 0x1d3   :  { %v1568_v4 = vsel %vm1565_vm1, %v1558_v3, 0.0 }
 0x1d4   :  { %v1569_v5 = vadd.f32 %v1568_v4, %v1564_v41 }
 0x1d6   :  { %1570 = vst [vmem:[%s3157_s4] sm:$0xff] %v1569_v5 }

// kernel: vqvae_forward.44
= control target key start
LH: loop header
LB: loop body
LE: loop exit
PB: predicated region body
PF: predicated region fallthrough
CT: control target
= control target key end

     0   :  { %vm93_vm0 = vcmask 261120   ;;  %s449_s1 = inlined_call_operand.vmem [shape: bf16[32,128], index: 1, kind: input, shape index: {}]   ;;  %s450_s0 = inlined_call_operand.vmem [shape: bf16[128,32], index: 0, kind: input, shape index: {}]   ;;  %s451_s2 = inlined_call_operand.vmem [shape: f32[1,128], index: 2, kind: input, shape index: {}]   ;;  %s452_s3 = inlined_call_operand.vmem [shape: f32[128,128], index: 3, kind: output, shape index: {0}]   ;;  %s453_s4 = inlined_call_operand.vmem [shape: f32[8,128], index: 4, kind: output, shape index: {1}]  }
   0x1   :  { %v318_v0 = vld [vmem:[%s449_s1 + $0x8] sm:$0xff]  ;;  %v317_v1 = vld [vmem:[%s449_s1] sm:$0xff]  ;;  %v311_v3 = vld [vmem:[%s450_s0 + $0x10] sm:$0xff] }
   0x2   :  { %124 = vmatpush.bf16.msra.mxu0 %v318_v0  ;;  %319 = vmatpush.bf16.msra.mxu1 %v318_v0  ;;  %v309_v2 = vld [vmem:[%s450_s0] sm:$0xff]  ;;  %v315_v5 = vld [vmem:[%s450_s0 + $0x30] sm:$0xff]  ;;  %v310_v6 = vld [vmem:[%s450_s0 + $0x8] sm:$0xff] }
   0x3   :  { %320 = vmatpush.bf16.msra.mxu2 %v318_v0  ;;  %321 = vmatpush.bf16.msra.mxu3 %v318_v0  ;;  %v313_v4 = vld [vmem:[%s450_s0 + $0x20] sm:$0xff]  ;;  %v312_v7 = vld [vmem:[%s450_s0 + $0x18] sm:$0xff]  ;;  %v314_v8 = vld [vmem:[%s450_s0 + $0x28] sm:$0xff] }
   0x4   :  { %v316_v9 = vld [vmem:[%s450_s0 + $0x38] sm:$0xff]  ;;  %v325_v10 = vld [vmem:[%s451_s2] ss:$0 sm:$0xff] }
   0x6   :  { %125 = vmatpush.bf16.msra.mxu0 %v317_v1  ;;  %322 = vmatpush.bf16.msra.mxu1 %v317_v1 }
   0x7   :  { %323 = vmatpush.bf16.msra.mxu2 %v317_v1  ;;  %324 = vmatpush.bf16.msra.mxu3 %v317_v1 }
   0x9   :  { %301 = vmatmul.msk.bf16.vlgmr.msra.gmra.mxu0 %vm93_vm0, %v309_v2  ;;  %303 = vmatmul.msk.bf16.vlgmr.msra.gmra.mxu1 %vm93_vm0, %v311_v3 }
   0xa   :  { %305 = vmatmul.msk.bf16.vlgmr.msra.gmra.mxu2 %vm93_vm0, %v313_v4  ;;  %307 = vmatmul.msk.bf16.vlgmr.msra.gmra.mxu3 %vm93_vm0, %v315_v5 }
  0x19   :  { %302 = vmatmul.msk.bf16.gmra.mxu0 %vm93_vm0, %v310_v6  ;;  %304 = vmatmul.msk.bf16.gmra.mxu1 %vm93_vm0, %v312_v7 }
  0x1a   :  { %306 = vmatmul.msk.bf16.gmra.mxu2 %vm93_vm0, %v314_v8  ;;  %308 = vmatmul.msk.bf16.gmra.mxu3 %vm93_vm0, %v316_v9 }
  0x86   :  { %v127_v11 = vpop.f32.mrf.mxu0  ;;  %v137_v12 = vpop.f32.mrf.mxu1 }
  0x87   :  { %v128_v13 = vadd.f32 %v325_v10, %v127_v11  ;;  %v138_v14 = vadd.f32 %v325_v10, %v137_v12 }
  0x89   :  { %167 = vst [vmem:[%s452_s3] sm:$0xff] %v128_v13  ;;  %v204_v32 = vmul.f32 %v128_v13, %v128_v13  ;;  %v208_v48 = vmul.f32 %v138_v14, %v138_v14 }
  0x8a   :  { %171 = vst [vmem:[%s452_s3 + $0x20] sm:$0xff] %v138_v14 }
  0x8d   :  { %v147_v15 = vpop.f32.mrf.mxu2  ;;  %v157_v16 = vpop.f32.mrf.mxu3 }
  0x8e   :  { %v129_v17 = vpop.f32.mrf.mxu0  ;;  %v139_v18 = vpop.f32.mrf.mxu1  ;;  %v148_v19 = vadd.f32 %v325_v10, %v147_v15  ;;  %v398_v22 = vadd.f32 %v325_v10, %v157_v16 }
  0x8f   :  { %v130_v20 = vadd.f32 %v325_v10, %v129_v17  ;;  %v140_v21 = vadd.f32 %v325_v10, %v139_v18 }
  0x90   :  { %175 = vst [vmem:[%s452_s3 + $0x40] sm:$0xff] %v148_v19  ;;  %v212_v0 = vmul.f32 %v148_v19, %v148_v19  ;;  %v216_v12 = vmul.f32 %v398_v22, %v398_v22 }
  0x91   :  { %168 = vst [vmem:[%s452_s3 + $0x8] sm:$0xff] %v130_v20  ;;  %v205_v31 = vmul.f32 %v130_v20, %v130_v20  ;;  %v183_v33 = vadd.f32 %v130_v20, %v128_v13  ;;  %v209_v51 = vmul.f32 %v140_v21, %v140_v21 }
  0x92   :  { %172 = vst [vmem:[%s452_s3 + $0x28] sm:$0xff] %v140_v21 }
  0x93   :  { %179 = vst [vmem:[%s452_s3 + $0x60] sm:$0xff] %v398_v22  ;;  %v220_v37 = vadd.f32 %v205_v31, %v204_v32 }
  0x95   :  { %v149_v23 = vpop.f32.mrf.mxu2  ;;  %v159_v24 = vpop.f32.mrf.mxu3 }
  0x96   :  { %v132_v25 = vpop.f32.mrf.mxu0  ;;  %v142_v26 = vpop.f32.mrf.mxu1  ;;  %v150_v27 = vadd.f32 %v325_v10, %v149_v23  ;;  %v160_v30 = vadd.f32 %v325_v10, %v159_v24 }
  0x97   :  { %v133_v28 = vadd.f32 %v325_v10, %v132_v25  ;;  %v143_v29 = vadd.f32 %v325_v10, %v142_v26 }
  0x98   :  { %176 = vst [vmem:[%s452_s3 + $0x48] sm:$0xff] %v150_v27  ;;  %v213_v3 = vmul.f32 %v150_v27, %v150_v27  ;;  %v217_v15 = vmul.f32 %v160_v30, %v160_v30 }
  0x99   :  { %169 = vst [vmem:[%s452_s3 + $0x10] sm:$0xff] %v133_v28  ;;  %v206_v34 = vmul.f32 %v133_v28, %v133_v28  ;;  %v184_v41 = vadd.f32 %v183_v33, %v133_v28  ;;  %v210_v58 = vmul.f32 %v143_v29, %v143_v29 }
  0x9a   :  { %173 = vst [vmem:[%s452_s3 + $0x30] sm:$0xff] %v143_v29 }
  0x9b   :  { %180 = vst [vmem:[%s452_s3 + $0x68] sm:$0xff] %v160_v30  ;;  %v221_v45 = vadd.f32 %v220_v37, %v206_v34 }
  0x9d   :  { %v152_v35 = vpop.f32.mrf.mxu2  ;;  %v162_v36 = vpop.f32.mrf.mxu3 }
  0x9e   :  { %v134_v38 = vpop.f32.mrf.mxu0  ;;  %v144_v39 = vpop.f32.mrf.mxu1  ;;  %v153_v40 = vadd.f32 %v325_v10, %v152_v35  ;;  %v163_v44 = vadd.f32 %v325_v10, %v162_v36 }
  0x9f   :  { %v135_v42 = vadd.f32 %v325_v10, %v134_v38  ;;  %v145_v43 = vadd.f32 %v325_v10, %v144_v39 }
  0xa0   :  { %177 = vst [vmem:[%s452_s3 + $0x50] sm:$0xff] %v153_v40  ;;  %v214_v7 = vmul.f32 %v153_v40, %v153_v40 }
  0xa1   :  { %170 = vst [vmem:[%s452_s3 + $0x18] sm:$0xff] %v135_v42  ;;  %v185_v46 = vadd.f32 %v184_v41, %v135_v42  ;;  %v207_v47 = vmul.f32 %v135_v42, %v135_v42  ;;  %v211_v62 = vmul.f32 %v145_v43, %v145_v43 }
  0xa2   :  { %174 = vst [vmem:[%s452_s3 + $0x38] sm:$0xff] %v145_v43 }
  0xa3   :  { %v186_v49 = vadd.f32 %v185_v46, %v138_v14  ;;  %v222_v50 = vadd.f32 %v221_v45, %v207_v47  ;;  %181 = vst [vmem:[%s452_s3 + $0x70] sm:$0xff] %v163_v44 }
  0xa5   :  { %v223_v52 = vadd.f32 %v222_v50, %v208_v48  ;;  %v187_v53 = vadd.f32 %v186_v49, %v140_v21  ;;  %v154_v54 = vpop.f32.mrf.mxu2  ;;  %v164_v55 = vpop.f32.mrf.mxu3 }
  0xa6   :  { %v155_v56 = vadd.f32 %v325_v10, %v154_v54  ;;  %v165_v57 = vadd.f32 %v325_v10, %v164_v55 }
  0xa7   :  { %v188_v59 = vadd.f32 %v187_v53, %v143_v29  ;;  %v224_v60 = vadd.f32 %v223_v52, %v209_v51  ;;  %v241_v29 = vlaneseq }
  0xa8   :  { %178 = vst [vmem:[%s452_s3 + $0x58] sm:$0xff] %v155_v56  ;;  %v215_v11 = vmul.f32 %v155_v56, %v155_v56  ;;  %v219_v24 = vmul.f32 %v165_v57, %v165_v57 }
  0xa9   :  { %v189_v61 = vadd.f32 %v188_v59, %v145_v43  ;;  %v225_v63 = vadd.f32 %v224_v60, %v210_v58  ;;  %182 = vst [vmem:[%s452_s3 + $0x78] sm:$0xff] %v165_v57 }
  0xab   :  { %v190_v1 = vadd.f32 %v189_v61, %v148_v19  ;;  %v226_v2 = vadd.f32 %v225_v63, %v211_v62  ;;  %v218_v19 = vmul.f32 %v163_v44, %v163_v44 }
  0xad   :  { %v227_v4 = vadd.f32 %v226_v2, %v212_v0  ;;  %v191_v5 = vadd.f32 %v190_v1, %v150_v27 }
  0xaf   :  { %v192_v6 = vadd.f32 %v191_v5, %v153_v40  ;;  %v228_v8 = vadd.f32 %v227_v4, %v213_v3 }
  0xb1   :  { %v229_v9 = vadd.f32 %v228_v8, %v214_v7  ;;  %v193_v10 = vadd.f32 %v192_v6, %v155_v56 }
  0xb3   :  { %v194_v13 = vadd.f32 %v193_v10, %v398_v22  ;;  %v230_v14 = vadd.f32 %v229_v9, %v215_v11  ;;  %v242_v22 = vshrl.u32 %v241_v29, 7 }
  0xb5   :  { %v231_v16 = vadd.f32 %v230_v14, %v216_v12  ;;  %v195_v17 = vadd.f32 %v194_v13, %v160_v30  ;;  %vm243_vm1 = vcmp.eq.s32.totalorder %v242_v22, 0  ;;  %vm247_vm2 = vcmp.eq.s32.totalorder %v242_v22, 1 }
  0xb7   :  { %v196_v18 = vadd.f32 %v195_v17, %v163_v44  ;;  %v232_v20 = vadd.f32 %v231_v16, %v217_v15 }
  0xb9   :  { %v233_v21 = vadd.f32 %v232_v20, %v218_v19  ;;  %v197_v23 = vadd.f32 %v196_v18, %v165_v57 }
  0xbb   :  { %v198_v25 = vrot.slane %v197_v23, 4  ;;  %v234_v26 = vadd.f32 %v233_v21, %v219_v24 }
  0xbd   :  { %v199_v27 = vadd.f32 %v198_v25, %v197_v23  ;;  %v235_v28 = vrot.slane %v234_v26, 4 }
  0xbf   :  { %v200_v31 = vrot.slane %v199_v27, 2  ;;  %v236_v32 = vadd.f32 %v235_v28, %v234_v26 }
  0xc1   :  { %v201_v33 = vadd.f32 %v200_v31, %v199_v27  ;;  %v237_v34 = vrot.slane %v236_v32, 2 }
  0xc3   :  { %v202_v35 = vrot.slane %v201_v33, 1  ;;  %v238_v36 = vadd.f32 %v237_v34, %v236_v32 }
  0xc5   :  { %v203_v37 = vadd.f32 %v202_v35, %v201_v33  ;;  %v239_v30 = vrot.slane %v238_v36, 1 }
  0xc7   :  { %v240_v38 = vadd.f32 %v239_v30, %v238_v36  ;;  %v246_v39 = vsel %vm243_vm1, %v203_v37, 0.0 }
  0xc9   :  { %v250_v40 = vsel %vm247_vm2, %v240_v38, 0.0 }
  0xca   :  { %v251_v41 = vadd.f32 %v250_v40, %v246_v39 }
  0xcc   :  { %252 = vst [vmem:[%s453_s4] sm:$0xff] %v251_v41 }

// kernel: vqvae_forward.42
= control target key start
LH: loop header
LB: loop body
LE: loop exit
PB: predicated region body
PF: predicated region fallthrough
CT: control target
= control target key end

     0   :  { %vm317_vm0 = vcmask 261120   ;;  %s1220_s1 = inlined_call_operand.vmem [shape: bf16[288,32], index: 1, kind: input, shape index: {}]   ;;  %s1221_s0 = inlined_call_operand.vmem [shape: bf16[128,288], index: 0, kind: input, shape index: {}]   ;;  %s1222_s2 = inlined_call_operand.vmem [shape: f32[1,32], index: 2, kind: input, shape index: {}]   ;;  %s1223_s3 = inlined_call_operand.vmem [shape: f32[128,32], index: 3, kind: output, shape index: {0}]   ;;  %s1224_s4 = inlined_call_operand.vmem [shape: f32[8,32], index: 4, kind: output, shape index: {1}]  }
   0x1   :  { %v822_v0 = vld [vmem:[%s1220_s1 + $0x38] sm:$0xff]  ;;  %v832_v2 = vld [vmem:[%s1220_s1 + $0x88] sm:$0xff]  ;;  %v821_v3 = vld [vmem:[%s1220_s1 + $0x30] sm:$0xff] }
   0x2   :  { %v830_v1 = vld [vmem:[%s1220_s1 + $0x78] sm:$0xff]  ;;  %342 = vmatpush.bf16.msra.mxu0 %v822_v0  ;;  %833 = vmatpush.bf16.msra.mxu3 %v822_v0  ;;  %v829_v4 = vld [vmem:[%s1220_s1 + $0x70] sm:$0xff]  ;;  %v831_v5 = vld [vmem:[%s1220_s1 + $0x80] sm:$0xff] }
   0x3   :  { %391 = vmatpush.bf16.msra.mxu1 %v830_v1  ;;  %446 = vmatpush.bf16.msra.mxu2 %v832_v2  ;;  %v625_v6 = vld [vmem:[%s1221_s0 + $0x8] sm:$0xf]  ;;  %v793_v7 = vld [vmem:[%s1221_s0 + $0x10] sm:$0xf0]  ;;  %v819_v11 = vld [vmem:[%s1220_s1 + $0x20] sm:$0xff] }
   0x4   :  { %v626_v8 = vor.u32 %v793_v7, %v625_v6  ;;  %v820_v9 = vld [vmem:[%s1220_s1 + $0x28] sm:$0xff]  ;;  %v827_v12 = vld [vmem:[%s1220_s1 + $0x60] sm:$0xff]  ;;  %v818_v13 = vld [vmem:[%s1220_s1 + $0x18] sm:$0xff] }
   0x5   :  { %v828_v10 = vld [vmem:[%s1220_s1 + $0x68] sm:$0xff]  ;;  %v826_v14 = vld [vmem:[%s1220_s1 + $0x58] sm:$0xff]  ;;  %v817_v15 = vld [vmem:[%s1220_s1 + $0x10] sm:$0xff] }
   0x6   :  { %343 = vmatpush.bf16.msra.mxu0 %v821_v3  ;;  %834 = vmatpush.bf16.msra.mxu3 %v821_v3  ;;  %v825_v16 = vld [vmem:[%s1220_s1 + $0x50] sm:$0xff]  ;;  %v637_v17 = vld [vmem:[%s1221_s0 + $0x20] sm:$0xf]  ;;  %v796_v18 = vld [vmem:[%s1221_s0 + $0x28] sm:$0xf0] }
   0x7   :  { %392 = vmatpush.bf16.msra.mxu1 %v829_v4  ;;  %447 = vmatpush.bf16.msra.mxu2 %v831_v5  ;;  %v638_v19 = vor.u32 %v796_v18, %v637_v17  ;;  %v816_v20 = vld [vmem:[%s1220_s1 + $0x8] sm:$0xff]  ;;  %v815_v22 = vld [vmem:[%s1220_s1] sm:$0xff]  ;;  %v689_v26 = vld [vmem:[%s1221_s0 + $0x90] sm:$0xf] }
   0x8   :  { %v824_v21 = vld [vmem:[%s1220_s1 + $0x48] sm:$0xff]  ;;  %v823_v23 = vld [vmem:[%s1220_s1 + $0x40] sm:$0xff]  ;;  %v810_v27 = vld [vmem:[%s1221_s0 + $0x98] sm:$0xf0] }
   0x9   :  { %v617_v24 = vld [vmem:[%s1221_s0] sm:$0xf]  ;;  %v792_v25 = vld [vmem:[%s1221_s0 + $0x8] sm:$0xf0]  ;;  %v791_v28 = vld [vmem:[%s1221_s0 + $0x4] sm:$0xf]  ;;  %v690_v31 = vor.u32 %v810_v27, %v689_v26 }
   0xa   :  { %783 = vmatmul.msk.bf16.vlgmr.msra.gmra.mxu2 %vm317_vm0, %v626_v8  ;;  %344 = vmatpush.bf16.msra.mxu0 %v820_v9  ;;  %v619_v29 = vld [vmem:[%s1221_s0 + $0xc] sm:$0xf0]  ;;  %v618_v30 = vor.u32 %v792_v25, %v617_v24  ;;  %v649_v33 = vld [vmem:[%s1221_s0 + $0x38] sm:$0xf]  ;;  %v799_v34 = vld [vmem:[%s1221_s0 + $0x40] sm:$0xf0] }
   0xb   :  { %835 = vmatpush.bf16.msra.mxu3 %v820_v9  ;;  %393 = vmatpush.bf16.msra.mxu1 %v828_v10  ;;  %v622_v32 = vor.u32 %v791_v28, %v619_v29  ;;  %v650_v35 = vor.u32 %v799_v34, %v649_v33  ;;  %v629_v36 = vld [vmem:[%s1221_s0 + $0x18] sm:$0xf]  ;;  %v795_v37 = vld [vmem:[%s1221_s0 + $0x20] sm:$0xf0]  ;;  %v701_v38 = vld [vmem:[%s1221_s0 + $0xa8] sm:$0xf] }
   0xc   :  { %v813_v39 = vld [vmem:[%s1221_s0 + $0xb0] sm:$0xf0]  ;;  %v794_v40 = vld [vmem:[%s1221_s0 + $0x1c] sm:$0xf]  ;;  %v631_v41 = vld [vmem:[%s1221_s0 + $0x24] sm:$0xf0]  ;;  %v630_v42 = vor.u32 %v795_v37, %v629_v36 }
   0xd   :  { %v702_v43 = vor.u32 %v813_v39, %v701_v38  ;;  %v634_v44 = vor.u32 %v794_v40, %v631_v41  ;;  %v661_v45 = vld [vmem:[%s1221_s0 + $0x50] sm:$0xf]  ;;  %v802_v46 = vld [vmem:[%s1221_s0 + $0x58] sm:$0xf0]  ;;  %v797_v50 = vld [vmem:[%s1221_s0 + $0x34] sm:$0xf] }
   0xe   :  { %345 = vmatpush.bf16.msra.mxu0 %v819_v11  ;;  %v662_v47 = vor.u32 %v802_v46, %v661_v45  ;;  %v641_v48 = vld [vmem:[%s1221_s0 + $0x30] sm:$0xf]  ;;  %v798_v49 = vld [vmem:[%s1221_s0 + $0x38] sm:$0xf0]  ;;  %v643_v51 = vld [vmem:[%s1221_s0 + $0x3c] sm:$0xf0] }
   0xf   :  { %836 = vmatpush.bf16.msra.mxu3 %v819_v11  ;;  %394 = vmatpush.bf16.msra.mxu1 %v827_v12  ;;  %v809_v52 = vld [vmem:[%s1221_s0 + $0x94] sm:$0xf]  ;;  %v691_v53 = vld [vmem:[%s1221_s0 + $0x9c] sm:$0xf0]  ;;  %v642_v54 = vor.u32 %v798_v49, %v641_v48  ;;  %v646_v55 = vor.u32 %v797_v50, %v643_v51  ;;  %v673_v57 = vld [vmem:[%s1221_s0 + $0x68] sm:$0xf] }
  0x10   :  { %v694_v56 = vor.u32 %v809_v52, %v691_v53  ;;  %v805_v58 = vld [vmem:[%s1221_s0 + $0x70] sm:$0xf0]  ;;  %v653_v60 = vld [vmem:[%s1221_s0 + $0x48] sm:$0xf]  ;;  %v800_v62 = vld [vmem:[%s1221_s0 + $0x4c] sm:$0xf] }
  0x11   :  { %v674_v59 = vor.u32 %v805_v58, %v673_v57  ;;  %v801_v61 = vld [vmem:[%s1221_s0 + $0x50] sm:$0xf0]  ;;  %v655_v63 = vld [vmem:[%s1221_s0 + $0x54] sm:$0xf0]  ;;  %v812_v0 = vld [vmem:[%s1221_s0 + $0xac] sm:$0xf] }
  0x12   :  { %346 = vmatpush.bf16.msra.mxu0 %v818_v13  ;;  %v654_v2 = vor.u32 %v801_v61, %v653_v60  ;;  %v658_v3 = vor.u32 %v800_v62, %v655_v63  ;;  %v685_v5 = vld [vmem:[%s1221_s0 + $0x80] sm:$0xf]  ;;  %v808_v6 = vld [vmem:[%s1221_s0 + $0x88] sm:$0xf0]  ;;  %v667_v11 = vld [vmem:[%s1221_s0 + $0x6c] sm:$0xf0] }
  0x13   :  { %837 = vmatpush.bf16.msra.mxu3 %v818_v13  ;;  %395 = vmatpush.bf16.msra.mxu1 %v826_v14  ;;  %v686_v7 = vor.u32 %v808_v6, %v685_v5  ;;  %v665_v8 = vld [vmem:[%s1221_s0 + $0x60] sm:$0xf]  ;;  %v804_v9 = vld [vmem:[%s1221_s0 + $0x68] sm:$0xf0]  ;;  %v677_v17 = vld [vmem:[%s1221_s0 + $0x78] sm:$0xf] }
  0x14   :  { %v807_v18 = vld [vmem:[%s1221_s0 + $0x80] sm:$0xf0]  ;;  %v814_v24 = vld [vmem:[%s1221_s0 + $0xb8] sm:$0xf0]  ;;  %v1084_v28 = vld [vmem:[%s1222_s2] ss:$0 sm:$0xff] }
  0x16   :  { %347 = vmatpush.bf16.msra.mxu0 %v817_v15 }
  0x17   :  { %838 = vmatpush.bf16.msra.mxu3 %v817_v15  ;;  %396 = vmatpush.bf16.msra.mxu1 %v825_v16  ;;  %v811_v15 = vld [vmem:[%s1221_s0 + $0xa0] sm:$0xf0] }
  0x1a   :  { %784 = vmatmul.msk.bf16.gmra.mxu2 %vm317_vm0, %v638_v19  ;;  %348 = vmatpush.bf16.msra.mxu0 %v816_v20  ;;  %v806_v19 = vld [vmem:[%s1221_s0 + $0x7c] sm:$0xf] }
  0x1b   :  { %839 = vmatpush.bf16.msra.mxu3 %v816_v20  ;;  %397 = vmatpush.bf16.msra.mxu1 %v824_v21  ;;  %v679_v20 = vld [vmem:[%s1221_s0 + $0x84] sm:$0xf0] }
  0x1e   :  { %349 = vmatpush.bf16.msra.mxu0 %v815_v22 }
  0x1f   :  { %840 = vmatpush.bf16.msra.mxu3 %v815_v22  ;;  %398 = vmatpush.bf16.msra.mxu1 %v823_v23  ;;  %v682_v22 = vor.u32 %v806_v19, %v679_v20 }
  0x21   :  { %350 = vmatmul.bf16.vlgmr.msra.gmra.mxu0 %v618_v30 }
  0x22   :  { %380 = vmatmul.bf16.vlgmr.msra.gmra.mxu3 %v690_v31  ;;  %399 = vmatmul.bf16.vlgmr.msra.gmra.mxu1 %v622_v32 }
  0x23   :  { %841 = vmatpush.bf16.msrb.mxu3 %v830_v1  ;;  %v703_v1 = vld [vmem:[%s1221_s0 + $0xb4] sm:$0xf0] }
  0x27   :  { %842 = vmatpush.bf16.msrb.mxu3 %v829_v4  ;;  %v706_v4 = vor.u32 %v812_v0, %v703_v1 }
  0x2a   :  { %785 = vmatmul.msk.bf16.gmra.mxu2 %vm317_vm0, %v650_v35 }
  0x2b   :  { %843 = vmatpush.bf16.msrb.mxu3 %v828_v10  ;;  %v803_v10 = vld [vmem:[%s1221_s0 + $0x64] sm:$0xf] }
  0x2c   :  { %v670_v13 = vor.u32 %v803_v10, %v667_v11 }
  0x2f   :  { %844 = vmatpush.bf16.msrb.mxu3 %v827_v12  ;;  %v666_v12 = vor.u32 %v804_v9, %v665_v8 }
  0x31   :  { %355 = vmatmul.bf16.gmra.mxu0 %v630_v42 }
  0x32   :  { %385 = vmatmul.bf16.gmra.mxu3 %v702_v43  ;;  %404 = vmatmul.bf16.gmra.mxu1 %v634_v44 }
  0x33   :  { %845 = vmatpush.bf16.msrb.mxu3 %v826_v14  ;;  %v697_v14 = vld [vmem:[%s1221_s0 + $0x98] sm:$0xf] }
  0x37   :  { %846 = vmatpush.bf16.msrb.mxu3 %v825_v16  ;;  %v698_v16 = vor.u32 %v811_v15, %v697_v14 }
  0x3a   :  { %786 = vmatmul.msk.bf16.gmra.mxu2 %vm317_vm0, %v662_v47 }
  0x3b   :  { %847 = vmatpush.bf16.msrb.mxu3 %v824_v21  ;;  %v678_v21 = vor.u32 %v807_v18, %v677_v17 }
  0x3f   :  { %848 = vmatpush.bf16.msrb.mxu3 %v823_v23  ;;  %v709_v23 = vld [vmem:[%s1221_s0 + $0xb0] sm:$0xf] }
  0x40   :  { %v710_v25 = vor.u32 %v814_v24, %v709_v23 }
  0x41   :  { %360 = vmatmul.bf16.gmra.mxu0 %v642_v54 }
  0x42   :  { %409 = vmatmul.bf16.gmra.mxu1 %v646_v55  ;;  %429 = vmatmul.bf16.vlgmr.msrb.gmra.mxu3 %v694_v56 }
  0x4a   :  { %787 = vmatmul.msk.bf16.gmra.mxu2 %vm317_vm0, %v674_v59 }
  0x51   :  { %365 = vmatmul.bf16.gmra.mxu0 %v654_v2 }
  0x52   :  { %414 = vmatmul.bf16.gmra.mxu1 %v658_v3  ;;  %434 = vmatmul.bf16.gmra.mxu3 %v706_v4 }
  0x5a   :  { %788 = vmatmul.msk.bf16.gmra.mxu2 %vm317_vm0, %v686_v7 }
  0x61   :  { %370 = vmatmul.bf16.gmra.mxu0 %v666_v12 }
  0x62   :  { %419 = vmatmul.bf16.gmra.mxu1 %v670_v13 }
  0x6a   :  { %789 = vmatmul.msk.bf16.gmra.mxu2 %vm317_vm0, %v698_v16 }
  0x71   :  { %375 = vmatmul.bf16.gmra.mxu0 %v678_v21 }
  0x72   :  { %424 = vmatmul.bf16.gmra.mxu1 %v682_v22 }
  0x7a   :  { %790 = vmatmul.msk.bf16.gmra.mxu2 %vm317_vm0, %v710_v25 }
  0x8d   :  { %v449_v26 = vpop.f32.mrf.mxu2 }
  0x95   :  { %v451_v27 = vpop.f32.mrf.mxu2 }
  0x9d   :  { %v454_v29 = vpop.f32.mrf.mxu2 }
  0x9e   :  { %v351_v30 = vpop.f32.mrf.mxu0 }
  0x9f   :  { %v352_v31 = vadd.f32 %v1084_v28, %v351_v30  ;;  %v400_v32 = vpop.f32.mrf.mxu1 }
  0xa1   :  { %v401_v33 = vadd.f32 %v400_v32, %v352_v31 }
  0xa3   :  { %v450_v34 = vadd.f32 %v449_v26, %v401_v33 }
  0xa5   :  { %489 = vst.msk [vmem:[%s1223_s3] sm:$0xff] %vm317_vm0, %v450_v34  ;;  %v456_v35 = vpop.f32.mrf.mxu2  ;;  %v542_v40 = vmul.f32 %v450_v34, %v450_v34  ;;  %v505_v42 = vsel %vm317_vm0, %v450_v34, 0.0  ;;  %v381_v60 = vpop.f32.mrf.mxu3 }
  0xa6   :  { %v353_v36 = vpop.f32.mrf.mxu0 }
  0xa7   :  { %v354_v37 = vadd.f32 %v1084_v28, %v353_v36  ;;  %v402_v38 = vpop.f32.mrf.mxu1  ;;  %v558_v48 = vsel %vm317_vm0, %v542_v40, 0.0 }
  0xa9   :  { %v403_v39 = vadd.f32 %v402_v38, %v354_v37  ;;  %v382_v38 = vadd.f32 %v1084_v28, %v381_v60 }
  0xab   :  { %v452_v41 = vadd.f32 %v451_v27, %v403_v39 }
  0xad   :  { %490 = vst.msk [vmem:[%s1223_s3 + $0x8] sm:$0xff] %vm317_vm0, %v452_v41  ;;  %v506_v43 = vsel %vm317_vm0, %v452_v41, 0.0  ;;  %v543_v44 = vmul.f32 %v452_v41, %v452_v41  ;;  %v459_v45 = vpop.f32.mrf.mxu2  ;;  %v1115_v4 = vpop.f32.mrf.mxu3 }
  0xae   :  { %v1098_v46 = vadd.f32 %v506_v43, %v505_v42  ;;  %v356_v47 = vpop.f32.mrf.mxu0 }
  0xaf   :  { %v559_v49 = vsel %vm317_vm0, %v543_v44, 0.0  ;;  %v357_v50 = vadd.f32 %v1084_v28, %v356_v47  ;;  %v405_v51 = vpop.f32.mrf.mxu1 }
  0xb0   :  { %v1103_v52 = vadd.f32 %v559_v49, %v558_v48 }
  0xb1   :  { %v406_v53 = vadd.f32 %v405_v51, %v357_v50 }
  0xb3   :  { %v455_v54 = vadd.f32 %v454_v29, %v406_v53 }
  0xb5   :  { %491 = vst.msk [vmem:[%s1223_s3 + $0x10] sm:$0xff] %vm317_vm0, %v455_v54  ;;  %v461_v55 = vpop.f32.mrf.mxu2  ;;  %v1126_v13 = vpop.f32.mrf.mxu3  ;;  %v508_v39 = vsel %vm317_vm0, %v455_v54, 0.0 }
  0xb6   :  { %v358_v56 = vpop.f32.mrf.mxu0  ;;  %v509_v47 = vadd.f32 %v508_v39, %v1098_v46 }
  0xb7   :  { %v359_v57 = vadd.f32 %v1084_v28, %v358_v56  ;;  %v407_v58 = vpop.f32.mrf.mxu1 }
  0xb9   :  { %v408_v59 = vadd.f32 %v407_v58, %v359_v57 }
  0xbb   :  { %v457_v61 = vadd.f32 %v456_v35, %v408_v59  ;;  %v544_v35 = vmul.f32 %v455_v54, %v455_v54 }
  0xbd   :  { %492 = vst.msk [vmem:[%s1223_s3 + $0x18] sm:$0xff] %vm317_vm0, %v457_v61  ;;  %v464_v62 = vpop.f32.mrf.mxu2  ;;  %v1134_v22 = vpop.f32.mrf.mxu3  ;;  %v545_v40 = vmul.f32 %v457_v61, %v457_v61  ;;  %v561_v42 = vsel %vm317_vm0, %v544_v35, 0.0  ;;  %v510_v43 = vsel %vm317_vm0, %v457_v61, 0.0 }
  0xbe   :  { %v361_v63 = vpop.f32.mrf.mxu0  ;;  %v511_v56 = vadd.f32 %v510_v43, %v509_v47 }
  0xbf   :  { %v362_v0 = vadd.f32 %v1084_v28, %v361_v63  ;;  %v410_v1 = vpop.f32.mrf.mxu1  ;;  %v563_v49 = vsel %vm317_vm0, %v545_v40, 0.0  ;;  %v384_v63 = vadd.f32 %v1084_v28, %v1115_v4 }
  0xc1   :  { %v411_v2 = vadd.f32 %v410_v1, %v362_v0 }
  0xc3   :  { %v460_v3 = vadd.f32 %v459_v45, %v411_v2 }
  0xc5   :  { %493 = vst.msk [vmem:[%s1223_s3 + $0x20] sm:$0xff] %vm317_vm0, %v460_v3  ;;  %v466_v5 = vpop.f32.mrf.mxu2  ;;  %v430_v31 = vpop.f32.mrf.mxu3  ;;  %v546_v44 = vmul.f32 %v460_v3, %v460_v3  ;;  %v512_v50 = vsel %vm317_vm0, %v460_v3, 0.0 }
  0xc6   :  { %v363_v6 = vpop.f32.mrf.mxu0  ;;  %v431_v48 = vadd.f32 %v430_v31, %v382_v38  ;;  %v513_v1 = vadd.f32 %v512_v50, %v511_v56 }
  0xc7   :  { %v364_v7 = vadd.f32 %v1084_v28, %v363_v6  ;;  %v412_v8 = vpop.f32.mrf.mxu1  ;;  %v565_v46 = vsel %vm317_vm0, %v546_v44, 0.0 }
  0xc9   :  { %v413_v9 = vadd.f32 %v412_v8, %v364_v7 }
  0xcb   :  { %v462_v10 = vadd.f32 %v461_v55, %v413_v9  ;;  %v562_v55 = vadd.f32 %v561_v42, %v1103_v52 }
  0xcd   :  { %494 = vst.msk [vmem:[%s1223_s3 + $0x28] sm:$0xff] %vm317_vm0, %v462_v10  ;;  %v469_v11 = vpop.f32.mrf.mxu2  ;;  %v547_v51 = vmul.f32 %v462_v10, %v462_v10  ;;  %v432_v53 = vpop.f32.mrf.mxu3  ;;  %v514_v59 = vsel %vm317_vm0, %v462_v10, 0.0  ;;  %v564_v0 = vadd.f32 %v563_v49, %v562_v55 }
  0xce   :  { %v366_v12 = vpop.f32.mrf.mxu0  ;;  %v515_v7 = vadd.f32 %v514_v59, %v513_v1 }
  0xcf   :  { %v367_v14 = vadd.f32 %v1084_v28, %v366_v12  ;;  %v415_v15 = vpop.f32.mrf.mxu1  ;;  %v567_v52 = vsel %vm317_vm0, %v547_v51, 0.0  ;;  %v566_v6 = vadd.f32 %v565_v46, %v564_v0  ;;  %v433_v12 = vadd.f32 %v432_v53, %v384_v63 }
  0xd1   :  { %v416_v16 = vadd.f32 %v415_v15, %v367_v14 }
  0xd3   :  { %v465_v17 = vadd.f32 %v464_v62, %v416_v16 }
  0xd5   :  { %495 = vst.msk [vmem:[%s1223_s3 + $0x30] sm:$0xff] %vm317_vm0, %v465_v17  ;;  %v471_v18 = vpop.f32.mrf.mxu2  ;;  %v548_v60 = vmul.f32 %v465_v17, %v465_v17  ;;  %v516_v2 = vsel %vm317_vm0, %v465_v17, 0.0 }
  0xd6   :  { %v368_v19 = vpop.f32.mrf.mxu0  ;;  %v517_v14 = vadd.f32 %v516_v2, %v515_v7 }
  0xd7   :  { %v369_v20 = vadd.f32 %v1084_v28, %v368_v19  ;;  %v417_v21 = vpop.f32.mrf.mxu1  ;;  %v569_v8 = vsel %vm317_vm0, %v548_v60, 0.0 }
  0xd9   :  { %v418_v23 = vadd.f32 %v417_v21, %v369_v20 }
  0xdb   :  { %v467_v24 = vadd.f32 %v466_v5, %v418_v23 }
  0xdd   :  { %496 = vst.msk [vmem:[%s1223_s3 + $0x38] sm:$0xff] %vm317_vm0, %v467_v24  ;;  %v474_v25 = vpop.f32.mrf.mxu2  ;;  %v549_v3 = vmul.f32 %v467_v24, %v467_v24  ;;  %v518_v9 = vsel %vm317_vm0, %v467_v24, 0.0  ;;  %v435_v24 = vpop.f32.mrf.mxu3 }
  0xde   :  { %v371_v26 = vpop.f32.mrf.mxu0  ;;  %v519_v20 = vadd.f32 %v518_v9, %v517_v14  ;;  %v595_v14 = vlaneseq }
  0xdf   :  { %v372_v27 = vadd.f32 %v1084_v28, %v371_v26  ;;  %v420_v29 = vpop.f32.mrf.mxu1  ;;  %v571_v15 = vsel %vm317_vm0, %v549_v3, 0.0 }
  0xe1   :  { %v421_v30 = vadd.f32 %v420_v29, %v372_v27 }
  0xe3   :  { %v470_v32 = vadd.f32 %v469_v11, %v421_v30  ;;  %v568_v11 = vadd.f32 %v567_v52, %v566_v6  ;;  %v387_v30 = vadd.f32 %v1084_v28, %v1126_v13 }
  0xe5   :  { %497 = vst.msk [vmem:[%s1223_s3 + $0x40] sm:$0xff] %vm317_vm0, %v470_v32  ;;  %v1145_v33 = vpop.f32.mrf.mxu2  ;;  %v550_v4 = vmul.f32 %v470_v32, %v470_v32  ;;  %v520_v16 = vsel %vm317_vm0, %v470_v32, 0.0  ;;  %v570_v19 = vadd.f32 %v569_v8, %v568_v11  ;;  %v436_v13 = vadd.f32 %v435_v24, %v387_v30  ;;  %v437_v46 = vpop.f32.mrf.mxu3 }
  0xe6   :  { %v373_v34 = vpop.f32.mrf.mxu0  ;;  %v521_v32 = vadd.f32 %v520_v16, %v519_v20 }
  0xe7   :  { %v374_v36 = vadd.f32 %v1084_v28, %v373_v34  ;;  %v422_v37 = vpop.f32.mrf.mxu1  ;;  %v572_v31 = vadd.f32 %v571_v15, %v570_v19  ;;  %v596_v19 = vshrl.u32 %v595_v14, 7 }
  0xe9   :  { %v423_v41 = vadd.f32 %v422_v37, %v374_v36  ;;  %vm597_vm1 = vcmp.eq.s32.totalorder %v596_v19, 0  ;;  %vm601_vm2 = vcmp.eq.s32.totalorder %v596_v19, 1 }
  0xeb   :  { %v472_v45 = vadd.f32 %v471_v18, %v423_v41 }
  0xed   :  { %498 = vst.msk [vmem:[%s1223_s3 + $0x48] sm:$0xff] %vm317_vm0, %v472_v45  ;;  %v479_v54 = vpop.f32.mrf.mxu2  ;;  %v551_v18 = vmul.f32 %v472_v45, %v472_v45  ;;  %v522_v26 = vsel %vm317_vm0, %v472_v45, 0.0 }
  0xee   :  { %v480_v57 = vadd.f32 %v479_v54, %v431_v48  ;;  %v376_v58 = vpop.f32.mrf.mxu0  ;;  %v523_v39 = vadd.f32 %v522_v26, %v521_v32  ;;  %v389_v54 = vadd.f32 %v1084_v28, %v1134_v22 }
  0xef   :  { %v377_v61 = vadd.f32 %v1084_v28, %v376_v58  ;;  %v425_v62 = vpop.f32.mrf.mxu1  ;;  %v575_v35 = vsel %vm317_vm0, %v551_v18, 0.0 }
  0xf0   :  { %501 = vst.msk [vmem:[%s1223_s3 + $0x60] sm:$0xff] %vm317_vm0, %v480_v57  ;;  %v554_v44 = vmul.f32 %v480_v57, %v480_v57  ;;  %v528_v53 = vsel %vm317_vm0, %v480_v57, 0.0 }
  0xf1   :  { %v426_v5 = vadd.f32 %v425_v62, %v377_v61  ;;  %v438_v62 = vadd.f32 %v437_v46, %v389_v54 }
  0xf2   :  { %v581_v59 = vsel %vm317_vm0, %v554_v44, 0.0 }
  0xf3   :  { %v475_v10 = vadd.f32 %v474_v25, %v426_v5  ;;  %v573_v25 = vsel %vm317_vm0, %v550_v4, 0.0 }
  0xf4   :  { %v574_v38 = vadd.f32 %v573_v25, %v572_v31 }
  0xf5   :  { %499 = vst.msk [vmem:[%s1223_s3 + $0x50] sm:$0xff] %vm317_vm0, %v475_v10  ;;  %v481_v17 = vpop.f32.mrf.mxu2  ;;  %v552_v27 = vmul.f32 %v475_v10, %v475_v10  ;;  %v524_v36 = vsel %vm317_vm0, %v475_v10, 0.0 }
  0xf6   :  { %v482_v21 = vadd.f32 %v481_v17, %v433_v12  ;;  %v378_v23 = vpop.f32.mrf.mxu0  ;;  %v576_v42 = vadd.f32 %v575_v35, %v574_v38  ;;  %v525_v43 = vadd.f32 %v524_v36, %v523_v39 }
  0xf7   :  { %v379_v29 = vadd.f32 %v1084_v28, %v378_v23  ;;  %v427_v34 = vpop.f32.mrf.mxu1  ;;  %v577_v40 = vsel %vm317_vm0, %v552_v27, 0.0 }
  0xf8   :  { %502 = vst.msk [vmem:[%s1223_s3 + $0x68] sm:$0xff] %vm317_vm0, %v482_v21  ;;  %v578_v49 = vadd.f32 %v577_v40, %v576_v42  ;;  %v555_v55 = vmul.f32 %v482_v21, %v482_v21  ;;  %v530_v60 = vsel %vm317_vm0, %v482_v21, 0.0 }
  0xf9   :  { %v428_v37 = vadd.f32 %v427_v34, %v379_v29 }
  0xfa   :  { %v583_v63 = vsel %vm317_vm0, %v555_v55, 0.0 }
  0xfb   :  { %v477_v41 = vadd.f32 %v1145_v33, %v428_v37 }
  0xfd   :  { %500 = vst.msk [vmem:[%s1223_s3 + $0x58] sm:$0xff] %vm317_vm0, %v477_v41  ;;  %v526_v45 = vsel %vm317_vm0, %v477_v41, 0.0  ;;  %v553_v47 = vmul.f32 %v477_v41, %v477_v41  ;;  %v484_v48 = vpop.f32.mrf.mxu2 }
  0xfe   :  { %v527_v50 = vadd.f32 %v526_v45, %v525_v43  ;;  %v485_v51 = vadd.f32 %v484_v48, %v436_v13 }
  0xff   :  { %v579_v33 = vsel %vm317_vm0, %v553_v47, 0.0 }
 0x100   :  { %v580_v56 = vadd.f32 %v579_v33, %v578_v49  ;;  %503 = vst.msk [vmem:[%s1223_s3 + $0x70] sm:$0xff] %vm317_vm0, %v485_v51  ;;  %v529_v58 = vadd.f32 %v528_v53, %v527_v50  ;;  %v556_v0 = vmul.f32 %v485_v51, %v485_v51  ;;  %v532_v1 = vsel %vm317_vm0, %v485_v51, 0.0 }
 0x102   :  { %v582_v61 = vadd.f32 %v581_v59, %v580_v56  ;;  %v531_v57 = vadd.f32 %v530_v60, %v529_v58  ;;  %v585_v3 = vsel %vm317_vm0, %v556_v0, 0.0 }
 0x104   :  { %v584_v28 = vadd.f32 %v583_v63, %v582_v61  ;;  %v533_v2 = vadd.f32 %v532_v1, %v531_v57 }
 0x105   :  { %v486_v22 = vpop.f32.mrf.mxu2 }
 0x106   :  { %v487_v52 = vadd.f32 %v486_v22, %v438_v62  ;;  %v586_v7 = vadd.f32 %v585_v3, %v584_v28 }
 0x108   :  { %504 = vst.msk [vmem:[%s1223_s3 + $0x78] sm:$0xff] %vm317_vm0, %v487_v52  ;;  %v534_v5 = vsel %vm317_vm0, %v487_v52, 0.0  ;;  %v557_v6 = vmul.f32 %v487_v52, %v487_v52 }
 0x109   :  { %v535_v8 = vadd.f32 %v534_v5, %v533_v2 }
 0x10a   :  { %v587_v9 = vsel %vm317_vm0, %v557_v6, 0.0 }
 0x10b   :  { %v536_v4 = vrot.slane %v535_v8, 4  ;;  %v588_v10 = vadd.f32 %v587_v9, %v586_v7 }
 0x10d   :  { %v537_v11 = vadd.f32 %v536_v4, %v535_v8  ;;  %v589_v12 = vrot.slane %v588_v10, 4 }
 0x10f   :  { %v538_v15 = vrot.slane %v537_v11, 2  ;;  %v590_v16 = vadd.f32 %v589_v12, %v588_v10 }
 0x111   :  { %v539_v18 = vadd.f32 %v538_v15, %v537_v11  ;;  %v591_v17 = vrot.slane %v590_v16, 2 }
 0x113   :  { %v540_v20 = vrot.slane %v539_v18, 1  ;;  %v592_v21 = vadd.f32 %v591_v17, %v590_v16 }
 0x115   :  { %v541_v23 = vadd.f32 %v540_v20, %v539_v18  ;;  %v593_v24 = vrot.slane %v592_v21, 1 }
 0x117   :  { %v594_v25 = vadd.f32 %v593_v24, %v592_v21  ;;  %v600_v26 = vsel %vm597_vm1, %v541_v23, 0.0 }
 0x119   :  { %v604_v27 = vsel %vm601_vm2, %v594_v25, 0.0 }
 0x11a   :  { %v605_v29 = vadd.f32 %v604_v27, %v600_v26 }
 0x11c   :  { %606 = vst.msk [vmem:[%s1224_s4] sm:$0xff] %vm317_vm0, %v605_v29 }

// kernel: vqvae_forward.45
= control target key start
LH: loop header
LB: loop body
LE: loop exit
PB: predicated region body
PF: predicated region fallthrough
CT: control target
= control target key end

     0   :  { %s354_s0 = inlined_call_operand.vmem [shape: f32[128,128], index: 0, kind: input, shape index: {}]   ;;  %s355_s1 = inlined_call_operand.vmem [shape: f32[1,128], index: 1, kind: input, shape index: {}]   ;;  %s356_s2 = inlined_call_operand.vmem [shape: f32[1,128], index: 2, kind: input, shape index: {}]   ;;  %s357_s3 = inlined_call_operand.vmem [shape: f32[128,128], index: 3, kind: input, shape index: {}]   ;;  %s358_s4 = inlined_call_operand.vmem [shape: f32[128,128], index: 4, kind: output, shape index: {}]  }
   0x1   :  { %v17_v0 = vld [vmem:[%s354_s0] sm:$0xff]  ;;  %v18_v4 = vld [vmem:[%s354_s0 + $0x8] sm:$0xff]  ;;  %v19_v5 = vld [vmem:[%s354_s0 + $0x10] sm:$0xff] }
   0x2   :  { %v174_v1 = vld [vmem:[%s355_s1] ss:$0 sm:$0xff]  ;;  %v74_v8 = vld [vmem:[%s357_s3 + $0x8] sm:$0xff]  ;;  %v20_v10 = vld [vmem:[%s354_s0 + $0x18] sm:$0xff] }
   0x3   :  { %v179_v2 = vld [vmem:[%s356_s2] ss:$0 sm:$0xff]  ;;  %v37_v3 = vmul.f32 %v174_v1, %v17_v0  ;;  %v38_v7 = vmul.f32 %v174_v1, %v18_v4  ;;  %v39_v9 = vmul.f32 %v174_v1, %v19_v5  ;;  %v75_v12 = vld [vmem:[%s357_s3 + $0x10] sm:$0xff]  ;;  %v40_v13 = vmul.f32 %v174_v1, %v20_v10  ;;  %v22_v15 = vld [vmem:[%s354_s0 + $0x28] sm:$0xff] }
   0x4   :  { %v73_v6 = vld [vmem:[%s357_s3] sm:$0xff]  ;;  %v76_v18 = vld [vmem:[%s357_s3 + $0x18] sm:$0xff]  ;;  %v42_v20 = vmul.f32 %v174_v1, %v22_v15  ;;  %v23_v21 = vld [vmem:[%s354_s0 + $0x30] sm:$0xff] }
   0x5   :  { %v57_v11 = vadd.f32 %v179_v2, %v37_v3  ;;  %v21_v14 = vld [vmem:[%s354_s0 + $0x20] sm:$0xff]  ;;  %v58_v16 = vadd.f32 %v179_v2, %v38_v7  ;;  %v59_v17 = vadd.f32 %v179_v2, %v39_v9  ;;  %v60_v23 = vadd.f32 %v179_v2, %v40_v13  ;;  %v78_v25 = vld [vmem:[%s357_s3 + $0x28] sm:$0xff]  ;;  %v24_v27 = vld [vmem:[%s354_s0 + $0x38] sm:$0xff] }
   0x6   :  { %v41_v19 = vmul.f32 %v174_v1, %v21_v14  ;;  %v77_v24 = vld [vmem:[%s357_s3 + $0x20] sm:$0xff]  ;;  %v43_v26 = vmul.f32 %v174_v1, %v23_v21  ;;  %v62_v31 = vadd.f32 %v179_v2, %v42_v20  ;;  %v79_v32 = vld [vmem:[%s357_s3 + $0x30] sm:$0xff]  ;;  %v44_v37 = vmul.f32 %v174_v1, %v24_v27  ;;  %v26_v38 = vld [vmem:[%s354_s0 + $0x48] sm:$0xff] }
   0x7   :  { %v89_v22 = vadd.f32 %v73_v6, %v57_v11  ;;  %v90_v28 = vadd.f32 %v74_v8, %v58_v16  ;;  %v91_v29 = vadd.f32 %v75_v12, %v59_v17  ;;  %v25_v33 = vld [vmem:[%s354_s0 + $0x40] sm:$0xff]  ;;  %v92_v35 = vadd.f32 %v76_v18, %v60_v23  ;;  %v27_v39 = vld [vmem:[%s354_s0 + $0x50] sm:$0xff]  ;;  %v80_v44 = vld [vmem:[%s357_s3 + $0x38] sm:$0xff] }
   0x8   :  { %v61_v30 = vadd.f32 %v179_v2, %v41_v19  ;;  %v63_v36 = vadd.f32 %v179_v2, %v43_v26  ;;  %v94_v43 = vadd.f32 %v78_v25, %v62_v31  ;;  %v28_v45 = vld [vmem:[%s354_s0 + $0x58] sm:$0xff]  ;;  %v64_v48 = vadd.f32 %v179_v2, %v44_v37  ;;  %v29_v50 = vld [vmem:[%s354_s0 + $0x60] sm:$0xff]  ;;  %v30_v51 = vld [vmem:[%s354_s0 + $0x68] sm:$0xff] }
   0x9   :  { %v105_v34 = vmax.f32 %v89_v22, 0.0  ;;  %v106_v40 = vmax.f32 %v90_v28, 0.0  ;;  %v107_v41 = vmax.f32 %v91_v29, 0.0  ;;  %v108_v46 = vmax.f32 %v92_v35, 0.0  ;;  %v81_v54 = vld [vmem:[%s357_s3 + $0x40] sm:$0xff]  ;;  %v31_v57 = vld [vmem:[%s354_s0 + $0x70] sm:$0xff] }
   0xa   :  { %v93_v42 = vadd.f32 %v77_v24, %v61_v30  ;;  %v95_v47 = vadd.f32 %v79_v32, %v63_v36  ;;  %v45_v49 = vmul.f32 %v174_v1, %v25_v33  ;;  %v110_v53 = vmax.f32 %v94_v43, 0.0  ;;  %v82_v61 = vld [vmem:[%s357_s3 + $0x48] sm:$0xff]  ;;  %v83_v62 = vld [vmem:[%s357_s3 + $0x50] sm:$0xff]  ;;  %v84_v4 = vld [vmem:[%s357_s3 + $0x58] sm:$0xff] }
   0xb   :  { %121 = vst [vmem:[%s358_s4] sm:$0xff] %v105_v34  ;;  %v46_v55 = vmul.f32 %v174_v1, %v26_v38  ;;  %v47_v56 = vmul.f32 %v174_v1, %v27_v39  ;;  %v96_v59 = vadd.f32 %v80_v44, %v64_v48  ;;  %v48_v63 = vmul.f32 %v174_v1, %v28_v45  ;;  %v32_v7 = vld [vmem:[%s354_s0 + $0x78] sm:$0xff]  ;;  %v85_v11 = vld [vmem:[%s357_s3 + $0x60] sm:$0xff]  ;;  %v86_v12 = vld [vmem:[%s357_s3 + $0x68] sm:$0xff] }
   0xc   :  { %122 = vst [vmem:[%s358_s4 + $0x8] sm:$0xff] %v106_v40  ;;  %v109_v52 = vmax.f32 %v93_v42, 0.0  ;;  %v111_v58 = vmax.f32 %v95_v47, 0.0  ;;  %v65_v60 = vadd.f32 %v179_v2, %v45_v49  ;;  %v49_v5 = vmul.f32 %v174_v1, %v29_v50  ;;  %v87_v18 = vld [vmem:[%s357_s3 + $0x70] sm:$0xff]  ;;  %v88_v27 = vld [vmem:[%s357_s3 + $0x78] sm:$0xff] }
   0xd   :  { %123 = vst [vmem:[%s358_s4 + $0x10] sm:$0xff] %v107_v41  ;;  %v66_v0 = vadd.f32 %v179_v2, %v46_v55  ;;  %v67_v3 = vadd.f32 %v179_v2, %v47_v56  ;;  %v50_v6 = vmul.f32 %v174_v1, %v30_v51  ;;  %v112_v8 = vmax.f32 %v96_v59, 0.0 }
   0xe   :  { %124 = vst [vmem:[%s358_s4 + $0x18] sm:$0xff] %v108_v46  ;;  %v97_v9 = vadd.f32 %v81_v54, %v65_v60  ;;  %v68_v10 = vadd.f32 %v179_v2, %v48_v63  ;;  %v51_v13 = vmul.f32 %v174_v1, %v31_v57  ;;  %v69_v16 = vadd.f32 %v179_v2, %v49_v5 }
   0xf   :  { %125 = vst [vmem:[%s358_s4 + $0x20] sm:$0xff] %v109_v52  ;;  %v98_v14 = vadd.f32 %v82_v61, %v66_v0  ;;  %v99_v15 = vadd.f32 %v83_v62, %v67_v3  ;;  %v70_v17 = vadd.f32 %v179_v2, %v50_v6  ;;  %v52_v22 = vmul.f32 %v174_v1, %v32_v7 }
  0x10   :  { %126 = vst [vmem:[%s358_s4 + $0x28] sm:$0xff] %v110_v53  ;;  %v113_v19 = vmax.f32 %v97_v9, 0.0  ;;  %v100_v20 = vadd.f32 %v84_v4, %v68_v10  ;;  %v71_v21 = vadd.f32 %v179_v2, %v51_v13  ;;  %v101_v25 = vadd.f32 %v85_v11, %v69_v16 }
  0x11   :  { %127 = vst [vmem:[%s358_s4 + $0x30] sm:$0xff] %v111_v58  ;;  %v114_v23 = vmax.f32 %v98_v14, 0.0  ;;  %v115_v24 = vmax.f32 %v99_v15, 0.0  ;;  %v102_v26 = vadd.f32 %v86_v12, %v70_v17  ;;  %v72_v1 = vadd.f32 %v179_v2, %v52_v22 }
  0x12   :  { %128 = vst [vmem:[%s358_s4 + $0x38] sm:$0xff] %v112_v8  ;;  %v116_v28 = vmax.f32 %v100_v20, 0.0  ;;  %v103_v29 = vadd.f32 %v87_v18, %v71_v21  ;;  %v117_v30 = vmax.f32 %v101_v25, 0.0 }
  0x13   :  { %129 = vst [vmem:[%s358_s4 + $0x40] sm:$0xff] %v113_v19  ;;  %v118_v31 = vmax.f32 %v102_v26, 0.0  ;;  %v104_v33 = vadd.f32 %v88_v27, %v72_v1 }
  0x14   :  { %130 = vst [vmem:[%s358_s4 + $0x48] sm:$0xff] %v114_v23  ;;  %v119_v32 = vmax.f32 %v103_v29, 0.0 }
  0x15   :  { %131 = vst [vmem:[%s358_s4 + $0x50] sm:$0xff] %v115_v24  ;;  %v120_v2 = vmax.f32 %v104_v33, 0.0 }
  0x16   :  { %132 = vst [vmem:[%s358_s4 + $0x58] sm:$0xff] %v116_v28 }
  0x17   :  { %133 = vst [vmem:[%s358_s4 + $0x60] sm:$0xff] %v117_v30 }
  0x18   :  { %134 = vst [vmem:[%s358_s4 + $0x68] sm:$0xff] %v118_v31 }
  0x19   :  { %135 = vst [vmem:[%s358_s4 + $0x70] sm:$0xff] %v119_v32 }
  0x1a   :  { %136 = vst [vmem:[%s358_s4 + $0x78] sm:$0xff] %v120_v2 }

// kernel: vqvae_forward.52
= control target key start
LH: loop header
LB: loop body
LE: loop exit
PB: predicated region body
PF: predicated region fallthrough
CT: control target
= control target key end

     0   :  { %s1879_s1 = inlined_call_operand.vmem [shape: f32[256,128], index: 1, kind: input, shape index: {}]   ;;  %s1880_s0 = inlined_call_operand.vmem [shape: f32[128,128], index: 0, kind: input, shape index: {}]   ;;  %s1881_s2 = inlined_call_operand.vmem [shape: f32[1,256], index: 2, kind: input, shape index: {}]   ;;  %s1882_s3 = inlined_call_operand.vmem [shape: f32[128,128], index: 3, kind: output, shape index: {0}]   ;;  %s1883_s4 = inlined_call_operand.vmem [shape: f32[8,128], index: 4, kind: output, shape index: {1}]  }
   0x1   :  { %v46_v0 = vld [vmem:[%s1879_s1 + $0x70] sm:$0xff]  ;;  %v47_v1 = vld [vmem:[%s1879_s1 + $0x78] sm:$0xff]  ;;  %v44_v6 = vld [vmem:[%s1879_s1 + $0x60] sm:$0xff] }
   0x2   :  { %v62_v2 = vld [vmem:[%s1879_s1 + $0xf0] sm:$0xff]  ;;  %v79_v3 = vpack.c.bf16 %v47_v1, %v46_v0  ;;  %v63_v4 = vld [vmem:[%s1879_s1 + $0xf8] sm:$0xff]  ;;  %723 = vmatpush.msra.mxu2 %v47_v1  ;;  %v45_v7 = vld [vmem:[%s1879_s1 + $0x68] sm:$0xff] }
   0x3   :  { %v87_v5 = vpack.c.bf16 %v63_v4, %v62_v2  ;;  %788 = vmatpush.msra.mxu3 %v63_v4  ;;  %v60_v8 = vld [vmem:[%s1879_s1 + $0xe0] sm:$0xff]  ;;  %v61_v9 = vld [vmem:[%s1879_s1 + $0xe8] sm:$0xff]  ;;  %v78_v10 = vpack.c.bf16 %v45_v7, %v44_v6  ;;  %v43_v12 = vld [vmem:[%s1879_s1 + $0x58] sm:$0xff] }
   0x4   :  { %88 = vmatpush.bf16.xpose.msra.mxu0 %v79_v3  ;;  %724 = vmatpush.msra.mxu2 %v46_v0  ;;  %v86_v11 = vpack.c.bf16 %v61_v9, %v60_v8  ;;  %v59_v13 = vld [vmem:[%s1879_s1 + $0xd8] sm:$0xff]  ;;  %v42_v14 = vld [vmem:[%s1879_s1 + $0x50] sm:$0xff]  ;;  %v41_v16 = vld [vmem:[%s1879_s1 + $0x48] sm:$0xff] }
   0x5   :  { %137 = vmatpush.bf16.xpose.msra.mxu1 %v87_v5  ;;  %789 = vmatpush.msra.mxu3 %v62_v2  ;;  %v58_v15 = vld [vmem:[%s1879_s1 + $0xd0] sm:$0xff]  ;;  %v57_v17 = vld [vmem:[%s1879_s1 + $0xc8] sm:$0xff]  ;;  %v40_v18 = vld [vmem:[%s1879_s1 + $0x40] sm:$0xff]  ;;  %v77_v19 = vpack.c.bf16 %v43_v12, %v42_v14 }
   0x6   :  { %725 = vmatpush.msra.mxu2 %v45_v7  ;;  %v56_v20 = vld [vmem:[%s1879_s1 + $0xc0] sm:$0xff]  ;;  %v85_v21 = vpack.c.bf16 %v59_v13, %v58_v15  ;;  %v39_v22 = vld [vmem:[%s1879_s1 + $0x38] sm:$0xff]  ;;  %v38_v24 = vld [vmem:[%s1879_s1 + $0x30] sm:$0xff]  ;;  %v76_v29 = vpack.c.bf16 %v41_v16, %v40_v18 }
   0x7   :  { %790 = vmatpush.msra.mxu3 %v61_v9  ;;  %v55_v23 = vld [vmem:[%s1879_s1 + $0xb8] sm:$0xff]  ;;  %v54_v25 = vld [vmem:[%s1879_s1 + $0xb0] sm:$0xff]  ;;  %v37_v26 = vld [vmem:[%s1879_s1 + $0x28] sm:$0xff]  ;;  %v84_v31 = vpack.c.bf16 %v57_v17, %v56_v20  ;;  %v75_v39 = vpack.c.bf16 %v39_v22, %v38_v24 }
   0x8   :  { %726 = vmatpush.msra.mxu2 %v44_v6  ;;  %v53_v27 = vld [vmem:[%s1879_s1 + $0xa8] sm:$0xff]  ;;  %v36_v28 = vld [vmem:[%s1879_s1 + $0x20] sm:$0xff]  ;;  %v35_v32 = vld [vmem:[%s1879_s1 + $0x18] sm:$0xff]  ;;  %v83_v41 = vpack.c.bf16 %v55_v23, %v54_v25 }
   0x9   :  { %791 = vmatpush.msra.mxu3 %v60_v8  ;;  %v52_v30 = vld [vmem:[%s1879_s1 + $0xa0] sm:$0xff]  ;;  %v51_v33 = vld [vmem:[%s1879_s1 + $0x98] sm:$0xff]  ;;  %v34_v34 = vld [vmem:[%s1879_s1 + $0x10] sm:$0xff]  ;;  %v74_v42 = vpack.c.bf16 %v37_v26, %v36_v28 }
   0xa   :  { %727 = vmatpush.msra.mxu2 %v43_v12  ;;  %v50_v35 = vld [vmem:[%s1879_s1 + $0x90] sm:$0xff]  ;;  %v33_v36 = vld [vmem:[%s1879_s1 + $0x8] sm:$0xff]  ;;  %v32_v38 = vld [vmem:[%s1879_s1] sm:$0xff]  ;;  %v82_v43 = vpack.c.bf16 %v53_v27, %v52_v30  ;;  %v73_v44 = vpack.c.bf16 %v35_v32, %v34_v34 }
   0xb   :  { %792 = vmatpush.msra.mxu3 %v59_v13  ;;  %v49_v37 = vld [vmem:[%s1879_s1 + $0x88] sm:$0xff]  ;;  %v48_v40 = vld [vmem:[%s1879_s1 + $0x80] sm:$0xff]  ;;  %v81_v45 = vpack.c.bf16 %v51_v33, %v50_v35  ;;  %v72_v46 = vpack.c.bf16 %v33_v36, %v32_v38  ;;  %v18_v51 = vld [vmem:[%s1880_s0 + $0x10] sm:$0xff] }
   0xc   :  { %89 = vmatpush.bf16.xpose.msra.mxu0 %v78_v10  ;;  %728 = vmatpush.msra.mxu2 %v42_v14  ;;  %v80_v47 = vpack.c.bf16 %v49_v37, %v48_v40  ;;  %v16_v48 = vld [vmem:[%s1880_s0] sm:$0xff]  ;;  %v17_v49 = vld [vmem:[%s1880_s0 + $0x8] sm:$0xff]  ;;  %v19_v52 = vld [vmem:[%s1880_s0 + $0x18] sm:$0xff] }
   0xd   :  { %138 = vmatpush.bf16.xpose.msra.mxu1 %v86_v11  ;;  %793 = vmatpush.msra.mxu3 %v58_v15  ;;  %v64_v50 = vpack.c.bf16 %v17_v49, %v16_v48  ;;  %v65_v53 = vpack.c.bf16 %v19_v52, %v18_v51  ;;  %v20_v54 = vld [vmem:[%s1880_s0 + $0x20] sm:$0xff]  ;;  %v21_v55 = vld [vmem:[%s1880_s0 + $0x28] sm:$0xff]  ;;  %v22_v57 = vld [vmem:[%s1880_s0 + $0x30] sm:$0xff] }
   0xe   :  { %729 = vmatpush.msra.mxu2 %v41_v16  ;;  %v66_v56 = vpack.c.bf16 %v21_v55, %v20_v54  ;;  %v23_v58 = vld [vmem:[%s1880_s0 + $0x38] sm:$0xff]  ;;  %v24_v60 = vld [vmem:[%s1880_s0 + $0x40] sm:$0xff]  ;;  %v25_v61 = vld [vmem:[%s1880_s0 + $0x48] sm:$0xff] }
   0xf   :  { %794 = vmatpush.msra.mxu3 %v57_v17  ;;  %v67_v59 = vpack.c.bf16 %v23_v58, %v22_v57  ;;  %v68_v62 = vpack.c.bf16 %v25_v61, %v24_v60  ;;  %v26_v63 = vld [vmem:[%s1880_s0 + $0x50] sm:$0xff]  ;;  %v27_v0 = vld [vmem:[%s1880_s0 + $0x58] sm:$0xff]  ;;  %v186_v2 = vld [vmem:[%s1881_s2] sm:$0x3] }
  0x10   :  { %730 = vmatpush.msra.mxu2 %v40_v18  ;;  %v69_v1 = vpack.c.bf16 %v27_v0, %v26_v63  ;;  %v1308_v3 = vperm.slane %v186_v2, 0  ;;  %v1310_v5 = vperm.slane %v186_v2, 1  ;;  %v28_v9 = vld [vmem:[%s1880_s0 + $0x60] sm:$0xff]  ;;  %v29_v10 = vld [vmem:[%s1880_s0 + $0x68] sm:$0xff] }
  0x11   :  { %795 = vmatpush.msra.mxu3 %v56_v20  ;;  %v70_v12 = vpack.c.bf16 %v29_v10, %v28_v9 }
  0x12   :  { %731 = vmatpush.msra.mxu2 %v39_v22 }
  0x13   :  { %796 = vmatpush.msra.mxu3 %v55_v23 }
  0x14   :  { %90 = vmatpush.bf16.xpose.msra.mxu0 %v77_v19  ;;  %732 = vmatpush.msra.mxu2 %v38_v24 }
  0x15   :  { %139 = vmatpush.bf16.xpose.msra.mxu1 %v85_v21  ;;  %797 = vmatpush.msra.mxu3 %v54_v25 }
  0x16   :  { %733 = vmatpush.msra.mxu2 %v37_v26 }
  0x17   :  { %798 = vmatpush.msra.mxu3 %v53_v27 }
  0x18   :  { %734 = vmatpush.msra.mxu2 %v36_v28  ;;  %v30_v28 = vld [vmem:[%s1880_s0 + $0x70] sm:$0xff] }
  0x19   :  { %799 = vmatpush.msra.mxu3 %v52_v30 }
  0x1a   :  { %735 = vmatpush.msra.mxu2 %v35_v32 }
  0x1b   :  { %800 = vmatpush.msra.mxu3 %v51_v33 }
  0x1c   :  { %91 = vmatpush.bf16.xpose.msra.mxu0 %v76_v29  ;;  %736 = vmatpush.msra.mxu2 %v34_v34  ;;  %v31_v29 = vld [vmem:[%s1880_s0 + $0x78] sm:$0xff] }
  0x1d   :  { %140 = vmatpush.bf16.xpose.msra.mxu1 %v84_v31  ;;  %801 = vmatpush.msra.mxu3 %v50_v35  ;;  %v71_v30 = vpack.c.bf16 %v31_v29, %v30_v28 }
  0x1e   :  { %737 = vmatpush.msra.mxu2 %v33_v36 }
  0x1f   :  { %802 = vmatpush.msra.mxu3 %v49_v37 }
  0x20   :  { %738 = vmatpush.msra.mxu2 %v32_v38 }
  0x21   :  { %803 = vmatpush.msra.mxu3 %v48_v40 }
  0x24   :  { %92 = vmatpush.bf16.xpose.msra.mxu0 %v75_v39 }
  0x25   :  { %141 = vmatpush.bf16.xpose.msra.mxu1 %v83_v41 }
  0x2c   :  { %93 = vmatpush.bf16.xpose.msra.mxu0 %v74_v42 }
  0x2d   :  { %142 = vmatpush.bf16.xpose.msra.mxu1 %v82_v43 }
  0x34   :  { %94 = vmatpush.bf16.xpose.msra.mxu0 %v73_v44 }
  0x35   :  { %143 = vmatpush.bf16.xpose.msra.mxu1 %v81_v45 }
  0x3c   :  { %95 = vmatpush.bf16.xpose.msra.mxu0 %v72_v46 }
  0x3d   :  { %144 = vmatpush.bf16.xpose.msra.mxu1 %v80_v47 }
  0x43   :  { %96 = vmatmul.bf16.vlgmr.msra.gmra.mxu0 %v64_v50 }
  0x44   :  { %145 = vmatmul.bf16.vlgmr.msra.gmra.mxu1 %v64_v50 }
  0x53   :  { %101 = vmatmul.bf16.gmra.mxu0 %v65_v53 }
  0x54   :  { %150 = vmatmul.bf16.gmra.mxu1 %v65_v53 }
  0x63   :  { %106 = vmatmul.bf16.gmra.mxu0 %v66_v56 }
  0x64   :  { %155 = vmatmul.bf16.gmra.mxu1 %v66_v56 }
  0x73   :  { %111 = vmatmul.bf16.gmra.mxu0 %v67_v59 }
  0x74   :  { %160 = vmatmul.bf16.gmra.mxu1 %v67_v59 }
  0x83   :  { %116 = vmatmul.bf16.gmra.mxu0 %v68_v62 }
  0x84   :  { %165 = vmatmul.bf16.gmra.mxu1 %v68_v62 }
  0x93   :  { %121 = vmatmul.bf16.gmra.mxu0 %v69_v1 }
  0x94   :  { %170 = vmatmul.bf16.gmra.mxu1 %v69_v1 }
  0xa3   :  { %126 = vmatmul.bf16.gmra.mxu0 %v70_v12 }
  0xa4   :  { %175 = vmatmul.bf16.gmra.mxu1 %v70_v12 }
  0xb3   :  { %131 = vmatmul.bf16.gmra.mxu0 %v71_v30 }
  0xb4   :  { %180 = vmatmul.bf16.gmra.mxu1 %v71_v30 }
  0xc0   :  { %v97_v4 = vpop.f32.mrf.mxu0 }
  0xc1   :  { %v187_v6 = vmul.f32 2.0, %v97_v4  ;;  %v146_v7 = vpop.f32.mrf.mxu1 }
  0xc2   :  { %v188_v8 = vmul.f32 2.0, %v146_v7 }
  0xc3   :  { %v1319_v11 = vsub.f32 %v1308_v3, %v187_v6  ;;  %v256_v6 = vlaneseq }
  0xc4   :  { %v1322_v13 = vsub.f32 %v1310_v5, %v188_v8 }
  0xc5   :  { %v1389_v8 = vand.u32 127, %v256_v6 }
  0xc6   :  { %v259_v14 = vmin.f32 %v1319_v11, %v1322_v13 }
  0xc7   :  { %v1392_v9 = vadd.s32 128, %v1389_v8 }
  0xc8   :  { %260 = vmin.xlane.f32.xlu0 %v259_v14  ;;  %v99_v15 = vpop.f32.mrf.mxu0 }
  0xc9   :  { %v189_v16 = vmul.f32 2.0, %v99_v15  ;;  %v148_v17 = vpop.f32.mrf.mxu1 }
  0xca   :  { %v190_v18 = vmul.f32 2.0, %v148_v17 }
  0xcb   :  { %v1327_v19 = vsub.f32 %v1308_v3, %v189_v16 }
  0xcc   :  { %v1330_v20 = vsub.f32 %v1310_v5, %v190_v18 }
  0xce   :  { %v262_v21 = vmin.f32 %v1327_v19, %v1330_v20 }
  0xd0   :  { %263 = vmin.xlane.f32.xlu0 %v262_v21  ;;  %v102_v22 = vpop.f32.mrf.mxu0 }
  0xd1   :  { %v191_v23 = vmul.f32 2.0, %v102_v22  ;;  %v151_v24 = vpop.f32.mrf.mxu1 }
  0xd2   :  { %v192_v25 = vmul.f32 2.0, %v151_v24 }
  0xd3   :  { %v1335_v26 = vsub.f32 %v1308_v3, %v191_v23 }
  0xd4   :  { %v1338_v27 = vsub.f32 %v1310_v5, %v192_v25 }
  0xd6   :  { %v265_v31 = vmin.f32 %v1335_v26, %v1338_v27 }
  0xd8   :  { %266 = vmin.xlane.f32.xlu1 %v265_v31  ;;  %v104_v32 = vpop.f32.mrf.mxu0 }
  0xd9   :  { %v193_v33 = vmul.f32 2.0, %v104_v32  ;;  %v153_v34 = vpop.f32.mrf.mxu1 }
  0xda   :  { %v194_v35 = vmul.f32 2.0, %v153_v34 }
  0xdb   :  { %v1349_v36 = vsub.f32 %v1308_v3, %v193_v33 }
  0xdc   :  { %v1352_v37 = vsub.f32 %v1310_v5, %v194_v35 }
  0xde   :  { %v268_v38 = vmin.f32 %v1349_v36, %v1352_v37 }
  0xe0   :  { %269 = vmin.xlane.f32.xlu1 %v268_v38  ;;  %v107_v39 = vpop.f32.mrf.mxu0 }
  0xe1   :  { %v195_v40 = vmul.f32 2.0, %v107_v39  ;;  %v156_v41 = vpop.f32.mrf.mxu1 }
  0xe2   :  { %v196_v42 = vmul.f32 2.0, %v156_v41 }
  0xe3   :  { %v1357_v43 = vsub.f32 %v1308_v3, %v195_v40 }
  0xe4   :  { %v1360_v44 = vsub.f32 %v1310_v5, %v196_v42 }
  0xe6   :  { %v271_v45 = vmin.f32 %v1357_v43, %v1360_v44 }
  0xe8   :  { %272 = vmin.xlane.f32.xlu2 %v271_v45  ;;  %v109_v46 = vpop.f32.mrf.mxu0 }
  0xe9   :  { %v197_v47 = vmul.f32 2.0, %v109_v46  ;;  %v158_v48 = vpop.f32.mrf.mxu1 }
  0xea   :  { %v198_v49 = vmul.f32 2.0, %v158_v48 }
  0xeb   :  { %v1365_v50 = vsub.f32 %v1308_v3, %v197_v47 }
  0xec   :  { %v1368_v51 = vsub.f32 %v1310_v5, %v198_v49 }
  0xee   :  { %v274_v52 = vmin.f32 %v1365_v50, %v1368_v51 }
  0xf0   :  { %275 = vmin.xlane.f32.xlu2 %v274_v52  ;;  %v112_v53 = vpop.f32.mrf.mxu0 }
  0xf1   :  { %v199_v54 = vmul.f32 2.0, %v112_v53  ;;  %v161_v55 = vpop.f32.mrf.mxu1 }
  0xf2   :  { %v200_v56 = vmul.f32 2.0, %v161_v55 }
  0xf3   :  { %v1373_v57 = vsub.f32 %v1308_v3, %v199_v54 }
  0xf4   :  { %v1376_v58 = vsub.f32 %v1310_v5, %v200_v56 }
  0xf6   :  { %v277_v59 = vmin.f32 %v1373_v57, %v1376_v58 }
  0xf8   :  { %278 = vmin.xlane.f32.xlu0 %v277_v59  ;;  %v114_v60 = vpop.f32.mrf.mxu0 }
  0xf9   :  { %v201_v61 = vmul.f32 2.0, %v114_v60  ;;  %v163_v62 = vpop.f32.mrf.mxu1 }
  0xfa   :  { %v202_v63 = vmul.f32 2.0, %v163_v62 }
  0xfb   :  { %v1381_v0 = vsub.f32 %v1308_v3, %v201_v61 }
  0xfc   :  { %v1384_v1 = vsub.f32 %v1310_v5, %v202_v63 }
  0xfe   :  { %v280_v2 = vmin.f32 %v1381_v0, %v1384_v1 }
 0x100   :  { %281 = vmin.xlane.f32.xlu2 %v280_v2  ;;  %v117_v4 = vpop.f32.mrf.mxu0 }
 0x101   :  { %v166_v7 = vpop.f32.mrf.mxu1  ;;  %v203_v18 = vmul.f32 2.0, %v117_v4 }
 0x102   :  { %v204_v21 = vmul.f32 2.0, %v166_v7 }
 0x108   :  { %v119_v10 = vpop.f32.mrf.mxu0 }
 0x109   :  { %v168_v14 = vpop.f32.mrf.mxu1  ;;  %v205_v34 = vmul.f32 2.0, %v119_v10 }
 0x10a   :  { %v206_v35 = vmul.f32 2.0, %v168_v14 }
 0x10b   :  { %v1427_v42 = vsub.f32 %v1308_v3, %v205_v34 }
 0x10c   :  { %v1430_v45 = vsub.f32 %v1310_v5, %v206_v35 }
 0x10e   :  { %v286_v49 = vmin.f32 %v1427_v42, %v1430_v45 }
 0x110   :  { %v122_v24 = vpop.f32.mrf.mxu0 }
 0x111   :  { %v171_v28 = vpop.f32.mrf.mxu1 }
 0x112   :  { %v208_v47 = vmul.f32 2.0, %v171_v28 }
 0x114   :  { %v1446_v54 = vsub.f32 %v1310_v5, %v208_v47 }
 0x119   :  { %v173_v41 = vpop.f32.mrf.mxu1 }
 0x11a   :  { %v210_v63 = vmul.f32 2.0, %v173_v41 }
 0x11c   :  { %v1464_v10 = vsub.f32 %v1310_v5, %v210_v63 }
 0x121   :  { %v176_v62 = vpop.f32.mrf.mxu1 }
 0x13b   :  { %v261_v12 = vpop.xlane.xlu0 %260 }
 0x13c   :  { %vm307_vm0 = vcmp.eq.f32.partialorder %v1319_v11, %v261_v12  ;;  %vm308_vm1 = vcmp.eq.f32.partialorder %v1322_v13, %v261_v12  ;;  %v1404_v11 = vsub.f32 %v1308_v3, %v203_v18  ;;  %v1407_v13 = vsub.f32 %v1310_v5, %v204_v21 }
 0x13d   :  { %v339_v15 = vsel %vm307_vm0, %v1389_v8, 256  ;;  %v340_v16 = vsel %vm308_vm1, %v1392_v9, 256 }
 0x13e   :  { %vm371_vm2 = vcmp.lt.s32.totalorder %v339_v15, %v340_v16  ;;  %v283_v33 = vmin.f32 %v1404_v11, %v1407_v13 }
 0x13f   :  { %v1398_v17 = vsel %vm371_vm2, %v339_v15, %v340_v16 }
 0x140   :  { %v374_v22 = vshra.s32 %v1398_v17, 16 }
 0x142   :  { %v1401_v23 = vcvt.s32.f32 %v374_v22  ;;  %v178_v22 = vpop.f32.mrf.mxu1 }
 0x143   :  { %v264_v25 = vpop.xlane.xlu0 %263 }
 0x144   :  { %vm309_vm3 = vcmp.eq.f32.partialorder %v1327_v19, %v264_v25  ;;  %vm310_vm4 = vcmp.eq.f32.partialorder %v1330_v20, %v264_v25  ;;  %377 = vmin.xlane.f32.xlu1 %v1401_v23  ;;  %v124_v20 = vpop.f32.mrf.mxu0 }
 0x145   :  { %v341_v29 = vsel %vm309_vm3, %v1389_v8, 256  ;;  %v342_v30 = vsel %vm310_vm4, %v1392_v9, 256  ;;  %v209_v61 = vmul.f32 2.0, %v124_v20 }
 0x146   :  { %vm387_vm5 = vcmp.lt.s32.totalorder %v341_v29, %v342_v30 }
 0x147   :  { %v1414_v31 = vsel %vm387_vm5, %v341_v29, %v342_v30  ;;  %v1458_v7 = vsub.f32 %v1308_v3, %v209_v61 }
 0x148   :  { %v390_v32 = vshra.s32 %v1414_v31, 16 }
 0x14a   :  { %v1419_v38 = vcvt.s32.f32 %v390_v32  ;;  %v181_v41 = vpop.f32.mrf.mxu1 }
 0x14b   :  { %v267_v19 = vpop.xlane.xlu1 %266 }
 0x14c   :  { %vm311_vm6 = vcmp.eq.f32.partialorder %v1335_v26, %v267_v19  ;;  %vm312_vm7 = vcmp.eq.f32.partialorder %v1338_v27, %v267_v19  ;;  %393 = vmin.xlane.f32.xlu0 %v1419_v38  ;;  %284 = vmin.xlane.f32.xlu1 %v283_v33  ;;  %v207_v26 = vmul.f32 2.0, %v122_v24  ;;  %v127_v59 = vpop.f32.mrf.mxu0 }
 0x14d   :  { %v343_v39 = vsel %vm311_vm6, %v1389_v8, 256  ;;  %v344_v40 = vsel %vm312_vm7, %v1392_v9, 256  ;;  %v211_v16 = vmul.f32 2.0, %v127_v59 }
 0x14e   :  { %vm403_vm8 = vcmp.lt.s32.totalorder %v343_v39, %v344_v40  ;;  %v1440_v53 = vsub.f32 %v1308_v3, %v207_v26 }
 0x14f   :  { %v1432_v46 = vsel %vm403_vm8, %v343_v39, %v344_v40  ;;  %v1476_v28 = vsub.f32 %v1308_v3, %v211_v16 }
 0x150   :  { %v406_v27 = vshra.s32 %v1432_v46, 16 }
 0x152   :  { %v1435_v48 = vcvt.s32.f32 %v406_v27 }
 0x153   :  { %v270_v52 = vpop.xlane.xlu1 %269 }
 0x154   :  { %vm313_vm9 = vcmp.eq.f32.partialorder %v1349_v36, %v270_v52  ;;  %vm314_vm10 = vcmp.eq.f32.partialorder %v1352_v37, %v270_v52  ;;  %409 = vmin.xlane.f32.xlu2 %v1435_v48  ;;  %287 = vmin.xlane.f32.xlu0 %v286_v49  ;;  %v289_v37 = vmin.f32 %v1440_v53, %v1446_v54  ;;  %v129_v21 = vpop.f32.mrf.mxu0 }
 0x155   :  { %v345_v55 = vsel %vm313_vm9, %v1389_v8, 256  ;;  %v346_v56 = vsel %vm314_vm10, %v1392_v9, 256  ;;  %v213_v34 = vmul.f32 2.0, %v129_v21 }
 0x156   :  { %vm419_vm11 = vcmp.lt.s32.totalorder %v345_v55, %v346_v56 }
 0x157   :  { %v1450_v60 = vsel %vm419_vm11, %v345_v55, %v346_v56  ;;  %v1494_v40 = vsub.f32 %v1308_v3, %v213_v34 }
 0x158   :  { %v422_v36 = vshra.s32 %v1450_v60, 16 }
 0x15a   :  { %v1455_v2 = vcvt.s32.f32 %v422_v36 }
 0x15b   :  { %v273_v4 = vpop.xlane.xlu2 %272 }
 0x15c   :  { %vm315_vm12 = vcmp.eq.f32.partialorder %v1357_v43, %v273_v4  ;;  %vm316_vm13 = vcmp.eq.f32.partialorder %v1360_v44, %v273_v4  ;;  %425 = vmin.xlane.f32.xlu1 %v1455_v2  ;;  %290 = vmin.xlane.f32.xlu2 %v289_v37  ;;  %v292_v43 = vmin.f32 %v1458_v7, %v1464_v10  ;;  %v212_v44 = vmul.f32 2.0, %v176_v62  ;;  %v132_v20 = vpop.f32.mrf.mxu0  ;;  %v183_v4 = vpop.f32.mrf.mxu1 }
 0x15d   :  { %v347_v12 = vsel %vm315_vm12, %v1389_v8, 256  ;;  %v348_v14 = vsel %vm316_vm13, %v1392_v9, 256  ;;  %v215_v52 = vmul.f32 2.0, %v132_v20  ;;  %v218_v16 = vmul.f32 2.0, %v183_v4 }
 0x15e   :  { %vm435_vm14 = vcmp.lt.s32.totalorder %v347_v12, %v348_v14  ;;  %v1482_v29 = vsub.f32 %v1310_v5, %v212_v44 }
 0x15f   :  { %v1468_v15 = vsel %vm435_vm14, %v347_v12, %v348_v14  ;;  %v1512_v61 = vsub.f32 %v1308_v3, %v215_v52  ;;  %v1534_v44 = vsub.f32 %v1310_v5, %v218_v16  ;;  %v421_v52 = vand.u32 65535, %v1450_v60 }
 0x160   :  { %v438_v18 = vshra.s32 %v1468_v15, 16 }
 0x162   :  { %v1473_v24 = vcvt.s32.f32 %v438_v18 }
 0x163   :  { %v276_v25 = vpop.xlane.xlu2 %275 }
 0x164   :  { %vm317_vm15 = vcmp.eq.f32.partialorder %v1365_v50, %v276_v25  ;;  %vm318_vm0 = vcmp.eq.f32.partialorder %v1368_v51, %v276_v25  ;;  %441 = vmin.xlane.f32.xlu0 %v1473_v24  ;;  %293 = vmin.xlane.f32.xlu1 %v292_v43  ;;  %v295_v50 = vmin.f32 %v1476_v28, %v1482_v29  ;;  %v214_v51 = vmul.f32 2.0, %v178_v22  ;;  %v134_v63 = vpop.f32.mrf.mxu0 }
 0x165   :  { %v349_v30 = vsel %vm317_vm15, %v1389_v8, 256  ;;  %v350_v32 = vsel %vm318_vm0, %v1392_v9, 256  ;;  %v373_v22 = vand.u32 65535, %v1398_v17 }
 0x166   :  { %vm451_vm1 = vcmp.lt.s32.totalorder %v349_v30, %v350_v32  ;;  %v1500_v26 = vsub.f32 %v1310_v5, %v214_v51 }
 0x167   :  { %v1486_v33 = vsel %vm451_vm1, %v349_v30, %v350_v32  ;;  %v375_v30 = vcvt.s32.f32 %v373_v22 }
 0x168   :  { %v454_v35 = vshra.s32 %v1486_v33, 16 }
 0x16a   :  { %v1491_v19 = vcvt.s32.f32 %v454_v35 }
 0x16b   :  { %v279_v39 = vpop.xlane.xlu0 %278 }
 0x16c   :  { %vm319_vm2 = vcmp.eq.f32.partialorder %v1373_v57, %v279_v39  ;;  %vm320_vm3 = vcmp.eq.f32.partialorder %v1376_v58, %v279_v39  ;;  %457 = vmin.xlane.f32.xlu2 %v1491_v19  ;;  %296 = vmin.xlane.f32.xlu1 %v295_v50  ;;  %v298_v57 = vmin.f32 %v1494_v40, %v1500_v26  ;;  %v216_v58 = vmul.f32 2.0, %v181_v41 }
 0x16d   :  { %v351_v27 = vsel %vm319_vm2, %v1389_v8, 256  ;;  %v352_v47 = vsel %vm320_vm3, %v1392_v9, 256 }
 0x16e   :  { %vm467_vm4 = vcmp.lt.s32.totalorder %v351_v27, %v352_v47  ;;  %v1518_v62 = vsub.f32 %v1310_v5, %v216_v58  ;;  %v423_v58 = vcvt.s32.f32 %v421_v52 }
 0x16f   :  { %v1504_v49 = vsel %vm467_vm4, %v351_v27, %v352_v47 }
 0x170   :  { %v470_v55 = vshra.s32 %v1504_v49, 16 }
 0x172   :  { %v1509_v56 = vcvt.s32.f32 %v470_v55 }
 0x173   :  { %v282_v59 = vpop.xlane.xlu2 %281 }
 0x174   :  { %vm321_vm5 = vcmp.eq.f32.partialorder %v1381_v0, %v282_v59  ;;  %vm322_vm6 = vcmp.eq.f32.partialorder %v1384_v1, %v282_v59  ;;  %473 = vmin.xlane.f32.xlu2 %v1509_v56  ;;  %299 = vmin.xlane.f32.xlu1 %v298_v57  ;;  %v301_v0 = vmin.f32 %v1512_v61, %v1518_v62  ;;  %v217_v1 = vmul.f32 2.0, %v134_v63 }
 0x175   :  { %v353_v36 = vsel %vm321_vm5, %v1389_v8, 256  ;;  %v354_v37 = vsel %vm322_vm6, %v1392_v9, 256 }
 0x176   :  { %vm483_vm7 = vcmp.lt.s32.totalorder %v353_v36, %v354_v37  ;;  %v1531_v43 = vsub.f32 %v1308_v3, %v217_v1  ;;  %v389_v3 = vand.u32 65535, %v1414_v31  ;;  %v405_v31 = vand.u32 65535, %v1432_v46 }
 0x177   :  { %v1522_v12 = vsel %vm483_vm7, %v353_v36, %v354_v37  ;;  %v437_v37 = vand.u32 65535, %v1468_v15  ;;  %v453_v1 = vand.u32 65535, %v1486_v33 }
 0x178   :  { %v486_v14 = vshra.s32 %v1522_v12, 16  ;;  %v304_v21 = vmin.f32 %v1531_v43, %v1534_v44  ;;  %v391_v35 = vcvt.s32.f32 %v389_v3  ;;  %v407_v41 = vcvt.s32.f32 %v405_v31 }
 0x179   :  { %v455_v22 = vcvt.s32.f32 %v453_v1  ;;  %v485_v31 = vand.u32 65535, %v1522_v12 }
 0x17a   :  { %v1527_v18 = vcvt.s32.f32 %v486_v14  ;;  %v439_v14 = vcvt.s32.f32 %v437_v37 }
 0x17c   :  { %489 = vmin.xlane.f32.xlu2 %v1527_v18  ;;  %302 = vmin.xlane.f32.xlu1 %v301_v0 }
 0x184   :  { %305 = vmin.xlane.f32.xlu1 %v304_v21 }
 0x1b7   :  { %v1539_v25 = vpop.xlane.xlu1 %377 }
 0x1b8   :  { %vm379_vm8 = vcmp.eq.f32.partialorder %v1401_v23, %v1539_v25 }
 0x1b9   :  { %v380_v32 = vsel %vm379_vm8, %v375_v30, inf }
 0x1ba   :  { %381 = vmin.xlane.f32.xlu0 %v380_v32 }
 0x1bf   :  { %v1544_v34 = vpop.xlane.xlu0 %393  ;;  %v285_v5 = vpop.xlane.xlu1 %284 }
 0x1c0   :  { %vm323_vm9 = vcmp.eq.f32.partialorder %v1404_v11, %v285_v5  ;;  %vm324_vm10 = vcmp.eq.f32.partialorder %v1407_v13, %v285_v5  ;;  %vm395_vm11 = vcmp.eq.f32.partialorder %v1419_v38, %v1544_v34 }
 0x1c1   :  { %v355_v17 = vsel %vm323_vm9, %v1389_v8, 256  ;;  %v356_v50 = vsel %vm324_vm10, %v1392_v9, 256  ;;  %v396_v23 = vsel %vm395_vm11, %v391_v35, inf }
 0x1c2   :  { %vm499_vm12 = vcmp.lt.s32.totalorder %v355_v17, %v356_v50  ;;  %397 = vmin.xlane.f32.xlu0 %v396_v23 }
 0x1c3   :  { %v1552_v51 = vsel %vm499_vm12, %v355_v17, %v356_v50 }
 0x1c4   :  { %v502_v20 = vshra.s32 %v1552_v51, 16 }
 0x1c6   :  { %v1556_v39 = vcvt.s32.f32 %v502_v20 }
 0x1c7   :  { %v1558_v11 = vpop.xlane.xlu2 %409  ;;  %v288_v13 = vpop.xlane.xlu0 %287 }
 0x1c8   :  { %vm325_vm13 = vcmp.eq.f32.partialorder %v1427_v42, %v288_v13  ;;  %vm326_vm14 = vcmp.eq.f32.partialorder %v1430_v45, %v288_v13  ;;  %505 = vmin.xlane.f32.xlu2 %v1556_v39  ;;  %vm411_vm15 = vcmp.eq.f32.partialorder %v1435_v48, %v1558_v11 }
 0x1c9   :  { %v357_v38 = vsel %vm325_vm13, %v1389_v8, 256  ;;  %v358_v46 = vsel %vm326_vm14, %v1392_v9, 256  ;;  %v412_v27 = vsel %vm411_vm15, %v407_v41, inf  ;;  %v487_v41 = vcvt.s32.f32 %v485_v31 }
 0x1ca   :  { %vm515_vm0 = vcmp.lt.s32.totalorder %v357_v38, %v358_v46  ;;  %413 = vmin.xlane.f32.xlu0 %v412_v27 }
 0x1cb   :  { %v1567_v47 = vsel %vm515_vm0, %v357_v38, %v358_v46 }
 0x1cc   :  { %v518_v42 = vshra.s32 %v1567_v47, 16 }
 0x1ce   :  { %v1571_v55 = vcvt.s32.f32 %v518_v42 }
 0x1cf   :  { %v1573_v45 = vpop.xlane.xlu1 %425  ;;  %v291_v57 = vpop.xlane.xlu2 %290 }
 0x1d0   :  { %vm327_vm1 = vcmp.eq.f32.partialorder %v1440_v53, %v291_v57  ;;  %vm328_vm2 = vcmp.eq.f32.partialorder %v1446_v54, %v291_v57  ;;  %521 = vmin.xlane.f32.xlu2 %v1571_v55  ;;  %vm427_vm3 = vcmp.eq.f32.partialorder %v1455_v2, %v1573_v45 }
 0x1d1   :  { %v359_v48 = vsel %vm327_vm1, %v1389_v8, 256  ;;  %v360_v60 = vsel %vm328_vm2, %v1392_v9, 256  ;;  %v428_v59 = vsel %vm427_vm3, %v423_v58, inf }
 0x1d2   :  { %vm531_vm4 = vcmp.lt.s32.totalorder %v359_v48, %v360_v60  ;;  %429 = vmin.xlane.f32.xlu0 %v428_v59  ;;  %v1147_v59 = vmov 1.0  }
 0x1d3   :  { %v1582_v36 = vsel %vm531_vm4, %v359_v48, %v360_v60  ;;  %v400_v60 = vcvt.f32.s32 %v1544_v34 }
 0x1d4   :  { %v534_v53 = vshra.s32 %v1582_v36, 16 }
 0x1d5   :  { %v401_v37 = vshll.u32 %v400_v60, 16 }
 0x1d6   :  { %v1586_v63 = vcvt.s32.f32 %v534_v53 }
 0x1d7   :  { %v1588_v54 = vpop.xlane.xlu0 %441  ;;  %v294_v4 = vpop.xlane.xlu1 %293 }
 0x1d8   :  { %vm329_vm5 = vcmp.eq.f32.partialorder %v1458_v7, %v294_v4  ;;  %vm330_vm6 = vcmp.eq.f32.partialorder %v1464_v10, %v294_v4  ;;  %537 = vmin.xlane.f32.xlu1 %v1586_v63  ;;  %vm443_vm7 = vcmp.eq.f32.partialorder %v1473_v24, %v1588_v54 }
 0x1d9   :  { %v361_v2 = vsel %vm329_vm5, %v1389_v8, 256  ;;  %v362_v15 = vsel %vm330_vm6, %v1392_v9, 256  ;;  %v444_v0 = vsel %vm443_vm7, %v439_v14, inf  ;;  %v501_v14 = vand.u32 65535, %v1552_v51 }
 0x1da   :  { %vm547_vm8 = vcmp.lt.s32.totalorder %v361_v2, %v362_v15  ;;  %445 = vmin.xlane.f32.xlu0 %v444_v0 }
 0x1db   :  { %v1598_v16 = vsel %vm547_vm8, %v361_v2, %v362_v15  ;;  %v416_v15 = vcvt.f32.s32 %v1558_v11 }
 0x1dc   :  { %v550_v7 = vshra.s32 %v1598_v16, 16 }
 0x1dd   :  { %v417_v11 = vshll.u32 %v416_v15, 16 }
 0x1de   :  { %v1607_v24 = vcvt.s32.f32 %v550_v7 }
 0x1df   :  { %v1601_v21 = vpop.xlane.xlu2 %457  ;;  %v297_v10 = vpop.xlane.xlu1 %296 }
 0x1e0   :  { %vm331_vm9 = vcmp.eq.f32.partialorder %v1476_v28, %v297_v10  ;;  %vm332_vm10 = vcmp.eq.f32.partialorder %v1482_v29, %v297_v10  ;;  %vm459_vm11 = vcmp.eq.f32.partialorder %v1491_v19, %v1601_v21  ;;  %v469_v28 = vand.u32 65535, %v1504_v49 }
 0x1e1   :  { %v363_v30 = vsel %vm331_vm9, %v1389_v8, 256  ;;  %v364_v33 = vsel %vm332_vm10, %v1392_v9, 256  ;;  %v460_v32 = vsel %vm459_vm11, %v455_v22, inf  ;;  %v517_v10 = vand.u32 65535, %v1567_v47 }
 0x1e2   :  { %vm563_vm12 = vcmp.lt.s32.totalorder %v363_v30, %v364_v33  ;;  %461 = vmin.xlane.f32.xlu2 %v460_v32  ;;  %553 = vmin.xlane.f32.xlu0 %v1607_v24  ;;  %v471_v35 = vcvt.s32.f32 %v469_v28 }
 0x1e3   :  { %v1612_v3 = vsel %vm563_vm12, %v363_v30, %v364_v33  ;;  %v432_v33 = vcvt.f32.s32 %v1573_v45  ;;  %v519_v32 = vcvt.s32.f32 %v517_v10 }
 0x1e4   :  { %v566_v29 = vshra.s32 %v1612_v3, 16 }
 0x1e6   :  { %v1620_v17 = vcvt.s32.f32 %v566_v29 }
 0x1e7   :  { %v1616_v5 = vpop.xlane.xlu2 %473  ;;  %v300_v19 = vpop.xlane.xlu1 %299 }
 0x1e8   :  { %vm333_vm13 = vcmp.eq.f32.partialorder %v1494_v40, %v300_v19  ;;  %vm334_vm14 = vcmp.eq.f32.partialorder %v1500_v26, %v300_v19  ;;  %vm475_vm15 = vcmp.eq.f32.partialorder %v1509_v56, %v1616_v5  ;;  %v433_v19 = vshll.u32 %v432_v33, 16 }
 0x1e9   :  { %v365_v50 = vsel %vm333_vm13, %v1389_v8, 256  ;;  %v366_v23 = vsel %vm334_vm14, %v1392_v9, 256  ;;  %v476_v49 = vsel %vm475_vm15, %v471_v35, inf  ;;  %v533_v35 = vand.u32 65535, %v1582_v36 }
 0x1ea   :  { %vm579_vm0 = vcmp.lt.s32.totalorder %v365_v50, %v366_v23  ;;  %569 = vmin.xlane.f32.xlu2 %v1620_v17  ;;  %477 = vmin.xlane.f32.xlu1 %v476_v49 }
 0x1eb   :  { %v1628_v20 = vsel %vm579_vm0, %v365_v50, %v366_v23  ;;  %v448_v23 = vcvt.f32.s32 %v1588_v54  ;;  %v535_v49 = vcvt.s32.f32 %v533_v35 }
 0x1ec   :  { %v582_v40 = vshra.s32 %v1628_v20, 16 }
 0x1ed   :  { %v449_v36 = vshll.u32 %v448_v23, 16 }
 0x1ee   :  { %v1637_v56 = vcvt.s32.f32 %v582_v40 }
 0x1ef   :  { %v1631_v26 = vpop.xlane.xlu2 %489  ;;  %v303_v13 = vpop.xlane.xlu1 %302 }
 0x1f0   :  { %vm335_vm1 = vcmp.eq.f32.partialorder %v1512_v61, %v303_v13  ;;  %vm336_vm2 = vcmp.eq.f32.partialorder %v1518_v62, %v303_v13  ;;  %vm491_vm3 = vcmp.eq.f32.partialorder %v1527_v18, %v1631_v26  ;;  %v384_v62 = vcvt.f32.s32 %v1539_v25 }
 0x1f1   :  { %v367_v38 = vsel %vm335_vm1, %v1389_v8, 256  ;;  %v368_v12 = vsel %vm336_vm2, %v1392_v9, 256  ;;  %v492_v46 = vsel %vm491_vm3, %v487_v41, inf  ;;  %v549_v41 = vand.u32 65535, %v1598_v16 }
 0x1f2   :  { %vm595_vm4 = vcmp.lt.s32.totalorder %v367_v38, %v368_v12  ;;  %493 = vmin.xlane.f32.xlu0 %v492_v46  ;;  %585 = vmin.xlane.f32.xlu1 %v1637_v56  ;;  %v385_v42 = vshll.u32 %v384_v62, 16 }
 0x1f3   :  { %v1642_v27 = vsel %vm595_vm4, %v367_v38, %v368_v12  ;;  %v464_v38 = vcvt.f32.s32 %v1601_v21  ;;  %v551_v46 = vcvt.s32.f32 %v549_v41  ;;  %v565_v21 = vand.u32 65535, %v1612_v3 }
 0x1f4   :  { %v598_v61 = vshra.s32 %v1642_v27, 16 }
 0x1f6   :  { %v1645_v52 = vcvt.s32.f32 %v598_v61  ;;  %v465_v61 = vshll.u32 %v464_v38, 16 }
 0x1f7   :  { %v306_v48 = vpop.xlane.xlu1 %305 }
 0x1f8   :  { %vm337_vm7 = vcmp.eq.f32.partialorder %v1531_v43, %v306_v48  ;;  %vm338_vm8 = vcmp.eq.f32.partialorder %v1534_v44, %v306_v48  ;;  %v503_v44 = vcvt.s32.f32 %v501_v14  ;;  %v567_v48 = vcvt.s32.f32 %v565_v21 }
 0x1f9   :  { %v369_v4 = vsel %vm337_vm7, %v1389_v8, 256  ;;  %v370_v34 = vsel %vm338_vm8, %v1392_v9, 256 }
 0x1fa   :  { %601 = vmin.xlane.f32.xlu0 %v1645_v52  ;;  %vm611_vm9 = vcmp.lt.s32.totalorder %v369_v4, %v370_v34 }
 0x1fb   :  { %v1668_v1 = vsel %vm611_vm9, %v369_v4, %v370_v34 }
 0x1fc   :  { %v614_v30 = vshra.s32 %v1668_v1, 16  ;;  %v613_v10 = vand.u32 65535, %v1668_v1 }
 0x1fe   :  { %v1681_v47 = vcvt.s32.f32 %v614_v30  ;;  %v615_v1 = vcvt.s32.f32 %v613_v10 }
 0x22d   :  { %v382_v18 = vpop.xlane.xlu0 %381 }
 0x22e   :  { %v383_v57 = vcvt.f32.s32 %v382_v18 }
 0x230   :  { %v386_v58 = vadd.s32 %v385_v42, %v383_v57  ;;  %v480_v42 = vcvt.f32.s32 %v1616_v5  ;;  %v581_v5 = vand.u32 65535, %v1628_v20 }
 0x232   :  { %vm627_vm5 = vcmp.eq.s32.totalorder %v1389_v8, %v386_v58  ;;  %vm628_vm6 = vcmp.eq.s32.totalorder %v1392_v9, %v386_v58  ;;  %v583_v34 = vcvt.s32.f32 %v581_v5  ;;  %v1134_v5 = vld [vmem:[%s1880_s0 + $0x18] sm:$0xff] }
 0x233   :  { %1098 = vmatmul.msk.f32.vlgmr.msra.gmra.mxu2 %vm627_vm5, %v1147_v59  ;;  %1114 = vmatmul.msk.f32.vlgmr.msra.gmra.mxu3 %vm628_vm6, %v1147_v59 }
 0x235   :  { %v398_v25 = vpop.xlane.xlu0 %397 }
 0x236   :  { %v399_v53 = vcvt.f32.s32 %v398_v25 }
 0x238   :  { %v402_v2 = vadd.s32 %v401_v37, %v399_v53  ;;  %v496_v37 = vcvt.f32.s32 %v1631_v26  ;;  %v597_v26 = vand.u32 65535, %v1642_v27 }
 0x23a   :  { %vm629_vm10 = vcmp.eq.s32.totalorder %v1389_v8, %v402_v2  ;;  %vm630_vm11 = vcmp.eq.s32.totalorder %v1392_v9, %v402_v2 }
 0x23b   :  { %1099 = vmatmul.msk.f32.gmra.mxu2 %vm629_vm10, %v1147_v59  ;;  %1115 = vmatmul.msk.f32.gmra.mxu3 %vm630_vm11, %v1147_v59  ;;  %v1664_v43 = vpop.xlane.xlu2 %505 }
 0x23c   :  { %vm507_vm12 = vcmp.eq.f32.partialorder %v1556_v39, %v1664_v43 }
 0x23d   :  { %v414_v0 = vpop.xlane.xlu0 %413  ;;  %v508_v51 = vsel %vm507_vm12, %v503_v44, inf  ;;  %v599_v44 = vcvt.s32.f32 %v597_v26 }
 0x23e   :  { %v415_v7 = vcvt.f32.s32 %v414_v0  ;;  %509 = vmin.xlane.f32.xlu2 %v508_v51  ;;  %v512_v0 = vcvt.f32.s32 %v1664_v43 }
 0x240   :  { %v418_v22 = vadd.s32 %v417_v11, %v415_v7  ;;  %v513_v27 = vshll.u32 %v512_v0, 16 }
 0x242   :  { %vm631_vm13 = vcmp.eq.s32.totalorder %v1389_v8, %v418_v22  ;;  %vm632_vm14 = vcmp.eq.s32.totalorder %v1392_v9, %v418_v22 }
 0x243   :  { %1100 = vmatmul.msk.f32.gmra.mxu2 %vm631_vm13, %v1147_v59  ;;  %1116 = vmatmul.msk.f32.gmra.mxu3 %vm632_vm14, %v1147_v59  ;;  %v1677_v39 = vpop.xlane.xlu2 %521 }
 0x244   :  { %vm523_vm15 = vcmp.eq.f32.partialorder %v1571_v55, %v1677_v39  ;;  %v528_v22 = vcvt.f32.s32 %v1677_v39  ;;  %v1131_v39 = vld [vmem:[%s1880_s0] sm:$0xff] }
 0x245   :  { %v430_v28 = vpop.xlane.xlu0 %429  ;;  %v524_v29 = vsel %vm523_vm15, %v519_v32, inf }
 0x246   :  { %v431_v45 = vcvt.f32.s32 %v430_v28  ;;  %525 = vmin.xlane.f32.xlu1 %v524_v29  ;;  %617 = vmin.xlane.f32.xlu2 %v1681_v47  ;;  %v529_v29 = vshll.u32 %v528_v22, 16 }
 0x248   :  { %v434_v50 = vadd.s32 %v433_v19, %v431_v45 }
 0x24a   :  { %vm633_vm0 = vcmp.eq.s32.totalorder %v1389_v8, %v434_v50  ;;  %vm634_vm1 = vcmp.eq.s32.totalorder %v1392_v9, %v434_v50 }
 0x24b   :  { %1101 = vmatmul.msk.f32.gmra.mxu2 %vm633_vm0, %v1147_v59  ;;  %1117 = vmatmul.msk.f32.gmra.mxu3 %vm634_vm1, %v1147_v59  ;;  %v1690_v55 = vpop.xlane.xlu1 %537 }
 0x24c   :  { %vm539_vm2 = vcmp.eq.f32.partialorder %v1586_v63, %v1690_v55  ;;  %v544_v23 = vcvt.f32.s32 %v1690_v55  ;;  %v1132_v55 = vld [vmem:[%s1880_s0 + $0x8] sm:$0xff] }
 0x24d   :  { %v446_v31 = vpop.xlane.xlu0 %445  ;;  %v540_v40 = vsel %vm539_vm2, %v535_v49, inf }
 0x24e   :  { %v447_v13 = vcvt.f32.s32 %v446_v31  ;;  %541 = vmin.xlane.f32.xlu0 %v540_v40 }
 0x250   :  { %v450_v54 = vadd.s32 %v449_v36, %v447_v13  ;;  %v545_v13 = vshll.u32 %v544_v23, 16 }
 0x252   :  { %vm635_vm3 = vcmp.eq.s32.totalorder %v1389_v8, %v450_v54  ;;  %vm636_vm4 = vcmp.eq.s32.totalorder %v1392_v9, %v450_v54 }
 0x253   :  { %1102 = vmatmul.msk.f32.gmra.mxu2 %vm635_vm3, %v1147_v59  ;;  %1118 = vmatmul.msk.f32.gmra.mxu3 %vm636_vm4, %v1147_v59 }
 0x255   :  { %v462_v12 = vpop.xlane.xlu2 %461  ;;  %v1700_v63 = vpop.xlane.xlu0 %553 }
 0x256   :  { %v463_v62 = vcvt.f32.s32 %v462_v12  ;;  %vm555_vm5 = vcmp.eq.f32.partialorder %v1607_v24, %v1700_v63  ;;  %v481_v24 = vshll.u32 %v480_v42, 16 }
 0x257   :  { %v556_v16 = vsel %vm555_vm5, %v551_v46, inf }
 0x258   :  { %v466_v18 = vadd.s32 %v465_v61, %v463_v62  ;;  %557 = vmin.xlane.f32.xlu1 %v556_v16  ;;  %v560_v62 = vcvt.f32.s32 %v1700_v63  ;;  %v1133_v16 = vld [vmem:[%s1880_s0 + $0x10] sm:$0xff] }
 0x25a   :  { %vm637_vm6 = vcmp.eq.s32.totalorder %v1389_v8, %v466_v18  ;;  %vm638_vm7 = vcmp.eq.s32.totalorder %v1392_v9, %v466_v18 }
 0x25b   :  { %1103 = vmatmul.msk.f32.gmra.mxu2 %vm637_vm6, %v1147_v59  ;;  %1119 = vmatmul.msk.f32.gmra.mxu3 %vm638_vm7, %v1147_v59 }
 0x25d   :  { %v1710_v57 = vpop.xlane.xlu2 %569  ;;  %v478_v58 = vpop.xlane.xlu1 %477 }
 0x25e   :  { %v479_v60 = vcvt.f32.s32 %v478_v58  ;;  %vm571_vm8 = vcmp.eq.f32.partialorder %v1620_v17, %v1710_v57  ;;  %v497_v17 = vshll.u32 %v496_v37, 16  ;;  %v561_v58 = vshll.u32 %v560_v62, 16 }
 0x25f   :  { %v572_v3 = vsel %vm571_vm8, %v567_v48, inf  ;;  %v576_v63 = vcvt.f32.s32 %v1710_v57 }
 0x260   :  { %v482_v25 = vadd.s32 %v481_v24, %v479_v60  ;;  %573 = vmin.xlane.f32.xlu2 %v572_v3 }
 0x261   :  { %v577_v57 = vshll.u32 %v576_v63, 16  ;;  %v1141_v63 = vld [vmem:[%s1880_s0 + $0x50] sm:$0xff] }
 0x262   :  { %vm639_vm9 = vcmp.eq.s32.totalorder %v1389_v8, %v482_v25  ;;  %vm640_vm10 = vcmp.eq.s32.totalorder %v1392_v9, %v482_v25 }
 0x263   :  { %1104 = vmatmul.msk.f32.gmra.mxu2 %vm639_vm9, %v1147_v59  ;;  %1120 = vmatmul.msk.f32.gmra.mxu3 %vm640_vm10, %v1147_v59 }
 0x265   :  { %v494_v53 = vpop.xlane.xlu0 %493  ;;  %v1720_v4 = vpop.xlane.xlu1 %585 }
 0x266   :  { %v495_v14 = vcvt.f32.s32 %v494_v53  ;;  %vm587_vm11 = vcmp.eq.f32.partialorder %v1637_v56, %v1720_v4 }
 0x267   :  { %v588_v20 = vsel %vm587_vm11, %v583_v34, inf }
 0x268   :  { %v498_v2 = vadd.s32 %v497_v17, %v495_v14  ;;  %589 = vmin.xlane.f32.xlu0 %v588_v20 }
 0x26a   :  { %vm641_vm12 = vcmp.eq.s32.totalorder %v1389_v8, %v498_v2  ;;  %vm642_vm13 = vcmp.eq.s32.totalorder %v1392_v9, %v498_v2 }
 0x26b   :  { %1105 = vmatmul.msk.f32.gmra.mxu2 %vm641_vm12, %v1147_v59  ;;  %1121 = vmatmul.msk.f32.gmra.mxu3 %vm642_vm13, %v1147_v59 }
 0x26d   :  { %v1729_v15 = vpop.xlane.xlu0 %601 }
 0x26e   :  { %vm603_vm14 = vcmp.eq.f32.partialorder %v1645_v52, %v1729_v15 }
 0x26f   :  { %v604_v56 = vsel %vm603_vm14, %v599_v44, inf  ;;  %v592_v44 = vcvt.f32.s32 %v1720_v4 }
 0x270   :  { %605 = vmin.xlane.f32.xlu1 %v604_v56  ;;  %v1135_v56 = vld [vmem:[%s1880_s0 + $0x20] sm:$0xff] }
 0x271   :  { %v593_v4 = vshll.u32 %v592_v44, 16 }
 0x2b1   :  { %v510_v51 = vpop.xlane.xlu2 %509 }
 0x2b2   :  { %v511_v11 = vcvt.f32.s32 %v510_v51 }
 0x2b4   :  { %v514_v7 = vadd.s32 %v513_v27, %v511_v11 }
 0x2b6   :  { %v740_v30 = vpop.f32.mrf.mxu2  ;;  %v805_v33 = vpop.f32.mrf.mxu3  ;;  %vm643_vm15 = vcmp.eq.s32.totalorder %v1389_v8, %v514_v7  ;;  %vm644_vm0 = vcmp.eq.s32.totalorder %v1392_v9, %v514_v7 }
 0x2b7   :  { %v806_v32 = vadd.f32 %v805_v33, %v740_v30  ;;  %1106 = vmatmul.msk.f32.gmra.mxu2 %vm643_vm15, %v1147_v59  ;;  %1122 = vmatmul.msk.f32.gmra.mxu3 %vm644_vm0, %v1147_v59  ;;  %v608_v33 = vcvt.f32.s32 %v1729_v15 }
 0x2b9   :  { %853 = vst [vmem:[%s1882_s3] sm:$0xff] %v806_v32  ;;  %v1743_v52 = vpop.xlane.xlu2 %617  ;;  %v526_v43 = vpop.xlane.xlu1 %525  ;;  %v904_v28 = vsub.f32 %v806_v32, %v1131_v39  ;;  %v1136_v32 = vld [vmem:[%s1880_s0 + $0x28] sm:$0xff]  ;;  %v609_v15 = vshll.u32 %v608_v33, 16 }
 0x2ba   :  { %v527_v19 = vcvt.f32.s32 %v526_v43  ;;  %vm619_vm1 = vcmp.eq.f32.partialorder %v1681_v47, %v1743_v52 }
 0x2bb   :  { %v620_v45 = vsel %vm619_vm1, %v615_v1, inf  ;;  %v984_v35 = vmul.f32 %v904_v28, %v904_v28  ;;  %vm1054_vm1 = vcmp.eq.s32.totalorder %v1389_v8, 0 }
 0x2bc   :  { %v530_v50 = vadd.s32 %v529_v29, %v527_v19  ;;  %621 = vmin.xlane.f32.xlu2 %v620_v45 }
 0x2bd   :  { %1000 = vadd.xlane.f32.xlu0 %v984_v35 }
 0x2be   :  { %v743_v49 = vpop.f32.mrf.mxu2  ;;  %v808_v31 = vpop.f32.mrf.mxu3  ;;  %vm645_vm2 = vcmp.eq.s32.totalorder %v1389_v8, %v530_v50  ;;  %vm646_vm3 = vcmp.eq.s32.totalorder %v1392_v9, %v530_v50  ;;  %v1137_v50 = vld [vmem:[%s1880_s0 + $0x30] sm:$0xff] }
 0x2bf   :  { %v809_v40 = vadd.f32 %v808_v31, %v743_v49  ;;  %1107 = vmatmul.msk.f32.gmra.mxu2 %vm645_vm2, %v1147_v59  ;;  %1123 = vmatmul.msk.f32.gmra.mxu3 %vm646_vm3, %v1147_v59 }
 0x2c1   :  { %854 = vst [vmem:[%s1882_s3 + $0x8] sm:$0xff] %v809_v40  ;;  %v542_v47 = vpop.xlane.xlu0 %541  ;;  %v905_v36 = vsub.f32 %v809_v40, %v1132_v55  ;;  %v1138_v55 = vld [vmem:[%s1880_s0 + $0x38] sm:$0xff] }
 0x2c2   :  { %v543_v54 = vcvt.f32.s32 %v542_v47 }
 0x2c3   :  { %v985_v41 = vmul.f32 %v905_v36, %v905_v36 }
 0x2c4   :  { %v546_v38 = vadd.s32 %v545_v13, %v543_v54  ;;  %v624_v54 = vcvt.f32.s32 %v1743_v52  ;;  %v1139_v52 = vld [vmem:[%s1880_s0 + $0x40] sm:$0xff] }
 0x2c5   :  { %1002 = vadd.xlane.f32.xlu1 %v985_v41 }
 0x2c6   :  { %v746_v12 = vpop.f32.mrf.mxu2  ;;  %v811_v46 = vpop.f32.mrf.mxu3  ;;  %vm647_vm4 = vcmp.eq.s32.totalorder %v1389_v8, %v546_v38  ;;  %vm648_vm5 = vcmp.eq.s32.totalorder %v1392_v9, %v546_v38  ;;  %v625_v38 = vshll.u32 %v624_v54, 16 }
 0x2c7   :  { %v812_v61 = vadd.f32 %v811_v46, %v746_v12  ;;  %1108 = vmatmul.msk.f32.gmra.mxu2 %vm647_vm4, %v1147_v59  ;;  %1124 = vmatmul.msk.f32.gmra.mxu3 %vm648_vm5, %v1147_v59 }
 0x2c9   :  { %855 = vst [vmem:[%s1882_s3 + $0x10] sm:$0xff] %v812_v61  ;;  %v906_v18 = vsub.f32 %v812_v61, %v1133_v16 }
 0x2cb   :  { %v558_v21 = vpop.xlane.xlu1 %557  ;;  %v986_v42 = vmul.f32 %v906_v18, %v906_v18 }
 0x2cc   :  { %v559_v48 = vcvt.f32.s32 %v558_v21 }
 0x2cd   :  { %1004 = vadd.xlane.f32.xlu2 %v986_v42 }
 0x2ce   :  { %v562_v24 = vadd.s32 %v561_v58, %v559_v48  ;;  %v749_v60 = vpop.f32.mrf.mxu2  ;;  %v814_v3 = vpop.f32.mrf.mxu3 }
 0x2cf   :  { %v815_v25 = vadd.f32 %v814_v3, %v749_v60 }
 0x2d0   :  { %vm649_vm6 = vcmp.eq.s32.totalorder %v1389_v8, %v562_v24  ;;  %vm650_vm7 = vcmp.eq.s32.totalorder %v1392_v9, %v562_v24 }
 0x2d1   :  { %856 = vst [vmem:[%s1882_s3 + $0x18] sm:$0xff] %v815_v25  ;;  %1109 = vmatmul.msk.f32.gmra.mxu2 %vm649_vm6, %v1147_v59  ;;  %1125 = vmatmul.msk.f32.gmra.mxu3 %vm650_vm7, %v1147_v59  ;;  %v907_v37 = vsub.f32 %v815_v25, %v1134_v5 }
 0x2d3   :  { %v574_v53 = vpop.xlane.xlu2 %573  ;;  %v987_v34 = vmul.f32 %v907_v37, %v907_v37 }
 0x2d4   :  { %v575_v17 = vcvt.f32.s32 %v574_v53 }
 0x2d5   :  { %1006 = vadd.xlane.f32.xlu0 %v987_v34 }
 0x2d6   :  { %v578_v14 = vadd.s32 %v577_v57, %v575_v17  ;;  %v752_v20 = vpop.f32.mrf.mxu2  ;;  %v817_v2 = vpop.f32.mrf.mxu3  ;;  %v1142_v17 = vld [vmem:[%s1880_s0 + $0x58] sm:$0xff] }
 0x2d7   :  { %v818_v26 = vadd.f32 %v817_v2, %v752_v20 }
 0x2d8   :  { %vm651_vm8 = vcmp.eq.s32.totalorder %v1389_v8, %v578_v14  ;;  %vm652_vm9 = vcmp.eq.s32.totalorder %v1392_v9, %v578_v14 }
 0x2d9   :  { %857 = vst [vmem:[%s1882_s3 + $0x20] sm:$0xff] %v818_v26  ;;  %1110 = vmatmul.msk.f32.gmra.mxu2 %vm651_vm8, %v1147_v59  ;;  %1126 = vmatmul.msk.f32.gmra.mxu3 %vm652_vm9, %v1147_v59  ;;  %v908_v0 = vsub.f32 %v818_v26, %v1135_v56  ;;  %v1143_v56 = vld [vmem:[%s1880_s0 + $0x60] sm:$0xff] }
 0x2db   :  { %v590_v51 = vpop.xlane.xlu0 %589  ;;  %v988_v27 = vmul.f32 %v908_v0, %v908_v0 }
 0x2dc   :  { %v591_v11 = vcvt.f32.s32 %v590_v51 }
 0x2dd   :  { %1008 = vadd.xlane.f32.xlu1 %v988_v27 }
 0x2de   :  { %v594_v7 = vadd.s32 %v593_v4, %v591_v11  ;;  %v755_v10 = vpop.f32.mrf.mxu2  ;;  %v820_v22 = vpop.f32.mrf.mxu3 }
 0x2df   :  { %v821_v30 = vadd.f32 %v820_v22, %v755_v10 }
 0x2e0   :  { %vm653_vm10 = vcmp.eq.s32.totalorder %v1389_v8, %v594_v7  ;;  %vm654_vm11 = vcmp.eq.s32.totalorder %v1392_v9, %v594_v7  ;;  %v1144_v7 = vld [vmem:[%s1880_s0 + $0x68] sm:$0xff] }
 0x2e1   :  { %858 = vst [vmem:[%s1882_s3 + $0x28] sm:$0xff] %v821_v30  ;;  %1111 = vmatmul.msk.f32.gmra.mxu2 %vm653_vm10, %v1147_v59  ;;  %1127 = vmatmul.msk.f32.gmra.mxu3 %vm654_vm11, %v1147_v59  ;;  %v909_v43 = vsub.f32 %v821_v30, %v1136_v32 }
 0x2e3   :  { %v606_v1 = vpop.xlane.xlu1 %605  ;;  %v989_v39 = vmul.f32 %v909_v43, %v909_v43  ;;  %v1145_v43 = vld [vmem:[%s1880_s0 + $0x70] sm:$0xff] }
 0x2e4   :  { %v607_v28 = vcvt.f32.s32 %v606_v1 }
 0x2e5   :  { %1010 = vadd.xlane.f32.xlu2 %v989_v39 }
 0x2e6   :  { %v610_v29 = vadd.s32 %v609_v15, %v607_v28  ;;  %v758_v19 = vpop.f32.mrf.mxu2  ;;  %v823_v45 = vpop.f32.mrf.mxu3 }
 0x2e7   :  { %v824_v35 = vadd.f32 %v823_v45, %v758_v19  ;;  %v1146_v19 = vld [vmem:[%s1880_s0 + $0x78] sm:$0xff] }
 0x2e8   :  { %vm655_vm12 = vcmp.eq.s32.totalorder %v1389_v8, %v610_v29  ;;  %vm656_vm13 = vcmp.eq.s32.totalorder %v1392_v9, %v610_v29 }
 0x2e9   :  { %859 = vst [vmem:[%s1882_s3 + $0x30] sm:$0xff] %v824_v35  ;;  %1112 = vmatmul.msk.f32.gmra.mxu2 %vm655_vm12, %v1147_v59  ;;  %1128 = vmatmul.msk.f32.gmra.mxu3 %vm656_vm13, %v1147_v59  ;;  %v910_v23 = vsub.f32 %v824_v35, %v1137_v50 }
 0x2eb   :  { %v990_v49 = vmul.f32 %v910_v23, %v910_v23 }
 0x2ed   :  { %1012 = vadd.xlane.f32.xlu0 %v990_v49 }
 0x2ee   :  { %v761_v31 = vpop.f32.mrf.mxu2  ;;  %v826_v40 = vpop.f32.mrf.mxu3 }
 0x2ef   :  { %v827_v47 = vadd.f32 %v826_v40, %v761_v31 }
 0x2f1   :  { %860 = vst [vmem:[%s1882_s3 + $0x38] sm:$0xff] %v827_v47  ;;  %v911_v36 = vsub.f32 %v827_v47, %v1138_v55 }
 0x2f3   :  { %v991_v13 = vmul.f32 %v911_v36, %v911_v36 }
 0x2f5   :  { %1014 = vadd.xlane.f32.xlu1 %v991_v13 }
 0x32f   :  { %v622_v41 = vpop.xlane.xlu2 %621 }
 0x330   :  { %v623_v12 = vcvt.f32.s32 %v622_v41  ;;  %v1001_v50 = vpop.xlane.xlu0 %1000 }
 0x332   :  { %v626_v46 = vadd.s32 %v625_v38, %v623_v12 }
 0x334   :  { %vm657_vm14 = vcmp.eq.s32.totalorder %v1389_v8, %v626_v46  ;;  %vm658_vm15 = vcmp.eq.s32.totalorder %v1392_v9, %v626_v46 }
 0x335   :  { %1113 = vmatmul.msk.f32.gmra.mxu2 %vm657_vm14, %v1147_v59  ;;  %1129 = vmatmul.msk.f32.gmra.mxu3 %vm658_vm15, %v1147_v59  ;;  %v1140_v59 = vld [vmem:[%s1880_s0 + $0x48] sm:$0xff] }
 0x338   :  { %v1003_v23 = vpop.xlane.xlu1 %1002 }
 0x339   :  { %v1032_v55 = vadd.f32 %v1003_v23, %v1001_v50 }
 0x33a   :  { %v764_v61 = vpop.f32.mrf.mxu2  ;;  %v829_v62 = vpop.f32.mrf.mxu3 }
 0x33b   :  { %v830_v16 = vadd.f32 %v829_v62, %v764_v61 }
 0x33d   :  { %861 = vst [vmem:[%s1882_s3 + $0x40] sm:$0xff] %v830_v16  ;;  %v912_v18 = vsub.f32 %v830_v16, %v1139_v52 }
 0x33f   :  { %v992_v21 = vmul.f32 %v912_v18, %v912_v18 }
 0x340   :  { %v1005_v49 = vpop.xlane.xlu2 %1004 }
 0x341   :  { %1016 = vadd.xlane.f32.xlu2 %v992_v21  ;;  %v1033_v36 = vadd.f32 %v1032_v55, %v1005_v49 }
 0x342   :  { %v767_v42 = vpop.f32.mrf.mxu2  ;;  %v832_v9 = vpop.f32.mrf.mxu3 }
 0x343   :  { %v833_v58 = vadd.f32 %v832_v9, %v767_v42 }
 0x345   :  { %862 = vst [vmem:[%s1882_s3 + $0x48] sm:$0xff] %v833_v58  ;;  %v913_v48 = vsub.f32 %v833_v58, %v1140_v59 }
 0x347   :  { %v993_v24 = vmul.f32 %v913_v48, %v913_v48 }
 0x348   :  { %v1007_v31 = vpop.xlane.xlu0 %1006 }
 0x349   :  { %1018 = vadd.xlane.f32.xlu0 %v993_v24  ;;  %v1034_v54 = vadd.f32 %v1033_v36, %v1007_v31 }
 0x34a   :  { %v770_v60 = vpop.f32.mrf.mxu2  ;;  %v835_v3 = vpop.f32.mrf.mxu3 }
 0x34b   :  { %v836_v25 = vadd.f32 %v835_v3, %v770_v60 }
 0x34d   :  { %863 = vst [vmem:[%s1882_s3 + $0x50] sm:$0xff] %v836_v25  ;;  %v914_v5 = vsub.f32 %v836_v25, %v1141_v63 }
 0x34f   :  { %v994_v37 = vmul.f32 %v914_v5, %v914_v5 }
 0x350   :  { %v1009_v40 = vpop.xlane.xlu1 %1008 }
 0x351   :  { %1020 = vadd.xlane.f32.xlu1 %v994_v37  ;;  %v1035_v38 = vadd.f32 %v1034_v54, %v1009_v40 }
 0x354   :  { %v773_v53 = vpop.f32.mrf.mxu2  ;;  %v838_v34 = vpop.f32.mrf.mxu3 }
 0x355   :  { %v839_v57 = vadd.f32 %v838_v34, %v773_v53  ;;  %v870_v53 = vshrl.u32 %v256_v6, 7 }
 0x357   :  { %864 = vst [vmem:[%s1882_s3 + $0x58] sm:$0xff] %v839_v57  ;;  %v915_v14 = vsub.f32 %v839_v57, %v1142_v17  ;;  %vm1053_vm0 = vcmp.eq.s32.totalorder %v870_v53, 0 }
 0x358   :  { %v1011_v47 = vpop.xlane.xlu2 %1010  ;;  %vm1055_vm2 = vmand %vm1053_vm0, %vm1054_vm1 }
 0x359   :  { %v995_v20 = vmul.f32 %v915_v14, %v915_v14  ;;  %v1036_v46 = vadd.f32 %v1035_v38, %v1011_v47 }
 0x35b   :  { %1022 = vadd.xlane.f32.xlu2 %v995_v20 }
 0x35c   :  { %v776_v2 = vpop.f32.mrf.mxu2  ;;  %v841_v26 = vpop.f32.mrf.mxu3 }
 0x35d   :  { %v842_v44 = vadd.f32 %v841_v26, %v776_v2 }
 0x35f   :  { %865 = vst [vmem:[%s1882_s3 + $0x60] sm:$0xff] %v842_v44  ;;  %v916_v0 = vsub.f32 %v842_v44, %v1143_v56 }
 0x360   :  { %v1013_v13 = vpop.xlane.xlu0 %1012 }
 0x361   :  { %v996_v51 = vmul.f32 %v916_v0, %v916_v0  ;;  %v1037_v61 = vadd.f32 %v1036_v46, %v1013_v13 }
 0x363   :  { %1024 = vadd.xlane.f32.xlu0 %v996_v51 }
 0x364   :  { %v779_v27 = vpop.f32.mrf.mxu2  ;;  %v844_v4 = vpop.f32.mrf.mxu3 }
 0x365   :  { %v845_v11 = vadd.f32 %v844_v4, %v779_v27 }
 0x367   :  { %866 = vst [vmem:[%s1882_s3 + $0x68] sm:$0xff] %v845_v11  ;;  %v917_v10 = vsub.f32 %v845_v11, %v1144_v7 }
 0x368   :  { %v1015_v41 = vpop.xlane.xlu1 %1014 }
 0x369   :  { %v997_v22 = vmul.f32 %v917_v10, %v917_v10  ;;  %v1038_v16 = vadd.f32 %v1037_v61, %v1015_v41 }
 0x36b   :  { %1026 = vadd.xlane.f32.xlu1 %v997_v22 }
 0x36c   :  { %v782_v30 = vpop.f32.mrf.mxu2  ;;  %v847_v33 = vpop.f32.mrf.mxu3 }
 0x36d   :  { %v848_v32 = vadd.f32 %v847_v33, %v782_v30 }
 0x36f   :  { %867 = vst [vmem:[%s1882_s3 + $0x70] sm:$0xff] %v848_v32  ;;  %v918_v1 = vsub.f32 %v848_v32, %v1145_v43 }
 0x371   :  { %v998_v39 = vmul.f32 %v918_v1, %v918_v1 }
 0x373   :  { %1028 = vadd.xlane.f32.xlu2 %v998_v39 }
 0x3b4   :  { %v1017_v12 = vpop.xlane.xlu2 %1016 }
 0x3b5   :  { %v1039_v18 = vadd.f32 %v1038_v16, %v1017_v12 }
 0x3b8   :  { %v785_v15 = vpop.f32.mrf.mxu2  ;;  %v850_v28 = vpop.f32.mrf.mxu3 }
 0x3b9   :  { %v851_v29 = vadd.f32 %v850_v28, %v785_v15 }
 0x3bb   :  { %868 = vst [vmem:[%s1882_s3 + $0x78] sm:$0xff] %v851_v29  ;;  %v919_v45 = vsub.f32 %v851_v29, %v1146_v19 }
 0x3bc   :  { %v1019_v62 = vpop.xlane.xlu0 %1018 }
 0x3bd   :  { %v999_v35 = vmul.f32 %v919_v45, %v919_v45  ;;  %v1040_v42 = vadd.f32 %v1039_v18, %v1019_v62 }
 0x3bf   :  { %1030 = vadd.xlane.f32.xlu0 %v999_v35 }
 0x3c4   :  { %v1021_v52 = vpop.xlane.xlu1 %1020 }
 0x3c5   :  { %v1041_v9 = vadd.f32 %v1040_v42, %v1021_v52 }
 0x3ce   :  { %v1023_v21 = vpop.xlane.xlu2 %1022 }
 0x3cf   :  { %v1042_v59 = vadd.f32 %v1041_v9, %v1023_v21 }
 0x3d6   :  { %v1025_v58 = vpop.xlane.xlu0 %1024 }
 0x3d7   :  { %v1043_v24 = vadd.f32 %v1042_v59, %v1025_v58 }
 0x3de   :  { %v1027_v48 = vpop.xlane.xlu1 %1026 }
 0x3df   :  { %v1044_v3 = vadd.f32 %v1043_v24, %v1027_v48 }
 0x3e6   :  { %v1029_v60 = vpop.xlane.xlu2 %1028 }
 0x3e7   :  { %v1045_v25 = vadd.f32 %v1044_v3, %v1029_v60 }
 0x432   :  { %v1031_v63 = vpop.xlane.xlu0 %1030 }
 0x433   :  { %v1046_v5 = vadd.f32 %v1045_v25, %v1031_v63 }
 0x435   :  { %v1047_v37 = vrot.slane %v1046_v5, 4 }
 0x437   :  { %v1048_v34 = vadd.f32 %v1047_v37, %v1046_v5 }
 0x439   :  { %v1049_v57 = vrot.slane %v1048_v34, 2 }
 0x43b   :  { %v1050_v17 = vadd.f32 %v1049_v57, %v1048_v34 }
 0x43d   :  { %v1051_v14 = vrot.slane %v1050_v17, 1 }
 0x43f   :  { %v1052_v20 = vadd.f32 %v1051_v14, %v1050_v17 }
 0x441   :  { %v1056_v2 = vsel %vm1055_vm2, %v1052_v20, 0.0 }
 0x442   :  { %1057 = vst [vmem:[%s1883_s4] sm:$0xff] %v1056_v2 }

// kernel: tile.219
= control target key start
LH: loop header
LB: loop body
LE: loop exit
PB: predicated region body
PF: predicated region fallthrough
CT: control target
= control target key end

     0   :  { %s22_s0 = inlined_call_operand.vmem [shape: f32[4], index: 0, kind: input, shape index: {}]   ;;  %s23_s1 = inlined_call_operand.vmem [shape: f32[4,4], index: 1, kind: output, shape index: {}]  }
   0x1   :  { %v4_v0 = vld [vmem:[%s22_s0] ss:$0 sm:$0xff] }
   0x2   :  { %5 = vst [vmem:[%s23_s1] sm:$0xf] %v4_v0 }

// kernel: tile.221
= control target key start
LH: loop header
LB: loop body
LE: loop exit
PB: predicated region body
PF: predicated region fallthrough
CT: control target
= control target key end

     0   :  { %s37_s8 = smov 4   ;;  %s38_s9 = smov 8   ;;  %vm7_vm0 = vcmask 31744   ;;  %vm13_vm1 = vcmask 130144   ;;  %vm19_vm2 = vcmask 97344   ;;  %vm25_vm3 = vcmask 64544   ;;  %s55_s0 = inlined_call_operand.vmem [shape: f32[4,4], index: 0, kind: input, shape index: {}]   ;;  %s56_s1 = inlined_call_operand.vmem [shape: f32[1,16], index: 1, kind: output, shape index: {}]  }
   0x1   :  { %v4_v0 = vld [vmem:[%s55_s0] sm:$0xf]  ;;  %s36_s0 = smov 12  }
   0x2   :  { %5 = vst [vmem:[#allocation1] sm:$0xf] %v4_v0 }
   0x9   :  { %v10_v1 = vld [vmem:[#allocation1 + $0x3] sm:$0x1]   ;;  %v22_v2 = vld [vmem:[#allocation1 + $0x1] sm:$0x1]   ;;  %v16_v3 = vld [vmem:[#allocation1 + $0x2] sm:$0x1]  }
   0xa   :  { %11 = vrot.lane.b32.xlu0 %v10_v1, %s36_s0  ;;  %23 = vrot.lane.b32.xlu1 %v22_v2, %s37_s8  ;;  %v6_v4 = vld [vmem:[#allocation1] sm:$0x1]  }
   0xb   :  { %8 = vst.msk [vmem:[#allocation0] sm:$0x1] %vm7_vm0, %v6_v4  }
  0x12   :  { %17 = vrot.lane.b32.xlu0 %v16_v3, %s38_s9 }
  0x7c   :  { %v12_v5 = vpop.permute.xlu0 %11   ;;  %v24_v6 = vpop.permute.xlu1 %23  }
  0x7d   :  { %14 = vst.msk [vmem:[#allocation0] sm:$0x1] %vm13_vm1, %v12_v5  }
  0x84   :  { %v18_v7 = vpop.permute.xlu0 %17  }
  0x85   :  { %20 = vst.msk [vmem:[#allocation0] sm:$0x1] %vm19_vm2, %v18_v7  }
  0x86   :  { %26 = vst.msk [vmem:[#allocation0] sm:$0x1] %vm25_vm3, %v24_v6  }
  0x8d   :  { %v29_v8 = vld [vmem:[#allocation0] sm:$0x1] }
  0x8e   :  { %32 = vst [vmem:[%s56_s1] sm:$0x1] %v29_v8 }

// kernel: tile.232
= control target key start
LH: loop header
LB: loop body
LE: loop exit
PB: predicated region body
PF: predicated region fallthrough
CT: control target
= control target key end

     0   :  { %s37_s8 = smov 4   ;;  %s38_s9 = smov 8   ;;  %vm7_vm0 = vcmask 31744   ;;  %vm13_vm1 = vcmask 130144   ;;  %vm19_vm2 = vcmask 97344   ;;  %vm25_vm3 = vcmask 64544   ;;  %s55_s0 = inlined_call_operand.vmem [shape: f32[4,4], index: 0, kind: input, shape index: {}]   ;;  %s56_s1 = inlined_call_operand.vmem [shape: f32[16], index: 1, kind: output, shape index: {}]  }
   0x1   :  { %v4_v0 = vld [vmem:[%s55_s0] sm:$0xf]  ;;  %s36_s0 = smov 12  }
   0x2   :  { %5 = vst [vmem:[#allocation1] sm:$0xf] %v4_v0 }
   0x9   :  { %v10_v1 = vld [vmem:[#allocation1 + $0x3] sm:$0x1]   ;;  %v22_v2 = vld [vmem:[#allocation1 + $0x1] sm:$0x1]   ;;  %v16_v3 = vld [vmem:[#allocation1 + $0x2] sm:$0x1]  }
   0xa   :  { %11 = vrot.lane.b32.xlu0 %v10_v1, %s36_s0  ;;  %23 = vrot.lane.b32.xlu1 %v22_v2, %s37_s8  ;;  %v6_v4 = vld [vmem:[#allocation1] sm:$0x1]  }
   0xb   :  { %8 = vst.msk [vmem:[#allocation0] sm:$0x1] %vm7_vm0, %v6_v4  }
  0x12   :  { %17 = vrot.lane.b32.xlu0 %v16_v3, %s38_s9 }
  0x7c   :  { %v12_v5 = vpop.permute.xlu0 %11   ;;  %v24_v6 = vpop.permute.xlu1 %23  }
  0x7d   :  { %14 = vst.msk [vmem:[#allocation0] sm:$0x1] %vm13_vm1, %v12_v5  }
  0x84   :  { %v18_v7 = vpop.permute.xlu0 %17  }
  0x85   :  { %20 = vst.msk [vmem:[#allocation0] sm:$0x1] %vm19_vm2, %v18_v7  }
  0x86   :  { %26 = vst.msk [vmem:[#allocation0] sm:$0x1] %vm25_vm3, %v24_v6  }
  0x8d   :  { %v29_v8 = vld [vmem:[#allocation0] sm:$0x1] }
  0x8e   :  { %32 = vst [vmem:[%s56_s1] sm:$0x1] %v29_v8 }

// kernel: tile.233
= control target key start
LH: loop header
LB: loop body
LE: loop exit
PB: predicated region body
PF: predicated region fallthrough
CT: control target
= control target key end

     0   :  { %s22_s0 = inlined_call_operand.vmem [shape: f32[16], index: 0, kind: input, shape index: {}]   ;;  %s23_s1 = inlined_call_operand.vmem [shape: f32[8,16], index: 1, kind: output, shape index: {}]  }
   0x1   :  { %v4_v0 = vld [vmem:[%s22_s0] ss:$0 sm:$0xff] }
   0x2   :  { %5 = vst [vmem:[%s23_s1] sm:$0xff] %v4_v0 }

// kernel: tile.234
= control target key start
LH: loop header
LB: loop body
LE: loop exit
PB: predicated region body
PF: predicated region fallthrough
CT: control target
= control target key end

     0   :  { %s67_s10 = smov 112   ;;  %s68_s11 = smov 80   ;;  %vm3_vm0 = vcmask 130048   ;;  %vm9_vm1 = vcmask 1048448   ;;  %vm15_vm2 = vcmask 917248   ;;  %vm21_vm3 = vcmask 786048   ;;  %s111_s0 = inlined_call_operand.vmem [shape: f32[8,16], index: 0, kind: input, shape index: {}]   ;;  %s112_s1 = inlined_call_operand.vmem [shape: f32[1,128], index: 1, kind: output, shape index: {}]  }
   0x1   :  { %v53_v0 = vld [vmem:[%s111_s0 + $0x7] sm:$0x1]   ;;  %v55_v1 = vld [vmem:[%s111_s0 + $0x5] sm:$0x1]   ;;  %v57_v2 = vld [vmem:[%s111_s0 + $0x3] sm:$0x1]  }
   0x2   :  { %7 = vrot.lane.b32.xlu0 %v53_v0, %s67_s10  ;;  %19 = vrot.lane.b32.xlu1 %v55_v1, %s68_s11  ;;  %s69_s14 = smov 48   ;;  %v54_v3 = vld [vmem:[%s111_s0 + $0x6] sm:$0x1]   ;;  %v56_v4 = vld [vmem:[%s111_s0 + $0x4] sm:$0x1]   ;;  %s70_s21 = smov 96  }
   0x3   :  { %31 = vrot.lane.b32.xlu2 %v57_v2, %s69_s14  ;;  %v58_v5 = vld [vmem:[%s111_s0 + $0x2] sm:$0x1]   ;;  %s71_s22 = smov 64   ;;  %s72_s23 = smov 32   ;;  %v59_v6 = vld [vmem:[%s111_s0 + $0x1] sm:$0x1]  }
   0x4   :  { %s73_s26 = smov 16   ;;  %v2_v7 = vld [vmem:[%s111_s0] sm:$0x1]   ;;  %vm27_vm4 = vcmask 654848   ;;  %vm33_vm5 = vcmask 523648   ;;  %vm39_vm6 = vcmask 392448  }
   0x5   :  { %4 = vst.msk [vmem:[#allocation0] sm:$0x1] %vm3_vm0, %v2_v7   ;;  %vm45_vm7 = vcmask 261248  }
   0xa   :  { %13 = vrot.lane.b32.xlu0 %v54_v3, %s70_s21  ;;  %25 = vrot.lane.b32.xlu1 %v56_v4, %s71_s22 }
   0xb   :  { %37 = vrot.lane.b32.xlu2 %v58_v5, %s72_s23 }
  0x12   :  { %43 = vrot.lane.b32.xlu0 %v59_v6, %s73_s26 }
  0x5d   :  { %v32_v8 = vpop.permute.xlu2 %31  }
  0x65   :  { %v38_v9 = vpop.permute.xlu2 %37  }
  0x74   :  { %v8_v10 = vpop.permute.xlu0 %7   ;;  %v20_v11 = vpop.permute.xlu1 %19  }
  0x75   :  { %10 = vst.msk [vmem:[#allocation0] sm:$0x1] %vm9_vm1, %v8_v10  }
  0x7c   :  { %v14_v12 = vpop.permute.xlu0 %13   ;;  %v26_v13 = vpop.permute.xlu1 %25  }
  0x7d   :  { %16 = vst.msk [vmem:[#allocation0] sm:$0x1] %vm15_vm2, %v14_v12  }
  0x7e   :  { %22 = vst.msk [vmem:[#allocation0] sm:$0x1] %vm21_vm3, %v20_v11  }
  0x7f   :  { %28 = vst.msk [vmem:[#allocation0] sm:$0x1] %vm27_vm4, %v26_v13  }
  0x80   :  { %34 = vst.msk [vmem:[#allocation0] sm:$0x1] %vm33_vm5, %v32_v8  }
  0x81   :  { %40 = vst.msk [vmem:[#allocation0] sm:$0x1] %vm39_vm6, %v38_v9  }
  0x84   :  { %v44_v14 = vpop.permute.xlu0 %43  }
  0x85   :  { %46 = vst.msk [vmem:[#allocation0] sm:$0x1] %vm45_vm7, %v44_v14  }
  0x8c   :  { %v49_v15 = vld [vmem:[#allocation0] sm:$0x1] }
  0x8d   :  { %52 = vst [vmem:[%s112_s1] sm:$0x1] %v49_v15 }

// kernel: vqvae_forward.70
= control target key start
LH: loop header
LB: loop body
LE: loop exit
PB: predicated region body
PF: predicated region fallthrough
CT: control target
= control target key end

     0   :  { %s74_s0 = inlined_call_operand.vmem [shape: f32[16,128], index: 0, kind: input, shape index: {}]   ;;  %s75_s1 = inlined_call_operand.vmem [shape: f32[1,128], index: 1, kind: input, shape index: {}]   ;;  %s76_s2 = inlined_call_operand.vmem [shape: f32[1,128], index: 2, kind: input, shape index: {}]   ;;  %s77_s3 = inlined_call_operand.vmem [shape: f32[16,128], index: 3, kind: output, shape index: {}]  }
   0x1   :  { %v14_v0 = vld [vmem:[%s74_s0] sm:$0xff]  ;;  %v15_v3 = vld [vmem:[%s74_s0 + $0x8] sm:$0xff] }
   0x2   :  { %v34_v1 = vld [vmem:[%s75_s1] ss:$0 sm:$0xff] }
   0x3   :  { %v35_v2 = vld [vmem:[%s76_s2] ss:$0 sm:$0xff]  ;;  %v20_v4 = vmul.f32 %v34_v1, %v14_v0  ;;  %v21_v5 = vmul.f32 %v34_v1, %v15_v3 }
   0x5   :  { %v26_v6 = vadd.f32 %v35_v2, %v20_v4  ;;  %v27_v7 = vadd.f32 %v35_v2, %v21_v5 }
   0x7   :  { %28 = vst [vmem:[%s77_s3] sm:$0xff] %v26_v6 }
   0x8   :  { %29 = vst [vmem:[%s77_s3 + $0x8] sm:$0xff] %v27_v7 }

// kernel: vqvae_forward.69
= control target key start
LH: loop header
LB: loop body
LE: loop exit
PB: predicated region body
PF: predicated region fallthrough
CT: control target
= control target key end

     0   :  { %vm1485_vm0 = vcmask 130048   ;;  %s3235_s1 = inlined_call_operand.vmem [shape: bf16[1152,16], index: 1, kind: input, shape index: {}]   ;;  %s3236_s2 = inlined_call_operand.vmem [shape: f32[1,16], index: 2, kind: input, shape index: {}]   ;;  %s3237_s0 = inlined_call_operand.vmem [shape: bf16[128,1152], index: 0, kind: input, shape index: {}]   ;;  %s3238_s3 = inlined_call_operand.vmem [shape: f32[128,16], index: 3, kind: output, shape index: {0}]   ;;  %s3239_s4 = inlined_call_operand.vmem [shape: f32[8,16], index: 4, kind: output, shape index: {1}]  }
   0x1   :  { %v2267_v0 = vld [vmem:[%s3235_s1 + $0x38] sm:$0xff]  ;;  %v2266_v1 = vld [vmem:[%s3235_s1 + $0x30] sm:$0xff]  ;;  %v2265_v2 = vld [vmem:[%s3235_s1 + $0x28] sm:$0xff] }
   0x2   :  { %2332 = vmatpush.bf16.msra.mxu1 %v2267_v0  ;;  %2333 = vmatpush.bf16.msra.mxu2 %v2267_v0  ;;  %v2264_v3 = vld [vmem:[%s3235_s1 + $0x20] sm:$0xff]  ;;  %v2263_v4 = vld [vmem:[%s3235_s1 + $0x18] sm:$0xff]  ;;  %v2262_v5 = vld [vmem:[%s3235_s1 + $0x10] sm:$0xff] }
   0x3   :  { %2334 = vmatpush.bf16.msra.mxu3 %v2267_v0  ;;  %1044 = vmatpush.bf16.msra.mxu0 %v2267_v0  ;;  %v2261_v6 = vld [vmem:[%s3235_s1 + $0x8] sm:$0xff]  ;;  %v2260_v7 = vld [vmem:[%s3235_s1] sm:$0xff]  ;;  %v1686_v8 = vld [vmem:[%s3237_s0 + $0x90] sm:$0xf] }
   0x4   :  { %v2210_v9 = vld [vmem:[%s3237_s0 + $0xb0] sm:$0xf0]  ;;  %v1758_v10 = vld [vmem:[%s3237_s0 + $0x120] sm:$0xf]  ;;  %v2228_v11 = vld [vmem:[%s3237_s0 + $0x140] sm:$0xf0] }
   0x5   :  { %v1830_v12 = vld [vmem:[%s3237_s0 + $0x1b0] sm:$0xf]  ;;  %v2246_v13 = vld [vmem:[%s3237_s0 + $0x1d0] sm:$0xf0]  ;;  %v1614_v14 = vld [vmem:[%s3237_s0] sm:$0xf]  ;;  %v1687_v18 = vor.u32 %v2210_v9, %v1686_v8  ;;  %v1759_v19 = vor.u32 %v2228_v11, %v1758_v10 }
   0x6   :  { %2335 = vmatpush.bf16.msra.mxu1 %v2266_v1  ;;  %2336 = vmatpush.bf16.msra.mxu2 %v2266_v1  ;;  %v2192_v15 = vld [vmem:[%s3237_s0 + $0x20] sm:$0xf0]  ;;  %v2283_v16 = vld [vmem:[%s3235_s1 + $0xb8] sm:$0xff]  ;;  %v1831_v20 = vor.u32 %v2246_v13, %v1830_v12  ;;  %v2282_v24 = vld [vmem:[%s3235_s1 + $0xb0] sm:$0xff] }
   0x7   :  { %2337 = vmatpush.bf16.msra.mxu3 %v2266_v1  ;;  %1045 = vmatpush.bf16.msra.mxu0 %v2266_v1  ;;  %v2275_v17 = vld [vmem:[%s3235_s1 + $0x78] sm:$0xff]  ;;  %v1615_v21 = vor.u32 %v2192_v15, %v1614_v14  ;;  %v2274_v25 = vld [vmem:[%s3235_s1 + $0x70] sm:$0xff]  ;;  %v2281_v28 = vld [vmem:[%s3235_s1 + $0xa8] sm:$0xff] }
   0x8   :  { %v2291_v22 = vld [vmem:[%s3235_s1 + $0xf8] sm:$0xff]  ;;  %v2290_v26 = vld [vmem:[%s3235_s1 + $0xf0] sm:$0xff]  ;;  %v2273_v29 = vld [vmem:[%s3235_s1 + $0x68] sm:$0xff] }
   0x9   :  { %v2299_v23 = vld [vmem:[%s3235_s1 + $0x138] sm:$0xff]  ;;  %v2298_v27 = vld [vmem:[%s3235_s1 + $0x130] sm:$0xff]  ;;  %v2289_v30 = vld [vmem:[%s3235_s1 + $0xe8] sm:$0xff] }
   0xa   :  { %2338 = vmatpush.bf16.msra.mxu1 %v2265_v2  ;;  %2339 = vmatpush.bf16.msra.mxu2 %v2265_v2  ;;  %v2297_v31 = vld [vmem:[%s3235_s1 + $0x128] sm:$0xff]  ;;  %v2280_v32 = vld [vmem:[%s3235_s1 + $0xa0] sm:$0xff]  ;;  %v1722_v36 = vld [vmem:[%s3237_s0 + $0xd8] sm:$0xf] }
   0xb   :  { %2340 = vmatpush.bf16.msra.mxu3 %v2265_v2  ;;  %1046 = vmatpush.bf16.msra.mxu0 %v2265_v2  ;;  %v2272_v33 = vld [vmem:[%s3235_s1 + $0x60] sm:$0xff]  ;;  %v2219_v37 = vld [vmem:[%s3237_s0 + $0xf8] sm:$0xf0]  ;;  %v1794_v38 = vld [vmem:[%s3237_s0 + $0x168] sm:$0xf] }
   0xc   :  { %v2288_v34 = vld [vmem:[%s3235_s1 + $0xe0] sm:$0xff]  ;;  %v2237_v39 = vld [vmem:[%s3237_s0 + $0x188] sm:$0xf0]  ;;  %v1866_v40 = vld [vmem:[%s3237_s0 + $0x1f8] sm:$0xf]  ;;  %v1723_v46 = vor.u32 %v2219_v37, %v1722_v36 }
   0xd   :  { %v2296_v35 = vld [vmem:[%s3235_s1 + $0x120] sm:$0xff]  ;;  %v2255_v41 = vld [vmem:[%s3237_s0 + $0x218] sm:$0xf0]  ;;  %v1650_v42 = vld [vmem:[%s3237_s0 + $0x48] sm:$0xf]  ;;  %v1795_v47 = vor.u32 %v2237_v39, %v1794_v38 }
   0xe   :  { %2341 = vmatpush.bf16.msra.mxu1 %v2264_v3  ;;  %2342 = vmatpush.bf16.msra.mxu2 %v2264_v3  ;;  %v2201_v43 = vld [vmem:[%s3237_s0 + $0x68] sm:$0xf0]  ;;  %v2279_v44 = vld [vmem:[%s3235_s1 + $0x98] sm:$0xff]  ;;  %v1867_v48 = vor.u32 %v2255_v41, %v1866_v40  ;;  %v2278_v52 = vld [vmem:[%s3235_s1 + $0x90] sm:$0xff] }
   0xf   :  { %2343 = vmatpush.bf16.msra.mxu3 %v2264_v3  ;;  %1047 = vmatpush.bf16.msra.mxu0 %v2264_v3  ;;  %v2271_v45 = vld [vmem:[%s3235_s1 + $0x58] sm:$0xff]  ;;  %v1651_v49 = vor.u32 %v2201_v43, %v1650_v42  ;;  %v2270_v53 = vld [vmem:[%s3235_s1 + $0x50] sm:$0xff]  ;;  %v2277_v56 = vld [vmem:[%s3235_s1 + $0x88] sm:$0xff] }
  0x10   :  { %v2287_v50 = vld [vmem:[%s3235_s1 + $0xd8] sm:$0xff]  ;;  %v2286_v54 = vld [vmem:[%s3235_s1 + $0xd0] sm:$0xff]  ;;  %v2269_v57 = vld [vmem:[%s3235_s1 + $0x48] sm:$0xff] }
  0x11   :  { %v2295_v51 = vld [vmem:[%s3235_s1 + $0x118] sm:$0xff]  ;;  %v2294_v55 = vld [vmem:[%s3235_s1 + $0x110] sm:$0xff]  ;;  %v2285_v58 = vld [vmem:[%s3235_s1 + $0xc8] sm:$0xff] }
  0x12   :  { %2344 = vmatpush.bf16.msra.mxu1 %v2263_v4  ;;  %2345 = vmatpush.bf16.msra.mxu2 %v2263_v4  ;;  %v2293_v59 = vld [vmem:[%s3235_s1 + $0x108] sm:$0xff]  ;;  %v2276_v60 = vld [vmem:[%s3235_s1 + $0x80] sm:$0xff]  ;;  %v2315_v2 = vld [vmem:[%s3235_s1 + $0x1b8] sm:$0xff] }
  0x13   :  { %2346 = vmatpush.bf16.msra.mxu3 %v2263_v4  ;;  %1048 = vmatpush.bf16.msra.mxu0 %v2263_v4  ;;  %v2268_v61 = vld [vmem:[%s3235_s1 + $0x40] sm:$0xff]  ;;  %v1616_v1 = vld [vmem:[%s3237_s0 + $0x24] sm:$0xf0]  ;;  %v2307_v3 = vld [vmem:[%s3235_s1 + $0x178] sm:$0xff] }
  0x14   :  { %v2188_v62 = vld [vmem:[%s3237_s0 + $0x4] sm:$0xf]  ;;  %v1622_v4 = vld [vmem:[%s3237_s0 + $0x8] sm:$0xf]  ;;  %v1630_v8 = vld [vmem:[%s3237_s0 + $0x10] sm:$0xf] }
  0x15   :  { %v2284_v63 = vld [vmem:[%s3235_s1 + $0xc0] sm:$0xff]  ;;  %v2194_v9 = vld [vmem:[%s3237_s0 + $0x30] sm:$0xf0]  ;;  %v2323_v10 = vld [vmem:[%s3235_s1 + $0x1f8] sm:$0xff]  ;;  %v1619_v12 = vor.u32 %v2188_v62, %v1616_v1 }
  0x16   :  { %2347 = vmatpush.bf16.msra.mxu1 %v2262_v5  ;;  %2348 = vmatpush.bf16.msra.mxu2 %v2262_v5  ;;  %v2292_v0 = vld [vmem:[%s3235_s1 + $0x100] sm:$0xff]  ;;  %v2331_v11 = vld [vmem:[%s3235_s1 + $0x238] sm:$0xff]  ;;  %v1631_v15 = vor.u32 %v2194_v9, %v1630_v8  ;;  %v2206_v40 = vld [vmem:[%s3237_s0 + $0x94] sm:$0xf] }
  0x17   :  { %2349 = vmatpush.bf16.msra.mxu3 %v2262_v5  ;;  %1049 = vmatpush.bf16.msra.mxu0 %v2262_v5  ;;  %v2193_v5 = vld [vmem:[%s3237_s0 + $0x28] sm:$0xf0]  ;;  %v2312_v36 = vld [vmem:[%s3235_s1 + $0x1a0] sm:$0xff]  ;;  %v1688_v41 = vld [vmem:[%s3237_s0 + $0xb4] sm:$0xf0] }
  0x18   :  { %v1623_v13 = vor.u32 %v2193_v5, %v1622_v4  ;;  %v2320_v37 = vld [vmem:[%s3235_s1 + $0x1e0] sm:$0xff]  ;;  %v1694_v42 = vld [vmem:[%s3237_s0 + $0x98] sm:$0xf]  ;;  %v2211_v43 = vld [vmem:[%s3237_s0 + $0xb8] sm:$0xf0] }
  0x19   :  { %v2304_v38 = vld [vmem:[%s3235_s1 + $0x160] sm:$0xff]  ;;  %v1738_v62 = vld [vmem:[%s3237_s0 + $0xe8] sm:$0xf]  ;;  %v2310_v4 = vld [vmem:[%s3235_s1 + $0x190] sm:$0xff] }
  0x1a   :  { %2350 = vmatpush.bf16.msra.mxu1 %v2261_v6  ;;  %2351 = vmatpush.bf16.msra.mxu2 %v2261_v6  ;;  %v2328_v39 = vld [vmem:[%s3235_s1 + $0x220] sm:$0xff]  ;;  %v2318_v5 = vld [vmem:[%s3235_s1 + $0x1d0] sm:$0xff]  ;;  %v1760_v9 = vld [vmem:[%s3237_s0 + $0x144] sm:$0xf0] }
  0x1b   :  { %2352 = vmatpush.bf16.msra.mxu3 %v2261_v6  ;;  %1050 = vmatpush.bf16.msra.mxu0 %v2261_v6  ;;  %v2189_v6 = vld [vmem:[%s3237_s0 + $0xc] sm:$0xf]  ;;  %v2224_v8 = vld [vmem:[%s3237_s0 + $0x124] sm:$0xf] }
  0x1e   :  { %2353 = vmatpush.bf16.msra.mxu1 %v2260_v7  ;;  %2354 = vmatpush.bf16.msra.mxu2 %v2260_v7 }
  0x1f   :  { %2355 = vmatpush.bf16.msra.mxu3 %v2260_v7  ;;  %1051 = vmatpush.bf16.msra.mxu0 %v2260_v7  ;;  %v1624_v7 = vld [vmem:[%s3237_s0 + $0x2c] sm:$0xf0] }
  0x20   :  { %v1627_v14 = vor.u32 %v2189_v6, %v1624_v7  ;;  %v2302_v6 = vld [vmem:[%s3235_s1 + $0x150] sm:$0xff] }
  0x21   :  { %1062 = vmatmul.bf16.vlgmr.msra.gmra.mxu1 %v1687_v18  ;;  %1072 = vmatmul.bf16.vlgmr.msra.gmra.mxu2 %v1759_v19  ;;  %v2322_v18 = vld [vmem:[%s3235_s1 + $0x1f0] sm:$0xff] }
  0x22   :  { %1142 = vmatpush.bf16.msrb.mxu2 %v2283_v16  ;;  %1093 = vmatpush.bf16.msrb.mxu1 %v2275_v17  ;;  %v2314_v16 = vld [vmem:[%s3235_s1 + $0x1b0] sm:$0xff] }
  0x23   :  { %1082 = vmatmul.bf16.vlgmr.msra.gmra.mxu3 %v1831_v20  ;;  %1052 = vmatmul.bf16.vlgmr.msra.gmra.mxu0 %v1615_v21  ;;  %v2306_v17 = vld [vmem:[%s3235_s1 + $0x170] sm:$0xff]  ;;  %v2313_v20 = vld [vmem:[%s3235_s1 + $0x1a8] sm:$0xff] }
  0x24   :  { %1191 = vmatpush.bf16.msrb.mxu3 %v2291_v22  ;;  %1240 = vmatpush.bf16.msrb.mxu0 %v2299_v23  ;;  %v2330_v19 = vld [vmem:[%s3235_s1 + $0x230] sm:$0xff]  ;;  %v2305_v21 = vld [vmem:[%s3235_s1 + $0x168] sm:$0xff] }
  0x25   :  { %v2321_v22 = vld [vmem:[%s3235_s1 + $0x1e8] sm:$0xff]  ;;  %v2326_v7 = vld [vmem:[%s3235_s1 + $0x210] sm:$0xff] }
  0x26   :  { %1143 = vmatpush.bf16.msrb.mxu2 %v2282_v24  ;;  %1094 = vmatpush.bf16.msrb.mxu1 %v2274_v25  ;;  %v2329_v23 = vld [vmem:[%s3235_s1 + $0x228] sm:$0xff]  ;;  %v1652_v25 = vld [vmem:[%s3237_s0 + $0x6c] sm:$0xf0] }
  0x27   :  { %v2197_v24 = vld [vmem:[%s3237_s0 + $0x4c] sm:$0xf] }
  0x28   :  { %1192 = vmatpush.bf16.msrb.mxu3 %v2290_v26  ;;  %1241 = vmatpush.bf16.msrb.mxu0 %v2298_v27  ;;  %v1658_v26 = vld [vmem:[%s3237_s0 + $0x50] sm:$0xf]  ;;  %v2202_v27 = vld [vmem:[%s3237_s0 + $0x70] sm:$0xf0] }
  0x2a   :  { %1144 = vmatpush.bf16.msrb.mxu2 %v2281_v28  ;;  %1095 = vmatpush.bf16.msrb.mxu1 %v2273_v29  ;;  %v2198_v28 = vld [vmem:[%s3237_s0 + $0x54] sm:$0xf]  ;;  %v1660_v29 = vld [vmem:[%s3237_s0 + $0x74] sm:$0xf0] }
  0x2c   :  { %1193 = vmatpush.bf16.msrb.mxu3 %v2289_v30  ;;  %1242 = vmatpush.bf16.msrb.mxu0 %v2297_v31  ;;  %v1666_v30 = vld [vmem:[%s3237_s0 + $0x58] sm:$0xf]  ;;  %v2203_v31 = vld [vmem:[%s3237_s0 + $0x78] sm:$0xf0] }
  0x2e   :  { %1145 = vmatpush.bf16.msrb.mxu2 %v2280_v32  ;;  %1096 = vmatpush.bf16.msrb.mxu1 %v2272_v33  ;;  %v1655_v32 = vor.u32 %v2197_v24, %v1652_v25  ;;  %v1659_v33 = vor.u32 %v2202_v27, %v1658_v26  ;;  %v2233_v24 = vld [vmem:[%s3237_s0 + $0x16c] sm:$0xf]  ;;  %v1796_v25 = vld [vmem:[%s3237_s0 + $0x18c] sm:$0xf0]  ;;  %v2238_v27 = vld [vmem:[%s3237_s0 + $0x190] sm:$0xf0] }
  0x2f   :  { %v1802_v26 = vld [vmem:[%s3237_s0 + $0x170] sm:$0xf] }
  0x30   :  { %1194 = vmatpush.bf16.msrb.mxu3 %v2288_v34  ;;  %1243 = vmatpush.bf16.msrb.mxu0 %v2296_v35  ;;  %v1663_v34 = vor.u32 %v2198_v28, %v1660_v29  ;;  %v1667_v35 = vor.u32 %v2203_v31, %v1666_v30  ;;  %v2234_v28 = vld [vmem:[%s3237_s0 + $0x174] sm:$0xf]  ;;  %v1804_v29 = vld [vmem:[%s3237_s0 + $0x194] sm:$0xf0]  ;;  %v2239_v31 = vld [vmem:[%s3237_s0 + $0x198] sm:$0xf0] }
  0x31   :  { %1067 = vmatmul.bf16.gmra.mxu1 %v1723_v46  ;;  %1077 = vmatmul.bf16.gmra.mxu2 %v1795_v47  ;;  %v1702_v46 = vld [vmem:[%s3237_s0 + $0xa0] sm:$0xf]  ;;  %v2212_v47 = vld [vmem:[%s3237_s0 + $0xc0] sm:$0xf0]  ;;  %v1810_v30 = vld [vmem:[%s3237_s0 + $0x178] sm:$0xf] }
  0x32   :  { %1146 = vmatpush.bf16.msrb.mxu2 %v2279_v44  ;;  %1097 = vmatpush.bf16.msrb.mxu1 %v2271_v45  ;;  %v2207_v44 = vld [vmem:[%s3237_s0 + $0x9c] sm:$0xf]  ;;  %v1696_v45 = vld [vmem:[%s3237_s0 + $0xbc] sm:$0xf0] }
  0x33   :  { %1087 = vmatmul.bf16.gmra.mxu3 %v1867_v48  ;;  %1057 = vmatmul.bf16.gmra.mxu0 %v1651_v49  ;;  %v1691_v48 = vor.u32 %v2206_v40, %v1688_v41  ;;  %v1695_v49 = vor.u32 %v2211_v43, %v1694_v42  ;;  %v2242_v40 = vld [vmem:[%s3237_s0 + $0x1b4] sm:$0xf]  ;;  %v1832_v41 = vld [vmem:[%s3237_s0 + $0x1d4] sm:$0xf0]  ;;  %v2247_v43 = vld [vmem:[%s3237_s0 + $0x1d8] sm:$0xf0] }
  0x34   :  { %1195 = vmatpush.bf16.msrb.mxu3 %v2287_v50  ;;  %1244 = vmatpush.bf16.msrb.mxu0 %v2295_v51  ;;  %v1699_v50 = vor.u32 %v2207_v44, %v1696_v45  ;;  %v1703_v51 = vor.u32 %v2212_v47, %v1702_v46  ;;  %v1838_v42 = vld [vmem:[%s3237_s0 + $0x1b8] sm:$0xf]  ;;  %v2243_v44 = vld [vmem:[%s3237_s0 + $0x1bc] sm:$0xf]  ;;  %v1840_v45 = vld [vmem:[%s3237_s0 + $0x1dc] sm:$0xf0] }
  0x35   :  { %v1846_v46 = vld [vmem:[%s3237_s0 + $0x1c0] sm:$0xf]  ;;  %v2248_v47 = vld [vmem:[%s3237_s0 + $0x1e0] sm:$0xf0] }
  0x36   :  { %1147 = vmatpush.bf16.msrb.mxu2 %v2278_v52  ;;  %1098 = vmatpush.bf16.msrb.mxu1 %v2270_v53  ;;  %v2311_v52 = vld [vmem:[%s3235_s1 + $0x198] sm:$0xff] }
  0x37   :  { %v2319_v53 = vld [vmem:[%s3235_s1 + $0x1d8] sm:$0xff] }
  0x38   :  { %1196 = vmatpush.bf16.msrb.mxu3 %v2286_v54  ;;  %1245 = vmatpush.bf16.msrb.mxu0 %v2294_v55  ;;  %v2303_v54 = vld [vmem:[%s3235_s1 + $0x158] sm:$0xff] }
  0x39   :  { %v2327_v55 = vld [vmem:[%s3235_s1 + $0x218] sm:$0xff] }
  0x3a   :  { %1148 = vmatpush.bf16.msrb.mxu2 %v2277_v56  ;;  %1099 = vmatpush.bf16.msrb.mxu1 %v2269_v57  ;;  %v2215_v56 = vld [vmem:[%s3237_s0 + $0xdc] sm:$0xf]  ;;  %v1724_v57 = vld [vmem:[%s3237_s0 + $0xfc] sm:$0xf0] }
  0x3c   :  { %1197 = vmatpush.bf16.msrb.mxu3 %v2285_v58  ;;  %1246 = vmatpush.bf16.msrb.mxu0 %v2293_v59  ;;  %v1730_v58 = vld [vmem:[%s3237_s0 + $0xe0] sm:$0xf]  ;;  %v2220_v59 = vld [vmem:[%s3237_s0 + $0x100] sm:$0xf0] }
  0x3d   :  { %v1731_v1 = vor.u32 %v2220_v59, %v1730_v58 }
  0x3e   :  { %1149 = vmatpush.bf16.msrb.mxu2 %v2276_v60  ;;  %1100 = vmatpush.bf16.msrb.mxu1 %v2268_v61  ;;  %v2216_v60 = vld [vmem:[%s3237_s0 + $0xe4] sm:$0xf]  ;;  %v1732_v61 = vld [vmem:[%s3237_s0 + $0x104] sm:$0xf0] }
  0x40   :  { %1198 = vmatpush.bf16.msrb.mxu3 %v2284_v63  ;;  %1247 = vmatpush.bf16.msrb.mxu0 %v2292_v0  ;;  %v2221_v63 = vld [vmem:[%s3237_s0 + $0x108] sm:$0xf0]  ;;  %v1727_v0 = vor.u32 %v2215_v56, %v1724_v57 }
  0x41   :  { %1101 = vmatmul.bf16.vlgmr.msrb.gmra.mxu1 %v1619_v12  ;;  %1150 = vmatmul.bf16.vlgmr.msrb.gmra.mxu2 %v1623_v13  ;;  %v2225_v12 = vld [vmem:[%s3237_s0 + $0x12c] sm:$0xf]  ;;  %v1768_v13 = vld [vmem:[%s3237_s0 + $0x14c] sm:$0xf0] }
  0x42   :  { %1338 = vmatpush.bf16.msra.mxu2 %v2315_v2  ;;  %1289 = vmatpush.bf16.msra.mxu1 %v2307_v3  ;;  %v1735_v2 = vor.u32 %v2216_v60, %v1732_v61  ;;  %v1739_v3 = vor.u32 %v2221_v63, %v1738_v62  ;;  %v2251_v61 = vld [vmem:[%s3237_s0 + $0x1fc] sm:$0xf]  ;;  %v1868_v62 = vld [vmem:[%s3237_s0 + $0x21c] sm:$0xf0] }
  0x43   :  { %1199 = vmatmul.bf16.vlgmr.msrb.gmra.mxu3 %v1627_v14  ;;  %1248 = vmatmul.bf16.vlgmr.msrb.gmra.mxu0 %v1631_v15  ;;  %v1774_v14 = vld [vmem:[%s3237_s0 + $0x130] sm:$0xf]  ;;  %v2230_v15 = vld [vmem:[%s3237_s0 + $0x150] sm:$0xf0]  ;;  %v1874_v63 = vld [vmem:[%s3237_s0 + $0x200] sm:$0xf] }
  0x44   :  { %1387 = vmatpush.bf16.msra.mxu3 %v2323_v10  ;;  %1436 = vmatpush.bf16.msra.mxu0 %v2331_v11  ;;  %v1766_v10 = vld [vmem:[%s3237_s0 + $0x128] sm:$0xf]  ;;  %v2229_v11 = vld [vmem:[%s3237_s0 + $0x148] sm:$0xf0] }
  0x46   :  { %1339 = vmatpush.bf16.msra.mxu2 %v2314_v16  ;;  %1290 = vmatpush.bf16.msra.mxu1 %v2306_v17  ;;  %v1763_v16 = vor.u32 %v2224_v8, %v1760_v9  ;;  %v1767_v17 = vor.u32 %v2229_v11, %v1766_v10  ;;  %v1871_v8 = vor.u32 %v2251_v61, %v1868_v62  ;;  %v1682_v61 = vld [vmem:[%s3237_s0 + $0x68] sm:$0xf]  ;;  %v2205_v62 = vld [vmem:[%s3237_s0 + $0x88] sm:$0xf0] }
  0x48   :  { %1388 = vmatpush.bf16.msra.mxu3 %v2322_v18  ;;  %1437 = vmatpush.bf16.msra.mxu0 %v2330_v19  ;;  %v1771_v18 = vor.u32 %v2225_v12, %v1768_v13  ;;  %v1775_v19 = vor.u32 %v2230_v15, %v1774_v14 }
  0x4a   :  { %1340 = vmatpush.bf16.msra.mxu2 %v2313_v20  ;;  %1291 = vmatpush.bf16.msra.mxu1 %v2305_v21  ;;  %v2309_v20 = vld [vmem:[%s3235_s1 + $0x188] sm:$0xff] }
  0x4b   :  { %v2317_v21 = vld [vmem:[%s3235_s1 + $0x1c8] sm:$0xff] }
  0x4c   :  { %1389 = vmatpush.bf16.msra.mxu3 %v2321_v22  ;;  %1438 = vmatpush.bf16.msra.mxu0 %v2329_v23  ;;  %v2301_v22 = vld [vmem:[%s3235_s1 + $0x148] sm:$0xff] }
  0x4d   :  { %v2325_v23 = vld [vmem:[%s3235_s1 + $0x208] sm:$0xff] }
  0x4e   :  { %1341 = vmatpush.bf16.msra.mxu2 %v2312_v36  ;;  %1292 = vmatpush.bf16.msra.mxu1 %v2304_v38  ;;  %v2308_v36 = vld [vmem:[%s3235_s1 + $0x180] sm:$0xff] }
  0x4f   :  { %v2300_v38 = vld [vmem:[%s3235_s1 + $0x140] sm:$0xff] }
  0x50   :  { %1390 = vmatpush.bf16.msra.mxu3 %v2320_v37  ;;  %1439 = vmatpush.bf16.msra.mxu0 %v2328_v39  ;;  %v2316_v37 = vld [vmem:[%s3235_s1 + $0x1c0] sm:$0xff] }
  0x51   :  { %1106 = vmatmul.bf16.gmra.mxu1 %v1655_v32  ;;  %1155 = vmatmul.bf16.gmra.mxu2 %v1659_v33  ;;  %v1799_v32 = vor.u32 %v2233_v24, %v1796_v25  ;;  %v1803_v33 = vor.u32 %v2238_v27, %v1802_v26  ;;  %v2324_v39 = vld [vmem:[%s3235_s1 + $0x200] sm:$0xff]  ;;  %v2195_v24 = vld [vmem:[%s3237_s0 + $0x38] sm:$0xf0] }
  0x52   :  { %1342 = vmatpush.bf16.msra.mxu2 %v2311_v52  ;;  %1293 = vmatpush.bf16.msra.mxu1 %v2303_v54  ;;  %v1847_v52 = vor.u32 %v2248_v47, %v1846_v46  ;;  %v2819_v54 = vld [vmem:[%s3236_s2] ss:$0 sm:$0xff]  ;;  %v2191_v25 = vld [vmem:[%s3237_s0 + $0x1c] sm:$0xf] }
  0x53   :  { %1204 = vmatmul.bf16.gmra.mxu3 %v1663_v34  ;;  %1253 = vmatmul.bf16.gmra.mxu0 %v1667_v35  ;;  %v1807_v34 = vor.u32 %v2234_v28, %v1804_v29  ;;  %v1811_v35 = vor.u32 %v2239_v31, %v1810_v30  ;;  %v1640_v26 = vld [vmem:[%s3237_s0 + $0x3c] sm:$0xf0]  ;;  %v2196_v28 = vld [vmem:[%s3237_s0 + $0x40] sm:$0xf0] }
  0x54   :  { %1391 = vmatpush.bf16.msra.mxu3 %v2319_v53  ;;  %1440 = vmatpush.bf16.msra.mxu0 %v2327_v55  ;;  %v1646_v27 = vld [vmem:[%s3237_s0 + $0x20] sm:$0xf] }
  0x56   :  { %1343 = vmatpush.bf16.msra.mxu2 %v2310_v4  ;;  %1294 = vmatpush.bf16.msra.mxu1 %v2302_v6  ;;  %v2257_v4 = vld [vmem:[%s3237_s0 + $0x228] sm:$0xf0] }
  0x58   :  { %1392 = vmatpush.bf16.msra.mxu3 %v2318_v5  ;;  %1441 = vmatpush.bf16.msra.mxu0 %v2326_v7 }
  0x5a   :  { %1344 = vmatpush.bf16.msra.mxu2 %v2309_v20  ;;  %1295 = vmatpush.bf16.msra.mxu1 %v2301_v22  ;;  %v1632_v22 = vld [vmem:[%s3237_s0 + $0x34] sm:$0xf0] }
  0x5c   :  { %1393 = vmatpush.bf16.msra.mxu3 %v2317_v21  ;;  %1442 = vmatpush.bf16.msra.mxu0 %v2325_v23  ;;  %v2190_v21 = vld [vmem:[%s3237_s0 + $0x14] sm:$0xf]  ;;  %v1638_v23 = vld [vmem:[%s3237_s0 + $0x18] sm:$0xf] }
  0x5e   :  { %1345 = vmatpush.bf16.msra.mxu2 %v2308_v36  ;;  %1296 = vmatpush.bf16.msra.mxu1 %v2300_v38  ;;  %v1647_v38 = vor.u32 %v2196_v28, %v1646_v27  ;;  %v2208_v27 = vld [vmem:[%s3237_s0 + $0xa4] sm:$0xf]  ;;  %v1704_v28 = vld [vmem:[%s3237_s0 + $0xc4] sm:$0xf0] }
  0x60   :  { %1394 = vmatpush.bf16.msra.mxu3 %v2316_v37  ;;  %1443 = vmatpush.bf16.msra.mxu0 %v2324_v39  ;;  %v1643_v37 = vor.u32 %v2191_v25, %v1640_v26 }
  0x61   :  { %1111 = vmatmul.bf16.gmra.mxu1 %v1691_v48  ;;  %1160 = vmatmul.bf16.gmra.mxu2 %v1695_v49  ;;  %v1835_v48 = vor.u32 %v2242_v40, %v1832_v41  ;;  %v1839_v49 = vor.u32 %v2247_v43, %v1838_v42 }
  0x63   :  { %1209 = vmatmul.bf16.gmra.mxu3 %v1699_v50  ;;  %1258 = vmatmul.bf16.gmra.mxu0 %v1703_v51  ;;  %v1843_v51 = vor.u32 %v2243_v44, %v1840_v45 }
  0x71   :  { %1116 = vmatmul.bf16.gmra.mxu1 %v1727_v0  ;;  %1165 = vmatmul.bf16.gmra.mxu2 %v1731_v1  ;;  %v2256_v0 = vld [vmem:[%s3237_s0 + $0x220] sm:$0xf0] }
  0x72   :  { %v2252_v1 = vld [vmem:[%s3237_s0 + $0x204] sm:$0xf]  ;;  %v1875_v9 = vor.u32 %v2256_v0, %v1874_v63 }
  0x73   :  { %1214 = vmatmul.bf16.gmra.mxu3 %v1735_v2  ;;  %1263 = vmatmul.bf16.gmra.mxu0 %v1739_v3  ;;  %v1876_v2 = vld [vmem:[%s3237_s0 + $0x224] sm:$0xf0] }
  0x74   :  { %v1882_v3 = vld [vmem:[%s3237_s0 + $0x208] sm:$0xf]  ;;  %v1879_v12 = vor.u32 %v2252_v1, %v1876_v2 }
  0x75   :  { %v1883_v13 = vor.u32 %v2257_v4, %v1882_v3 }
  0x81   :  { %1121 = vmatmul.bf16.gmra.mxu1 %v1763_v16  ;;  %1170 = vmatmul.bf16.gmra.mxu2 %v1767_v17 }
  0x83   :  { %1219 = vmatmul.bf16.gmra.mxu3 %v1771_v18  ;;  %1268 = vmatmul.bf16.gmra.mxu0 %v1775_v19 }
  0x91   :  { %1126 = vmatmul.bf16.gmra.mxu1 %v1799_v32  ;;  %1175 = vmatmul.bf16.gmra.mxu2 %v1803_v33  ;;  %v1635_v33 = vor.u32 %v2190_v21, %v1632_v22 }
  0x93   :  { %1224 = vmatmul.bf16.gmra.mxu3 %v1807_v34  ;;  %1273 = vmatmul.bf16.gmra.mxu0 %v1811_v35  ;;  %v1639_v34 = vor.u32 %v2195_v24, %v1638_v23 }
  0x9e   :  { %v2814_v50 = vpop.f32.mrf.mxu1 }
  0xa0   :  { %v1053_v53 = vpop.f32.mrf.mxu0 }
  0xa1   :  { %1131 = vmatmul.bf16.gmra.mxu1 %v1835_v48  ;;  %1180 = vmatmul.bf16.gmra.mxu2 %v1839_v49  ;;  %v1054_v30 = vadd.f32 %v2819_v54, %v1053_v53  ;;  %v2199_v49 = vld [vmem:[%s3237_s0 + $0x5c] sm:$0xf]  ;;  %v1674_v53 = vld [vmem:[%s3237_s0 + $0x60] sm:$0xf] }
  0xa3   :  { %1229 = vmatmul.bf16.gmra.mxu3 %v1843_v51  ;;  %1278 = vmatmul.bf16.gmra.mxu0 %v1847_v52  ;;  %v1668_v51 = vld [vmem:[%s3237_s0 + $0x7c] sm:$0xf0] }
  0xa4   :  { %v1073_v55 = vpop.f32.mrf.mxu2  ;;  %v1671_v3 = vor.u32 %v2199_v49, %v1668_v51 }
  0xa5   :  { %v2822_v56 = vadd.f32 %v2819_v54, %v1073_v55  ;;  %v2204_v55 = vld [vmem:[%s3237_s0 + $0x80] sm:$0xf0] }
  0xa6   :  { %v1083_v57 = vpop.f32.mrf.mxu3  ;;  %v2827_v59 = vpop.f32.mrf.mxu1  ;;  %v1675_v4 = vor.u32 %v2204_v55, %v1674_v53 }
  0xa7   :  { %v2825_v58 = vadd.f32 %v2819_v54, %v1083_v57  ;;  %v2200_v57 = vld [vmem:[%s3237_s0 + $0x64] sm:$0xf] }
  0xa8   :  { %v1055_v60 = vpop.f32.mrf.mxu0 }
  0xa9   :  { %v1056_v42 = vadd.f32 %v2819_v54, %v1055_v60  ;;  %v1676_v60 = vld [vmem:[%s3237_s0 + $0x84] sm:$0xf0] }
  0xac   :  { %v1075_v5 = vpop.f32.mrf.mxu2 }
  0xad   :  { %v2854_v6 = vadd.f32 %v2819_v54, %v1075_v5 }
  0xae   :  { %v1085_v7 = vpop.f32.mrf.mxu3  ;;  %v2859_v11 = vpop.f32.mrf.mxu1 }
  0xaf   :  { %v2857_v10 = vadd.f32 %v2819_v54, %v1085_v7  ;;  %v1679_v7 = vor.u32 %v2200_v57, %v1676_v60 }
  0xb0   :  { %v1058_v14 = vpop.f32.mrf.mxu0 }
  0xb1   :  { %1136 = vmatmul.bf16.gmra.mxu1 %v1871_v8  ;;  %1185 = vmatmul.bf16.gmra.mxu2 %v1875_v9  ;;  %v1059_v0 = vadd.f32 %v2819_v54, %v1058_v14  ;;  %v1683_v8 = vor.u32 %v2205_v62, %v1682_v61 }
  0xb3   :  { %1234 = vmatmul.bf16.gmra.mxu3 %v1879_v12  ;;  %1283 = vmatmul.bf16.gmra.mxu0 %v1883_v13 }
  0xb4   :  { %v1078_v15 = vpop.f32.mrf.mxu2 }
  0xb5   :  { %v2862_v16 = vadd.f32 %v2819_v54, %v1078_v15 }
  0xb6   :  { %v1088_v17 = vpop.f32.mrf.mxu3  ;;  %v2867_v19 = vpop.f32.mrf.mxu1 }
  0xb7   :  { %v2865_v18 = vadd.f32 %v2819_v54, %v1088_v17 }
  0xb8   :  { %v1060_v20 = vpop.f32.mrf.mxu0 }
  0xb9   :  { %v1061_v21 = vadd.f32 %v2819_v54, %v1060_v20  ;;  %v1710_v20 = vld [vmem:[%s3237_s0 + $0xa8] sm:$0xf] }
  0xbc   :  { %v1080_v29 = vpop.f32.mrf.mxu2 }
  0xbd   :  { %v2895_v31 = vadd.f32 %v2819_v54, %v1080_v29 }
  0xbe   :  { %v1090_v32 = vpop.f32.mrf.mxu3  ;;  %v1102_v36 = vpop.f32.mrf.mxu1 }
  0xbf   :  { %v2898_v35 = vadd.f32 %v2819_v54, %v1090_v32  ;;  %v1103_v39 = vadd.f32 %v1102_v36, %v1054_v30  ;;  %v2213_v30 = vld [vmem:[%s3237_s0 + $0xc8] sm:$0xf0]  ;;  %v2214_v36 = vld [vmem:[%s3237_s0 + $0xd0] sm:$0xf0] }
  0xc0   :  { %v1249_v40 = vpop.f32.mrf.mxu0  ;;  %v2209_v32 = vld [vmem:[%s3237_s0 + $0xac] sm:$0xf] }
  0xc1   :  { %1297 = vmatmul.bf16.vlgmr.msra.gmra.mxu1 %v1635_v33  ;;  %1346 = vmatmul.bf16.vlgmr.msra.gmra.mxu2 %v1639_v34  ;;  %v1712_v33 = vld [vmem:[%s3237_s0 + $0xcc] sm:$0xf0] }
  0xc2   :  { %v1718_v34 = vld [vmem:[%s3237_s0 + $0xb0] sm:$0xf] }
  0xc3   :  { %1395 = vmatmul.bf16.vlgmr.msra.gmra.mxu3 %v1643_v37  ;;  %1444 = vmatmul.bf16.vlgmr.msra.gmra.mxu0 %v1647_v38  ;;  %v1064_v38 = vadd.f32 %v2819_v54, %v2814_v50  ;;  %v1066_v50 = vadd.f32 %v2819_v54, %v2827_v59  ;;  %v1746_v59 = vld [vmem:[%s3237_s0 + $0xf0] sm:$0xf] }
  0xc4   :  { %v1151_v41 = vpop.f32.mrf.mxu2 }
  0xc5   :  { %v1152_v43 = vadd.f32 %v1151_v41, %v1103_v39  ;;  %v1707_v41 = vor.u32 %v2208_v27, %v1704_v28 }
  0xc6   :  { %v1200_v44 = vpop.f32.mrf.mxu3  ;;  %v1104_v45 = vpop.f32.mrf.mxu1 }
  0xc7   :  { %v1201_v46 = vadd.f32 %v1200_v44, %v1152_v43  ;;  %v1105_v47 = vadd.f32 %v1104_v45, %v1056_v42  ;;  %v1711_v42 = vor.u32 %v2213_v30, %v1710_v20  ;;  %v1715_v44 = vor.u32 %v2209_v32, %v1712_v33 }
  0xc8   :  { %v1251_v48 = vpop.f32.mrf.mxu0  ;;  %v1719_v45 = vor.u32 %v2214_v36, %v1718_v34 }
  0xc9   :  { %v2907_v52 = vadd.f32 %v1249_v40, %v1201_v46 }
  0xcc   :  { %v1153_v63 = vpop.f32.mrf.mxu2 }
  0xcd   :  { %v1154_v1 = vadd.f32 %v1153_v63, %v1105_v47  ;;  %v2217_v63 = vld [vmem:[%s3237_s0 + $0xec] sm:$0xf] }
  0xce   :  { %v1202_v2 = vpop.f32.mrf.mxu3  ;;  %v1107_v5 = vpop.f32.mrf.mxu1 }
  0xcf   :  { %v1203_v9 = vadd.f32 %v1202_v2, %v1154_v1  ;;  %v1108_v12 = vadd.f32 %v1107_v5, %v1059_v0  ;;  %v1740_v0 = vld [vmem:[%s3237_s0 + $0x10c] sm:$0xf0]  ;;  %v2222_v2 = vld [vmem:[%s3237_s0 + $0x110] sm:$0xf0]  ;;  %v1754_v5 = vld [vmem:[%s3237_s0 + $0xf8] sm:$0xf] }
  0xd0   :  { %v1254_v13 = vpop.f32.mrf.mxu0 }
  0xd1   :  { %1302 = vmatmul.bf16.gmra.mxu1 %v1671_v3  ;;  %1351 = vmatmul.bf16.gmra.mxu2 %v1675_v4  ;;  %v2928_v15 = vadd.f32 %v1251_v48, %v1203_v9  ;;  %v2218_v3 = vld [vmem:[%s3237_s0 + $0xf4] sm:$0xf]  ;;  %v1748_v4 = vld [vmem:[%s3237_s0 + $0x114] sm:$0xf0]  ;;  %v1069_v9 = vadd.f32 %v2819_v54, %v2859_v11  ;;  %v1071_v11 = vadd.f32 %v2819_v54, %v2867_v19  ;;  %v2231_v19 = vld [vmem:[%s3237_s0 + $0x158] sm:$0xf0] }
  0xd2   :  { %v1782_v54 = vld [vmem:[%s3237_s0 + $0x138] sm:$0xf] }
  0xd3   :  { %1400 = vmatmul.bf16.gmra.mxu3 %v1679_v7  ;;  %1449 = vmatmul.bf16.gmra.mxu0 %v1683_v8  ;;  %v2223_v7 = vld [vmem:[%s3237_s0 + $0x118] sm:$0xf0] }
  0xd4   :  { %v1156_v17 = vpop.f32.mrf.mxu2 }
  0xd5   :  { %v1157_v14 = vadd.f32 %v1156_v17, %v1108_v12  ;;  %v1743_v17 = vor.u32 %v2217_v63, %v1740_v0 }
  0xd6   :  { %v1205_v22 = vpop.f32.mrf.mxu3  ;;  %v1109_v23 = vpop.f32.mrf.mxu1 }
  0xd7   :  { %v1206_v24 = vadd.f32 %v1205_v22, %v1157_v14  ;;  %v1110_v25 = vadd.f32 %v1109_v23, %v1061_v21  ;;  %v1747_v21 = vor.u32 %v2222_v2, %v1746_v59  ;;  %v1751_v22 = vor.u32 %v2218_v3, %v1748_v4 }
  0xd8   :  { %v1256_v26 = vpop.f32.mrf.mxu0  ;;  %v1755_v23 = vor.u32 %v2223_v7, %v1754_v5  ;;  %v2235_v5 = vld [vmem:[%s3237_s0 + $0x17c] sm:$0xf] }
  0xd9   :  { %v2937_v29 = vadd.f32 %v1254_v13, %v1206_v24 }
  0xdc   :  { %v1158_v37 = vpop.f32.mrf.mxu2 }
  0xdd   :  { %v1159_v39 = vadd.f32 %v1158_v37, %v1110_v25  ;;  %v2226_v37 = vld [vmem:[%s3237_s0 + $0x134] sm:$0xf] }
  0xde   :  { %v1207_v40 = vpop.f32.mrf.mxu3  ;;  %v1112_v43 = vpop.f32.mrf.mxu1 }
  0xdf   :  { %v1208_v46 = vadd.f32 %v1207_v40, %v1159_v39  ;;  %v1113_v47 = vadd.f32 %v1112_v43, %v1064_v38  ;;  %v1776_v38 = vld [vmem:[%s3237_s0 + $0x154] sm:$0xf0]  ;;  %v2227_v40 = vld [vmem:[%s3237_s0 + $0x13c] sm:$0xf]  ;;  %v2232_v43 = vld [vmem:[%s3237_s0 + $0x160] sm:$0xf0] }
  0xe0   :  { %v1259_v48 = vpop.f32.mrf.mxu0 }
  0xe1   :  { %1307 = vmatmul.bf16.gmra.mxu1 %v1707_v41  ;;  %1356 = vmatmul.bf16.gmra.mxu2 %v1711_v42  ;;  %v2959_v49 = vadd.f32 %v1256_v26, %v1208_v46  ;;  %v1784_v41 = vld [vmem:[%s3237_s0 + $0x15c] sm:$0xf0] }
  0xe2   :  { %v1790_v42 = vld [vmem:[%s3237_s0 + $0x140] sm:$0xf] }
  0xe3   :  { %1405 = vmatmul.bf16.gmra.mxu3 %v1715_v44  ;;  %1454 = vmatmul.bf16.gmra.mxu0 %v1719_v45 }
  0xe4   :  { %v1161_v51 = vpop.f32.mrf.mxu2 }
  0xe5   :  { %v1162_v53 = vadd.f32 %v1161_v51, %v1113_v47  ;;  %v1779_v47 = vor.u32 %v2226_v37, %v1776_v38 }
  0xe6   :  { %v1210_v55 = vpop.f32.mrf.mxu3  ;;  %v1114_v57 = vpop.f32.mrf.mxu1 }
  0xe7   :  { %v1211_v60 = vadd.f32 %v1210_v55, %v1162_v53  ;;  %v1115_v61 = vadd.f32 %v1114_v57, %v1066_v50  ;;  %v1787_v50 = vor.u32 %v2227_v40, %v1784_v41  ;;  %v1791_v53 = vor.u32 %v2232_v43, %v1790_v42  ;;  %v2244_v40 = vld [vmem:[%s3237_s0 + $0x1c4] sm:$0xf]  ;;  %v1854_v42 = vld [vmem:[%s3237_s0 + $0x1c8] sm:$0xf]  ;;  %v2249_v43 = vld [vmem:[%s3237_s0 + $0x1e8] sm:$0xf0] }
  0xe8   :  { %v1261_v62 = vpop.f32.mrf.mxu0 }
  0xe9   :  { %v2969_v1 = vadd.f32 %v1259_v48, %v1211_v60  ;;  %v1783_v48 = vor.u32 %v2231_v19, %v1782_v54 }
  0xec   :  { %v1163_v8 = vpop.f32.mrf.mxu2 }
  0xed   :  { %v1164_v12 = vadd.f32 %v1163_v8, %v1115_v61  ;;  %v1818_v8 = vld [vmem:[%s3237_s0 + $0x180] sm:$0xf] }
  0xee   :  { %v1212_v13 = vpop.f32.mrf.mxu3  ;;  %v1117_v14 = vpop.f32.mrf.mxu1 }
  0xef   :  { %v1213_v24 = vadd.f32 %v1212_v13, %v1164_v12  ;;  %v1118_v25 = vadd.f32 %v1117_v14, %v1069_v9  ;;  %v2240_v9 = vld [vmem:[%s3237_s0 + $0x1a0] sm:$0xf0]  ;;  %v1820_v12 = vld [vmem:[%s3237_s0 + $0x1a4] sm:$0xf0] }
  0xf0   :  { %v1264_v26 = vpop.f32.mrf.mxu0  ;;  %v1826_v13 = vld [vmem:[%s3237_s0 + $0x188] sm:$0xf] }
  0xf1   :  { %1312 = vmatmul.bf16.gmra.mxu1 %v1743_v17  ;;  %1361 = vmatmul.bf16.gmra.mxu2 %v1747_v21  ;;  %v2991_v27 = vadd.f32 %v1261_v62, %v1213_v24  ;;  %v2241_v17 = vld [vmem:[%s3237_s0 + $0x1a8] sm:$0xf0]  ;;  %v1819_v24 = vor.u32 %v2240_v9, %v1818_v8 }
  0xf3   :  { %1410 = vmatmul.bf16.gmra.mxu3 %v1751_v22  ;;  %1459 = vmatmul.bf16.gmra.mxu0 %v1755_v23 }
  0xf4   :  { %v1166_v28 = vpop.f32.mrf.mxu2 }
  0xf5   :  { %v1167_v20 = vadd.f32 %v1166_v28, %v1118_v25  ;;  %v1827_v28 = vor.u32 %v2241_v17, %v1826_v13  ;;  %v1890_v13 = vld [vmem:[%s3237_s0 + $0x210] sm:$0xf]  ;;  %v2258_v17 = vld [vmem:[%s3237_s0 + $0x230] sm:$0xf0] }
  0xf6   :  { %v1215_v30 = vpop.f32.mrf.mxu3  ;;  %v1119_v32 = vpop.f32.mrf.mxu1 }
  0xf7   :  { %v1216_v33 = vadd.f32 %v1215_v30, %v1167_v20  ;;  %v1120_v34 = vadd.f32 %v1119_v32, %v1071_v11 }
  0xf8   :  { %v1266_v36 = vpop.f32.mrf.mxu0 }
  0xf9   :  { %v3001_v39 = vadd.f32 %v1264_v26, %v1216_v33 }
  0xfc   :  { %v1168_v44 = vpop.f32.mrf.mxu2 }
  0xfd   :  { %v1169_v45 = vadd.f32 %v1168_v44, %v1120_v34  ;;  %v1856_v44 = vld [vmem:[%s3237_s0 + $0x1ec] sm:$0xf0] }
  0xfe   :  { %v1217_v46 = vpop.f32.mrf.mxu3  ;;  %v1122_v51 = vpop.f32.mrf.mxu1 }
  0xff   :  { %v1218_v55 = vadd.f32 %v1217_v46, %v1169_v45  ;;  %v1123_v57 = vadd.f32 %v1122_v51, %v2822_v56  ;;  %v1812_v56 = vld [vmem:[%s3237_s0 + $0x19c] sm:$0xf0]  ;;  %v1862_v45 = vld [vmem:[%s3237_s0 + $0x1d0] sm:$0xf]  ;;  %v2250_v46 = vld [vmem:[%s3237_s0 + $0x1f0] sm:$0xf0] }
 0x100   :  { %v1269_v60 = vpop.f32.mrf.mxu0  ;;  %v1815_v23 = vor.u32 %v2235_v5, %v1812_v56 }
 0x101   :  { %1317 = vmatmul.bf16.gmra.mxu1 %v1779_v47  ;;  %1366 = vmatmul.bf16.gmra.mxu2 %v1783_v48  ;;  %v3022_v61 = vadd.f32 %v1266_v36, %v1218_v55 }
 0x103   :  { %1415 = vmatmul.bf16.gmra.mxu3 %v1787_v50  ;;  %1464 = vmatmul.bf16.gmra.mxu0 %v1791_v53  ;;  %v1855_v53 = vor.u32 %v2249_v43, %v1854_v42 }
 0x104   :  { %v1171_v62 = vpop.f32.mrf.mxu2 }
 0x105   :  { %v1172_v63 = vadd.f32 %v1171_v62, %v1123_v57 }
 0x106   :  { %v1220_v0 = vpop.f32.mrf.mxu3  ;;  %v1124_v59 = vpop.f32.mrf.mxu1 }
 0x107   :  { %v1221_v2 = vadd.f32 %v1220_v0, %v1172_v63  ;;  %v1125_v3 = vadd.f32 %v1124_v59, %v2854_v6  ;;  %v2236_v6 = vld [vmem:[%s3237_s0 + $0x184] sm:$0xf] }
 0x108   :  { %v1271_v4 = vpop.f32.mrf.mxu0  ;;  %v1823_v26 = vor.u32 %v2236_v6, %v1820_v12  ;;  %v2253_v6 = vld [vmem:[%s3237_s0 + $0x20c] sm:$0xf] }
 0x109   :  { %v3031_v7 = vadd.f32 %v1269_v60, %v1221_v2  ;;  %v1863_v60 = vor.u32 %v2250_v46, %v1862_v45 }
 0x10c   :  { %v1173_v21 = vpop.f32.mrf.mxu2 }
 0x10d   :  { %v1174_v14 = vadd.f32 %v1173_v21, %v1125_v3  ;;  %v1892_v21 = vld [vmem:[%s3237_s0 + $0x234] sm:$0xf0] }
 0x10e   :  { %v1222_v22 = vpop.f32.mrf.mxu3  ;;  %v1127_v25 = vpop.f32.mrf.mxu1 }
 0x10f   :  { %v1223_v11 = vadd.f32 %v1222_v22, %v1174_v14  ;;  %v1128_v20 = vadd.f32 %v1127_v25, %v2862_v16  ;;  %v1848_v16 = vld [vmem:[%s3237_s0 + $0x1e4] sm:$0xf0]  ;;  %v1898_v14 = vld [vmem:[%s3237_s0 + $0x218] sm:$0xf]  ;;  %v2259_v22 = vld [vmem:[%s3237_s0 + $0x238] sm:$0xf0] }
 0x110   :  { %v1274_v30 = vpop.f32.mrf.mxu0  ;;  %v1851_v50 = vor.u32 %v2244_v40, %v1848_v16 }
 0x111   :  { %1322 = vmatmul.bf16.gmra.mxu1 %v1815_v23  ;;  %1371 = vmatmul.bf16.gmra.mxu2 %v1819_v24  ;;  %v3052_v32 = vadd.f32 %v1271_v4, %v1223_v11 }
 0x113   :  { %1420 = vmatmul.bf16.gmra.mxu3 %v1823_v26  ;;  %1469 = vmatmul.bf16.gmra.mxu0 %v1827_v28  ;;  %v1891_v28 = vor.u32 %v2258_v17, %v1890_v13 }
 0x114   :  { %v1176_v33 = vpop.f32.mrf.mxu2 }
 0x115   :  { %v1177_v34 = vadd.f32 %v1176_v33, %v1128_v20 }
 0x116   :  { %v1225_v36 = vpop.f32.mrf.mxu3  ;;  %v1129_v37 = vpop.f32.mrf.mxu1 }
 0x117   :  { %v1226_v38 = vadd.f32 %v1225_v36, %v1177_v34  ;;  %v1130_v54 = vadd.f32 %v1129_v37, %v2895_v31  ;;  %v2245_v31 = vld [vmem:[%s3237_s0 + $0x1cc] sm:$0xf] }
 0x118   :  { %v1276_v19 = vpop.f32.mrf.mxu0  ;;  %v1859_v57 = vor.u32 %v2245_v31, %v1856_v44 }
 0x119   :  { %v3061_v41 = vadd.f32 %v1274_v30, %v1226_v38  ;;  %v1899_v30 = vor.u32 %v2259_v22, %v1898_v14 }
 0x11c   :  { %v1178_v47 = vpop.f32.mrf.mxu2 }
 0x11d   :  { %v1179_v48 = vadd.f32 %v1178_v47, %v1130_v54 }
 0x11e   :  { %v1227_v51 = vpop.f32.mrf.mxu3  ;;  %v1132_v55 = vpop.f32.mrf.mxu1 }
 0x11f   :  { %v1228_v62 = vadd.f32 %v1227_v51, %v1179_v48  ;;  %v1133_v63 = vadd.f32 %v1132_v55, %v2825_v58  ;;  %v1884_v58 = vld [vmem:[%s3237_s0 + $0x22c] sm:$0xf0] }
 0x120   :  { %v1279_v0 = vpop.f32.mrf.mxu0  ;;  %v1887_v26 = vor.u32 %v2253_v6, %v1884_v58 }
 0x121   :  { %1327 = vmatmul.bf16.gmra.mxu1 %v1851_v50  ;;  %1376 = vmatmul.bf16.gmra.mxu2 %v1855_v53  ;;  %v3082_v59 = vadd.f32 %v1276_v19, %v1228_v62 }
 0x123   :  { %1425 = vmatmul.bf16.gmra.mxu3 %v1859_v57  ;;  %1474 = vmatmul.bf16.gmra.mxu0 %v1863_v60 }
 0x124   :  { %v1181_v2 = vpop.f32.mrf.mxu2 }
 0x125   :  { %v1182_v3 = vadd.f32 %v1181_v2, %v1133_v63 }
 0x126   :  { %v1230_v4 = vpop.f32.mrf.mxu3  ;;  %v1134_v5 = vpop.f32.mrf.mxu1 }
 0x127   :  { %v1231_v56 = vadd.f32 %v1230_v4, %v1182_v3  ;;  %v1135_v8 = vadd.f32 %v1134_v5, %v2857_v10  ;;  %v2254_v10 = vld [vmem:[%s3237_s0 + $0x214] sm:$0xf] }
 0x128   :  { %v1281_v9 = vpop.f32.mrf.mxu0  ;;  %v1895_v20 = vor.u32 %v2254_v10, %v1892_v21 }
 0x129   :  { %v3091_v12 = vadd.f32 %v1279_v0, %v1231_v56 }
 0x12c   :  { %v1183_v23 = vpop.f32.mrf.mxu2 }
 0x12d   :  { %v1184_v24 = vadd.f32 %v1183_v23, %v1135_v8 }
 0x12e   :  { %v1232_v25 = vpop.f32.mrf.mxu3  ;;  %v1137_v11 = vpop.f32.mrf.mxu1 }
 0x12f   :  { %v1233_v33 = vadd.f32 %v1232_v25, %v1184_v24  ;;  %v1138_v34 = vadd.f32 %v1137_v11, %v2865_v18 }
 0x130   :  { %v1284_v36 = vpop.f32.mrf.mxu0 }
 0x131   :  { %1332 = vmatmul.bf16.gmra.mxu1 %v1887_v26  ;;  %1381 = vmatmul.bf16.gmra.mxu2 %v1891_v28  ;;  %v3112_v37 = vadd.f32 %v1281_v9, %v1233_v33 }
 0x133   :  { %1430 = vmatmul.bf16.gmra.mxu3 %v1895_v20  ;;  %1479 = vmatmul.bf16.gmra.mxu0 %v1899_v30 }
 0x134   :  { %v1186_v38 = vpop.f32.mrf.mxu2 }
 0x135   :  { %v1187_v54 = vadd.f32 %v1186_v38, %v1138_v34 }
 0x136   :  { %v1235_v19 = vpop.f32.mrf.mxu3  ;;  %v1139_v40 = vpop.f32.mrf.mxu1 }
 0x137   :  { %v1236_v16 = vadd.f32 %v1235_v19, %v1187_v54  ;;  %v1140_v42 = vadd.f32 %v1139_v40, %v2898_v35 }
 0x138   :  { %v1286_v43 = vpop.f32.mrf.mxu0 }
 0x139   :  { %v3115_v31 = vadd.f32 %v1284_v36, %v1236_v16 }
 0x13c   :  { %v1188_v44 = vpop.f32.mrf.mxu2 }
 0x13d   :  { %v1189_v45 = vadd.f32 %v1188_v44, %v1140_v42 }
 0x13e   :  { %v1237_v18 = vpop.f32.mrf.mxu3  ;;  %v1298_v46 = vpop.f32.mrf.mxu1 }
 0x13f   :  { %v1238_v47 = vadd.f32 %v1237_v18, %v1189_v45  ;;  %v1299_v50 = vadd.f32 %v1298_v46, %v2907_v52 }
 0x140   :  { %v1445_v48 = vpop.f32.mrf.mxu0 }
 0x141   :  { %v3117_v51 = vadd.f32 %v1286_v43, %v1238_v47 }
 0x144   :  { %v1347_v53 = vpop.f32.mrf.mxu2 }
 0x145   :  { %v1348_v55 = vadd.f32 %v1347_v53, %v1299_v50 }
 0x146   :  { %v1396_v57 = vpop.f32.mrf.mxu3  ;;  %v1300_v60 = vpop.f32.mrf.mxu1 }
 0x147   :  { %v1397_v62 = vadd.f32 %v1396_v57, %v1348_v55  ;;  %v1301_v0 = vadd.f32 %v1300_v60, %v2928_v15 }
 0x148   :  { %v1447_v63 = vpop.f32.mrf.mxu0 }
 0x149   :  { %v1446_v35 = vadd.f32 %v1445_v48, %v1397_v62 }
 0x14b   :  { %1486 = vst.msk [vmem:[%s3238_s3] sm:$0xff] %vm1485_vm0, %v1446_v35  ;;  %v1539_v8 = vmul.f32 %v1446_v35, %v1446_v35  ;;  %v1502_v6 = vsel %vm1485_vm0, %v1446_v35, 0.0 }
 0x14c   :  { %v1349_v2 = vpop.f32.mrf.mxu2 }
 0x14d   :  { %v1350_v3 = vadd.f32 %v1349_v2, %v1301_v0  ;;  %v1555_v21 = vsel %vm1485_vm0, %v1539_v8, 0.0 }
 0x14e   :  { %v1398_v4 = vpop.f32.mrf.mxu3  ;;  %v1303_v5 = vpop.f32.mrf.mxu1 }
 0x14f   :  { %v1399_v52 = vadd.f32 %v1398_v4, %v1350_v3  ;;  %v1304_v15 = vadd.f32 %v1303_v5, %v2937_v29 }
 0x150   :  { %v1450_v56 = vpop.f32.mrf.mxu0 }
 0x151   :  { %v1448_v9 = vadd.f32 %v1447_v63, %v1399_v52 }
 0x153   :  { %1487 = vst.msk [vmem:[%s3238_s3 + $0x8] sm:$0xff] %vm1485_vm0, %v1448_v9  ;;  %v1503_v58 = vsel %vm1485_vm0, %v1448_v9, 0.0  ;;  %v1540_v13 = vmul.f32 %v1448_v9, %v1448_v9 }
 0x154   :  { %v1504_v17 = vadd.f32 %v1503_v58, %v1502_v6  ;;  %v1352_v10 = vpop.f32.mrf.mxu2 }
 0x155   :  { %v1556_v14 = vsel %vm1485_vm0, %v1540_v13, 0.0  ;;  %v1353_v22 = vadd.f32 %v1352_v10, %v1304_v15 }
 0x156   :  { %v1401_v23 = vpop.f32.mrf.mxu3  ;;  %v1557_v24 = vadd.f32 %v1556_v14, %v1555_v21  ;;  %v1305_v25 = vpop.f32.mrf.mxu1 }
 0x157   :  { %v1402_v26 = vadd.f32 %v1401_v23, %v1353_v22  ;;  %v1306_v30 = vadd.f32 %v1305_v25, %v2959_v49 }
 0x158   :  { %v1452_v28 = vpop.f32.mrf.mxu0 }
 0x159   :  { %v1451_v11 = vadd.f32 %v1450_v56, %v1402_v26 }
 0x15b   :  { %1488 = vst.msk [vmem:[%s3238_s3 + $0x10] sm:$0xff] %vm1485_vm0, %v1451_v11  ;;  %v1505_v29 = vsel %vm1485_vm0, %v1451_v11, 0.0  ;;  %v1541_v20 = vmul.f32 %v1451_v11, %v1451_v11 }
 0x15c   :  { %v1506_v33 = vadd.f32 %v1505_v29, %v1504_v17  ;;  %v1354_v34 = vpop.f32.mrf.mxu2 }
 0x15d   :  { %v1558_v36 = vsel %vm1485_vm0, %v1541_v20, 0.0  ;;  %v1355_v38 = vadd.f32 %v1354_v34, %v1306_v30 }
 0x15e   :  { %v1403_v54 = vpop.f32.mrf.mxu3  ;;  %v1559_v19 = vadd.f32 %v1558_v36, %v1557_v24  ;;  %v1308_v40 = vpop.f32.mrf.mxu1 }
 0x15f   :  { %v1404_v16 = vadd.f32 %v1403_v54, %v1355_v38  ;;  %v1309_v49 = vadd.f32 %v1308_v40, %v2969_v1 }
 0x160   :  { %v1455_v42 = vpop.f32.mrf.mxu0 }
 0x161   :  { %v1453_v43 = vadd.f32 %v1452_v28, %v1404_v16 }
 0x163   :  { %1489 = vst.msk [vmem:[%s3238_s3 + $0x18] sm:$0xff] %vm1485_vm0, %v1453_v43  ;;  %v1507_v44 = vsel %vm1485_vm0, %v1453_v43, 0.0  ;;  %v1542_v45 = vmul.f32 %v1453_v43, %v1453_v43 }
 0x164   :  { %v1508_v18 = vadd.f32 %v1507_v44, %v1506_v33  ;;  %v1357_v46 = vpop.f32.mrf.mxu2 }
 0x165   :  { %v1560_v47 = vsel %vm1485_vm0, %v1542_v45, 0.0  ;;  %v1358_v48 = vadd.f32 %v1357_v46, %v1309_v49 }
 0x166   :  { %v1406_v50 = vpop.f32.mrf.mxu3  ;;  %v1561_v53 = vadd.f32 %v1560_v47, %v1559_v19  ;;  %v1310_v55 = vpop.f32.mrf.mxu1 }
 0x167   :  { %v1407_v57 = vadd.f32 %v1406_v50, %v1358_v48  ;;  %v1311_v1 = vadd.f32 %v1310_v55, %v2991_v27 }
 0x168   :  { %v1457_v60 = vpop.f32.mrf.mxu0 }
 0x169   :  { %v1456_v62 = vadd.f32 %v1455_v42, %v1407_v57 }
 0x16b   :  { %1490 = vst.msk [vmem:[%s3238_s3 + $0x20] sm:$0xff] %vm1485_vm0, %v1456_v62  ;;  %v1509_v63 = vsel %vm1485_vm0, %v1456_v62, 0.0  ;;  %v1543_v35 = vmul.f32 %v1456_v62, %v1456_v62 }
 0x16c   :  { %v1510_v0 = vadd.f32 %v1509_v63, %v1508_v18  ;;  %v1359_v2 = vpop.f32.mrf.mxu2 }
 0x16d   :  { %v1562_v3 = vsel %vm1485_vm0, %v1543_v35, 0.0  ;;  %v1360_v4 = vadd.f32 %v1359_v2, %v1311_v1 }
 0x16e   :  { %v1408_v5 = vpop.f32.mrf.mxu3  ;;  %v1563_v52 = vadd.f32 %v1562_v3, %v1561_v53  ;;  %v1313_v56 = vpop.f32.mrf.mxu1 }
 0x16f   :  { %v1409_v8 = vadd.f32 %v1408_v5, %v1360_v4  ;;  %v1314_v27 = vadd.f32 %v1313_v56, %v3001_v39 }
 0x170   :  { %v1460_v9 = vpop.f32.mrf.mxu0 }
 0x171   :  { %v1458_v6 = vadd.f32 %v1457_v60, %v1409_v8 }
 0x173   :  { %1491 = vst.msk [vmem:[%s3238_s3 + $0x28] sm:$0xff] %vm1485_vm0, %v1458_v6  ;;  %v1511_v58 = vsel %vm1485_vm0, %v1458_v6, 0.0  ;;  %v1544_v13 = vmul.f32 %v1458_v6, %v1458_v6 }
 0x174   :  { %v1512_v15 = vadd.f32 %v1511_v58, %v1510_v0  ;;  %v1362_v17 = vpop.f32.mrf.mxu2 }
 0x175   :  { %v1564_v10 = vsel %vm1485_vm0, %v1544_v13, 0.0  ;;  %v1363_v21 = vadd.f32 %v1362_v17, %v1314_v27 }
 0x176   :  { %v1411_v14 = vpop.f32.mrf.mxu3  ;;  %v1565_v22 = vadd.f32 %v1564_v10, %v1563_v52  ;;  %v1315_v23 = vpop.f32.mrf.mxu1 }
 0x177   :  { %v1412_v24 = vadd.f32 %v1411_v14, %v1363_v21  ;;  %v1316_v39 = vadd.f32 %v1315_v23, %v3022_v61 }
 0x178   :  { %v1462_v25 = vpop.f32.mrf.mxu0 }
 0x179   :  { %v1461_v26 = vadd.f32 %v1460_v9, %v1412_v24 }
 0x17b   :  { %1492 = vst.msk [vmem:[%s3238_s3 + $0x30] sm:$0xff] %vm1485_vm0, %v1461_v26  ;;  %v1513_v28 = vsel %vm1485_vm0, %v1461_v26, 0.0  ;;  %v1545_v11 = vmul.f32 %v1461_v26, %v1461_v26 }
 0x17c   :  { %v1514_v29 = vadd.f32 %v1513_v28, %v1512_v15  ;;  %v1364_v20 = vpop.f32.mrf.mxu2 }
 0x17d   :  { %v1566_v30 = vsel %vm1485_vm0, %v1545_v11, 0.0  ;;  %v1365_v33 = vadd.f32 %v1364_v20, %v1316_v39 }
 0x17e   :  { %v1413_v34 = vpop.f32.mrf.mxu3  ;;  %v1567_v36 = vadd.f32 %v1566_v30, %v1565_v22  ;;  %v1318_v38 = vpop.f32.mrf.mxu1 }
 0x17f   :  { %v1414_v54 = vadd.f32 %v1413_v34, %v1365_v33  ;;  %v1319_v61 = vadd.f32 %v1318_v38, %v3031_v7 }
 0x180   :  { %v1465_v19 = vpop.f32.mrf.mxu0 }
 0x181   :  { %v1463_v40 = vadd.f32 %v1462_v25, %v1414_v54 }
 0x183   :  { %1493 = vst.msk [vmem:[%s3238_s3 + $0x38] sm:$0xff] %vm1485_vm0, %v1463_v40  ;;  %v1515_v16 = vsel %vm1485_vm0, %v1463_v40, 0.0  ;;  %v1546_v42 = vmul.f32 %v1463_v40, %v1463_v40 }
 0x184   :  { %v1516_v43 = vadd.f32 %v1515_v16, %v1514_v29  ;;  %v1367_v44 = vpop.f32.mrf.mxu2 }
 0x185   :  { %v1568_v45 = vsel %vm1485_vm0, %v1546_v42, 0.0  ;;  %v1368_v49 = vadd.f32 %v1367_v44, %v1319_v61 }
 0x186   :  { %v1416_v18 = vpop.f32.mrf.mxu3  ;;  %v1569_v46 = vadd.f32 %v1568_v45, %v1567_v36  ;;  %v1320_v47 = vpop.f32.mrf.mxu1 }
 0x187   :  { %v1417_v48 = vadd.f32 %v1416_v18, %v1368_v49  ;;  %v1321_v7 = vadd.f32 %v1320_v47, %v3052_v32 }
 0x188   :  { %v1467_v50 = vpop.f32.mrf.mxu0 }
 0x189   :  { %v1466_v53 = vadd.f32 %v1465_v19, %v1417_v48 }
 0x18b   :  { %1494 = vst.msk [vmem:[%s3238_s3 + $0x40] sm:$0xff] %vm1485_vm0, %v1466_v53  ;;  %v1517_v55 = vsel %vm1485_vm0, %v1466_v53, 0.0  ;;  %v1547_v57 = vmul.f32 %v1466_v53, %v1466_v53 }
 0x18c   :  { %v1518_v60 = vadd.f32 %v1517_v55, %v1516_v43  ;;  %v1369_v62 = vpop.f32.mrf.mxu2 }
 0x18d   :  { %v1570_v63 = vsel %vm1485_vm0, %v1547_v57, 0.0  ;;  %v1370_v35 = vadd.f32 %v1369_v62, %v1321_v7 }
 0x18e   :  { %v1418_v1 = vpop.f32.mrf.mxu3  ;;  %v1571_v0 = vadd.f32 %v1570_v63, %v1569_v46  ;;  %v1323_v2 = vpop.f32.mrf.mxu1 }
 0x18f   :  { %v1419_v3 = vadd.f32 %v1418_v1, %v1370_v35  ;;  %v1324_v32 = vadd.f32 %v1323_v2, %v3061_v41 }
 0x190   :  { %v1470_v4 = vpop.f32.mrf.mxu0 }
 0x191   :  { %v1468_v5 = vadd.f32 %v1467_v50, %v1419_v3 }
 0x193   :  { %1495 = vst.msk [vmem:[%s3238_s3 + $0x48] sm:$0xff] %vm1485_vm0, %v1468_v5  ;;  %v1519_v52 = vsel %vm1485_vm0, %v1468_v5, 0.0  ;;  %v1548_v56 = vmul.f32 %v1468_v5, %v1468_v5 }
 0x194   :  { %v1520_v8 = vadd.f32 %v1519_v52, %v1518_v60  ;;  %v1372_v9 = vpop.f32.mrf.mxu2 }
 0x195   :  { %v1572_v6 = vsel %vm1485_vm0, %v1548_v56, 0.0  ;;  %v1373_v58 = vadd.f32 %v1372_v9, %v1324_v32 }
 0x196   :  { %v1421_v13 = vpop.f32.mrf.mxu3  ;;  %v1573_v27 = vadd.f32 %v1572_v6, %v1571_v0  ;;  %v1325_v15 = vpop.f32.mrf.mxu1 }
 0x197   :  { %v1422_v17 = vadd.f32 %v1421_v13, %v1373_v58  ;;  %v1326_v41 = vadd.f32 %v1325_v15, %v3082_v59 }
 0x198   :  { %v1472_v10 = vpop.f32.mrf.mxu0 }
 0x199   :  { %v1471_v21 = vadd.f32 %v1470_v4, %v1422_v17 }
 0x19b   :  { %1496 = vst.msk [vmem:[%s3238_s3 + $0x50] sm:$0xff] %vm1485_vm0, %v1471_v21  ;;  %v1521_v14 = vsel %vm1485_vm0, %v1471_v21, 0.0  ;;  %v1549_v22 = vmul.f32 %v1471_v21, %v1471_v21 }
 0x19c   :  { %v1522_v23 = vadd.f32 %v1521_v14, %v1520_v8  ;;  %v1374_v24 = vpop.f32.mrf.mxu2 }
 0x19d   :  { %v1574_v25 = vsel %vm1485_vm0, %v1549_v22, 0.0  ;;  %v1375_v26 = vadd.f32 %v1374_v24, %v1326_v41 }
 0x19e   :  { %v1423_v28 = vpop.f32.mrf.mxu3  ;;  %v1575_v11 = vadd.f32 %v1574_v25, %v1573_v27  ;;  %v1328_v39 = vpop.f32.mrf.mxu1 }
 0x19f   :  { %v1424_v29 = vadd.f32 %v1423_v28, %v1375_v26  ;;  %v1329_v59 = vadd.f32 %v1328_v39, %v3091_v12  ;;  %v1592_v28 = vlaneseq }
 0x1a0   :  { %v1475_v30 = vpop.f32.mrf.mxu0 }
 0x1a1   :  { %v1473_v20 = vadd.f32 %v1472_v10, %v1424_v29 }
 0x1a3   :  { %1497 = vst.msk [vmem:[%s3238_s3 + $0x58] sm:$0xff] %vm1485_vm0, %v1473_v20  ;;  %v1523_v33 = vsel %vm1485_vm0, %v1473_v20, 0.0  ;;  %v1550_v34 = vmul.f32 %v1473_v20, %v1473_v20 }
 0x1a4   :  { %v1524_v36 = vadd.f32 %v1523_v33, %v1522_v23  ;;  %v1377_v38 = vpop.f32.mrf.mxu2 }
 0x1a5   :  { %v1576_v54 = vsel %vm1485_vm0, %v1550_v34, 0.0  ;;  %v1378_v19 = vadd.f32 %v1377_v38, %v1329_v59 }
 0x1a6   :  { %v1426_v40 = vpop.f32.mrf.mxu3  ;;  %v1577_v16 = vadd.f32 %v1576_v54, %v1575_v11  ;;  %v1330_v42 = vpop.f32.mrf.mxu1 }
 0x1a7   :  { %v1427_v61 = vadd.f32 %v1426_v40, %v1378_v19  ;;  %v1331_v12 = vadd.f32 %v1330_v42, %v3112_v37 }
 0x1a8   :  { %v1477_v18 = vpop.f32.mrf.mxu0 }
 0x1a9   :  { %v1476_v43 = vadd.f32 %v1475_v30, %v1427_v61  ;;  %v1593_v30 = vshrl.u32 %v1592_v28, 7 }
 0x1ab   :  { %1498 = vst.msk [vmem:[%s3238_s3 + $0x60] sm:$0xff] %vm1485_vm0, %v1476_v43  ;;  %v1525_v44 = vsel %vm1485_vm0, %v1476_v43, 0.0  ;;  %v1551_v45 = vmul.f32 %v1476_v43, %v1476_v43  ;;  %vm1594_vm1 = vcmp.eq.s32.totalorder %v1593_v30, 0  ;;  %vm1598_vm2 = vcmp.eq.s32.totalorder %v1593_v30, 1 }
 0x1ac   :  { %v1526_v49 = vadd.f32 %v1525_v44, %v1524_v36  ;;  %v1379_v46 = vpop.f32.mrf.mxu2 }
 0x1ad   :  { %v1578_v47 = vsel %vm1485_vm0, %v1551_v45, 0.0  ;;  %v1380_v48 = vadd.f32 %v1379_v46, %v1331_v12 }
 0x1ae   :  { %v1428_v50 = vpop.f32.mrf.mxu3  ;;  %v1579_v53 = vadd.f32 %v1578_v47, %v1577_v16  ;;  %v1333_v55 = vpop.f32.mrf.mxu1 }
 0x1af   :  { %v1429_v57 = vadd.f32 %v1428_v50, %v1380_v48  ;;  %v1334_v37 = vadd.f32 %v1333_v55, %v3115_v31 }
 0x1b0   :  { %v1480_v4 = vpop.f32.mrf.mxu0 }
 0x1b1   :  { %v1478_v7 = vadd.f32 %v1477_v18, %v1429_v57 }
 0x1b3   :  { %1499 = vst.msk [vmem:[%s3238_s3 + $0x68] sm:$0xff] %vm1485_vm0, %v1478_v7  ;;  %v1527_v60 = vsel %vm1485_vm0, %v1478_v7, 0.0  ;;  %v1552_v62 = vmul.f32 %v1478_v7, %v1478_v7 }
 0x1b4   :  { %v1528_v63 = vadd.f32 %v1527_v60, %v1526_v49  ;;  %v1382_v35 = vpop.f32.mrf.mxu2 }
 0x1b5   :  { %v1580_v1 = vsel %vm1485_vm0, %v1552_v62, 0.0  ;;  %v1383_v0 = vadd.f32 %v1382_v35, %v1334_v37 }
 0x1b6   :  { %v1431_v2 = vpop.f32.mrf.mxu3  ;;  %v1581_v3 = vadd.f32 %v1580_v1, %v1579_v53  ;;  %v1335_v52 = vpop.f32.mrf.mxu1 }
 0x1b7   :  { %v1432_v5 = vadd.f32 %v1431_v2, %v1383_v0  ;;  %v1336_v31 = vadd.f32 %v1335_v52, %v3117_v51 }
 0x1b8   :  { %v1482_v10 = vpop.f32.mrf.mxu0 }
 0x1b9   :  { %v1481_v56 = vadd.f32 %v1480_v4, %v1432_v5 }
 0x1bb   :  { %1500 = vst.msk [vmem:[%s3238_s3 + $0x70] sm:$0xff] %vm1485_vm0, %v1481_v56  ;;  %v1529_v32 = vsel %vm1485_vm0, %v1481_v56, 0.0  ;;  %v1553_v8 = vmul.f32 %v1481_v56, %v1481_v56 }
 0x1bc   :  { %v1530_v9 = vadd.f32 %v1529_v32, %v1528_v63  ;;  %v1384_v6 = vpop.f32.mrf.mxu2 }
 0x1bd   :  { %v1582_v58 = vsel %vm1485_vm0, %v1553_v8, 0.0  ;;  %v1385_v13 = vadd.f32 %v1384_v6, %v1336_v31 }
 0x1be   :  { %v1583_v27 = vadd.f32 %v1582_v58, %v1581_v3  ;;  %v1433_v15 = vpop.f32.mrf.mxu3 }
 0x1bf   :  { %v1434_v17 = vadd.f32 %v1433_v15, %v1385_v13 }
 0x1c1   :  { %v1483_v21 = vadd.f32 %v1482_v10, %v1434_v17 }
 0x1c3   :  { %1501 = vst.msk [vmem:[%s3238_s3 + $0x78] sm:$0xff] %vm1485_vm0, %v1483_v21  ;;  %v1531_v14 = vsel %vm1485_vm0, %v1483_v21, 0.0  ;;  %v1554_v22 = vmul.f32 %v1483_v21, %v1483_v21 }
 0x1c4   :  { %v1532_v41 = vadd.f32 %v1531_v14, %v1530_v9 }
 0x1c5   :  { %v1584_v51 = vsel %vm1485_vm0, %v1554_v22, 0.0 }
 0x1c6   :  { %v1533_v23 = vrot.slane %v1532_v41, 4  ;;  %v1585_v24 = vadd.f32 %v1584_v51, %v1583_v27 }
 0x1c8   :  { %v1534_v25 = vadd.f32 %v1533_v23, %v1532_v41  ;;  %v1586_v26 = vrot.slane %v1585_v24, 4 }
 0x1ca   :  { %v1535_v11 = vrot.slane %v1534_v25, 2  ;;  %v1587_v39 = vadd.f32 %v1586_v26, %v1585_v24 }
 0x1cc   :  { %v1536_v29 = vadd.f32 %v1535_v11, %v1534_v25  ;;  %v1588_v20 = vrot.slane %v1587_v39, 2 }
 0x1ce   :  { %v1537_v33 = vrot.slane %v1536_v29, 1  ;;  %v1589_v34 = vadd.f32 %v1588_v20, %v1587_v39 }
 0x1d0   :  { %v1538_v59 = vadd.f32 %v1537_v33, %v1536_v29  ;;  %v1590_v36 = vrot.slane %v1589_v34, 1 }
 0x1d2   :  { %v1591_v38 = vadd.f32 %v1590_v36, %v1589_v34  ;;  %v1597_v54 = vsel %vm1594_vm1, %v1538_v59, 0.0 }
 0x1d4   :  { %v1601_v19 = vsel %vm1598_vm2, %v1591_v38, 0.0 }
 0x1d5   :  { %v1602_v40 = vadd.f32 %v1601_v19, %v1597_v54 }
 0x1d7   :  { %1603 = vst.msk [vmem:[%s3239_s4] sm:$0xff] %vm1485_vm0, %v1602_v40 }

// kernel: vqvae_forward.71
= control target key start
LH: loop header
LB: loop body
LE: loop exit
PB: predicated region body
PF: predicated region fallthrough
CT: control target
= control target key end

     0   :  { %v30_v10 = vlaneseq  ;;  %s73_s0 = inlined_call_operand.vmem [shape: f32[16,128], index: 0, kind: input, shape index: {}]   ;;  %s74_s1 = inlined_call_operand.vmem [shape: f32[16,128], index: 1, kind: input, shape index: {}]   ;;  %s75_s2 = inlined_call_operand.vmem [shape: f32[8,128], index: 2, kind: output, shape index: {}]  }
   0x1   :  { %v11_v0 = vld [vmem:[%s73_s0] sm:$0xff]  ;;  %v12_v3 = vld [vmem:[%s73_s0 + $0x8] sm:$0xff] }
   0x2   :  { %v13_v1 = vld [vmem:[%s74_s1] sm:$0xff]  ;;  %v14_v4 = vld [vmem:[%s74_s1 + $0x8] sm:$0xff]  ;;  %v31_v13 = vshrl.u32 %v30_v10, 7  ;;  %v33_v14 = vand.u32 127, %v30_v10 }
   0x3   :  { %v15_v2 = vsub.f32 %v11_v0, %v13_v1  ;;  %v16_v6 = vsub.f32 %v12_v3, %v14_v4 }
   0x4   :  { %vm34_vm0 = vcmp.eq.s32.totalorder %v31_v13, 0  ;;  %vm35_vm1 = vcmp.eq.s32.totalorder %v33_v14, 0 }
   0x5   :  { %v17_v5 = vmul.f32 %v15_v2, %v15_v2  ;;  %v18_v7 = vmul.f32 %v16_v6, %v16_v6  ;;  %vm36_vm2 = vmand %vm34_vm0, %vm35_vm1 }
   0x7   :  { %19 = vadd.xlane.f32.xlu0 %v17_v5 }
   0xf   :  { %21 = vadd.xlane.f32.xlu0 %v18_v7 }
  0x7a   :  { %v20_v8 = vpop.xlane.xlu0 %19 }
  0x82   :  { %v22_v9 = vpop.xlane.xlu0 %21 }
  0x83   :  { %v23_v11 = vadd.f32 %v22_v9, %v20_v8 }
  0x85   :  { %v24_v12 = vrot.slane %v23_v11, 4 }
  0x87   :  { %v25_v15 = vadd.f32 %v24_v12, %v23_v11 }
  0x89   :  { %v26_v16 = vrot.slane %v25_v15, 2 }
  0x8b   :  { %v27_v17 = vadd.f32 %v26_v16, %v25_v15 }
  0x8d   :  { %v28_v18 = vrot.slane %v27_v17, 1 }
  0x8f   :  { %v29_v19 = vadd.f32 %v28_v18, %v27_v17 }
  0x91   :  { %v37_v20 = vsel %vm36_vm2, %v29_v19, 0.0 }
  0x92   :  { %38 = vst [vmem:[%s75_s2] sm:$0xff] %v37_v20 }

</bundles_post_ra>
